<compile_context>
chip_gen: v7x
topology: tpu7x:2x2x1
jax: 0.10.0
libtpu: 0.0.40
codegen_flags: <defaults>
</compile_context>

<pallas_src>
import functools

import jax
import jax.numpy as jnp
from jax.experimental import pallas as pl
from jax.experimental.pallas import tpu as pltpu

NUM_JOINTS = 17
BN_EPS = 1e-5
HEAD_PAD = 128  # pad the 17-joint head to 128 output lanes (lane-dense store)


# ----------------------------------------------------------------------------
# ConvTranspose2d(k=4, s=2, p=1) phase decomposition table.
# Output pixel (2r+dy, 2c+dx) is a 4-tap depthwise conv of the pad-1 input.
# Each entry is (ky, kx, yoff, xoff): weight index and offset into the padded
# input slice xp[:, yoff:yoff+H, xoff:xoff+W, :].
# ----------------------------------------------------------------------------
def _dct_phase_table():
    per = {0: [(1, 1), (3, 0)], 1: [(0, 2), (2, 1)]}  # d -> [(k, off)]
    table = []
    for dy in (0, 1):
        for dx in (0, 1):
            table.append([(ky, kx, yo, xo)
                          for (ky, yo) in per[dy] for (kx, xo) in per[dx]])
    return table


_DCT_TABLE = _dct_phase_table()


# ----------------------------------------------------------------------------
# Pallas kernels (all compute + BN + ReLU6 fused in-kernel)
# ----------------------------------------------------------------------------
def _relu6(x):
    return jnp.minimum(jnp.maximum(x, 0.0), 6.0)


def _stem_kernel(p_ref, w1_ref, s1_ref, b1_ref, w2_ref, s2_ref, b2_ref, o_ref):
    # im2col'd 3x3-s2 conv as (TP, 27) @ (27, 32) on the MXU + BN/ReLU6,
    # then the following 1x1 conv 32->32 + BN/ReLU6, all in one kernel.
    h = jnp.dot(p_ref[...], w1_ref[...], preferred_element_type=jnp.float32)
    h = _relu6(h * s1_ref[...] + b1_ref[...])
    h = jnp.dot(h.astype(jnp.bfloat16), w2_ref[...],
                preferred_element_type=jnp.float32)
    h = _relu6(h * s2_ref[...] + b2_ref[...])
    o_ref[...] = h.astype(o_ref.dtype)


def _block_kernel(*refs, expand):
    # dw3x3-s2 tap MAC (VPU, f32) + BN + ReLU6 -> pw project (MXU) + BN
    # [-> pw expand (MXU) + BN + ReLU6].  Narrow intermediates stay in VMEM.
    if expand:
        (t_ref, wdw_ref, s0_ref, b0_ref, w1_ref, s1_ref, b1_ref,
         w2_ref, s2_ref, b2_ref, o_ref) = refs
    else:
        (t_ref, wdw_ref, s0_ref, b0_ref, w1_ref, s1_ref, b1_ref, o_ref) = refs
    wdw = wdw_ref[...]                              # (9, C) f32
    acc = jnp.zeros(t_ref.shape[1:], jnp.float32)   # (TP, C)
    for k in range(t_ref.shape[0]):
        acc = acc + t_ref[k].astype(jnp.float32) * wdw[k:k + 1, :]
    h = _relu6(acc * s0_ref[...] + b0_ref[...])
    h = jnp.dot(h.astype(jnp.bfloat16), w1_ref[...],
                preferred_element_type=jnp.float32)
    h = h * s1_ref[...] + b1_ref[...]               # project: BN, no ReLU6
    if expand:
        h = jnp.dot(h.astype(jnp.bfloat16), w2_ref[...],
                    preferred_element_type=jnp.float32)
        h = _relu6(h * s2_ref[...] + b2_ref[...])
    o_ref[...] = h.astype(o_ref.dtype)


def _deconv_kernel(*refs, head):
    # One output phase of the depthwise ConvTranspose 4x4 s2 (4 taps on the
    # un-dilated input, f32 MAC) + BN + ReLU6 -> 1x1 conv 256->256 + BN +
    # ReLU6 [-> fused 1x1 head padded to 128 lanes + bias].
    if head:
        (t_ref, wd_ref, s0_ref, b0_ref, wpw_ref, s1_ref, b1_ref,
         wh_ref, bh_ref, o_ref) = refs
    else:
        (t_ref, wd_ref, s0_ref, b0_ref, wpw_ref, s1_ref, b1_ref, o_ref) = refs
    wd = wd_ref[0]                                  # (4, C) f32, this phase
    acc = jnp.zeros(t_ref.shape[1:], jnp.float32)   # (TP, C)
    for k in range(4):
        acc = acc + t_ref[k].astype(jnp.float32) * wd[k:k + 1, :]
    h = _relu6(acc * s0_ref[...] + b0_ref[...])
    h = jnp.dot(h.astype(jnp.bfloat16), wpw_ref[...],
                preferred_element_type=jnp.float32)
    h = _relu6(h * s1_ref[...] + b1_ref[...])
    if head:
        h = jnp.dot(h.astype(jnp.bfloat16), wh_ref[...],
                    preferred_element_type=jnp.float32)
        h = h + bh_ref[...]
    o_ref[0] = h.astype(o_ref.dtype)


# ----------------------------------------------------------------------------
# pallas_call wrappers
# ----------------------------------------------------------------------------
def _pick_tp(P, cap):
    """Largest row tile <= cap that divides P (full P if P <= cap)."""
    if P <= cap:
        return P
    for tp in range(cap, 7, -1):
        if P % tp == 0 and tp % 8 == 0:
            return tp
    return P


def stem_conv(patches, w1, s1, b1, w2, s2, b2):
    P, F = patches.shape
    C1, C2 = w1.shape[1], w2.shape[1]
    TP = _pick_tp(P, 512)
    return pl.pallas_call(
        _stem_kernel,
        out_shape=jax.ShapeDtypeStruct((P, C2), jnp.bfloat16),
        grid_spec=pltpu.PrefetchScalarGridSpec(
            num_scalar_prefetch=0,
            grid=(P // TP,),
            in_specs=[
                pl.BlockSpec((TP, F), lambda i: (i, 0)),
                pl.BlockSpec((F, C1), lambda i: (0, 0)),
                pl.BlockSpec((1, C1), lambda i: (0, 0)),
                pl.BlockSpec((1, C1), lambda i: (0, 0)),
                pl.BlockSpec((C1, C2), lambda i: (0, 0)),
                pl.BlockSpec((1, C2), lambda i: (0, 0)),
                pl.BlockSpec((1, C2), lambda i: (0, 0)),
            ],
            out_specs=pl.BlockSpec((TP, C2), lambda i: (i, 0)),
        ),
        compiler_params=pltpu.CompilerParams(dimension_semantics=("parallel",)),
    )(patches, w1, s1, b1, w2, s2, b2)


def fused_dw_block(taps, wdw, s0, b0, w1, s1, b1, w2=None, s2=None, b2=None):
    K, P, C = taps.shape
    C1 = w1.shape[1]
    expand = w2 is not None
    Cout = w2.shape[1] if expand else C1
    TP = _pick_tp(P, 256)
    in_specs = [
        pl.BlockSpec((K, TP, C), lambda i: (0, i, 0)),
        pl.BlockSpec((K, C), lambda i: (0, 0)),
        pl.BlockSpec((1, C), lambda i: (0, 0)),
        pl.BlockSpec((1, C), lambda i: (0, 0)),
        pl.BlockSpec((C, C1), lambda i: (0, 0)),
        pl.BlockSpec((1, C1), lambda i: (0, 0)),
        pl.BlockSpec((1, C1), lambda i: (0, 0)),
    ]
    args = [taps, wdw, s0, b0, w1, s1, b1]
    if expand:
        in_specs += [
            pl.BlockSpec((C1, Cout), lambda i: (0, 0)),
            pl.BlockSpec((1, Cout), lambda i: (0, 0)),
            pl.BlockSpec((1, Cout), lambda i: (0, 0)),
        ]
        args += [w2, s2, b2]
    return pl.pallas_call(
        functools.partial(_block_kernel, expand=expand),
        out_shape=jax.ShapeDtypeStruct((P, Cout), jnp.bfloat16),
        grid_spec=pltpu.PrefetchScalarGridSpec(
            num_scalar_prefetch=0,
            grid=(P // TP,),
            in_specs=in_specs,
            out_specs=pl.BlockSpec((TP, Cout), lambda i: (i, 0)),
        ),
        compiler_params=pltpu.CompilerParams(dimension_semantics=("parallel",)),
    )(*args)


def fused_deconv_block(taps16, wdct, s0, b0, wpw, s1, b1, wh=None, bh=None):
    _, P, C = taps16.shape                   # (16, P, C): 4 phases x 4 taps
    Cpw = wpw.shape[1]
    head = wh is not None
    Cout = wh.shape[1] if head else Cpw
    # TP=64 keeps the (TP, 256) f32 accumulator + current tap well under the
    # 64-vreg file (feedback: avoid spills in the C=256 depthwise MAC).
    TP = _pick_tp(P, 64)
    in_specs = [
        pl.BlockSpec((4, TP, C), lambda ph, i: (ph, i, 0)),
        pl.BlockSpec((1, 4, C), lambda ph, i: (ph, 0, 0)),
        pl.BlockSpec((1, C), lambda ph, i: (0, 0)),
        pl.BlockSpec((1, C), lambda ph, i: (0, 0)),
        pl.BlockSpec((C, Cpw), lambda ph, i: (0, 0)),
        pl.BlockSpec((1, Cpw), lambda ph, i: (0, 0)),
        pl.BlockSpec((1, Cpw), lambda ph, i: (0, 0)),
    ]
    args = [taps16, wdct, s0, b0, wpw, s1, b1]
    if head:
        in_specs += [
            pl.BlockSpec((Cpw, Cout), lambda ph, i: (0, 0)),
            pl.BlockSpec((1, Cout), lambda ph, i: (0, 0)),
        ]
        args += [wh, bh]
    out_dtype = jnp.float32 if head else jnp.bfloat16
    return pl.pallas_call(
        functools.partial(_deconv_kernel, head=head),
        out_shape=jax.ShapeDtypeStruct((4, P, Cout), out_dtype),
        grid_spec=pltpu.PrefetchScalarGridSpec(
            num_scalar_prefetch=0,
            grid=(4, P // TP),
            in_specs=in_specs,
            out_specs=pl.BlockSpec((1, TP, Cout), lambda ph, i: (ph, i, 0)),
        ),
        compiler_params=pltpu.CompilerParams(
            dimension_semantics=("parallel", "parallel")),
    )(*args)


# ----------------------------------------------------------------------------
# XLA-side glue (tap extraction / phase interleave) — small tensors only.
# TODO(synk): move tap/patch extraction in-kernel via halo BlockSpecs to drop
#             the stacked-copy HBM traffic at larger resolutions.
# ----------------------------------------------------------------------------
def _stem_patches(x):
    N, H, W, C = x.shape
    Ho, Wo = H // 2, W // 2
    xp = jnp.pad(x, ((0, 0), (1, 1), (1, 1), (0, 0)))
    chunks = [xp[:, kh:kh + 2 * Ho:2, kw:kw + 2 * Wo:2, :]
              for kh in range(3) for kw in range(3)]
    return jnp.concatenate(chunks, -1).reshape(N * Ho * Wo, 9 * C), Ho, Wo


def _dw_s2_taps(x):
    N, H, W, C = x.shape
    Ho, Wo = H // 2, W // 2
    xp = jnp.pad(x, ((0, 0), (1, 1), (1, 1), (0, 0)))
    taps = [xp[:, kh:kh + 2 * Ho:2, kw:kw + 2 * Wo:2, :]
            for kh in range(3) for kw in range(3)]
    return jnp.stack(taps, 0).reshape(9, N * Ho * Wo, C), Ho, Wo


def _deconv_taps(x):
    # Phase-decomposed taps on the UN-dilated input (pad 1). Phase-major order.
    N, H, W, C = x.shape
    xp = jnp.pad(x, ((0, 0), (1, 1), (1, 1), (0, 0)))
    taps = [xp[:, yo:yo + H, xo:xo + W, :]
            for phase in _DCT_TABLE for (_, _, yo, xo) in phase]
    return jnp.stack(taps, 0).reshape(16, N * H * W, C)


def _interleave_phases(y, N, H, W):
    # y: (4, N*H*W, C) with phase order (dy, dx) -> (N, 2H, 2W, C)
    C = y.shape[-1]
    y = y.reshape(2, 2, N, H, W, C)
    y = jnp.transpose(y, (2, 3, 0, 4, 1, 5))
    return y.reshape(N, 2 * H, 2 * W, C)


# ----------------------------------------------------------------------------
# Parameters (PyTorch-equivalent random init; kernel-ready layouts, bf16)
# ----------------------------------------------------------------------------
def _make_bn(c):
    # Eval-mode BatchNorm (default init): gamma=1, beta=0, mean=0, var=1.
    gamma = jnp.ones((c,), jnp.float32)
    beta = jnp.zeros((c,), jnp.float32)
    mean = jnp.zeros((c,), jnp.float32)
    var = jnp.ones((c,), jnp.float32)
    scale = gamma / jnp.sqrt(var + BN_EPS)
    shift = beta - mean * scale
    return scale.reshape(1, c), shift.reshape(1, c)


def init_params(key):
    keys = iter(jax.random.split(key, 32))

    def nrm(shape, fan):
        return jax.random.normal(next(keys), shape, jnp.float32) * (2.0 / fan) ** 0.5

    p = {}
    # stem: Conv2d(3,32,3,s2,p1)+BN+ReLU6, Conv2d(32,32,1)+BN+ReLU6
    w_stem = nrm((32, 3, 3, 3), 27)
    p["stem_w1"] = jnp.transpose(w_stem, (2, 3, 1, 0)).reshape(27, 32).astype(jnp.bfloat16)
    p["stem_s1"], p["stem_b1"] = _make_bn(32)
    w_pw = nrm((32, 32, 1, 1), 32)
    p["stem_w2"] = jnp.transpose(w_pw[:, :, 0, 0], (1, 0)).astype(jnp.bfloat16)
    p["stem_s2"], p["stem_b2"] = _make_bn(32)

    # dw blocks: dw3x3-s2(C)+BN+ReLU6 -> pw C->C1 +BN [-> pw C1->C2 +BN+ReLU6]
    p["blocks"] = []
    for C, C1, C2 in [(32, 16, 96), (96, 24, 144), (144, 32, 192), (192, 256, None)]:
        b = {}
        wdw = nrm((C, 1, 3, 3), 9)
        b["wdw"] = jnp.transpose(wdw[:, 0], (1, 2, 0)).reshape(9, C)   # f32
        b["s0"], b["b0"] = _make_bn(C)
        wpj = nrm((C1, C, 1, 1), C)
        b["w1"] = jnp.transpose(wpj[:, :, 0, 0], (1, 0)).astype(jnp.bfloat16)
        b["s1"], b["b1"] = _make_bn(C1)
        if C2 is not None:
            wex = nrm((C2, C1, 1, 1), C1)
            b["w2"] = jnp.transpose(wex[:, :, 0, 0], (1, 0)).astype(jnp.bfloat16)
            b["s2"], b["b2"] = _make_bn(C2)
        p["blocks"].append(b)

    # deconv blocks: ConvTranspose2d(256,256,4,s2,p1,groups=256)+BN+ReLU6,
    #                Conv2d(256,256,1)+BN+ReLU6. Stored as per-phase tap rows.
    p["deconv"] = []
    for _ in range(3):
        d = {}
        wdct = nrm((256, 1, 4, 4), 16)                   # (in_ch, 1, ky, kx)
        rows = [wdct[:, 0, ky, kx]
                for phase in _DCT_TABLE for (ky, kx, _, _) in phase]
        d["wdct"] = jnp.stack(rows, 0).reshape(4, 4, 256)  # (phase, tap, C) f32
        d["s0"], d["b0"] = _make_bn(256)
        wpw = nrm((256, 256, 1, 1), 256)
        d["wpw"] = jnp.transpose(wpw[:, :, 0, 0], (1, 0)).astype(jnp.bfloat16)
        d["s1"], d["b1"] = _make_bn(256)
        p["deconv"].append(d)

    # head: Conv2d(256,17,1,bias=True), padded lane-dense to 128 columns
    wh = jax.random.normal(next(keys), (NUM_JOINTS, 256), jnp.float32) * (1.0 / 256) ** 0.5
    bh = jax.random.normal(next(keys), (NUM_JOINTS,), jnp.float32) * 0.01
    p["head_w"] = (jnp.zeros((256, HEAD_PAD), jnp.float32)
                   .at[:, :NUM_JOINTS].set(wh.T).astype(jnp.bfloat16))
    p["head_b"] = jnp.zeros((1, HEAD_PAD), jnp.float32).at[0, :NUM_JOINTS].set(bh)
    return p


# ----------------------------------------------------------------------------
# Forward pass
# ----------------------------------------------------------------------------
def forward(params, x_nchw):
    N, _, H, W = x_nchw.shape
    assert H % 32 == 0 and W % 32 == 0, "input H/W must be divisible by 32"
    x = jnp.transpose(x_nchw, (0, 2, 3, 1)).astype(jnp.bfloat16)  # NHWC, bf16

    # stem (conv3x3 s2 + BN + ReLU6 + pw 32->32 + BN + ReLU6) — one call
    patches, Ho, Wo = _stem_patches(x)
    y = stem_conv(patches, params["stem_w1"], params["stem_s1"], params["stem_b1"],
                  params["stem_w2"], params["stem_s2"], params["stem_b2"])
    x = y.reshape(N, Ho, Wo, y.shape[-1])

    # 4 fused depthwise blocks — one call each
    for b in params["blocks"]:
        taps, Ho, Wo = _dw_s2_taps(x)
        y = fused_dw_block(taps, b["wdw"], b["s0"], b["b0"],
                           b["w1"], b["s1"], b["b1"],
                           b.get("w2"), b.get("s2"), b.get("b2"))
        x = y.reshape(N, Ho, Wo, y.shape[-1])

    # 3 fused deconv blocks — one call each; 17-joint head fused in the last
    n_dec = len(params["deconv"])
    for di, d in enumerate(params["deconv"]):
        Hn, Wn = x.shape[1], x.shape[2]
        taps16 = _deconv_taps(x)
        if di == n_dec - 1:
            y = fused_deconv_block(taps16, d["wdct"], d["s0"], d["b0"],
                                   d["wpw"], d["s1"], d["b1"],
                                   params["head_w"], params["head_b"])
        else:
            y = fused_deconv_block(taps16, d["wdct"], d["s0"], d["b0"],
                                   d["wpw"], d["s1"], d["b1"])
        x = _interleave_phases(y, N, Hn, Wn)

    heat = x[..., :NUM_JOINTS].astype(jnp.float32)
    return jnp.transpose(heat, (0, 3, 1, 2))  # NCHW


if __name__ == "__main__":
    key = jax.random.PRNGKey(0)
    pkey, xkey = jax.random.split(key)
    params = init_params(pkey)
    # Input spatial must be divisible by 32 (5 stride-2 stages in the encoder).
    x = jax.random.normal(xkey, (2, 3, 64, 64), jnp.float32)  # NCHW
    out = jax.jit(forward)(params, x)
    out = jax.block_until_ready(out)
    assert out.shape == (2, NUM_JOINTS, 16, 16), out.shape
    assert bool(jnp.all(jnp.isfinite(out)))
    print("KERNEL_OK")
</pallas_src>

<mosaic_0001>
module attributes {stable_mosaic.version = 11 : i64} {
  func.func @_stem_kernel(%arg0: i32, %arg1: memref<512x27xbf16, #tpu.memory_space<vmem>>, %arg2: memref<27x32xbf16, #tpu.memory_space<vmem>>, %arg3: memref<1x32xf32, #tpu.memory_space<vmem>>, %arg4: memref<1x32xf32, #tpu.memory_space<vmem>>, %arg5: memref<32x32xbf16, #tpu.memory_space<vmem>>, %arg6: memref<1x32xf32, #tpu.memory_space<vmem>>, %arg7: memref<1x32xf32, #tpu.memory_space<vmem>>, %arg8: memref<512x32xbf16, #tpu.memory_space<vmem>>) attributes {dimension_semantics = [#tpu.dimension_semantics<parallel>], iteration_bounds = array<i64: 4>, scalar_prefetch = 0 : i64, scratch_operands = 0 : i64, tpu.core_type = #tpu.core_type<tc>, window_params = [{transform_indices = @transform_0, window_bounds = array<i64: 512, 27>}, {pipeline_mode = #tpu.pipeline_mode<synchronous>, transform_indices = @transform_1, window_bounds = array<i64: 27, 32>}, {pipeline_mode = #tpu.pipeline_mode<synchronous>, transform_indices = @transform_2, window_bounds = array<i64: 1, 32>}, {pipeline_mode = #tpu.pipeline_mode<synchronous>, transform_indices = @transform_3, window_bounds = array<i64: 1, 32>}, {pipeline_mode = #tpu.pipeline_mode<synchronous>, transform_indices = @transform_4, window_bounds = array<i64: 32, 32>}, {pipeline_mode = #tpu.pipeline_mode<synchronous>, transform_indices = @transform_5, window_bounds = array<i64: 1, 32>}, {pipeline_mode = #tpu.pipeline_mode<synchronous>, transform_indices = @transform_6, window_bounds = array<i64: 1, 32>}, {transform_indices = @transform_7, window_bounds = array<i64: 512, 32>}]} {
    %c0 = arith.constant 0 : index
    %c0_0 = arith.constant 0 : index
    %0 = vector.load %arg1[%c0, %c0_0] : memref<512x27xbf16, #tpu.memory_space<vmem>>, vector<512x27xbf16>
    %c0_1 = arith.constant 0 : index
    %c0_2 = arith.constant 0 : index
    %1 = vector.load %arg2[%c0_1, %c0_2] : memref<27x32xbf16, #tpu.memory_space<vmem>>, vector<27x32xbf16>
    %cst = arith.constant dense<0.000000e+00> : vector<512x32xf32>
    %2 = tpu.matmul %0, %1, %cst {dimension_numbers = #tpu.dot_dimension_numbers<[1], [0], [0], [1], [0, 0, 1, 1], [], []>} : vector<512x27xbf16>, vector<27x32xbf16>, vector<512x32xf32> -> vector<512x32xf32>
    %c0_3 = arith.constant 0 : index
    %c0_4 = arith.constant 0 : index
    %3 = vector.load %arg3[%c0_3, %c0_4] : memref<1x32xf32, #tpu.memory_space<vmem>>, vector<1x32xf32>
    %4 = vector.broadcast %3 : vector<1x32xf32> to vector<512x32xf32>
    %5 = arith.mulf %2, %4 : vector<512x32xf32>
    %c0_5 = arith.constant 0 : index
    %c0_6 = arith.constant 0 : index
    %6 = vector.load %arg4[%c0_5, %c0_6] : memref<1x32xf32, #tpu.memory_space<vmem>>, vector<1x32xf32>
    %7 = vector.broadcast %6 : vector<1x32xf32> to vector<512x32xf32>
    %8 = arith.addf %5, %7 : vector<512x32xf32>
    %cst_7 = arith.constant 0.000000e+00 : f32
    %9 = vector.broadcast %cst_7 : f32 to vector<512x32xf32>
    %10 = arith.maximumf %8, %9 : vector<512x32xf32>
    %cst_8 = arith.constant 6.000000e+00 : f32
    %11 = vector.broadcast %cst_8 : f32 to vector<512x32xf32>
    %12 = arith.minimumf %10, %11 : vector<512x32xf32>
    %13 = arith.truncf %12 : vector<512x32xf32> to vector<512x32xbf16>
    %c0_9 = arith.constant 0 : index
    %c0_10 = arith.constant 0 : index
    %14 = vector.load %arg5[%c0_9, %c0_10] : memref<32x32xbf16, #tpu.memory_space<vmem>>, vector<32x32xbf16>
    %cst_11 = arith.constant dense<0.000000e+00> : vector<512x32xf32>
    %15 = tpu.matmul %13, %14, %cst_11 {dimension_numbers = #tpu.dot_dimension_numbers<[1], [0], [0], [1], [0, 0, 1, 1], [], []>} : vector<512x32xbf16>, vector<32x32xbf16>, vector<512x32xf32> -> vector<512x32xf32>
    %c0_12 = arith.constant 0 : index
    %c0_13 = arith.constant 0 : index
    %16 = vector.load %arg6[%c0_12, %c0_13] : memref<1x32xf32, #tpu.memory_space<vmem>>, vector<1x32xf32>
    %17 = vector.broadcast %16 : vector<1x32xf32> to vector<512x32xf32>
    %18 = arith.mulf %15, %17 : vector<512x32xf32>
    %c0_14 = arith.constant 0 : index
    %c0_15 = arith.constant 0 : index
    %19 = vector.load %arg7[%c0_14, %c0_15] : memref<1x32xf32, #tpu.memory_space<vmem>>, vector<1x32xf32>
    %20 = vector.broadcast %19 : vector<1x32xf32> to vector<512x32xf32>
    %21 = arith.addf %18, %20 : vector<512x32xf32>
    %cst_16 = arith.constant 0.000000e+00 : f32
    %22 = vector.broadcast %cst_16 : f32 to vector<512x32xf32>
    %23 = arith.maximumf %21, %22 : vector<512x32xf32>
    %cst_17 = arith.constant 6.000000e+00 : f32
    %24 = vector.broadcast %cst_17 : f32 to vector<512x32xf32>
    %25 = arith.minimumf %23, %24 : vector<512x32xf32>
    %26 = arith.truncf %25 : vector<512x32xf32> to vector<512x32xbf16>
    %c0_18 = arith.constant 0 : index
    %c0_19 = arith.constant 0 : index
    %27 = vector.load %arg8[%c0_18, %c0_19] : memref<512x32xbf16, #tpu.memory_space<vmem>>, vector<512x32xbf16>
    tpu.vector_store %arg8[%c0_18, %c0_19], %26 {strides = array<i32>} : memref<512x32xbf16, #tpu.memory_space<vmem>>, vector<512x32xbf16>,
    return
  }
  func.func @transform_0(%arg0: i32) -> (i32, i32) {
    %c0_i32 = arith.constant 0 : i32
    %c0_i32_0 = arith.constant 0 : i32
    return %arg0, %c0_i32 : i32, i32
  }
  func.func @transform_1(%arg0: i32) -> (i32, i32) {
    %c0_i32 = arith.constant 0 : i32
    %c0_i32_0 = arith.constant 0 : i32
    %c0_i32_1 = arith.constant 0 : i32
    return %c0_i32, %c0_i32_0 : i32, i32
  }
  func.func @transform_2(%arg0: i32) -> (i32, i32) {
    %c0_i32 = arith.constant 0 : i32
    %c0_i32_0 = arith.constant 0 : i32
    %c0_i32_1 = arith.constant 0 : i32
    return %c0_i32, %c0_i32_0 : i32, i32
  }
  func.func @transform_3(%arg0: i32) -> (i32, i32) {
    %c0_i32 = arith.constant 0 : i32
    %c0_i32_0 = arith.constant 0 : i32
    %c0_i32_1 = arith.constant 0 : i32
    return %c0_i32, %c0_i32_0 : i32, i32
  }
  func.func @transform_4(%arg0: i32) -> (i32, i32) {
    %c0_i32 = arith.constant 0 : i32
    %c0_i32_0 = arith.constant 0 : i32
    %c0_i32_1 = arith.constant 0 : i32
    return %c0_i32, %c0_i32_0 : i32, i32
  }
  func.func @transform_5(%arg0: i32) -> (i32, i32) {
    %c0_i32 = arith.constant 0 : i32
    %c0_i32_0 = arith.constant 0 : i32
    %c0_i32_1 = arith.constant 0 : i32
    return %c0_i32, %c0_i32_0 : i32, i32
  }
  func.func @transform_6(%arg0: i32) -> (i32, i32) {
    %c0_i32 = arith.constant 0 : i32
    %c0_i32_0 = arith.constant 0 : i32
    %c0_i32_1 = arith.constant 0 : i32
    return %c0_i32, %c0_i32_0 : i32, i32
  }
  func.func @transform_7(%arg0: i32) -> (i32, i32) {
    %c0_i32 = arith.constant 0 : i32
    %c0_i32_0 = arith.constant 0 : i32
    return %arg0, %c0_i32 : i32, i32
  }
}

module attributes {stable_mosaic.version = 11 : i64} {
  func.func @_block_kernel(%arg0: i32, %arg1: memref<9x256x32xbf16, #tpu.memory_space<vmem>>, %arg2: memref<9x32xf32, #tpu.memory_space<vmem>>, %arg3: memref<1x32xf32, #tpu.memory_space<vmem>>, %arg4: memref<1x32xf32, #tpu.memory_space<vmem>>, %arg5: memref<32x16xbf16, #tpu.memory_space<vmem>>, %arg6: memref<1x16xf32, #tpu.memory_space<vmem>>, %arg7: memref<1x16xf32, #tpu.memory_space<vmem>>, %arg8: memref<16x96xbf16, #tpu.memory_space<vmem>>, %arg9: memref<1x96xf32, #tpu.memory_space<vmem>>, %arg10: memref<1x96xf32, #tpu.memory_space<vmem>>, %arg11: memref<256x96xbf16, #tpu.memory_space<vmem>>) attributes {dimension_semantics = [#tpu.dimension_semantics<parallel>], iteration_bounds = array<i64: 2>, scalar_prefetch = 0 : i64, scratch_operands = 0 : i64, tpu.core_type = #tpu.core_type<tc>, window_params = [{transform_indices = @transform_0, window_bounds = array<i64: 9, 256, 32>}, {pipeline_mode = #tpu.pipeline_mode<synchronous>, transform_indices = @transform_1, window_bounds = array<i64: 9, 32>}, {pipeline_mode = #tpu.pipeline_mode<synchronous>, transform_indices = @transform_2, window_bounds = array<i64: 1, 32>}, {pipeline_mode = #tpu.pipeline_mode<synchronous>, transform_indices = @transform_3, window_bounds = array<i64: 1, 32>}, {pipeline_mode = #tpu.pipeline_mode<synchronous>, transform_indices = @transform_4, window_bounds = array<i64: 32, 16>}, {pipeline_mode = #tpu.pipeline_mode<synchronous>, transform_indices = @transform_5, window_bounds = array<i64: 1, 16>}, {pipeline_mode = #tpu.pipeline_mode<synchronous>, transform_indices = @transform_6, window_bounds = array<i64: 1, 16>}, {pipeline_mode = #tpu.pipeline_mode<synchronous>, transform_indices = @transform_7, window_bounds = array<i64: 16, 96>}, {pipeline_mode = #tpu.pipeline_mode<synchronous>, transform_indices = @transform_8, window_bounds = array<i64: 1, 96>}, {pipeline_mode = #tpu.pipeline_mode<synchronous>, transform_indices = @transform_9, window_bounds = array<i64: 1, 96>}, {transform_indices = @transform_10, window_bounds = array<i64: 256, 96>}]} {
    %c0 = arith.constant 0 : index
    %c0_0 = arith.constant 0 : index
    %0 = vector.load %arg2[%c0, %c0_0] : memref<9x32xf32, #tpu.memory_space<vmem>>, vector<9x32xf32>
    %cst = arith.constant 0.000000e+00 : f32
    %1 = vector.broadcast %cst : f32 to vector<256x32xf32>
    %c0_1 = arith.constant 0 : index
    %c0_2 = arith.constant 0 : index
    %c0_3 = arith.constant 0 : index
    %2 = vector.load %arg1[%c0_1, %c0_2, %c0_3] : memref<9x256x32xbf16, #tpu.memory_space<vmem>>, vector<1x256x32xbf16>
    %3 = vector.shape_cast %2 : vector<1x256x32xbf16> to vector<256x32xbf16>
    %4 = arith.extf %3 : vector<256x32xbf16> to vector<256x32xf32>
    %5 = vector.extract_strided_slice %0 {offsets = [0, 0], sizes = [1, 32], strides = [1, 1]} : vector<9x32xf32> to vector<1x32xf32>
    %6 = vector.broadcast %5 : vector<1x32xf32> to vector<256x32xf32>
    %7 = arith.mulf %4, %6 : vector<256x32xf32>
    %8 = arith.addf %1, %7 : vector<256x32xf32>
    %c1 = arith.constant 1 : index
    %c0_4 = arith.constant 0 : index
    %c0_5 = arith.constant 0 : index
    %9 = vector.load %arg1[%c1, %c0_4, %c0_5] : memref<9x256x32xbf16, #tpu.memory_space<vmem>>, vector<1x256x32xbf16>
    %10 = vector.shape_cast %9 : vector<1x256x32xbf16> to vector<256x32xbf16>
    %11 = arith.extf %10 : vector<256x32xbf16> to vector<256x32xf32>
    %12 = vector.extract_strided_slice %0 {offsets = [1, 0], sizes = [1, 32], strides = [1, 1]} : vector<9x32xf32> to vector<1x32xf32>
    %13 = vector.broadcast %12 : vector<1x32xf32> to vector<256x32xf32>
    %14 = arith.mulf %11, %13 : vector<256x32xf32>
    %15 = arith.addf %8, %14 : vector<256x32xf32>
    %c2 = arith.constant 2 : index
    %c0_6 = arith.constant 0 : index
    %c0_7 = arith.constant 0 : index
    %16 = vector.load %arg1[%c2, %c0_6, %c0_7] : memref<9x256x32xbf16, #tpu.memory_space<vmem>>, vector<1x256x32xbf16>
    %17 = vector.shape_cast %16 : vector<1x256x32xbf16> to vector<256x32xbf16>
    %18 = arith.extf %17 : vector<256x32xbf16> to vector<256x32xf32>
    %19 = vector.extract_strided_slice %0 {offsets = [2, 0], sizes = [1, 32], strides = [1, 1]} : vector<9x32xf32> to vector<1x32xf32>
    %20 = vector.broadcast %19 : vector<1x32xf32> to vector<256x32xf32>
    %21 = arith.mulf %18, %20 : vector<256x32xf32>
    %22 = arith.addf %15, %21 : vector<256x32xf32>
    %c3 = arith.constant 3 : index
    %c0_8 = arith.constant 0 : index
    %c0_9 = arith.constant 0 : index
    %23 = vector.load %arg1[%c3, %c0_8, %c0_9] : memref<9x256x32xbf16, #tpu.memory_space<vmem>>, vector<1x256x32xbf16>
    %24 = vector.shape_cast %23 : vector<1x256x32xbf16> to vector<256x32xbf16>
    %25 = arith.extf %24 : vector<256x32xbf16> to vector<256x32xf32>
    %26 = vector.extract_strided_slice %0 {offsets = [3, 0], sizes = [1, 32], strides = [1, 1]} : vector<9x32xf32> to vector<1x32xf32>
    %27 = vector.broadcast %26 : vector<1x32xf32> to vector<256x32xf32>
    %28 = arith.mulf %25, %27 : vector<256x32xf32>
    %29 = arith.addf %22, %28 : vector<256x32xf32>
    %c4 = arith.constant 4 : index
    %c0_10 = arith.constant 0 : index
    %c0_11 = arith.constant 0 : index
    %30 = vector.load %arg1[%c4, %c0_10, %c0_11] : memref<9x256x32xbf16, #tpu.memory_space<vmem>>, vector<1x256x32xbf16>
    %31 = vector.shape_cast %30 : vector<1x256x32xbf16> to vector<256x32xbf16>
    %32 = arith.extf %31 : vector<256x32xbf16> to vector<256x32xf32>
    %33 = vector.extract_strided_slice %0 {offsets = [4, 0], sizes = [1, 32], strides = [1, 1]} : vector<9x32xf32> to vector<1x32xf32>
    %34 = vector.broadcast %33 : vector<1x32xf32> to vector<256x32xf32>
    %35 = arith.mulf %32, %34 : vector<256x32xf32>
    %36 = arith.addf %29, %35 : vector<256x32xf32>
    %c5 = arith.constant 5 : index
    %c0_12 = arith.constant 0 : index
    %c0_13 = arith.constant 0 : index
    %37 = vector.load %arg1[%c5, %c0_12, %c0_13] : memref<9x256x32xbf16, #tpu.memory_space<vmem>>, vector<1x256x32xbf16>
    %38 = vector.shape_cast %37 : vector<1x256x32xbf16> to vector<256x32xbf16>
    %39 = arith.extf %38 : vector<256x32xbf16> to vector<256x32xf32>
    %40 = vector.extract_strided_slice %0 {offsets = [5, 0], sizes = [1, 32], strides = [1, 1]} : vector<9x32xf32> to vector<1x32xf32>
    %41 = vector.broadcast %40 : vector<1x32xf32> to vector<256x32xf32>
    %42 = arith.mulf %39, %41 : vector<256x32xf32>
    %43 = arith.addf %36, %42 : vector<256x32xf32>
    %c6 = arith.constant 6 : index
    %c0_14 = arith.constant 0 : index
    %c0_15 = arith.constant 0 : index
    %44 = vector.load %arg1[%c6, %c0_14, %c0_15] : memref<9x256x32xbf16, #tpu.memory_space<vmem>>, vector<1x256x32xbf16>
    %45 = vector.shape_cast %44 : vector<1x256x32xbf16> to vector<256x32xbf16>
    %46 = arith.extf %45 : vector<256x32xbf16> to vector<256x32xf32>
    %47 = vector.extract_strided_slice %0 {offsets = [6, 0], sizes = [1, 32], strides = [1, 1]} : vector<9x32xf32> to vector<1x32xf32>
    %48 = vector.broadcast %47 : vector<1x32xf32> to vector<256x32xf32>
    %49 = arith.mulf %46, %48 : vector<256x32xf32>
    %50 = arith.addf %43, %49 : vector<256x32xf32>
    %c7 = arith.constant 7 : index
    %c0_16 = arith.constant 0 : index
    %c0_17 = arith.constant 0 : index
    %51 = vector.load %arg1[%c7, %c0_16, %c0_17] : memref<9x256x32xbf16, #tpu.memory_space<vmem>>, vector<1x256x32xbf16>
    %52 = vector.shape_cast %51 : vector<1x256x32xbf16> to vector<256x32xbf16>
    %53 = arith.extf %52 : vector<256x32xbf16> to vector<256x32xf32>
    %54 = vector.extract_strided_slice %0 {offsets = [7, 0], sizes = [1, 32], strides = [1, 1]} : vector<9x32xf32> to vector<1x32xf32>
    %55 = vector.broadcast %54 : vector<1x32xf32> to vector<256x32xf32>
    %56 = arith.mulf %53, %55 : vector<256x32xf32>
    %57 = arith.addf %50, %56 : vector<256x32xf32>
    %c8 = arith.constant 8 : index
    %c0_18 = arith.constant 0 : index
    %c0_19 = arith.constant 0 : index
    %58 = vector.load %arg1[%c8, %c0_18, %c0_19] : memref<9x256x32xbf16, #tpu.memory_space<vmem>>, vector<1x256x32xbf16>
    %59 = vector.shape_cast %58 : vector<1x256x32xbf16> to vector<256x32xbf16>
    %60 = arith.extf %59 : vector<256x32xbf16> to vector<256x32xf32>
    %61 = vector.extract_strided_slice %0 {offsets = [8, 0], sizes = [1, 32], strides = [1, 1]} : vector<9x32xf32> to vector<1x32xf32>
    %62 = vector.broadcast %61 : vector<1x32xf32> to vector<256x32xf32>
    %63 = arith.mulf %60, %62 : vector<256x32xf32>
    %64 = arith.addf %57, %63 : vector<256x32xf32>
    %c0_20 = arith.constant 0 : index
    %c0_21 = arith.constant 0 : index
    %65 = vector.load %arg3[%c0_20, %c0_21] : memref<1x32xf32, #tpu.memory_space<vmem>>, vector<1x32xf32>
    %66 = vector.broadcast %65 : vector<1x32xf32> to vector<256x32xf32>
    %67 = arith.mulf %64, %66 : vector<256x32xf32>
    %c0_22 = arith.constant 0 : index
    %c0_23 = arith.constant 0 : index
    %68 = vector.load %arg4[%c0_22, %c0_23] : memref<1x32xf32, #tpu.memory_space<vmem>>, vector<1x32xf32>
    %69 = vector.broadcast %68 : vector<1x32xf32> to vector<256x32xf32>
    %70 = arith.addf %67, %69 : vector<256x32xf32>
    %cst_24 = arith.constant 0.000000e+00 : f32
    %71 = vector.broadcast %cst_24 : f32 to vector<256x32xf32>
    %72 = arith.maximumf %70, %71 : vector<256x32xf32>
    %cst_25 = arith.constant 6.000000e+00 : f32
    %73 = vector.broadcast %cst_25 : f32 to vector<256x32xf32>
    %74 = arith.minimumf %72, %73 : vector<256x32xf32>
    %75 = arith.truncf %74 : vector<256x32xf32> to vector<256x32xbf16>
    %c0_26 = arith.constant 0 : index
    %c0_27 = arith.constant 0 : index
    %76 = vector.load %arg5[%c0_26, %c0_27] : memref<32x16xbf16, #tpu.memory_space<vmem>>, vector<32x16xbf16>
    %cst_28 = arith.constant dense<0.000000e+00> : vector<256x16xf32>
    %77 = tpu.matmul %75, %76, %cst_28 {dimension_numbers = #tpu.dot_dimension_numbers<[1], [0], [0], [1], [0, 0, 1, 1], [], []>} : vector<256x32xbf16>, vector<32x16xbf16>, vector<256x16xf32> -> vector<256x16xf32>
    %c0_29 = arith.constant 0 : index
    %c0_30 = arith.constant 0 : index
    %78 = vector.load %arg6[%c0_29, %c0_30] : memref<1x16xf32, #tpu.memory_space<vmem>>, vector<1x16xf32>
    %79 = vector.broadcast %78 : vector<1x16xf32> to vector<256x16xf32>
    %80 = arith.mulf %77, %79 : vector<256x16xf32>
    %c0_31 = arith.constant 0 : index
    %c0_32 = arith.constant 0 : index
    %81 = vector.load %arg7[%c0_31, %c0_32] : memref<1x16xf32, #tpu.memory_space<vmem>>, vector<1x16xf32>
    %82 = vector.broadcast %81 : vector<1x16xf32> to vector<256x16xf32>
    %83 = arith.addf %80, %82 : vector<256x16xf32>
    %84 = arith.truncf %83 : vector<256x16xf32> to vector<256x16xbf16>
    %c0_33 = arith.constant 0 : index
    %c0_34 = arith.constant 0 : index
    %85 = vector.load %arg8[%c0_33, %c0_34] : memref<16x96xbf16, #tpu.memory_space<vmem>>, vector<16x96xbf16>
    %cst_35 = arith.constant dense<0.000000e+00> : vector<256x96xf32>
    %86 = tpu.matmul %84, %85, %cst_35 {dimension_numbers = #tpu.dot_dimension_numbers<[1], [0], [0], [1], [0, 0, 1, 1], [], []>} : vector<256x16xbf16>, vector<16x96xbf16>, vector<256x96xf32> -> vector<256x96xf32>
    %c0_36 = arith.constant 0 : index
    %c0_37 = arith.constant 0 : index
    %87 = vector.load %arg9[%c0_36, %c0_37] : memref<1x96xf32, #tpu.memory_space<vmem>>, vector<1x96xf32>
    %88 = vector.broadcast %87 : vector<1x96xf32> to vector<256x96xf32>
    %89 = arith.mulf %86, %88 : vector<256x96xf32>
    %c0_38 = arith.constant 0 : index
    %c0_39 = arith.constant 0 : index
    %90 = vector.load %arg10[%c0_38, %c0_39] : memref<1x96xf32, #tpu.memory_space<vmem>>, vector<1x96xf32>
    %91 = vector.broadcast %90 : vector<1x96xf32> to vector<256x96xf32>
    %92 = arith.addf %89, %91 : vector<256x96xf32>
    %cst_40 = arith.constant 0.000000e+00 : f32
    %93 = vector.broadcast %cst_40 : f32 to vector<256x96xf32>
    %94 = arith.maximumf %92, %93 : vector<256x96xf32>
    %cst_41 = arith.constant 6.000000e+00 : f32
    %95 = vector.broadcast %cst_41 : f32 to vector<256x96xf32>
    %96 = arith.minimumf %94, %95 : vector<256x96xf32>
    %97 = arith.truncf %96 : vector<256x96xf32> to vector<256x96xbf16>
    %c0_42 = arith.constant 0 : index
    %c0_43 = arith.constant 0 : index
    %98 = vector.load %arg11[%c0_42, %c0_43] : memref<256x96xbf16, #tpu.memory_space<vmem>>, vector<256x96xbf16>
    tpu.vector_store %arg11[%c0_42, %c0_43], %97 {strides = array<i32>} : memref<256x96xbf16, #tpu.memory_space<vmem>>, vector<256x96xbf16>,
    return
  }
  func.func @transform_0(%arg0: i32) -> (i32, i32, i32) {
    %c0_i32 = arith.constant 0 : i32
    %c0_i32_0 = arith.constant 0 : i32
    %c0_i32_1 = arith.constant 0 : i32
    return %c0_i32, %arg0, %c0_i32_0 : i32, i32, i32
  }
  func.func @transform_1(%arg0: i32) -> (i32, i32) {
    %c0_i32 = arith.constant 0 : i32
    %c0_i32_0 = arith.constant 0 : i32
    %c0_i32_1 = arith.constant 0 : i32
    return %c0_i32, %c0_i32_0 : i32, i32
  }
  func.func @transform_2(%arg0: i32) -> (i32, i32) {
    %c0_i32 = arith.constant 0 : i32
    %c0_i32_0 = arith.constant 0 : i32
    %c0_i32_1 = arith.constant 0 : i32
    return %c0_i32, %c0_i32_0 : i32, i32
  }
  func.func @transform_3(%arg0: i32) -> (i32, i32) {
    %c0_i32 = arith.constant 0 : i32
    %c0_i32_0 = arith.constant 0 : i32
    %c0_i32_1 = arith.constant 0 : i32
    return %c0_i32, %c0_i32_0 : i32, i32
  }
  func.func @transform_4(%arg0: i32) -> (i32, i32) {
    %c0_i32 = arith.constant 0 : i32
    %c0_i32_0 = arith.constant 0 : i32
    %c0_i32_1 = arith.constant 0 : i32
    return %c0_i32, %c0_i32_0 : i32, i32
  }
  func.func @transform_5(%arg0: i32) -> (i32, i32) {
    %c0_i32 = arith.constant 0 : i32
    %c0_i32_0 = arith.constant 0 : i32
    %c0_i32_1 = arith.constant 0 : i32
    return %c0_i32, %c0_i32_0 : i32, i32
  }
  func.func @transform_6(%arg0: i32) -> (i32, i32) {
    %c0_i32 = arith.constant 0 : i32
    %c0_i32_0 = arith.constant 0 : i32
    %c0_i32_1 = arith.constant 0 : i32
    return %c0_i32, %c0_i32_0 : i32, i32
  }
  func.func @transform_7(%arg0: i32) -> (i32, i32) {
    %c0_i32 = arith.constant 0 : i32
    %c0_i32_0 = arith.constant 0 : i32
    %c0_i32_1 = arith.constant 0 : i32
    return %c0_i32, %c0_i32_0 : i32, i32
  }
  func.func @transform_8(%arg0: i32) -> (i32, i32) {
    %c0_i32 = arith.constant 0 : i32
    %c0_i32_0 = arith.constant 0 : i32
    %c0_i32_1 = arith.constant 0 : i32
    return %c0_i32, %c0_i32_0 : i32, i32
  }
  func.func @transform_9(%arg0: i32) -> (i32, i32) {
    %c0_i32 = arith.constant 0 : i32
    %c0_i32_0 = arith.constant 0 : i32
    %c0_i32_1 = arith.constant 0 : i32
    return %c0_i32, %c0_i32_0 : i32, i32
  }
  func.func @transform_10(%arg0: i32) -> (i32, i32) {
    %c0_i32 = arith.constant 0 : i32
    %c0_i32_0 = arith.constant 0 : i32
    return %arg0, %c0_i32 : i32, i32
  }
}

module attributes {stable_mosaic.version = 11 : i64} {
  func.func @_block_kernel(%arg0: i32, %arg1: memref<9x128x96xbf16, #tpu.memory_space<vmem>>, %arg2: memref<9x96xf32, #tpu.memory_space<vmem>>, %arg3: memref<1x96xf32, #tpu.memory_space<vmem>>, %arg4: memref<1x96xf32, #tpu.memory_space<vmem>>, %arg5: memref<96x24xbf16, #tpu.memory_space<vmem>>, %arg6: memref<1x24xf32, #tpu.memory_space<vmem>>, %arg7: memref<1x24xf32, #tpu.memory_space<vmem>>, %arg8: memref<24x144xbf16, #tpu.memory_space<vmem>>, %arg9: memref<1x144xf32, #tpu.memory_space<vmem>>, %arg10: memref<1x144xf32, #tpu.memory_space<vmem>>, %arg11: memref<128x144xbf16, #tpu.memory_space<vmem>>) attributes {dimension_semantics = [#tpu.dimension_semantics<parallel>], iteration_bounds = array<i64: 1>, scalar_prefetch = 0 : i64, scratch_operands = 0 : i64, tpu.core_type = #tpu.core_type<tc>, window_params = [{transform_indices = @transform_0, window_bounds = array<i64: 9, 128, 96>}, {pipeline_mode = #tpu.pipeline_mode<synchronous>, transform_indices = @transform_1, window_bounds = array<i64: 9, 96>}, {pipeline_mode = #tpu.pipeline_mode<synchronous>, transform_indices = @transform_2, window_bounds = array<i64: 1, 96>}, {pipeline_mode = #tpu.pipeline_mode<synchronous>, transform_indices = @transform_3, window_bounds = array<i64: 1, 96>}, {pipeline_mode = #tpu.pipeline_mode<synchronous>, transform_indices = @transform_4, window_bounds = array<i64: 96, 24>}, {pipeline_mode = #tpu.pipeline_mode<synchronous>, transform_indices = @transform_5, window_bounds = array<i64: 1, 24>}, {pipeline_mode = #tpu.pipeline_mode<synchronous>, transform_indices = @transform_6, window_bounds = array<i64: 1, 24>}, {pipeline_mode = #tpu.pipeline_mode<synchronous>, transform_indices = @transform_7, window_bounds = array<i64: 24, 144>}, {pipeline_mode = #tpu.pipeline_mode<synchronous>, transform_indices = @transform_8, window_bounds = array<i64: 1, 144>}, {pipeline_mode = #tpu.pipeline_mode<synchronous>, transform_indices = @transform_9, window_bounds = array<i64: 1, 144>}, {transform_indices = @transform_10, window_bounds = array<i64: 128, 144>}]} {
    %c0 = arith.constant 0 : index
    %c0_0 = arith.constant 0 : index
    %0 = vector.load %arg2[%c0, %c0_0] : memref<9x96xf32, #tpu.memory_space<vmem>>, vector<9x96xf32>
    %cst = arith.constant 0.000000e+00 : f32
    %1 = vector.broadcast %cst : f32 to vector<128x96xf32>
    %c0_1 = arith.constant 0 : index
    %c0_2 = arith.constant 0 : index
    %c0_3 = arith.constant 0 : index
    %2 = vector.load %arg1[%c0_1, %c0_2, %c0_3] : memref<9x128x96xbf16, #tpu.memory_space<vmem>>, vector<1x128x96xbf16>
    %3 = vector.shape_cast %2 : vector<1x128x96xbf16> to vector<128x96xbf16>
    %4 = arith.extf %3 : vector<128x96xbf16> to vector<128x96xf32>
    %5 = vector.extract_strided_slice %0 {offsets = [0, 0], sizes = [1, 96], strides = [1, 1]} : vector<9x96xf32> to vector<1x96xf32>
    %6 = vector.broadcast %5 : vector<1x96xf32> to vector<128x96xf32>
    %7 = arith.mulf %4, %6 : vector<128x96xf32>
    %8 = arith.addf %1, %7 : vector<128x96xf32>
    %c1 = arith.constant 1 : index
    %c0_4 = arith.constant 0 : index
    %c0_5 = arith.constant 0 : index
    %9 = vector.load %arg1[%c1, %c0_4, %c0_5] : memref<9x128x96xbf16, #tpu.memory_space<vmem>>, vector<1x128x96xbf16>
    %10 = vector.shape_cast %9 : vector<1x128x96xbf16> to vector<128x96xbf16>
    %11 = arith.extf %10 : vector<128x96xbf16> to vector<128x96xf32>
    %12 = vector.extract_strided_slice %0 {offsets = [1, 0], sizes = [1, 96], strides = [1, 1]} : vector<9x96xf32> to vector<1x96xf32>
    %13 = vector.broadcast %12 : vector<1x96xf32> to vector<128x96xf32>
    %14 = arith.mulf %11, %13 : vector<128x96xf32>
    %15 = arith.addf %8, %14 : vector<128x96xf32>
    %c2 = arith.constant 2 : index
    %c0_6 = arith.constant 0 : index
    %c0_7 = arith.constant 0 : index
    %16 = vector.load %arg1[%c2, %c0_6, %c0_7] : memref<9x128x96xbf16, #tpu.memory_space<vmem>>, vector<1x128x96xbf16>
    %17 = vector.shape_cast %16 : vector<1x128x96xbf16> to vector<128x96xbf16>
    %18 = arith.extf %17 : vector<128x96xbf16> to vector<128x96xf32>
    %19 = vector.extract_strided_slice %0 {offsets = [2, 0], sizes = [1, 96], strides = [1, 1]} : vector<9x96xf32> to vector<1x96xf32>
    %20 = vector.broadcast %19 : vector<1x96xf32> to vector<128x96xf32>
    %21 = arith.mulf %18, %20 : vector<128x96xf32>
    %22 = arith.addf %15, %21 : vector<128x96xf32>
    %c3 = arith.constant 3 : index
    %c0_8 = arith.constant 0 : index
    %c0_9 = arith.constant 0 : index
    %23 = vector.load %arg1[%c3, %c0_8, %c0_9] : memref<9x128x96xbf16, #tpu.memory_space<vmem>>, vector<1x128x96xbf16>
    %24 = vector.shape_cast %23 : vector<1x128x96xbf16> to vector<128x96xbf16>
    %25 = arith.extf %24 : vector<128x96xbf16> to vector<128x96xf32>
    %26 = vector.extract_strided_slice %0 {offsets = [3, 0], sizes = [1, 96], strides = [1, 1]} : vector<9x96xf32> to vector<1x96xf32>
    %27 = vector.broadcast %26 : vector<1x96xf32> to vector<128x96xf32>
    %28 = arith.mulf %25, %27 : vector<128x96xf32>
    %29 = arith.addf %22, %28 : vector<128x96xf32>
    %c4 = arith.constant 4 : index
    %c0_10 = arith.constant 0 : index
    %c0_11 = arith.constant 0 : index
    %30 = vector.load %arg1[%c4, %c0_10, %c0_11] : memref<9x128x96xbf16, #tpu.memory_space<vmem>>, vector<1x128x96xbf16>
    %31 = vector.shape_cast %30 : vector<1x128x96xbf16> to vector<128x96xbf16>
    %32 = arith.extf %31 : vector<128x96xbf16> to vector<128x96xf32>
    %33 = vector.extract_strided_slice %0 {offsets = [4, 0], sizes = [1, 96], strides = [1, 1]} : vector<9x96xf32> to vector<1x96xf32>
    %34 = vector.broadcast %33 : vector<1x96xf32> to vector<128x96xf32>
    %35 = arith.mulf %32, %34 : vector<128x96xf32>
    %36 = arith.addf %29, %35 : vector<128x96xf32>
    %c5 = arith.constant 5 : index
    %c0_12 = arith.constant 0 : index
    %c0_13 = arith.constant 0 : index
    %37 = vector.load %arg1[%c5, %c0_12, %c0_13] : memref<9x128x96xbf16, #tpu.memory_space<vmem>>, vector<1x128x96xbf16>
    %38 = vector.shape_cast %37 : vector<1x128x96xbf16> to vector<128x96xbf16>
    %39 = arith.extf %38 : vector<128x96xbf16> to vector<128x96xf32>
    %40 = vector.extract_strided_slice %0 {offsets = [5, 0], sizes = [1, 96], strides = [1, 1]} : vector<9x96xf32> to vector<1x96xf32>
    %41 = vector.broadcast %40 : vector<1x96xf32> to vector<128x96xf32>
    %42 = arith.mulf %39, %41 : vector<128x96xf32>
    %43 = arith.addf %36, %42 : vector<128x96xf32>
    %c6 = arith.constant 6 : index
    %c0_14 = arith.constant 0 : index
    %c0_15 = arith.constant 0 : index
    %44 = vector.load %arg1[%c6, %c0_14, %c0_15] : memref<9x128x96xbf16, #tpu.memory_space<vmem>>, vector<1x128x96xbf16>
    %45 = vector.shape_cast %44 : vector<1x128x96xbf16> to vector<128x96xbf16>
    %46 = arith.extf %45 : vector<128x96xbf16> to vector<128x96xf32>
    %47 = vector.extract_strided_slice %0 {offsets = [6, 0], sizes = [1, 96], strides = [1, 1]} : vector<9x96xf32> to vector<1x96xf32>
    %48 = vector.broadcast %47 : vector<1x96xf32> to vector<128x96xf32>
    %49 = arith.mulf %46, %48 : vector<128x96xf32>
    %50 = arith.addf %43, %49 : vector<128x96xf32>
    %c7 = arith.constant 7 : index
    %c0_16 = arith.constant 0 : index
    %c0_17 = arith.constant 0 : index
    %51 = vector.load %arg1[%c7, %c0_16, %c0_17] : memref<9x128x96xbf16, #tpu.memory_space<vmem>>, vector<1x128x96xbf16>
    %52 = vector.shape_cast %51 : vector<1x128x96xbf16> to vector<128x96xbf16>
    %53 = arith.extf %52 : vector<128x96xbf16> to vector<128x96xf32>
    %54 = vector.extract_strided_slice %0 {offsets = [7, 0], sizes = [1, 96], strides = [1, 1]} : vector<9x96xf32> to vector<1x96xf32>
    %55 = vector.broadcast %54 : vector<1x96xf32> to vector<128x96xf32>
    %56 = arith.mulf %53, %55 : vector<128x96xf32>
    %57 = arith.addf %50, %56 : vector<128x96xf32>
    %c8 = arith.constant 8 : index
    %c0_18 = arith.constant 0 : index
    %c0_19 = arith.constant 0 : index
    %58 = vector.load %arg1[%c8, %c0_18, %c0_19] : memref<9x128x96xbf16, #tpu.memory_space<vmem>>, vector<1x128x96xbf16>
    %59 = vector.shape_cast %58 : vector<1x128x96xbf16> to vector<128x96xbf16>
    %60 = arith.extf %59 : vector<128x96xbf16> to vector<128x96xf32>
    %61 = vector.extract_strided_slice %0 {offsets = [8, 0], sizes = [1, 96], strides = [1, 1]} : vector<9x96xf32> to vector<1x96xf32>
    %62 = vector.broadcast %61 : vector<1x96xf32> to vector<128x96xf32>
    %63 = arith.mulf %60, %62 : vector<128x96xf32>
    %64 = arith.addf %57, %63 : vector<128x96xf32>
    %c0_20 = arith.constant 0 : index
    %c0_21 = arith.constant 0 : index
    %65 = vector.load %arg3[%c0_20, %c0_21] : memref<1x96xf32, #tpu.memory_space<vmem>>, vector<1x96xf32>
    %66 = vector.broadcast %65 : vector<1x96xf32> to vector<128x96xf32>
    %67 = arith.mulf %64, %66 : vector<128x96xf32>
    %c0_22 = arith.constant 0 : index
    %c0_23 = arith.constant 0 : index
    %68 = vector.load %arg4[%c0_22, %c0_23] : memref<1x96xf32, #tpu.memory_space<vmem>>, vector<1x96xf32>
    %69 = vector.broadcast %68 : vector<1x96xf32> to vector<128x96xf32>
    %70 = arith.addf %67, %69 : vector<128x96xf32>
    %cst_24 = arith.constant 0.000000e+00 : f32
    %71 = vector.broadcast %cst_24 : f32 to vector<128x96xf32>
    %72 = arith.maximumf %70, %71 : vector<128x96xf32>
    %cst_25 = arith.constant 6.000000e+00 : f32
    %73 = vector.broadcast %cst_25 : f32 to vector<128x96xf32>
    %74 = arith.minimumf %72, %73 : vector<128x96xf32>
    %75 = arith.truncf %74 : vector<128x96xf32> to vector<128x96xbf16>
    %c0_26 = arith.constant 0 : index
    %c0_27 = arith.constant 0 : index
    %76 = vector.load %arg5[%c0_26, %c0_27] : memref<96x24xbf16, #tpu.memory_space<vmem>>, vector<96x24xbf16>
    %cst_28 = arith.constant dense<0.000000e+00> : vector<128x24xf32>
    %77 = tpu.matmul %75, %76, %cst_28 {dimension_numbers = #tpu.dot_dimension_numbers<[1], [0], [0], [1], [0, 0, 1, 1], [], []>} : vector<128x96xbf16>, vector<96x24xbf16>, vector<128x24xf32> -> vector<128x24xf32>
    %c0_29 = arith.constant 0 : index
    %c0_30 = arith.constant 0 : index
    %78 = vector.load %arg6[%c0_29, %c0_30] : memref<1x24xf32, #tpu.memory_space<vmem>>, vector<1x24xf32>
    %79 = vector.broadcast %78 : vector<1x24xf32> to vector<128x24xf32>
    %80 = arith.mulf %77, %79 : vector<128x24xf32>
    %c0_31 = arith.constant 0 : index
    %c0_32 = arith.constant 0 : index
    %81 = vector.load %arg7[%c0_31, %c0_32] : memref<1x24xf32, #tpu.memory_space<vmem>>, vector<1x24xf32>
    %82 = vector.broadcast %81 : vector<1x24xf32> to vector<128x24xf32>
    %83 = arith.addf %80, %82 : vector<128x24xf32>
    %84 = arith.truncf %83 : vector<128x24xf32> to vector<128x24xbf16>
    %c0_33 = arith.constant 0 : index
    %c0_34 = arith.constant 0 : index
    %85 = vector.load %arg8[%c0_33, %c0_34] : memref<24x144xbf16, #tpu.memory_space<vmem>>, vector<24x144xbf16>
    %cst_35 = arith.constant dense<0.000000e+00> : vector<128x144xf32>
    %86 = tpu.matmul %84, %85, %cst_35 {dimension_numbers = #tpu.dot_dimension_numbers<[1], [0], [0], [1], [0, 0, 1, 1], [], []>} : vector<128x24xbf16>, vector<24x144xbf16>, vector<128x144xf32> -> vector<128x144xf32>
    %c0_36 = arith.constant 0 : index
    %c0_37 = arith.constant 0 : index
    %87 = vector.load %arg9[%c0_36, %c0_37] : memref<1x144xf32, #tpu.memory_space<vmem>>, vector<1x144xf32>
    %88 = vector.broadcast %87 : vector<1x144xf32> to vector<128x144xf32>
    %89 = arith.mulf %86, %88 : vector<128x144xf32>
    %c0_38 = arith.constant 0 : index
    %c0_39 = arith.constant 0 : index
    %90 = vector.load %arg10[%c0_38, %c0_39] : memref<1x144xf32, #tpu.memory_space<vmem>>, vector<1x144xf32>
    %91 = vector.broadcast %90 : vector<1x144xf32> to vector<128x144xf32>
    %92 = arith.addf %89, %91 : vector<128x144xf32>
    %cst_40 = arith.constant 0.000000e+00 : f32
    %93 = vector.broadcast %cst_40 : f32 to vector<128x144xf32>
    %94 = arith.maximumf %92, %93 : vector<128x144xf32>
    %cst_41 = arith.constant 6.000000e+00 : f32
    %95 = vector.broadcast %cst_41 : f32 to vector<128x144xf32>
    %96 = arith.minimumf %94, %95 : vector<128x144xf32>
    %97 = arith.truncf %96 : vector<128x144xf32> to vector<128x144xbf16>
    %c0_42 = arith.constant 0 : index
    %c0_43 = arith.constant 0 : index
    %98 = vector.load %arg11[%c0_42, %c0_43] : memref<128x144xbf16, #tpu.memory_space<vmem>>, vector<128x144xbf16>
    tpu.vector_store %arg11[%c0_42, %c0_43], %97 {strides = array<i32>} : memref<128x144xbf16, #tpu.memory_space<vmem>>, vector<128x144xbf16>,
    return
  }
  func.func @transform_0(%arg0: i32) -> (i32, i32, i32) {
    %c0_i32 = arith.constant 0 : i32
    %c0_i32_0 = arith.constant 0 : i32
    %c0_i32_1 = arith.constant 0 : i32
    return %c0_i32, %arg0, %c0_i32_0 : i32, i32, i32
  }
  func.func @transform_1(%arg0: i32) -> (i32, i32) {
    %c0_i32 = arith.constant 0 : i32
    %c0_i32_0 = arith.constant 0 : i32
    %c0_i32_1 = arith.constant 0 : i32
    return %c0_i32, %c0_i32_0 : i32, i32
  }
  func.func @transform_2(%arg0: i32) -> (i32, i32) {
    %c0_i32 = arith.constant 0 : i32
    %c0_i32_0 = arith.constant 0 : i32
    %c0_i32_1 = arith.constant 0 : i32
    return %c0_i32, %c0_i32_0 : i32, i32
  }
  func.func @transform_3(%arg0: i32) -> (i32, i32) {
    %c0_i32 = arith.constant 0 : i32
    %c0_i32_0 = arith.constant 0 : i32
    %c0_i32_1 = arith.constant 0 : i32
    return %c0_i32, %c0_i32_0 : i32, i32
  }
  func.func @transform_4(%arg0: i32) -> (i32, i32) {
    %c0_i32 = arith.constant 0 : i32
    %c0_i32_0 = arith.constant 0 : i32
    %c0_i32_1 = arith.constant 0 : i32
    return %c0_i32, %c0_i32_0 : i32, i32
  }
  func.func @transform_5(%arg0: i32) -> (i32, i32) {
    %c0_i32 = arith.constant 0 : i32
    %c0_i32_0 = arith.constant 0 : i32
    %c0_i32_1 = arith.constant 0 : i32
    return %c0_i32, %c0_i32_0 : i32, i32
  }
  func.func @transform_6(%arg0: i32) -> (i32, i32) {
    %c0_i32 = arith.constant 0 : i32
    %c0_i32_0 = arith.constant 0 : i32
    %c0_i32_1 = arith.constant 0 : i32
    return %c0_i32, %c0_i32_0 : i32, i32
  }
  func.func @transform_7(%arg0: i32) -> (i32, i32) {
    %c0_i32 = arith.constant 0 : i32
    %c0_i32_0 = arith.constant 0 : i32
    %c0_i32_1 = arith.constant 0 : i32
    return %c0_i32, %c0_i32_0 : i32, i32
  }
  func.func @transform_8(%arg0: i32) -> (i32, i32) {
    %c0_i32 = arith.constant 0 : i32
    %c0_i32_0 = arith.constant 0 : i32
    %c0_i32_1 = arith.constant 0 : i32
    return %c0_i32, %c0_i32_0 : i32, i32
  }
  func.func @transform_9(%arg0: i32) -> (i32, i32) {
    %c0_i32 = arith.constant 0 : i32
    %c0_i32_0 = arith.constant 0 : i32
    %c0_i32_1 = arith.constant 0 : i32
    return %c0_i32, %c0_i32_0 : i32, i32
  }
  func.func @transform_10(%arg0: i32) -> (i32, i32) {
    %c0_i32 = arith.constant 0 : i32
    %c0_i32_0 = arith.constant 0 : i32
    return %arg0, %c0_i32 : i32, i32
  }
}

module attributes {stable_mosaic.version = 11 : i64} {
  func.func @_block_kernel(%arg0: i32, %arg1: memref<9x32x144xbf16, #tpu.memory_space<vmem>>, %arg2: memref<9x144xf32, #tpu.memory_space<vmem>>, %arg3: memref<1x144xf32, #tpu.memory_space<vmem>>, %arg4: memref<1x144xf32, #tpu.memory_space<vmem>>, %arg5: memref<144x32xbf16, #tpu.memory_space<vmem>>, %arg6: memref<1x32xf32, #tpu.memory_space<vmem>>, %arg7: memref<1x32xf32, #tpu.memory_space<vmem>>, %arg8: memref<32x192xbf16, #tpu.memory_space<vmem>>, %arg9: memref<1x192xf32, #tpu.memory_space<vmem>>, %arg10: memref<1x192xf32, #tpu.memory_space<vmem>>, %arg11: memref<32x192xbf16, #tpu.memory_space<vmem>>) attributes {dimension_semantics = [#tpu.dimension_semantics<parallel>], iteration_bounds = array<i64: 1>, scalar_prefetch = 0 : i64, scratch_operands = 0 : i64, tpu.core_type = #tpu.core_type<tc>, window_params = [{transform_indices = @transform_0, window_bounds = array<i64: 9, 32, 144>}, {pipeline_mode = #tpu.pipeline_mode<synchronous>, transform_indices = @transform_1, window_bounds = array<i64: 9, 144>}, {pipeline_mode = #tpu.pipeline_mode<synchronous>, transform_indices = @transform_2, window_bounds = array<i64: 1, 144>}, {pipeline_mode = #tpu.pipeline_mode<synchronous>, transform_indices = @transform_3, window_bounds = array<i64: 1, 144>}, {pipeline_mode = #tpu.pipeline_mode<synchronous>, transform_indices = @transform_4, window_bounds = array<i64: 144, 32>}, {pipeline_mode = #tpu.pipeline_mode<synchronous>, transform_indices = @transform_5, window_bounds = array<i64: 1, 32>}, {pipeline_mode = #tpu.pipeline_mode<synchronous>, transform_indices = @transform_6, window_bounds = array<i64: 1, 32>}, {pipeline_mode = #tpu.pipeline_mode<synchronous>, transform_indices = @transform_7, window_bounds = array<i64: 32, 192>}, {pipeline_mode = #tpu.pipeline_mode<synchronous>, transform_indices = @transform_8, window_bounds = array<i64: 1, 192>}, {pipeline_mode = #tpu.pipeline_mode<synchronous>, transform_indices = @transform_9, window_bounds = array<i64: 1, 192>}, {transform_indices = @transform_10, window_bounds = array<i64: 32, 192>}]} {
    %c0 = arith.constant 0 : index
    %c0_0 = arith.constant 0 : index
    %0 = vector.load %arg2[%c0, %c0_0] : memref<9x144xf32, #tpu.memory_space<vmem>>, vector<9x144xf32>
    %cst = arith.constant 0.000000e+00 : f32
    %1 = vector.broadcast %cst : f32 to vector<32x144xf32>
    %c0_1 = arith.constant 0 : index
    %c0_2 = arith.constant 0 : index
    %c0_3 = arith.constant 0 : index
    %2 = vector.load %arg1[%c0_1, %c0_2, %c0_3] : memref<9x32x144xbf16, #tpu.memory_space<vmem>>, vector<1x32x144xbf16>
    %3 = vector.shape_cast %2 : vector<1x32x144xbf16> to vector<32x144xbf16>
    %4 = arith.extf %3 : vector<32x144xbf16> to vector<32x144xf32>
    %5 = vector.extract_strided_slice %0 {offsets = [0, 0], sizes = [1, 144], strides = [1, 1]} : vector<9x144xf32> to vector<1x144xf32>
    %6 = vector.broadcast %5 : vector<1x144xf32> to vector<32x144xf32>
    %7 = arith.mulf %4, %6 : vector<32x144xf32>
    %8 = arith.addf %1, %7 : vector<32x144xf32>
    %c1 = arith.constant 1 : index
    %c0_4 = arith.constant 0 : index
    %c0_5 = arith.constant 0 : index
    %9 = vector.load %arg1[%c1, %c0_4, %c0_5] : memref<9x32x144xbf16, #tpu.memory_space<vmem>>, vector<1x32x144xbf16>
    %10 = vector.shape_cast %9 : vector<1x32x144xbf16> to vector<32x144xbf16>
    %11 = arith.extf %10 : vector<32x144xbf16> to vector<32x144xf32>
    %12 = vector.extract_strided_slice %0 {offsets = [1, 0], sizes = [1, 144], strides = [1, 1]} : vector<9x144xf32> to vector<1x144xf32>
    %13 = vector.broadcast %12 : vector<1x144xf32> to vector<32x144xf32>
    %14 = arith.mulf %11, %13 : vector<32x144xf32>
    %15 = arith.addf %8, %14 : vector<32x144xf32>
    %c2 = arith.constant 2 : index
    %c0_6 = arith.constant 0 : index
    %c0_7 = arith.constant 0 : index
    %16 = vector.load %arg1[%c2, %c0_6, %c0_7] : memref<9x32x144xbf16, #tpu.memory_space<vmem>>, vector<1x32x144xbf16>
    %17 = vector.shape_cast %16 : vector<1x32x144xbf16> to vector<32x144xbf16>
    %18 = arith.extf %17 : vector<32x144xbf16> to vector<32x144xf32>
    %19 = vector.extract_strided_slice %0 {offsets = [2, 0], sizes = [1, 144], strides = [1, 1]} : vector<9x144xf32> to vector<1x144xf32>
    %20 = vector.broadcast %19 : vector<1x144xf32> to vector<32x144xf32>
    %21 = arith.mulf %18, %20 : vector<32x144xf32>
    %22 = arith.addf %15, %21 : vector<32x144xf32>
    %c3 = arith.constant 3 : index
    %c0_8 = arith.constant 0 : index
    %c0_9 = arith.constant 0 : index
    %23 = vector.load %arg1[%c3, %c0_8, %c0_9] : memref<9x32x144xbf16, #tpu.memory_space<vmem>>, vector<1x32x144xbf16>
    %24 = vector.shape_cast %23 : vector<1x32x144xbf16> to vector<32x144xbf16>
    %25 = arith.extf %24 : vector<32x144xbf16> to vector<32x144xf32>
    %26 = vector.extract_strided_slice %0 {offsets = [3, 0], sizes = [1, 144], strides = [1, 1]} : vector<9x144xf32> to vector<1x144xf32>
    %27 = vector.broadcast %26 : vector<1x144xf32> to vector<32x144xf32>
    %28 = arith.mulf %25, %27 : vector<32x144xf32>
    %29 = arith.addf %22, %28 : vector<32x144xf32>
    %c4 = arith.constant 4 : index
    %c0_10 = arith.constant 0 : index
    %c0_11 = arith.constant 0 : index
    %30 = vector.load %arg1[%c4, %c0_10, %c0_11] : memref<9x32x144xbf16, #tpu.memory_space<vmem>>, vector<1x32x144xbf16>
    %31 = vector.shape_cast %30 : vector<1x32x144xbf16> to vector<32x144xbf16>
    %32 = arith.extf %31 : vector<32x144xbf16> to vector<32x144xf32>
    %33 = vector.extract_strided_slice %0 {offsets = [4, 0], sizes = [1, 144], strides = [1, 1]} : vector<9x144xf32> to vector<1x144xf32>
    %34 = vector.broadcast %33 : vector<1x144xf32> to vector<32x144xf32>
    %35 = arith.mulf %32, %34 : vector<32x144xf32>
    %36 = arith.addf %29, %35 : vector<32x144xf32>
    %c5 = arith.constant 5 : index
    %c0_12 = arith.constant 0 : index
    %c0_13 = arith.constant 0 : index
    %37 = vector.load %arg1[%c5, %c0_12, %c0_13] : memref<9x32x144xbf16, #tpu.memory_space<vmem>>, vector<1x32x144xbf16>
    %38 = vector.shape_cast %37 : vector<1x32x144xbf16> to vector<32x144xbf16>
    %39 = arith.extf %38 : vector<32x144xbf16> to vector<32x144xf32>
    %40 = vector.extract_strided_slice %0 {offsets = [5, 0], sizes = [1, 144], strides = [1, 1]} : vector<9x144xf32> to vector<1x144xf32>
    %41 = vector.broadcast %40 : vector<1x144xf32> to vector<32x144xf32>
    %42 = arith.mulf %39, %41 : vector<32x144xf32>
    %43 = arith.addf %36, %42 : vector<32x144xf32>
    %c6 = arith.constant 6 : index
    %c0_14 = arith.constant 0 : index
    %c0_15 = arith.constant 0 : index
    %44 = vector.load %arg1[%c6, %c0_14, %c0_15] : memref<9x32x144xbf16, #tpu.memory_space<vmem>>, vector<1x32x144xbf16>
    %45 = vector.shape_cast %44 : vector<1x32x144xbf16> to vector<32x144xbf16>
    %46 = arith.extf %45 : vector<32x144xbf16> to vector<32x144xf32>
    %47 = vector.extract_strided_slice %0 {offsets = [6, 0], sizes = [1, 144], strides = [1, 1]} : vector<9x144xf32> to vector<1x144xf32>
    %48 = vector.broadcast %47 : vector<1x144xf32> to vector<32x144xf32>
    %49 = arith.mulf %46, %48 : vector<32x144xf32>
    %50 = arith.addf %43, %49 : vector<32x144xf32>
    %c7 = arith.constant 7 : index
    %c0_16 = arith.constant 0 : index
    %c0_17 = arith.constant 0 : index
    %51 = vector.load %arg1[%c7, %c0_16, %c0_17] : memref<9x32x144xbf16, #tpu.memory_space<vmem>>, vector<1x32x144xbf16>
    %52 = vector.shape_cast %51 : vector<1x32x144xbf16> to vector<32x144xbf16>
    %53 = arith.extf %52 : vector<32x144xbf16> to vector<32x144xf32>
    %54 = vector.extract_strided_slice %0 {offsets = [7, 0], sizes = [1, 144], strides = [1, 1]} : vector<9x144xf32> to vector<1x144xf32>
    %55 = vector.broadcast %54 : vector<1x144xf32> to vector<32x144xf32>
    %56 = arith.mulf %53, %55 : vector<32x144xf32>
    %57 = arith.addf %50, %56 : vector<32x144xf32>
    %c8 = arith.constant 8 : index
    %c0_18 = arith.constant 0 : index
    %c0_19 = arith.constant 0 : index
    %58 = vector.load %arg1[%c8, %c0_18, %c0_19] : memref<9x32x144xbf16, #tpu.memory_space<vmem>>, vector<1x32x144xbf16>
    %59 = vector.shape_cast %58 : vector<1x32x144xbf16> to vector<32x144xbf16>
    %60 = arith.extf %59 : vector<32x144xbf16> to vector<32x144xf32>
    %61 = vector.extract_strided_slice %0 {offsets = [8, 0], sizes = [1, 144], strides = [1, 1]} : vector<9x144xf32> to vector<1x144xf32>
    %62 = vector.broadcast %61 : vector<1x144xf32> to vector<32x144xf32>
    %63 = arith.mulf %60, %62 : vector<32x144xf32>
    %64 = arith.addf %57, %63 : vector<32x144xf32>
    %c0_20 = arith.constant 0 : index
    %c0_21 = arith.constant 0 : index
    %65 = vector.load %arg3[%c0_20, %c0_21] : memref<1x144xf32, #tpu.memory_space<vmem>>, vector<1x144xf32>
    %66 = vector.broadcast %65 : vector<1x144xf32> to vector<32x144xf32>
    %67 = arith.mulf %64, %66 : vector<32x144xf32>
    %c0_22 = arith.constant 0 : index
    %c0_23 = arith.constant 0 : index
    %68 = vector.load %arg4[%c0_22, %c0_23] : memref<1x144xf32, #tpu.memory_space<vmem>>, vector<1x144xf32>
    %69 = vector.broadcast %68 : vector<1x144xf32> to vector<32x144xf32>
    %70 = arith.addf %67, %69 : vector<32x144xf32>
    %cst_24 = arith.constant 0.000000e+00 : f32
    %71 = vector.broadcast %cst_24 : f32 to vector<32x144xf32>
    %72 = arith.maximumf %70, %71 : vector<32x144xf32>
    %cst_25 = arith.constant 6.000000e+00 : f32
    %73 = vector.broadcast %cst_25 : f32 to vector<32x144xf32>
    %74 = arith.minimumf %72, %73 : vector<32x144xf32>
    %75 = arith.truncf %74 : vector<32x144xf32> to vector<32x144xbf16>
    %c0_26 = arith.constant 0 : index
    %c0_27 = arith.constant 0 : index
    %76 = vector.load %arg5[%c0_26, %c0_27] : memref<144x32xbf16, #tpu.memory_space<vmem>>, vector<144x32xbf16>
    %cst_28 = arith.constant dense<0.000000e+00> : vector<32x32xf32>
    %77 = tpu.matmul %75, %76, %cst_28 {dimension_numbers = #tpu.dot_dimension_numbers<[1], [0], [0], [1], [0, 0, 1, 1], [], []>} : vector<32x144xbf16>, vector<144x32xbf16>, vector<32x32xf32> -> vector<32x32xf32>
    %c0_29 = arith.constant 0 : index
    %c0_30 = arith.constant 0 : index
    %78 = vector.load %arg6[%c0_29, %c0_30] : memref<1x32xf32, #tpu.memory_space<vmem>>, vector<1x32xf32>
    %79 = vector.broadcast %78 : vector<1x32xf32> to vector<32x32xf32>
    %80 = arith.mulf %77, %79 : vector<32x32xf32>
    %c0_31 = arith.constant 0 : index
    %c0_32 = arith.constant 0 : index
    %81 = vector.load %arg7[%c0_31, %c0_32] : memref<1x32xf32, #tpu.memory_space<vmem>>, vector<1x32xf32>
    %82 = vector.broadcast %81 : vector<1x32xf32> to vector<32x32xf32>
    %83 = arith.addf %80, %82 : vector<32x32xf32>
    %84 = arith.truncf %83 : vector<32x32xf32> to vector<32x32xbf16>
    %c0_33 = arith.constant 0 : index
    %c0_34 = arith.constant 0 : index
    %85 = vector.load %arg8[%c0_33, %c0_34] : memref<32x192xbf16, #tpu.memory_space<vmem>>, vector<32x192xbf16>
    %cst_35 = arith.constant dense<0.000000e+00> : vector<32x192xf32>
    %86 = tpu.matmul %84, %85, %cst_35 {dimension_numbers = #tpu.dot_dimension_numbers<[1], [0], [0], [1], [0, 0, 1, 1], [], []>} : vector<32x32xbf16>, vector<32x192xbf16>, vector<32x192xf32> -> vector<32x192xf32>
    %c0_36 = arith.constant 0 : index
    %c0_37 = arith.constant 0 : index
    %87 = vector.load %arg9[%c0_36, %c0_37] : memref<1x192xf32, #tpu.memory_space<vmem>>, vector<1x192xf32>
    %88 = vector.broadcast %87 : vector<1x192xf32> to vector<32x192xf32>
    %89 = arith.mulf %86, %88 : vector<32x192xf32>
    %c0_38 = arith.constant 0 : index
    %c0_39 = arith.constant 0 : index
    %90 = vector.load %arg10[%c0_38, %c0_39] : memref<1x192xf32, #tpu.memory_space<vmem>>, vector<1x192xf32>
    %91 = vector.broadcast %90 : vector<1x192xf32> to vector<32x192xf32>
    %92 = arith.addf %89, %91 : vector<32x192xf32>
    %cst_40 = arith.constant 0.000000e+00 : f32
    %93 = vector.broadcast %cst_40 : f32 to vector<32x192xf32>
    %94 = arith.maximumf %92, %93 : vector<32x192xf32>
    %cst_41 = arith.constant 6.000000e+00 : f32
    %95 = vector.broadcast %cst_41 : f32 to vector<32x192xf32>
    %96 = arith.minimumf %94, %95 : vector<32x192xf32>
    %97 = arith.truncf %96 : vector<32x192xf32> to vector<32x192xbf16>
    %c0_42 = arith.constant 0 : index
    %c0_43 = arith.constant 0 : index
    %98 = vector.load %arg11[%c0_42, %c0_43] : memref<32x192xbf16, #tpu.memory_space<vmem>>, vector<32x192xbf16>
    tpu.vector_store %arg11[%c0_42, %c0_43], %97 {strides = array<i32>} : memref<32x192xbf16, #tpu.memory_space<vmem>>, vector<32x192xbf16>,
    return
  }
  func.func @transform_0(%arg0: i32) -> (i32, i32, i32) {
    %c0_i32 = arith.constant 0 : i32
    %c0_i32_0 = arith.constant 0 : i32
    %c0_i32_1 = arith.constant 0 : i32
    return %c0_i32, %arg0, %c0_i32_0 : i32, i32, i32
  }
  func.func @transform_1(%arg0: i32) -> (i32, i32) {
    %c0_i32 = arith.constant 0 : i32
    %c0_i32_0 = arith.constant 0 : i32
    %c0_i32_1 = arith.constant 0 : i32
    return %c0_i32, %c0_i32_0 : i32, i32
  }
  func.func @transform_2(%arg0: i32) -> (i32, i32) {
    %c0_i32 = arith.constant 0 : i32
    %c0_i32_0 = arith.constant 0 : i32
    %c0_i32_1 = arith.constant 0 : i32
    return %c0_i32, %c0_i32_0 : i32, i32
  }
  func.func @transform_3(%arg0: i32) -> (i32, i32) {
    %c0_i32 = arith.constant 0 : i32
    %c0_i32_0 = arith.constant 0 : i32
    %c0_i32_1 = arith.constant 0 : i32
    return %c0_i32, %c0_i32_0 : i32, i32
  }
  func.func @transform_4(%arg0: i32) -> (i32, i32) {
    %c0_i32 = arith.constant 0 : i32
    %c0_i32_0 = arith.constant 0 : i32
    %c0_i32_1 = arith.constant 0 : i32
    return %c0_i32, %c0_i32_0 : i32, i32
  }
  func.func @transform_5(%arg0: i32) -> (i32, i32) {
    %c0_i32 = arith.constant 0 : i32
    %c0_i32_0 = arith.constant 0 : i32
    %c0_i32_1 = arith.constant 0 : i32
    return %c0_i32, %c0_i32_0 : i32, i32
  }
  func.func @transform_6(%arg0: i32) -> (i32, i32) {
    %c0_i32 = arith.constant 0 : i32
    %c0_i32_0 = arith.constant 0 : i32
    %c0_i32_1 = arith.constant 0 : i32
    return %c0_i32, %c0_i32_0 : i32, i32
  }
  func.func @transform_7(%arg0: i32) -> (i32, i32) {
    %c0_i32 = arith.constant 0 : i32
    %c0_i32_0 = arith.constant 0 : i32
    %c0_i32_1 = arith.constant 0 : i32
    return %c0_i32, %c0_i32_0 : i32, i32
  }
  func.func @transform_8(%arg0: i32) -> (i32, i32) {
    %c0_i32 = arith.constant 0 : i32
    %c0_i32_0 = arith.constant 0 : i32
    %c0_i32_1 = arith.constant 0 : i32
    return %c0_i32, %c0_i32_0 : i32, i32
  }
  func.func @transform_9(%arg0: i32) -> (i32, i32) {
    %c0_i32 = arith.constant 0 : i32
    %c0_i32_0 = arith.constant 0 : i32
    %c0_i32_1 = arith.constant 0 : i32
    return %c0_i32, %c0_i32_0 : i32, i32
  }
  func.func @transform_10(%arg0: i32) -> (i32, i32) {
    %c0_i32 = arith.constant 0 : i32
    %c0_i32_0 = arith.constant 0 : i32
    return %arg0, %c0_i32 : i32, i32
  }
}

module attributes {stable_mosaic.version = 11 : i64} {
  func.func @_block_kernel(%arg0: i32, %arg1: memref<9x8x192xbf16, #tpu.memory_space<vmem>>, %arg2: memref<9x192xf32, #tpu.memory_space<vmem>>, %arg3: memref<1x192xf32, #tpu.memory_space<vmem>>, %arg4: memref<1x192xf32, #tpu.memory_space<vmem>>, %arg5: memref<192x256xbf16, #tpu.memory_space<vmem>>, %arg6: memref<1x256xf32, #tpu.memory_space<vmem>>, %arg7: memref<1x256xf32, #tpu.memory_space<vmem>>, %arg8: memref<8x256xbf16, #tpu.memory_space<vmem>>) attributes {dimension_semantics = [#tpu.dimension_semantics<parallel>], iteration_bounds = array<i64: 1>, scalar_prefetch = 0 : i64, scratch_operands = 0 : i64, tpu.core_type = #tpu.core_type<tc>, window_params = [{transform_indices = @transform_0, window_bounds = array<i64: 9, 8, 192>}, {pipeline_mode = #tpu.pipeline_mode<synchronous>, transform_indices = @transform_1, window_bounds = array<i64: 9, 192>}, {pipeline_mode = #tpu.pipeline_mode<synchronous>, transform_indices = @transform_2, window_bounds = array<i64: 1, 192>}, {pipeline_mode = #tpu.pipeline_mode<synchronous>, transform_indices = @transform_3, window_bounds = array<i64: 1, 192>}, {pipeline_mode = #tpu.pipeline_mode<synchronous>, transform_indices = @transform_4, window_bounds = array<i64: 192, 256>}, {pipeline_mode = #tpu.pipeline_mode<synchronous>, transform_indices = @transform_5, window_bounds = array<i64: 1, 256>}, {pipeline_mode = #tpu.pipeline_mode<synchronous>, transform_indices = @transform_6, window_bounds = array<i64: 1, 256>}, {transform_indices = @transform_7, window_bounds = array<i64: 8, 256>}]} {
    %c0 = arith.constant 0 : index
    %c0_0 = arith.constant 0 : index
    %0 = vector.load %arg2[%c0, %c0_0] : memref<9x192xf32, #tpu.memory_space<vmem>>, vector<9x192xf32>
    %cst = arith.constant 0.000000e+00 : f32
    %1 = vector.broadcast %cst : f32 to vector<8x192xf32>
    %c0_1 = arith.constant 0 : index
    %c0_2 = arith.constant 0 : index
    %c0_3 = arith.constant 0 : index
    %2 = vector.load %arg1[%c0_1, %c0_2, %c0_3] : memref<9x8x192xbf16, #tpu.memory_space<vmem>>, vector<1x8x192xbf16>
    %3 = vector.shape_cast %2 : vector<1x8x192xbf16> to vector<8x192xbf16>
    %4 = arith.extf %3 : vector<8x192xbf16> to vector<8x192xf32>
    %5 = vector.extract_strided_slice %0 {offsets = [0, 0], sizes = [1, 192], strides = [1, 1]} : vector<9x192xf32> to vector<1x192xf32>
    %6 = vector.broadcast %5 : vector<1x192xf32> to vector<8x192xf32>
    %7 = arith.mulf %4, %6 : vector<8x192xf32>
    %8 = arith.addf %1, %7 : vector<8x192xf32>
    %c1 = arith.constant 1 : index
    %c0_4 = arith.constant 0 : index
    %c0_5 = arith.constant 0 : index
    %9 = vector.load %arg1[%c1, %c0_4, %c0_5] : memref<9x8x192xbf16, #tpu.memory_space<vmem>>, vector<1x8x192xbf16>
    %10 = vector.shape_cast %9 : vector<1x8x192xbf16> to vector<8x192xbf16>
    %11 = arith.extf %10 : vector<8x192xbf16> to vector<8x192xf32>
    %12 = vector.extract_strided_slice %0 {offsets = [1, 0], sizes = [1, 192], strides = [1, 1]} : vector<9x192xf32> to vector<1x192xf32>
    %13 = vector.broadcast %12 : vector<1x192xf32> to vector<8x192xf32>
    %14 = arith.mulf %11, %13 : vector<8x192xf32>
    %15 = arith.addf %8, %14 : vector<8x192xf32>
    %c2 = arith.constant 2 : index
    %c0_6 = arith.constant 0 : index
    %c0_7 = arith.constant 0 : index
    %16 = vector.load %arg1[%c2, %c0_6, %c0_7] : memref<9x8x192xbf16, #tpu.memory_space<vmem>>, vector<1x8x192xbf16>
    %17 = vector.shape_cast %16 : vector<1x8x192xbf16> to vector<8x192xbf16>
    %18 = arith.extf %17 : vector<8x192xbf16> to vector<8x192xf32>
    %19 = vector.extract_strided_slice %0 {offsets = [2, 0], sizes = [1, 192], strides = [1, 1]} : vector<9x192xf32> to vector<1x192xf32>
    %20 = vector.broadcast %19 : vector<1x192xf32> to vector<8x192xf32>
    %21 = arith.mulf %18, %20 : vector<8x192xf32>
    %22 = arith.addf %15, %21 : vector<8x192xf32>
    %c3 = arith.constant 3 : index
    %c0_8 = arith.constant 0 : index
    %c0_9 = arith.constant 0 : index
    %23 = vector.load %arg1[%c3, %c0_8, %c0_9] : memref<9x8x192xbf16, #tpu.memory_space<vmem>>, vector<1x8x192xbf16>
    %24 = vector.shape_cast %23 : vector<1x8x192xbf16> to vector<8x192xbf16>
    %25 = arith.extf %24 : vector<8x192xbf16> to vector<8x192xf32>
    %26 = vector.extract_strided_slice %0 {offsets = [3, 0], sizes = [1, 192], strides = [1, 1]} : vector<9x192xf32> to vector<1x192xf32>
    %27 = vector.broadcast %26 : vector<1x192xf32> to vector<8x192xf32>
    %28 = arith.mulf %25, %27 : vector<8x192xf32>
    %29 = arith.addf %22, %28 : vector<8x192xf32>
    %c4 = arith.constant 4 : index
    %c0_10 = arith.constant 0 : index
    %c0_11 = arith.constant 0 : index
    %30 = vector.load %arg1[%c4, %c0_10, %c0_11] : memref<9x8x192xbf16, #tpu.memory_space<vmem>>, vector<1x8x192xbf16>
    %31 = vector.shape_cast %30 : vector<1x8x192xbf16> to vector<8x192xbf16>
    %32 = arith.extf %31 : vector<8x192xbf16> to vector<8x192xf32>
    %33 = vector.extract_strided_slice %0 {offsets = [4, 0], sizes = [1, 192], strides = [1, 1]} : vector<9x192xf32> to vector<1x192xf32>
    %34 = vector.broadcast %33 : vector<1x192xf32> to vector<8x192xf32>
    %35 = arith.mulf %32, %34 : vector<8x192xf32>
    %36 = arith.addf %29, %35 : vector<8x192xf32>
    %c5 = arith.constant 5 : index
    %c0_12 = arith.constant 0 : index
    %c0_13 = arith.constant 0 : index
    %37 = vector.load %arg1[%c5, %c0_12, %c0_13] : memref<9x8x192xbf16, #tpu.memory_space<vmem>>, vector<1x8x192xbf16>
    %38 = vector.shape_cast %37 : vector<1x8x192xbf16> to vector<8x192xbf16>
    %39 = arith.extf %38 : vector<8x192xbf16> to vector<8x192xf32>
    %40 = vector.extract_strided_slice %0 {offsets = [5, 0], sizes = [1, 192], strides = [1, 1]} : vector<9x192xf32> to vector<1x192xf32>
    %41 = vector.broadcast %40 : vector<1x192xf32> to vector<8x192xf32>
    %42 = arith.mulf %39, %41 : vector<8x192xf32>
    %43 = arith.addf %36, %42 : vector<8x192xf32>
    %c6 = arith.constant 6 : index
    %c0_14 = arith.constant 0 : index
    %c0_15 = arith.constant 0 : index
    %44 = vector.load %arg1[%c6, %c0_14, %c0_15] : memref<9x8x192xbf16, #tpu.memory_space<vmem>>, vector<1x8x192xbf16>
    %45 = vector.shape_cast %44 : vector<1x8x192xbf16> to vector<8x192xbf16>
    %46 = arith.extf %45 : vector<8x192xbf16> to vector<8x192xf32>
    %47 = vector.extract_strided_slice %0 {offsets = [6, 0], sizes = [1, 192], strides = [1, 1]} : vector<9x192xf32> to vector<1x192xf32>
    %48 = vector.broadcast %47 : vector<1x192xf32> to vector<8x192xf32>
    %49 = arith.mulf %46, %48 : vector<8x192xf32>
    %50 = arith.addf %43, %49 : vector<8x192xf32>
    %c7 = arith.constant 7 : index
    %c0_16 = arith.constant 0 : index
    %c0_17 = arith.constant 0 : index
    %51 = vector.load %arg1[%c7, %c0_16, %c0_17] : memref<9x8x192xbf16, #tpu.memory_space<vmem>>, vector<1x8x192xbf16>
    %52 = vector.shape_cast %51 : vector<1x8x192xbf16> to vector<8x192xbf16>
    %53 = arith.extf %52 : vector<8x192xbf16> to vector<8x192xf32>
    %54 = vector.extract_strided_slice %0 {offsets = [7, 0], sizes = [1, 192], strides = [1, 1]} : vector<9x192xf32> to vector<1x192xf32>
    %55 = vector.broadcast %54 : vector<1x192xf32> to vector<8x192xf32>
    %56 = arith.mulf %53, %55 : vector<8x192xf32>
    %57 = arith.addf %50, %56 : vector<8x192xf32>
    %c8 = arith.constant 8 : index
    %c0_18 = arith.constant 0 : index
    %c0_19 = arith.constant 0 : index
    %58 = vector.load %arg1[%c8, %c0_18, %c0_19] : memref<9x8x192xbf16, #tpu.memory_space<vmem>>, vector<1x8x192xbf16>
    %59 = vector.shape_cast %58 : vector<1x8x192xbf16> to vector<8x192xbf16>
    %60 = arith.extf %59 : vector<8x192xbf16> to vector<8x192xf32>
    %61 = vector.extract_strided_slice %0 {offsets = [8, 0], sizes = [1, 192], strides = [1, 1]} : vector<9x192xf32> to vector<1x192xf32>
    %62 = vector.broadcast %61 : vector<1x192xf32> to vector<8x192xf32>
    %63 = arith.mulf %60, %62 : vector<8x192xf32>
    %64 = arith.addf %57, %63 : vector<8x192xf32>
    %c0_20 = arith.constant 0 : index
    %c0_21 = arith.constant 0 : index
    %65 = vector.load %arg3[%c0_20, %c0_21] : memref<1x192xf32, #tpu.memory_space<vmem>>, vector<1x192xf32>
    %66 = vector.broadcast %65 : vector<1x192xf32> to vector<8x192xf32>
    %67 = arith.mulf %64, %66 : vector<8x192xf32>
    %c0_22 = arith.constant 0 : index
    %c0_23 = arith.constant 0 : index
    %68 = vector.load %arg4[%c0_22, %c0_23] : memref<1x192xf32, #tpu.memory_space<vmem>>, vector<1x192xf32>
    %69 = vector.broadcast %68 : vector<1x192xf32> to vector<8x192xf32>
    %70 = arith.addf %67, %69 : vector<8x192xf32>
    %cst_24 = arith.constant 0.000000e+00 : f32
    %71 = vector.broadcast %cst_24 : f32 to vector<8x192xf32>
    %72 = arith.maximumf %70, %71 : vector<8x192xf32>
    %cst_25 = arith.constant 6.000000e+00 : f32
    %73 = vector.broadcast %cst_25 : f32 to vector<8x192xf32>
    %74 = arith.minimumf %72, %73 : vector<8x192xf32>
    %75 = arith.truncf %74 : vector<8x192xf32> to vector<8x192xbf16>
    %c0_26 = arith.constant 0 : index
    %c0_27 = arith.constant 0 : index
    %76 = vector.load %arg5[%c0_26, %c0_27] : memref<192x256xbf16, #tpu.memory_space<vmem>>, vector<192x256xbf16>
    %cst_28 = arith.constant dense<0.000000e+00> : vector<8x256xf32>
    %77 = tpu.matmul %75, %76, %cst_28 {dimension_numbers = #tpu.dot_dimension_numbers<[1], [0], [0], [1], [0, 0, 1, 1], [], []>} : vector<8x192xbf16>, vector<192x256xbf16>, vector<8x256xf32> -> vector<8x256xf32>
    %c0_29 = arith.constant 0 : index
    %c0_30 = arith.constant 0 : index
    %78 = vector.load %arg6[%c0_29, %c0_30] : memref<1x256xf32, #tpu.memory_space<vmem>>, vector<1x256xf32>
    %79 = vector.broadcast %78 : vector<1x256xf32> to vector<8x256xf32>
    %80 = arith.mulf %77, %79 : vector<8x256xf32>
    %c0_31 = arith.constant 0 : index
    %c0_32 = arith.constant 0 : index
    %81 = vector.load %arg7[%c0_31, %c0_32] : memref<1x256xf32, #tpu.memory_space<vmem>>, vector<1x256xf32>
    %82 = vector.broadcast %81 : vector<1x256xf32> to vector<8x256xf32>
    %83 = arith.addf %80, %82 : vector<8x256xf32>
    %84 = arith.truncf %83 : vector<8x256xf32> to vector<8x256xbf16>
    %c0_33 = arith.constant 0 : index
    %c0_34 = arith.constant 0 : index
    %85 = vector.load %arg8[%c0_33, %c0_34] : memref<8x256xbf16, #tpu.memory_space<vmem>>, vector<8x256xbf16>
    tpu.vector_store %arg8[%c0_33, %c0_34], %84 {strides = array<i32>} : memref<8x256xbf16, #tpu.memory_space<vmem>>, vector<8x256xbf16>,
    return
  }
  func.func @transform_0(%arg0: i32) -> (i32, i32, i32) {
    %c0_i32 = arith.constant 0 : i32
    %c0_i32_0 = arith.constant 0 : i32
    %c0_i32_1 = arith.constant 0 : i32
    return %c0_i32, %arg0, %c0_i32_0 : i32, i32, i32
  }
  func.func @transform_1(%arg0: i32) -> (i32, i32) {
    %c0_i32 = arith.constant 0 : i32
    %c0_i32_0 = arith.constant 0 : i32
    %c0_i32_1 = arith.constant 0 : i32
    return %c0_i32, %c0_i32_0 : i32, i32
  }
  func.func @transform_2(%arg0: i32) -> (i32, i32) {
    %c0_i32 = arith.constant 0 : i32
    %c0_i32_0 = arith.constant 0 : i32
    %c0_i32_1 = arith.constant 0 : i32
    return %c0_i32, %c0_i32_0 : i32, i32
  }
  func.func @transform_3(%arg0: i32) -> (i32, i32) {
    %c0_i32 = arith.constant 0 : i32
    %c0_i32_0 = arith.constant 0 : i32
    %c0_i32_1 = arith.constant 0 : i32
    return %c0_i32, %c0_i32_0 : i32, i32
  }
  func.func @transform_4(%arg0: i32) -> (i32, i32) {
    %c0_i32 = arith.constant 0 : i32
    %c0_i32_0 = arith.constant 0 : i32
    %c0_i32_1 = arith.constant 0 : i32
    return %c0_i32, %c0_i32_0 : i32, i32
  }
  func.func @transform_5(%arg0: i32) -> (i32, i32) {
    %c0_i32 = arith.constant 0 : i32
    %c0_i32_0 = arith.constant 0 : i32
    %c0_i32_1 = arith.constant 0 : i32
    return %c0_i32, %c0_i32_0 : i32, i32
  }
  func.func @transform_6(%arg0: i32) -> (i32, i32) {
    %c0_i32 = arith.constant 0 : i32
    %c0_i32_0 = arith.constant 0 : i32
    %c0_i32_1 = arith.constant 0 : i32
    return %c0_i32, %c0_i32_0 : i32, i32
  }
  func.func @transform_7(%arg0: i32) -> (i32, i32) {
    %c0_i32 = arith.constant 0 : i32
    %c0_i32_0 = arith.constant 0 : i32
    return %arg0, %c0_i32 : i32, i32
  }
}

module attributes {stable_mosaic.version = 11 : i64} {
  func.func @_deconv_kernel(%arg0: i32, %arg1: i32, %arg2: memref<4x8x256xbf16, #tpu.memory_space<vmem>>, %arg3: memref<1x4x256xf32, #tpu.memory_space<vmem>>, %arg4: memref<1x256xf32, #tpu.memory_space<vmem>>, %arg5: memref<1x256xf32, #tpu.memory_space<vmem>>, %arg6: memref<256x256xbf16, #tpu.memory_space<vmem>>, %arg7: memref<1x256xf32, #tpu.memory_space<vmem>>, %arg8: memref<1x256xf32, #tpu.memory_space<vmem>>, %arg9: memref<1x8x256xbf16, #tpu.memory_space<vmem>>) attributes {dimension_semantics = [#tpu.dimension_semantics<parallel>, #tpu.dimension_semantics<parallel>], iteration_bounds = array<i64: 4, 1>, scalar_prefetch = 0 : i64, scratch_operands = 0 : i64, tpu.core_type = #tpu.core_type<tc>, window_params = [{transform_indices = @transform_0, window_bounds = array<i64: 4, 8, 256>}, {transform_indices = @transform_1, window_bounds = array<i64: 1, 4, 256>}, {pipeline_mode = #tpu.pipeline_mode<synchronous>, transform_indices = @transform_2, window_bounds = array<i64: 1, 256>}, {pipeline_mode = #tpu.pipeline_mode<synchronous>, transform_indices = @transform_3, window_bounds = array<i64: 1, 256>}, {pipeline_mode = #tpu.pipeline_mode<synchronous>, transform_indices = @transform_4, window_bounds = array<i64: 256, 256>}, {pipeline_mode = #tpu.pipeline_mode<synchronous>, transform_indices = @transform_5, window_bounds = array<i64: 1, 256>}, {pipeline_mode = #tpu.pipeline_mode<synchronous>, transform_indices = @transform_6, window_bounds = array<i64: 1, 256>}, {transform_indices = @transform_7, window_bounds = array<i64: 1, 8, 256>}]} {
    %c0 = arith.constant 0 : index
    %c0_0 = arith.constant 0 : index
    %c0_1 = arith.constant 0 : index
    %0 = vector.load %arg3[%c0, %c0_0, %c0_1] : memref<1x4x256xf32, #tpu.memory_space<vmem>>, vector<1x4x256xf32>
    %1 = vector.shape_cast %0 : vector<1x4x256xf32> to vector<4x256xf32>
    %cst = arith.constant 0.000000e+00 : f32
    %2 = vector.broadcast %cst : f32 to vector<8x256xf32>
    %c0_2 = arith.constant 0 : index
    %c0_3 = arith.constant 0 : index
    %c0_4 = arith.constant 0 : index
    %3 = vector.load %arg2[%c0_2, %c0_3, %c0_4] : memref<4x8x256xbf16, #tpu.memory_space<vmem>>, vector<1x8x256xbf16>
    %4 = vector.shape_cast %3 : vector<1x8x256xbf16> to vector<8x256xbf16>
    %5 = arith.extf %4 : vector<8x256xbf16> to vector<8x256xf32>
    %6 = vector.extract_strided_slice %1 {offsets = [0, 0], sizes = [1, 256], strides = [1, 1]} : vector<4x256xf32> to vector<1x256xf32>
    %7 = vector.broadcast %6 : vector<1x256xf32> to vector<8x256xf32>
    %8 = arith.mulf %5, %7 : vector<8x256xf32>
    %9 = arith.addf %2, %8 : vector<8x256xf32>
    %c1 = arith.constant 1 : index
    %c0_5 = arith.constant 0 : index
    %c0_6 = arith.constant 0 : index
    %10 = vector.load %arg2[%c1, %c0_5, %c0_6] : memref<4x8x256xbf16, #tpu.memory_space<vmem>>, vector<1x8x256xbf16>
    %11 = vector.shape_cast %10 : vector<1x8x256xbf16> to vector<8x256xbf16>
    %12 = arith.extf %11 : vector<8x256xbf16> to vector<8x256xf32>
    %13 = vector.extract_strided_slice %1 {offsets = [1, 0], sizes = [1, 256], strides = [1, 1]} : vector<4x256xf32> to vector<1x256xf32>
    %14 = vector.broadcast %13 : vector<1x256xf32> to vector<8x256xf32>
    %15 = arith.mulf %12, %14 : vector<8x256xf32>
    %16 = arith.addf %9, %15 : vector<8x256xf32>
    %c2 = arith.constant 2 : index
    %c0_7 = arith.constant 0 : index
    %c0_8 = arith.constant 0 : index
    %17 = vector.load %arg2[%c2, %c0_7, %c0_8] : memref<4x8x256xbf16, #tpu.memory_space<vmem>>, vector<1x8x256xbf16>
    %18 = vector.shape_cast %17 : vector<1x8x256xbf16> to vector<8x256xbf16>
    %19 = arith.extf %18 : vector<8x256xbf16> to vector<8x256xf32>
    %20 = vector.extract_strided_slice %1 {offsets = [2, 0], sizes = [1, 256], strides = [1, 1]} : vector<4x256xf32> to vector<1x256xf32>
    %21 = vector.broadcast %20 : vector<1x256xf32> to vector<8x256xf32>
    %22 = arith.mulf %19, %21 : vector<8x256xf32>
    %23 = arith.addf %16, %22 : vector<8x256xf32>
    %c3 = arith.constant 3 : index
    %c0_9 = arith.constant 0 : index
    %c0_10 = arith.constant 0 : index
    %24 = vector.load %arg2[%c3, %c0_9, %c0_10] : memref<4x8x256xbf16, #tpu.memory_space<vmem>>, vector<1x8x256xbf16>
    %25 = vector.shape_cast %24 : vector<1x8x256xbf16> to vector<8x256xbf16>
    %26 = arith.extf %25 : vector<8x256xbf16> to vector<8x256xf32>
    %27 = vector.extract_strided_slice %1 {offsets = [3, 0], sizes = [1, 256], strides = [1, 1]} : vector<4x256xf32> to vector<1x256xf32>
    %28 = vector.broadcast %27 : vector<1x256xf32> to vector<8x256xf32>
    %29 = arith.mulf %26, %28 : vector<8x256xf32>
    %30 = arith.addf %23, %29 : vector<8x256xf32>
    %c0_11 = arith.constant 0 : index
    %c0_12 = arith.constant 0 : index
    %31 = vector.load %arg4[%c0_11, %c0_12] : memref<1x256xf32, #tpu.memory_space<vmem>>, vector<1x256xf32>
    %32 = vector.broadcast %31 : vector<1x256xf32> to vector<8x256xf32>
    %33 = arith.mulf %30, %32 : vector<8x256xf32>
    %c0_13 = arith.constant 0 : index
    %c0_14 = arith.constant 0 : index
    %34 = vector.load %arg5[%c0_13, %c0_14] : memref<1x256xf32, #tpu.memory_space<vmem>>, vector<1x256xf32>
    %35 = vector.broadcast %34 : vector<1x256xf32> to vector<8x256xf32>
    %36 = arith.addf %33, %35 : vector<8x256xf32>
    %cst_15 = arith.constant 0.000000e+00 : f32
    %37 = vector.broadcast %cst_15 : f32 to vector<8x256xf32>
    %38 = arith.maximumf %36, %37 : vector<8x256xf32>
    %cst_16 = arith.constant 6.000000e+00 : f32
    %39 = vector.broadcast %cst_16 : f32 to vector<8x256xf32>
    %40 = arith.minimumf %38, %39 : vector<8x256xf32>
    %41 = arith.truncf %40 : vector<8x256xf32> to vector<8x256xbf16>
    %c0_17 = arith.constant 0 : index
    %c0_18 = arith.constant 0 : index
    %42 = vector.load %arg6[%c0_17, %c0_18] : memref<256x256xbf16, #tpu.memory_space<vmem>>, vector<256x256xbf16>
    %cst_19 = arith.constant dense<0.000000e+00> : vector<8x256xf32>
    %43 = tpu.matmul %41, %42, %cst_19 {dimension_numbers = #tpu.dot_dimension_numbers<[1], [0], [0], [1], [0, 0, 1, 1], [], []>} : vector<8x256xbf16>, vector<256x256xbf16>, vector<8x256xf32> -> vector<8x256xf32>
    %c0_20 = arith.constant 0 : index
    %c0_21 = arith.constant 0 : index
    %44 = vector.load %arg7[%c0_20, %c0_21] : memref<1x256xf32, #tpu.memory_space<vmem>>, vector<1x256xf32>
    %45 = vector.broadcast %44 : vector<1x256xf32> to vector<8x256xf32>
    %46 = arith.mulf %43, %45 : vector<8x256xf32>
    %c0_22 = arith.constant 0 : index
    %c0_23 = arith.constant 0 : index
    %47 = vector.load %arg8[%c0_22, %c0_23] : memref<1x256xf32, #tpu.memory_space<vmem>>, vector<1x256xf32>
    %48 = vector.broadcast %47 : vector<1x256xf32> to vector<8x256xf32>
    %49 = arith.addf %46, %48 : vector<8x256xf32>
    %cst_24 = arith.constant 0.000000e+00 : f32
    %50 = vector.broadcast %cst_24 : f32 to vector<8x256xf32>
    %51 = arith.maximumf %49, %50 : vector<8x256xf32>
    %cst_25 = arith.constant 6.000000e+00 : f32
    %52 = vector.broadcast %cst_25 : f32 to vector<8x256xf32>
    %53 = arith.minimumf %51, %52 : vector<8x256xf32>
    %54 = arith.truncf %53 : vector<8x256xf32> to vector<8x256xbf16>
    %c0_26 = arith.constant 0 : index
    %c0_27 = arith.constant 0 : index
    %c0_28 = arith.constant 0 : index
    %55 = vector.load %arg9[%c0_26, %c0_27, %c0_28] : memref<1x8x256xbf16, #tpu.memory_space<vmem>>, vector<1x8x256xbf16>
    %56 = vector.shape_cast %55 : vector<1x8x256xbf16> to vector<8x256xbf16>
    %57 = vector.shape_cast %54 : vector<8x256xbf16> to vector<1x8x256xbf16>
    tpu.vector_store %arg9[%c0_26, %c0_27, %c0_28], %57 {strides = array<i32>} : memref<1x8x256xbf16, #tpu.memory_space<vmem>>, vector<1x8x256xbf16>,
    return
  }
  func.func @transform_0(%arg0: i32, %arg1: i32) -> (i32, i32, i32) {
    %c0_i32 = arith.constant 0 : i32
    %c0_i32_0 = arith.constant 0 : i32
    return %arg0, %arg1, %c0_i32 : i32, i32, i32
  }
  func.func @transform_1(%arg0: i32, %arg1: i32) -> (i32, i32, i32) {
    %c0_i32 = arith.constant 0 : i32
    %c0_i32_0 = arith.constant 0 : i32
    %c0_i32_1 = arith.constant 0 : i32
    return %arg0, %c0_i32, %c0_i32_0 : i32, i32, i32
  }
  func.func @transform_2(%arg0: i32, %arg1: i32) -> (i32, i32) {
    %c0_i32 = arith.constant 0 : i32
    %c0_i32_0 = arith.constant 0 : i32
    %c0_i32_1 = arith.constant 0 : i32
    return %c0_i32, %c0_i32_0 : i32, i32
  }
  func.func @transform_3(%arg0: i32, %arg1: i32) -> (i32, i32) {
    %c0_i32 = arith.constant 0 : i32
    %c0_i32_0 = arith.constant 0 : i32
    %c0_i32_1 = arith.constant 0 : i32
    return %c0_i32, %c0_i32_0 : i32, i32
  }
  func.func @transform_4(%arg0: i32, %arg1: i32) -> (i32, i32) {
    %c0_i32 = arith.constant 0 : i32
    %c0_i32_0 = arith.constant 0 : i32
    %c0_i32_1 = arith.constant 0 : i32
    return %c0_i32, %c0_i32_0 : i32, i32
  }
  func.func @transform_5(%arg0: i32, %arg1: i32) -> (i32, i32) {
    %c0_i32 = arith.constant 0 : i32
    %c0_i32_0 = arith.constant 0 : i32
    %c0_i32_1 = arith.constant 0 : i32
    return %c0_i32, %c0_i32_0 : i32, i32
  }
  func.func @transform_6(%arg0: i32, %arg1: i32) -> (i32, i32) {
    %c0_i32 = arith.constant 0 : i32
    %c0_i32_0 = arith.constant 0 : i32
    %c0_i32_1 = arith.constant 0 : i32
    return %c0_i32, %c0_i32_0 : i32, i32
  }
  func.func @transform_7(%arg0: i32, %arg1: i32) -> (i32, i32, i32) {
    %c0_i32 = arith.constant 0 : i32
    %c0_i32_0 = arith.constant 0 : i32
    return %arg0, %arg1, %c0_i32 : i32, i32, i32
  }
}

module attributes {stable_mosaic.version = 11 : i64} {
  func.func @_deconv_kernel(%arg0: i32, %arg1: i32, %arg2: memref<4x32x256xbf16, #tpu.memory_space<vmem>>, %arg3: memref<1x4x256xf32, #tpu.memory_space<vmem>>, %arg4: memref<1x256xf32, #tpu.memory_space<vmem>>, %arg5: memref<1x256xf32, #tpu.memory_space<vmem>>, %arg6: memref<256x256xbf16, #tpu.memory_space<vmem>>, %arg7: memref<1x256xf32, #tpu.memory_space<vmem>>, %arg8: memref<1x256xf32, #tpu.memory_space<vmem>>, %arg9: memref<1x32x256xbf16, #tpu.memory_space<vmem>>) attributes {dimension_semantics = [#tpu.dimension_semantics<parallel>, #tpu.dimension_semantics<parallel>], iteration_bounds = array<i64: 4, 1>, scalar_prefetch = 0 : i64, scratch_operands = 0 : i64, tpu.core_type = #tpu.core_type<tc>, window_params = [{transform_indices = @transform_0, window_bounds = array<i64: 4, 32, 256>}, {transform_indices = @transform_1, window_bounds = array<i64: 1, 4, 256>}, {pipeline_mode = #tpu.pipeline_mode<synchronous>, transform_indices = @transform_2, window_bounds = array<i64: 1, 256>}, {pipeline_mode = #tpu.pipeline_mode<synchronous>, transform_indices = @transform_3, window_bounds = array<i64: 1, 256>}, {pipeline_mode = #tpu.pipeline_mode<synchronous>, transform_indices = @transform_4, window_bounds = array<i64: 256, 256>}, {pipeline_mode = #tpu.pipeline_mode<synchronous>, transform_indices = @transform_5, window_bounds = array<i64: 1, 256>}, {pipeline_mode = #tpu.pipeline_mode<synchronous>, transform_indices = @transform_6, window_bounds = array<i64: 1, 256>}, {transform_indices = @transform_7, window_bounds = array<i64: 1, 32, 256>}]} {
    %c0 = arith.constant 0 : index
    %c0_0 = arith.constant 0 : index
    %c0_1 = arith.constant 0 : index
    %0 = vector.load %arg3[%c0, %c0_0, %c0_1] : memref<1x4x256xf32, #tpu.memory_space<vmem>>, vector<1x4x256xf32>
    %1 = vector.shape_cast %0 : vector<1x4x256xf32> to vector<4x256xf32>
    %cst = arith.constant 0.000000e+00 : f32
    %2 = vector.broadcast %cst : f32 to vector<32x256xf32>
    %c0_2 = arith.constant 0 : index
    %c0_3 = arith.constant 0 : index
    %c0_4 = arith.constant 0 : index
    %3 = vector.load %arg2[%c0_2, %c0_3, %c0_4] : memref<4x32x256xbf16, #tpu.memory_space<vmem>>, vector<1x32x256xbf16>
    %4 = vector.shape_cast %3 : vector<1x32x256xbf16> to vector<32x256xbf16>
    %5 = arith.extf %4 : vector<32x256xbf16> to vector<32x256xf32>
    %6 = vector.extract_strided_slice %1 {offsets = [0, 0], sizes = [1, 256], strides = [1, 1]} : vector<4x256xf32> to vector<1x256xf32>
    %7 = vector.broadcast %6 : vector<1x256xf32> to vector<32x256xf32>
    %8 = arith.mulf %5, %7 : vector<32x256xf32>
    %9 = arith.addf %2, %8 : vector<32x256xf32>
    %c1 = arith.constant 1 : index
    %c0_5 = arith.constant 0 : index
    %c0_6 = arith.constant 0 : index
    %10 = vector.load %arg2[%c1, %c0_5, %c0_6] : memref<4x32x256xbf16, #tpu.memory_space<vmem>>, vector<1x32x256xbf16>
    %11 = vector.shape_cast %10 : vector<1x32x256xbf16> to vector<32x256xbf16>
    %12 = arith.extf %11 : vector<32x256xbf16> to vector<32x256xf32>
    %13 = vector.extract_strided_slice %1 {offsets = [1, 0], sizes = [1, 256], strides = [1, 1]} : vector<4x256xf32> to vector<1x256xf32>
    %14 = vector.broadcast %13 : vector<1x256xf32> to vector<32x256xf32>
    %15 = arith.mulf %12, %14 : vector<32x256xf32>
    %16 = arith.addf %9, %15 : vector<32x256xf32>
    %c2 = arith.constant 2 : index
    %c0_7 = arith.constant 0 : index
    %c0_8 = arith.constant 0 : index
    %17 = vector.load %arg2[%c2, %c0_7, %c0_8] : memref<4x32x256xbf16, #tpu.memory_space<vmem>>, vector<1x32x256xbf16>
    %18 = vector.shape_cast %17 : vector<1x32x256xbf16> to vector<32x256xbf16>
    %19 = arith.extf %18 : vector<32x256xbf16> to vector<32x256xf32>
    %20 = vector.extract_strided_slice %1 {offsets = [2, 0], sizes = [1, 256], strides = [1, 1]} : vector<4x256xf32> to vector<1x256xf32>
    %21 = vector.broadcast %20 : vector<1x256xf32> to vector<32x256xf32>
    %22 = arith.mulf %19, %21 : vector<32x256xf32>
    %23 = arith.addf %16, %22 : vector<32x256xf32>
    %c3 = arith.constant 3 : index
    %c0_9 = arith.constant 0 : index
    %c0_10 = arith.constant 0 : index
    %24 = vector.load %arg2[%c3, %c0_9, %c0_10] : memref<4x32x256xbf16, #tpu.memory_space<vmem>>, vector<1x32x256xbf16>
    %25 = vector.shape_cast %24 : vector<1x32x256xbf16> to vector<32x256xbf16>
    %26 = arith.extf %25 : vector<32x256xbf16> to vector<32x256xf32>
    %27 = vector.extract_strided_slice %1 {offsets = [3, 0], sizes = [1, 256], strides = [1, 1]} : vector<4x256xf32> to vector<1x256xf32>
    %28 = vector.broadcast %27 : vector<1x256xf32> to vector<32x256xf32>
    %29 = arith.mulf %26, %28 : vector<32x256xf32>
    %30 = arith.addf %23, %29 : vector<32x256xf32>
    %c0_11 = arith.constant 0 : index
    %c0_12 = arith.constant 0 : index
    %31 = vector.load %arg4[%c0_11, %c0_12] : memref<1x256xf32, #tpu.memory_space<vmem>>, vector<1x256xf32>
    %32 = vector.broadcast %31 : vector<1x256xf32> to vector<32x256xf32>
    %33 = arith.mulf %30, %32 : vector<32x256xf32>
    %c0_13 = arith.constant 0 : index
    %c0_14 = arith.constant 0 : index
    %34 = vector.load %arg5[%c0_13, %c0_14] : memref<1x256xf32, #tpu.memory_space<vmem>>, vector<1x256xf32>
    %35 = vector.broadcast %34 : vector<1x256xf32> to vector<32x256xf32>
    %36 = arith.addf %33, %35 : vector<32x256xf32>
    %cst_15 = arith.constant 0.000000e+00 : f32
    %37 = vector.broadcast %cst_15 : f32 to vector<32x256xf32>
    %38 = arith.maximumf %36, %37 : vector<32x256xf32>
    %cst_16 = arith.constant 6.000000e+00 : f32
    %39 = vector.broadcast %cst_16 : f32 to vector<32x256xf32>
    %40 = arith.minimumf %38, %39 : vector<32x256xf32>
    %41 = arith.truncf %40 : vector<32x256xf32> to vector<32x256xbf16>
    %c0_17 = arith.constant 0 : index
    %c0_18 = arith.constant 0 : index
    %42 = vector.load %arg6[%c0_17, %c0_18] : memref<256x256xbf16, #tpu.memory_space<vmem>>, vector<256x256xbf16>
    %cst_19 = arith.constant dense<0.000000e+00> : vector<32x256xf32>
    %43 = tpu.matmul %41, %42, %cst_19 {dimension_numbers = #tpu.dot_dimension_numbers<[1], [0], [0], [1], [0, 0, 1, 1], [], []>} : vector<32x256xbf16>, vector<256x256xbf16>, vector<32x256xf32> -> vector<32x256xf32>
    %c0_20 = arith.constant 0 : index
    %c0_21 = arith.constant 0 : index
    %44 = vector.load %arg7[%c0_20, %c0_21] : memref<1x256xf32, #tpu.memory_space<vmem>>, vector<1x256xf32>
    %45 = vector.broadcast %44 : vector<1x256xf32> to vector<32x256xf32>
    %46 = arith.mulf %43, %45 : vector<32x256xf32>
    %c0_22 = arith.constant 0 : index
    %c0_23 = arith.constant 0 : index
    %47 = vector.load %arg8[%c0_22, %c0_23] : memref<1x256xf32, #tpu.memory_space<vmem>>, vector<1x256xf32>
    %48 = vector.broadcast %47 : vector<1x256xf32> to vector<32x256xf32>
    %49 = arith.addf %46, %48 : vector<32x256xf32>
    %cst_24 = arith.constant 0.000000e+00 : f32
    %50 = vector.broadcast %cst_24 : f32 to vector<32x256xf32>
    %51 = arith.maximumf %49, %50 : vector<32x256xf32>
    %cst_25 = arith.constant 6.000000e+00 : f32
    %52 = vector.broadcast %cst_25 : f32 to vector<32x256xf32>
    %53 = arith.minimumf %51, %52 : vector<32x256xf32>
    %54 = arith.truncf %53 : vector<32x256xf32> to vector<32x256xbf16>
    %c0_26 = arith.constant 0 : index
    %c0_27 = arith.constant 0 : index
    %c0_28 = arith.constant 0 : index
    %55 = vector.load %arg9[%c0_26, %c0_27, %c0_28] : memref<1x32x256xbf16, #tpu.memory_space<vmem>>, vector<1x32x256xbf16>
    %56 = vector.shape_cast %55 : vector<1x32x256xbf16> to vector<32x256xbf16>
    %57 = vector.shape_cast %54 : vector<32x256xbf16> to vector<1x32x256xbf16>
    tpu.vector_store %arg9[%c0_26, %c0_27, %c0_28], %57 {strides = array<i32>} : memref<1x32x256xbf16, #tpu.memory_space<vmem>>, vector<1x32x256xbf16>,
    return
  }
  func.func @transform_0(%arg0: i32, %arg1: i32) -> (i32, i32, i32) {
    %c0_i32 = arith.constant 0 : i32
    %c0_i32_0 = arith.constant 0 : i32
    return %arg0, %arg1, %c0_i32 : i32, i32, i32
  }
  func.func @transform_1(%arg0: i32, %arg1: i32) -> (i32, i32, i32) {
    %c0_i32 = arith.constant 0 : i32
    %c0_i32_0 = arith.constant 0 : i32
    %c0_i32_1 = arith.constant 0 : i32
    return %arg0, %c0_i32, %c0_i32_0 : i32, i32, i32
  }
  func.func @transform_2(%arg0: i32, %arg1: i32) -> (i32, i32) {
    %c0_i32 = arith.constant 0 : i32
    %c0_i32_0 = arith.constant 0 : i32
    %c0_i32_1 = arith.constant 0 : i32
    return %c0_i32, %c0_i32_0 : i32, i32
  }
  func.func @transform_3(%arg0: i32, %arg1: i32) -> (i32, i32) {
    %c0_i32 = arith.constant 0 : i32
    %c0_i32_0 = arith.constant 0 : i32
    %c0_i32_1 = arith.constant 0 : i32
    return %c0_i32, %c0_i32_0 : i32, i32
  }
  func.func @transform_4(%arg0: i32, %arg1: i32) -> (i32, i32) {
    %c0_i32 = arith.constant 0 : i32
    %c0_i32_0 = arith.constant 0 : i32
    %c0_i32_1 = arith.constant 0 : i32
    return %c0_i32, %c0_i32_0 : i32, i32
  }
  func.func @transform_5(%arg0: i32, %arg1: i32) -> (i32, i32) {
    %c0_i32 = arith.constant 0 : i32
    %c0_i32_0 = arith.constant 0 : i32
    %c0_i32_1 = arith.constant 0 : i32
    return %c0_i32, %c0_i32_0 : i32, i32
  }
  func.func @transform_6(%arg0: i32, %arg1: i32) -> (i32, i32) {
    %c0_i32 = arith.constant 0 : i32
    %c0_i32_0 = arith.constant 0 : i32
    %c0_i32_1 = arith.constant 0 : i32
    return %c0_i32, %c0_i32_0 : i32, i32
  }
  func.func @transform_7(%arg0: i32, %arg1: i32) -> (i32, i32, i32) {
    %c0_i32 = arith.constant 0 : i32
    %c0_i32_0 = arith.constant 0 : i32
    return %arg0, %arg1, %c0_i32 : i32, i32, i32
  }
}

module attributes {stable_mosaic.version = 11 : i64} {
  func.func @_deconv_kernel(%arg0: i32, %arg1: i32, %arg2: memref<4x64x256xbf16, #tpu.memory_space<vmem>>, %arg3: memref<1x4x256xf32, #tpu.memory_space<vmem>>, %arg4: memref<1x256xf32, #tpu.memory_space<vmem>>, %arg5: memref<1x256xf32, #tpu.memory_space<vmem>>, %arg6: memref<256x256xbf16, #tpu.memory_space<vmem>>, %arg7: memref<1x256xf32, #tpu.memory_space<vmem>>, %arg8: memref<1x256xf32, #tpu.memory_space<vmem>>, %arg9: memref<256x128xbf16, #tpu.memory_space<vmem>>, %arg10: memref<1x128xf32, #tpu.memory_space<vmem>>, %arg11: memref<1x64x128xf32, #tpu.memory_space<vmem>>) attributes {dimension_semantics = [#tpu.dimension_semantics<parallel>, #tpu.dimension_semantics<parallel>], iteration_bounds = array<i64: 4, 2>, scalar_prefetch = 0 : i64, scratch_operands = 0 : i64, tpu.core_type = #tpu.core_type<tc>, window_params = [{transform_indices = @transform_0, window_bounds = array<i64: 4, 64, 256>}, {transform_indices = @transform_1, window_bounds = array<i64: 1, 4, 256>}, {pipeline_mode = #tpu.pipeline_mode<synchronous>, transform_indices = @transform_2, window_bounds = array<i64: 1, 256>}, {pipeline_mode = #tpu.pipeline_mode<synchronous>, transform_indices = @transform_3, window_bounds = array<i64: 1, 256>}, {pipeline_mode = #tpu.pipeline_mode<synchronous>, transform_indices = @transform_4, window_bounds = array<i64: 256, 256>}, {pipeline_mode = #tpu.pipeline_mode<synchronous>, transform_indices = @transform_5, window_bounds = array<i64: 1, 256>}, {pipeline_mode = #tpu.pipeline_mode<synchronous>, transform_indices = @transform_6, window_bounds = array<i64: 1, 256>}, {pipeline_mode = #tpu.pipeline_mode<synchronous>, transform_indices = @transform_7, window_bounds = array<i64: 256, 128>}, {pipeline_mode = #tpu.pipeline_mode<synchronous>, transform_indices = @transform_8, window_bounds = array<i64: 1, 128>}, {transform_indices = @transform_9, window_bounds = array<i64: 1, 64, 128>}]} {
    %c0 = arith.constant 0 : index
    %c0_0 = arith.constant 0 : index
    %c0_1 = arith.constant 0 : index
    %0 = vector.load %arg3[%c0, %c0_0, %c0_1] : memref<1x4x256xf32, #tpu.memory_space<vmem>>, vector<1x4x256xf32>
    %1 = vector.shape_cast %0 : vector<1x4x256xf32> to vector<4x256xf32>
    %cst = arith.constant 0.000000e+00 : f32
    %2 = vector.broadcast %cst : f32 to vector<64x256xf32>
    %c0_2 = arith.constant 0 : index
    %c0_3 = arith.constant 0 : index
    %c0_4 = arith.constant 0 : index
    %3 = vector.load %arg2[%c0_2, %c0_3, %c0_4] : memref<4x64x256xbf16, #tpu.memory_space<vmem>>, vector<1x64x256xbf16>
    %4 = vector.shape_cast %3 : vector<1x64x256xbf16> to vector<64x256xbf16>
    %5 = arith.extf %4 : vector<64x256xbf16> to vector<64x256xf32>
    %6 = vector.extract_strided_slice %1 {offsets = [0, 0], sizes = [1, 256], strides = [1, 1]} : vector<4x256xf32> to vector<1x256xf32>
    %7 = vector.broadcast %6 : vector<1x256xf32> to vector<64x256xf32>
    %8 = arith.mulf %5, %7 : vector<64x256xf32>
    %9 = arith.addf %2, %8 : vector<64x256xf32>
    %c1 = arith.constant 1 : index
    %c0_5 = arith.constant 0 : index
    %c0_6 = arith.constant 0 : index
    %10 = vector.load %arg2[%c1, %c0_5, %c0_6] : memref<4x64x256xbf16, #tpu.memory_space<vmem>>, vector<1x64x256xbf16>
    %11 = vector.shape_cast %10 : vector<1x64x256xbf16> to vector<64x256xbf16>
    %12 = arith.extf %11 : vector<64x256xbf16> to vector<64x256xf32>
    %13 = vector.extract_strided_slice %1 {offsets = [1, 0], sizes = [1, 256], strides = [1, 1]} : vector<4x256xf32> to vector<1x256xf32>
    %14 = vector.broadcast %13 : vector<1x256xf32> to vector<64x256xf32>
    %15 = arith.mulf %12, %14 : vector<64x256xf32>
    %16 = arith.addf %9, %15 : vector<64x256xf32>
    %c2 = arith.constant 2 : index
    %c0_7 = arith.constant 0 : index
    %c0_8 = arith.constant 0 : index
    %17 = vector.load %arg2[%c2, %c0_7, %c0_8] : memref<4x64x256xbf16, #tpu.memory_space<vmem>>, vector<1x64x256xbf16>
    %18 = vector.shape_cast %17 : vector<1x64x256xbf16> to vector<64x256xbf16>
    %19 = arith.extf %18 : vector<64x256xbf16> to vector<64x256xf32>
    %20 = vector.extract_strided_slice %1 {offsets = [2, 0], sizes = [1, 256], strides = [1, 1]} : vector<4x256xf32> to vector<1x256xf32>
    %21 = vector.broadcast %20 : vector<1x256xf32> to vector<64x256xf32>
    %22 = arith.mulf %19, %21 : vector<64x256xf32>
    %23 = arith.addf %16, %22 : vector<64x256xf32>
    %c3 = arith.constant 3 : index
    %c0_9 = arith.constant 0 : index
    %c0_10 = arith.constant 0 : index
    %24 = vector.load %arg2[%c3, %c0_9, %c0_10] : memref<4x64x256xbf16, #tpu.memory_space<vmem>>, vector<1x64x256xbf16>
    %25 = vector.shape_cast %24 : vector<1x64x256xbf16> to vector<64x256xbf16>
    %26 = arith.extf %25 : vector<64x256xbf16> to vector<64x256xf32>
    %27 = vector.extract_strided_slice %1 {offsets = [3, 0], sizes = [1, 256], strides = [1, 1]} : vector<4x256xf32> to vector<1x256xf32>
    %28 = vector.broadcast %27 : vector<1x256xf32> to vector<64x256xf32>
    %29 = arith.mulf %26, %28 : vector<64x256xf32>
    %30 = arith.addf %23, %29 : vector<64x256xf32>
    %c0_11 = arith.constant 0 : index
    %c0_12 = arith.constant 0 : index
    %31 = vector.load %arg4[%c0_11, %c0_12] : memref<1x256xf32, #tpu.memory_space<vmem>>, vector<1x256xf32>
    %32 = vector.broadcast %31 : vector<1x256xf32> to vector<64x256xf32>
    %33 = arith.mulf %30, %32 : vector<64x256xf32>
    %c0_13 = arith.constant 0 : index
    %c0_14 = arith.constant 0 : index
    %34 = vector.load %arg5[%c0_13, %c0_14] : memref<1x256xf32, #tpu.memory_space<vmem>>, vector<1x256xf32>
    %35 = vector.broadcast %34 : vector<1x256xf32> to vector<64x256xf32>
    %36 = arith.addf %33, %35 : vector<64x256xf32>
    %cst_15 = arith.constant 0.000000e+00 : f32
    %37 = vector.broadcast %cst_15 : f32 to vector<64x256xf32>
    %38 = arith.maximumf %36, %37 : vector<64x256xf32>
    %cst_16 = arith.constant 6.000000e+00 : f32
    %39 = vector.broadcast %cst_16 : f32 to vector<64x256xf32>
    %40 = arith.minimumf %38, %39 : vector<64x256xf32>
    %41 = arith.truncf %40 : vector<64x256xf32> to vector<64x256xbf16>
    %c0_17 = arith.constant 0 : index
    %c0_18 = arith.constant 0 : index
    %42 = vector.load %arg6[%c0_17, %c0_18] : memref<256x256xbf16, #tpu.memory_space<vmem>>, vector<256x256xbf16>
    %cst_19 = arith.constant dense<0.000000e+00> : vector<64x256xf32>
    %43 = tpu.matmul %41, %42, %cst_19 {dimension_numbers = #tpu.dot_dimension_numbers<[1], [0], [0], [1], [0, 0, 1, 1], [], []>} : vector<64x256xbf16>, vector<256x256xbf16>, vector<64x256xf32> -> vector<64x256xf32>
    %c0_20 = arith.constant 0 : index
    %c0_21 = arith.constant 0 : index
    %44 = vector.load %arg7[%c0_20, %c0_21] : memref<1x256xf32, #tpu.memory_space<vmem>>, vector<1x256xf32>
    %45 = vector.broadcast %44 : vector<1x256xf32> to vector<64x256xf32>
    %46 = arith.mulf %43, %45 : vector<64x256xf32>
    %c0_22 = arith.constant 0 : index
    %c0_23 = arith.constant 0 : index
    %47 = vector.load %arg8[%c0_22, %c0_23] : memref<1x256xf32, #tpu.memory_space<vmem>>, vector<1x256xf32>
    %48 = vector.broadcast %47 : vector<1x256xf32> to vector<64x256xf32>
    %49 = arith.addf %46, %48 : vector<64x256xf32>
    %cst_24 = arith.constant 0.000000e+00 : f32
    %50 = vector.broadcast %cst_24 : f32 to vector<64x256xf32>
    %51 = arith.maximumf %49, %50 : vector<64x256xf32>
    %cst_25 = arith.constant 6.000000e+00 : f32
    %52 = vector.broadcast %cst_25 : f32 to vector<64x256xf32>
    %53 = arith.minimumf %51, %52 : vector<64x256xf32>
    %54 = arith.truncf %53 : vector<64x256xf32> to vector<64x256xbf16>
    %c0_26 = arith.constant 0 : index
    %c0_27 = arith.constant 0 : index
    %55 = vector.load %arg9[%c0_26, %c0_27] : memref<256x128xbf16, #tpu.memory_space<vmem>>, vector<256x128xbf16>
    %cst_28 = arith.constant dense<0.000000e+00> : vector<64x128xf32>
    %56 = tpu.matmul %54, %55, %cst_28 {dimension_numbers = #tpu.dot_dimension_numbers<[1], [0], [0], [1], [0, 0, 1, 1], [], []>} : vector<64x256xbf16>, vector<256x128xbf16>, vector<64x128xf32> -> vector<64x128xf32>
    %c0_29 = arith.constant 0 : index
    %c0_30 = arith.constant 0 : index
    %57 = vector.load %arg10[%c0_29, %c0_30] : memref<1x128xf32, #tpu.memory_space<vmem>>, vector<1x128xf32>
    %58 = vector.broadcast %57 : vector<1x128xf32> to vector<64x128xf32>
    %59 = arith.addf %56, %58 : vector<64x128xf32>
    %c0_31 = arith.constant 0 : index
    %c0_32 = arith.constant 0 : index
    %c0_33 = arith.constant 0 : index
    %60 = vector.load %arg11[%c0_31, %c0_32, %c0_33] : memref<1x64x128xf32, #tpu.memory_space<vmem>>, vector<1x64x128xf32>
    %61 = vector.shape_cast %60 : vector<1x64x128xf32> to vector<64x128xf32>
    %62 = vector.shape_cast %59 : vector<64x128xf32> to vector<1x64x128xf32>
    tpu.vector_store %arg11[%c0_31, %c0_32, %c0_33], %62 {strides = array<i32>} : memref<1x64x128xf32, #tpu.memory_space<vmem>>, vector<1x64x128xf32>,
    return
  }
  func.func @transform_0(%arg0: i32, %arg1: i32) -> (i32, i32, i32) {
    %c0_i32 = arith.constant 0 : i32
    %c0_i32_0 = arith.constant 0 : i32
    return %arg0, %arg1, %c0_i32 : i32, i32, i32
  }
  func.func @transform_1(%arg0: i32, %arg1: i32) -> (i32, i32, i32) {
    %c0_i32 = arith.constant 0 : i32
    %c0_i32_0 = arith.constant 0 : i32
    %c0_i32_1 = arith.constant 0 : i32
    return %arg0, %c0_i32, %c0_i32_0 : i32, i32, i32
  }
  func.func @transform_2(%arg0: i32, %arg1: i32) -> (i32, i32) {
    %c0_i32 = arith.constant 0 : i32
    %c0_i32_0 = arith.constant 0 : i32
    %c0_i32_1 = arith.constant 0 : i32
    return %c0_i32, %c0_i32_0 : i32, i32
  }
  func.func @transform_3(%arg0: i32, %arg1: i32) -> (i32, i32) {
    %c0_i32 = arith.constant 0 : i32
    %c0_i32_0 = arith.constant 0 : i32
    %c0_i32_1 = arith.constant 0 : i32
    return %c0_i32, %c0_i32_0 : i32, i32
  }
  func.func @transform_4(%arg0: i32, %arg1: i32) -> (i32, i32) {
    %c0_i32 = arith.constant 0 : i32
    %c0_i32_0 = arith.constant 0 : i32
    %c0_i32_1 = arith.constant 0 : i32
    return %c0_i32, %c0_i32_0 : i32, i32
  }
  func.func @transform_5(%arg0: i32, %arg1: i32) -> (i32, i32) {
    %c0_i32 = arith.constant 0 : i32
    %c0_i32_0 = arith.constant 0 : i32
    %c0_i32_1 = arith.constant 0 : i32
    return %c0_i32, %c0_i32_0 : i32, i32
  }
  func.func @transform_6(%arg0: i32, %arg1: i32) -> (i32, i32) {
    %c0_i32 = arith.constant 0 : i32
    %c0_i32_0 = arith.constant 0 : i32
    %c0_i32_1 = arith.constant 0 : i32
    return %c0_i32, %c0_i32_0 : i32, i32
  }
  func.func @transform_7(%arg0: i32, %arg1: i32) -> (i32, i32) {
    %c0_i32 = arith.constant 0 : i32
    %c0_i32_0 = arith.constant 0 : i32
    %c0_i32_1 = arith.constant 0 : i32
    return %c0_i32, %c0_i32_0 : i32, i32
  }
  func.func @transform_8(%arg0: i32, %arg1: i32) -> (i32, i32) {
    %c0_i32 = arith.constant 0 : i32
    %c0_i32_0 = arith.constant 0 : i32
    %c0_i32_1 = arith.constant 0 : i32
    return %c0_i32, %c0_i32_0 : i32, i32
  }
  func.func @transform_9(%arg0: i32, %arg1: i32) -> (i32, i32, i32) {
    %c0_i32 = arith.constant 0 : i32
    %c0_i32_0 = arith.constant 0 : i32
    return %arg0, %arg1, %c0_i32 : i32, i32, i32
  }
}

</mosaic_0001>

<bundles_post_ra>
// kernel: forward.8
= control target key start
LH: loop header
LB: loop body
LE: loop exit
PB: predicated region body
PF: predicated region fallthrough
CT: control target
= control target key end

     0   :  { %s2807_s24 = smov 0   ;;  %s3347_s0 = inlined_call_operand.vmem [shape: bf16[2048,27], index: 0, kind: input, shape index: {}]   ;;  %s3348_s1 = inlined_call_operand.vmem [shape: bf16[27,32], index: 1, kind: input, shape index: {}]   ;;  %s3349_s2 = inlined_call_operand.vmem [shape: f32[1,32], index: 2, kind: input, shape index: {}]   ;;  %s3350_s3 = inlined_call_operand.vmem [shape: f32[1,32], index: 3, kind: input, shape index: {}]   ;;  %s3351_s4 = inlined_call_operand.vmem [shape: bf16[32,32], index: 4, kind: input, shape index: {}]   ;;  %s3352_s5 = inlined_call_operand.vmem [shape: f32[1,32], index: 5, kind: input, shape index: {}]   ;;  %s3353_s6 = inlined_call_operand.vmem [shape: f32[1,32], index: 6, kind: input, shape index: {}]   ;;  %s3354_s7 = inlined_call_operand.vmem [shape: bf16[2048,32], index: 7, kind: output, shape index: {}]  }
   0x1 LB: > { %s2266_s25 = sadd.s32 4294967295, %s2764_s24   ;;  %p2270_p0 = scmp.ge.s32.totalorder %s2764_s24, 1  ;;  %s2764_s24 = sphi %s2807_s24, %s17_s24  }
   0x2   : > { %p238_p1 = scmp.lt.s32.totalorder %s2764_s24, 5 }
   0x4   : > { %p239_p2 = pnand %p2270_p0, %p238_p1 }
   0x5   : > { %v2722_v0 = vld [vmem:[%s3348_s1] sm:$0xff] (!%p239_p2)   ;;  %vm619_vm0 = vcmask (!%p239_p2), 1044480   ;;  %v2723_v1 = vld [vmem:[%s3348_s1 + $0x8] sm:$0x3f] (!%p239_p2)   ;;  %vm620_vm1 = vcmask (!%p239_p2), 1045504   ;;  %s2271_s30 = sshll.u32 (!%p239_p2), %s2266_s25, 6 }
   0x6   : > { %242 = sbr.rel (%p239_p2) target bundleno = 590 (0x24e), region = 48  ;;  %2577 = vmatprep.subr.bf16.mxu0 (!%p239_p2), %v2722_v0  ;;  %v2766_v2 = vmov (!%p239_p2), 65535   ;;  %p271_p3 = scmp.lt.s32.totalorder (!%p239_p2), %s2271_s30, 255  ;;  %vm522_vm2 = vcmask (!%p239_p2), 220160   ;;  %v2756_v31 = vld [vmem:[%s3351_s4] sm:$0xff] (!%p239_p2)   ;;  %v2757_v33 = vld [vmem:[%s3351_s4 + $0x8] sm:$0xff] (!%p239_p2)  }
   0x7   : > { %2578 = vmatpush3.bf16.msra.mxu0 (!%p239_p2), %v2722_v0  ;;  %v621_v3 = vsel (!%p239_p2), %vm619_vm0, 4294967295, %v2766_v2  ;;  %2645 = vmatprep.subr.bf16.mxu1 (!%p239_p2), %v2756_v31  ;;  %v2904_v40 = vld [vmem:[%s3349_s2] ss:$0 sm:$0xff] (!%p239_p2)  ;;  %vm1233_vm3 = vcmask (!%p239_p2), 261120   ;;  %vm2145_vm4 = vcmask (!%p239_p2), 257024  }
   0x8   : > { %v622_v4 = vsel (!%p239_p2), %vm620_vm1, %v621_v3, 0  ;;  %2646 = vmatpush3.bf16.msra.mxu1 (!%p239_p2), %v2756_v31  ;;  %v2909_v42 = vld [vmem:[%s3350_s3] ss:$0 sm:$0xff] (!%p239_p2) }
   0x9   : > { %v624_v5 = vand.u32 (!%p239_p2), %v2723_v1, %v622_v4  ;;  %2647 = vmatprep.subr.bf16.mxu1 (!%p239_p2), %v2757_v33 }
   0xb   : > { %2579 = vmatprep.subr.bf16.mxu0 (!%p239_p2), %v624_v5 }
   0xc   : > { %2580 = vmatpush3.bf16.msra.mxu0 (!%p239_p2), %v624_v5  ;;  %2648 = vmatpush3.bf16.msra.mxu1 (!%p239_p2), %v2757_v33 }
   0xd   : > { %s3356_s30 = smov (!%p271_p3, %s2271_s30), 255 }
   0xe   : > { %s2272_s8 = sshll.u32 %s3356_s30, 2 }
   0xf   : > { %s2829_s11 = scalar_lea.vmem %s3347_s0, %s2272_s8  ;;  %s3094_s27 = scalar_lea.vmem %s3354_s7, %s2272_s8 }
  0x10   : > { %v2724_v6 = vld [vmem:[%s2829_s11] sm:$0xff]   ;;  %v2725_v7 = vld [vmem:[%s2829_s11 + $0x8] sm:$0xff]   ;;  %v2726_v8 = vld [vmem:[%s2829_s11 + $0x10] sm:$0xff]  }
  0x11   : > { %2581 = vmatprep.mubr.msk.bf16.mxu0 %vm522_vm2, %v2724_v6  ;;  %v2727_v9 = vld [vmem:[%s2829_s11 + $0x18] sm:$0xff]   ;;  %v2728_v10 = vld [vmem:[%s2829_s11 + $0x20] sm:$0xff]   ;;  %v2729_v11 = vld [vmem:[%s2829_s11 + $0x28] sm:$0xff]  }
  0x12   : > { %2582 = vmatmul.mubr.msk.bf16.vlgmr.msra.gmra.mrb[0].mxu0 %vm522_vm2, %v2725_v7  ;;  %v2730_v12 = vld [vmem:[%s2829_s11 + $0x30] sm:$0xff]   ;;  %v2731_v13 = vld [vmem:[%s2829_s11 + $0x38] sm:$0xff]   ;;  %v2732_v14 = vld [vmem:[%s2829_s11 + $0x40] sm:$0xff]  }
  0x13   : > { %2585 = vmatprep.mubr.msk.bf16.mxu0 %vm522_vm2, %v2726_v8  ;;  %v2733_v15 = vld [vmem:[%s2829_s11 + $0x48] sm:$0xff]   ;;  %v2734_v16 = vld [vmem:[%s2829_s11 + $0x50] sm:$0xff]   ;;  %v2735_v17 = vld [vmem:[%s2829_s11 + $0x58] sm:$0xff]  }
  0x14   : > { %v2736_v18 = vld [vmem:[%s2829_s11 + $0x60] sm:$0xff]   ;;  %v2737_v19 = vld [vmem:[%s2829_s11 + $0x68] sm:$0xff]   ;;  %v2738_v20 = vld [vmem:[%s2829_s11 + $0x70] sm:$0xff]  }
  0x15   : > { %v2739_v21 = vld [vmem:[%s2829_s11 + $0x78] sm:$0xff]   ;;  %v2740_v22 = vld [vmem:[%s2829_s11 + $0x80] sm:$0xff]   ;;  %v2741_v23 = vld [vmem:[%s2829_s11 + $0x88] sm:$0xff]  }
  0x16   : > { %v2742_v24 = vld [vmem:[%s2829_s11 + $0x90] sm:$0xff]   ;;  %v2743_v25 = vld [vmem:[%s2829_s11 + $0x98] sm:$0xff]   ;;  %v2744_v26 = vld [vmem:[%s2829_s11 + $0xa0] sm:$0xff]  }
  0x17   : > { %v2745_v27 = vld [vmem:[%s2829_s11 + $0xa8] sm:$0xff]   ;;  %v2746_v28 = vld [vmem:[%s2829_s11 + $0xb0] sm:$0xff]   ;;  %v2747_v29 = vld [vmem:[%s2829_s11 + $0xb8] sm:$0xff]  }
  0x18   : > { %v2748_v30 = vld [vmem:[%s2829_s11 + $0xc0] sm:$0xff]   ;;  %v2749_v32 = vld [vmem:[%s2829_s11 + $0xc8] sm:$0xff]   ;;  %v2750_v34 = vld [vmem:[%s2829_s11 + $0xd0] sm:$0xff]  }
  0x19   : > { %v2751_v35 = vld [vmem:[%s2829_s11 + $0xd8] sm:$0xff]   ;;  %v2752_v36 = vld [vmem:[%s2829_s11 + $0xe0] sm:$0xff]   ;;  %v2753_v37 = vld [vmem:[%s2829_s11 + $0xe8] sm:$0xff]  }
  0x1a   : > { %2586 = vmatmul.mubr.msk.bf16.gmra.mrb[4].mxu0 %vm522_vm2, %v2727_v9  ;;  %v2754_v38 = vld [vmem:[%s2829_s11 + $0xf0] sm:$0xff]   ;;  %v2755_v39 = vld [vmem:[%s2829_s11 + $0xf8] sm:$0xff]  }
  0x1b   : > { %2589 = vmatprep.mubr.msk.bf16.mxu0 %vm522_vm2, %v2728_v10 }
  0x22   : > { %2590 = vmatmul.mubr.msk.bf16.gmra.mrb[8].mxu0 %vm522_vm2, %v2729_v11 }
  0x23   : > { %2593 = vmatprep.mubr.msk.bf16.mxu0 %vm522_vm2, %v2730_v12 }
  0x2a   : > { %2594 = vmatmul.mubr.msk.bf16.gmra.mrb[12].mxu0 %vm522_vm2, %v2731_v13 }
  0x2b   : > { %2597 = vmatprep.mubr.msk.bf16.mxu0 %vm522_vm2, %v2732_v14 }
  0x32   : > { %2598 = vmatmul.mubr.msk.bf16.gmra.mrb[16].mxu0 %vm522_vm2, %v2733_v15 }
  0x33   : > { %2601 = vmatprep.mubr.msk.bf16.mxu0 %vm522_vm2, %v2734_v16 }
  0x3a   : > { %2602 = vmatmul.mubr.msk.bf16.gmra.mrb[20].mxu0 %vm522_vm2, %v2735_v17 }
  0x3b   : > { %2605 = vmatprep.mubr.msk.bf16.mxu0 %vm522_vm2, %v2736_v18 }
  0x42   : > { %2606 = vmatmul.mubr.msk.bf16.gmra.mrb[24].mxu0 %vm522_vm2, %v2737_v19 }
  0x43   : > { %2609 = vmatprep.mubr.msk.bf16.mxu0 %vm522_vm2, %v2738_v20 }
  0x4a   : > { %2610 = vmatmul.mubr.msk.bf16.gmra.mrb[28].mxu0 %vm522_vm2, %v2739_v21 }
  0x4b   : > { %2613 = vmatprep.mubr.msk.bf16.mxu0 %vm522_vm2, %v2740_v22 }
  0x52   : > { %2614 = vmatmul.mubr.msk.bf16.gmra.mrb[32].mxu0 %vm522_vm2, %v2741_v23 }
  0x53   : > { %2617 = vmatprep.mubr.msk.bf16.mxu0 %vm522_vm2, %v2742_v24 }
  0x5a   : > { %2618 = vmatmul.mubr.msk.bf16.gmra.mrb[36].mxu0 %vm522_vm2, %v2743_v25 }
  0x5b   : > { %2621 = vmatprep.mubr.msk.bf16.mxu0 %vm522_vm2, %v2744_v26 }
  0x62   : > { %2622 = vmatmul.mubr.msk.bf16.gmra.mrb[40].mxu0 %vm522_vm2, %v2745_v27 }
  0x63   : > { %2625 = vmatprep.mubr.msk.bf16.mxu0 %vm522_vm2, %v2746_v28 }
  0x6a   : > { %2626 = vmatmul.mubr.msk.bf16.gmra.mrb[44].mxu0 %vm522_vm2, %v2747_v29 }
  0x6b   : > { %2629 = vmatprep.mubr.msk.bf16.mxu0 %vm522_vm2, %v2748_v30 }
  0x72   : > { %2630 = vmatmul.mubr.msk.bf16.gmra.mrb[48].mxu0 %vm522_vm2, %v2749_v32 }
  0x73   : > { %2633 = vmatprep.mubr.msk.bf16.mxu0 %vm522_vm2, %v2750_v34 }
  0x7a   : > { %2634 = vmatmul.mubr.msk.bf16.gmra.mrb[52].mxu0 %vm522_vm2, %v2751_v35 }
  0x7b   : > { %2637 = vmatprep.mubr.msk.bf16.mxu0 %vm522_vm2, %v2752_v36 }
  0x82   : > { %2638 = vmatmul.mubr.msk.bf16.gmra.mrb[56].mxu0 %vm522_vm2, %v2753_v37 }
  0x83   : > { %2641 = vmatprep.mubr.msk.bf16.mxu0 %vm522_vm2, %v2754_v38 }
  0x8a   : > { %2642 = vmatmul.mubr.msk.bf16.gmra.mrb[60].mxu0 %vm522_vm2, %v2755_v39 }
  0xe5   : > { %v2583_v41 = vpop.f32.mrb[0].mxu0 }
  0xe6   : > { %v924_v43 = vmul.f32 %v2583_v41, %v2904_v40  ;;  %v660_v44 = vpop.f32.mrb[1].mxu0 }
  0xe7   : > { %v922_v45 = vmul.f32 %v2904_v40, %v660_v44  ;;  %v2584_v46 = vpop.f32.mrb[2].mxu0 }
  0xe8   : > { %v995_v47 = vadd.f32 %v2909_v42, %v924_v43  ;;  %v925_v48 = vmul.f32 %v2584_v46, %v2904_v40  ;;  %v663_v49 = vpop.f32.mrb[3].mxu0 }
  0xe9   : > { %v993_v50 = vadd.f32 %v2909_v42, %v922_v45  ;;  %v923_v51 = vmul.f32 %v2904_v40, %v663_v49 }
  0xea   : > { %v1059_v52 = vmax.f32 %v995_v47, 0.0  ;;  %v996_v53 = vadd.f32 %v2909_v42, %v925_v48 }
  0xeb   : > { %v1057_v54 = vmax.f32 %v993_v50, 0.0  ;;  %v994_v55 = vadd.f32 %v2909_v42, %v923_v51 }
  0xec   : > { %v1060_v56 = vmax.f32 %v996_v53, 0.0  ;;  %v1123_v59 = vmin.f32 %v1059_v52, 6.0 }
  0xed   : > { %v1058_v57 = vmax.f32 %v994_v55, 0.0  ;;  %v2587_v58 = vpop.f32.mrb[4].mxu0  ;;  %v1121_v1 = vmin.f32 %v1057_v54, 6.0 }
  0xee   : > { %v1124_v60 = vmin.f32 %v1060_v56, 6.0  ;;  %v928_v61 = vmul.f32 %v2587_v58, %v2904_v40  ;;  %v676_v62 = vpop.f32.mrb[5].mxu0 }
  0xef   : > { %v926_v63 = vmul.f32 %v2904_v40, %v676_v62  ;;  %v2588_v0 = vpop.f32.mrb[6].mxu0  ;;  %v1122_v2 = vmin.f32 %v1058_v57, 6.0 }
  0xf0   : > { %v1186_v3 = vpack.c.bf16 %v1124_v60, %v1123_v59  ;;  %v999_v4 = vadd.f32 %v2909_v42, %v928_v61  ;;  %v929_v5 = vmul.f32 %v2588_v0, %v2904_v40  ;;  %v679_v6 = vpop.f32.mrb[7].mxu0 }
  0xf1   : > { %v997_v7 = vadd.f32 %v2909_v42, %v926_v63  ;;  %v927_v8 = vmul.f32 %v2904_v40, %v679_v6  ;;  %v1185_v9 = vpack.c.bf16 %v1122_v2, %v1121_v1 }
  0xf2   : > { %v1063_v10 = vmax.f32 %v999_v4, 0.0  ;;  %v1000_v11 = vadd.f32 %v2909_v42, %v929_v5 }
  0xf3   : > { %v1061_v12 = vmax.f32 %v997_v7, 0.0  ;;  %v998_v13 = vadd.f32 %v2909_v42, %v927_v8  ;;  %2649 = vmatprep.mubr.msk.bf16.mxu1 %vm1233_vm3, %v1185_v9 }
  0xf4   : > { %v1064_v14 = vmax.f32 %v1000_v11, 0.0  ;;  %2650 = vmatmul.mubr.msk.bf16.vlgmr.msra.gmra.mrb[0].mxu1 %vm1233_vm3, %v1186_v3  ;;  %v1127_v17 = vmin.f32 %v1063_v10, 6.0 }
  0xf5   : > { %v1062_v15 = vmax.f32 %v998_v13, 0.0  ;;  %v2591_v16 = vpop.f32.mrb[8].mxu0  ;;  %v1125_v21 = vmin.f32 %v1061_v12, 6.0 }
  0xf6   : > { %v1128_v18 = vmin.f32 %v1064_v14, 6.0  ;;  %v932_v19 = vmul.f32 %v2591_v16, %v2904_v40  ;;  %v692_v20 = vpop.f32.mrb[9].mxu0 }
  0xf7   : > { %v1126_v22 = vmin.f32 %v1062_v15, 6.0  ;;  %v930_v23 = vmul.f32 %v2904_v40, %v692_v20  ;;  %v2592_v24 = vpop.f32.mrb[10].mxu0 }
  0xf8   : > { %v1188_v25 = vpack.c.bf16 %v1128_v18, %v1127_v17  ;;  %v1003_v26 = vadd.f32 %v2909_v42, %v932_v19  ;;  %v933_v27 = vmul.f32 %v2592_v24, %v2904_v40  ;;  %v695_v28 = vpop.f32.mrb[11].mxu0 }
  0xf9   : > { %v1187_v29 = vpack.c.bf16 %v1126_v22, %v1125_v21  ;;  %v1001_v30 = vadd.f32 %v2909_v42, %v930_v23  ;;  %v931_v31 = vmul.f32 %v2904_v40, %v695_v28 }
  0xfa   : > { %v1067_v32 = vmax.f32 %v1003_v26, 0.0  ;;  %v1004_v33 = vadd.f32 %v2909_v42, %v933_v27 }
  0xfb   : > { %v1065_v34 = vmax.f32 %v1001_v30, 0.0  ;;  %v1002_v35 = vadd.f32 %v2909_v42, %v931_v31  ;;  %2653 = vmatprep.mubr.msk.bf16.mxu1 %vm1233_vm3, %v1187_v29 }
  0xfc   : > { %v1068_v36 = vmax.f32 %v1004_v33, 0.0  ;;  %2654 = vmatmul.mubr.msk.bf16.gmra.mrb[4].mxu1 %vm1233_vm3, %v1188_v25  ;;  %v1131_v39 = vmin.f32 %v1067_v32, 6.0 }
  0xfd   : > { %v1066_v37 = vmax.f32 %v1002_v35, 0.0  ;;  %v2595_v38 = vpop.f32.mrb[12].mxu0  ;;  %v1129_v45 = vmin.f32 %v1065_v34, 6.0 }
  0xfe   : > { %v1132_v41 = vmin.f32 %v1068_v36, 6.0  ;;  %v936_v43 = vmul.f32 %v2595_v38, %v2904_v40  ;;  %v708_v44 = vpop.f32.mrb[13].mxu0 }
  0xff   : > { %v1130_v46 = vmin.f32 %v1066_v37, 6.0  ;;  %v934_v47 = vmul.f32 %v2904_v40, %v708_v44  ;;  %v2596_v48 = vpop.f32.mrb[14].mxu0 }
 0x100   : > { %v1190_v49 = vpack.c.bf16 %v1132_v41, %v1131_v39  ;;  %v1007_v50 = vadd.f32 %v2909_v42, %v936_v43  ;;  %v937_v51 = vmul.f32 %v2596_v48, %v2904_v40  ;;  %v711_v52 = vpop.f32.mrb[15].mxu0 }
 0x101   : > { %v1189_v53 = vpack.c.bf16 %v1130_v46, %v1129_v45  ;;  %v1005_v54 = vadd.f32 %v2909_v42, %v934_v47  ;;  %v935_v55 = vmul.f32 %v2904_v40, %v711_v52 }
 0x102   : > { %v1071_v56 = vmax.f32 %v1007_v50, 0.0  ;;  %v1008_v57 = vadd.f32 %v2909_v42, %v937_v51 }
 0x103   : > { %v1069_v58 = vmax.f32 %v1005_v54, 0.0  ;;  %v1006_v59 = vadd.f32 %v2909_v42, %v935_v55  ;;  %2657 = vmatprep.mubr.msk.bf16.mxu1 %vm1233_vm3, %v1189_v53 }
 0x104   : > { %v1072_v60 = vmax.f32 %v1008_v57, 0.0  ;;  %2658 = vmatmul.mubr.msk.bf16.gmra.mrb[8].mxu1 %vm1233_vm3, %v1190_v49  ;;  %v1135_v63 = vmin.f32 %v1071_v56, 6.0 }
 0x105   : > { %v1070_v61 = vmax.f32 %v1006_v59, 0.0  ;;  %v2599_v62 = vpop.f32.mrb[16].mxu0  ;;  %v1133_v3 = vmin.f32 %v1069_v58, 6.0 }
 0x106   : > { %v1136_v0 = vmin.f32 %v1072_v60, 6.0  ;;  %v940_v1 = vmul.f32 %v2599_v62, %v2904_v40  ;;  %v724_v2 = vpop.f32.mrb[17].mxu0 }
 0x107   : > { %v1134_v4 = vmin.f32 %v1070_v61, 6.0  ;;  %v938_v5 = vmul.f32 %v2904_v40, %v724_v2  ;;  %v2600_v6 = vpop.f32.mrb[18].mxu0 }
 0x108   : > { %v1192_v7 = vpack.c.bf16 %v1136_v0, %v1135_v63  ;;  %v1011_v8 = vadd.f32 %v2909_v42, %v940_v1  ;;  %v941_v9 = vmul.f32 %v2600_v6, %v2904_v40  ;;  %v727_v10 = vpop.f32.mrb[19].mxu0 }
 0x109   : > { %v1191_v11 = vpack.c.bf16 %v1134_v4, %v1133_v3  ;;  %v1009_v12 = vadd.f32 %v2909_v42, %v938_v5  ;;  %v939_v13 = vmul.f32 %v2904_v40, %v727_v10 }
 0x10a   : > { %v1075_v14 = vmax.f32 %v1011_v8, 0.0  ;;  %v1012_v15 = vadd.f32 %v2909_v42, %v941_v9 }
 0x10b   : > { %v1073_v16 = vmax.f32 %v1009_v12, 0.0  ;;  %v1010_v17 = vadd.f32 %v2909_v42, %v939_v13  ;;  %2661 = vmatprep.mubr.msk.bf16.mxu1 %vm1233_vm3, %v1191_v11 }
 0x10c   : > { %v1076_v18 = vmax.f32 %v1012_v15, 0.0  ;;  %2662 = vmatmul.mubr.msk.bf16.gmra.mrb[12].mxu1 %vm1233_vm3, %v1192_v7  ;;  %v1139_v21 = vmin.f32 %v1075_v14, 6.0 }
 0x10d   : > { %v1074_v19 = vmax.f32 %v1010_v17, 0.0  ;;  %v2603_v20 = vpop.f32.mrb[20].mxu0  ;;  %v1137_v25 = vmin.f32 %v1073_v16, 6.0 }
 0x10e   : > { %v1140_v22 = vmin.f32 %v1076_v18, 6.0  ;;  %v944_v23 = vmul.f32 %v2603_v20, %v2904_v40  ;;  %v740_v24 = vpop.f32.mrb[21].mxu0 }
 0x10f   : > { %v1138_v26 = vmin.f32 %v1074_v19, 6.0  ;;  %v942_v27 = vmul.f32 %v2904_v40, %v740_v24  ;;  %v2604_v28 = vpop.f32.mrb[22].mxu0 }
 0x110   : > { %v1194_v29 = vpack.c.bf16 %v1140_v22, %v1139_v21  ;;  %v1015_v30 = vadd.f32 %v2909_v42, %v944_v23  ;;  %v945_v31 = vmul.f32 %v2604_v28, %v2904_v40  ;;  %v743_v32 = vpop.f32.mrb[23].mxu0 }
 0x111   : > { %v1193_v33 = vpack.c.bf16 %v1138_v26, %v1137_v25  ;;  %v1013_v34 = vadd.f32 %v2909_v42, %v942_v27  ;;  %v943_v35 = vmul.f32 %v2904_v40, %v743_v32 }
 0x112   : > { %v1079_v36 = vmax.f32 %v1015_v30, 0.0  ;;  %v1016_v37 = vadd.f32 %v2909_v42, %v945_v31 }
 0x113   : > { %v1077_v38 = vmax.f32 %v1013_v34, 0.0  ;;  %v1014_v39 = vadd.f32 %v2909_v42, %v943_v35  ;;  %2665 = vmatprep.mubr.msk.bf16.mxu1 %vm1233_vm3, %v1193_v33 }
 0x114   : > { %v1080_v41 = vmax.f32 %v1016_v37, 0.0  ;;  %2666 = vmatmul.mubr.msk.bf16.gmra.mrb[16].mxu1 %vm1233_vm3, %v1194_v29  ;;  %v1143_v45 = vmin.f32 %v1079_v36, 6.0 }
 0x115   : > { %v1078_v43 = vmax.f32 %v1014_v39, 0.0  ;;  %v2607_v44 = vpop.f32.mrb[24].mxu0  ;;  %v1141_v49 = vmin.f32 %v1077_v38, 6.0 }
 0x116   : > { %v1144_v46 = vmin.f32 %v1080_v41, 6.0  ;;  %v948_v47 = vmul.f32 %v2607_v44, %v2904_v40  ;;  %v756_v48 = vpop.f32.mrb[25].mxu0 }
 0x117   : > { %v1142_v50 = vmin.f32 %v1078_v43, 6.0  ;;  %v946_v51 = vmul.f32 %v2904_v40, %v756_v48  ;;  %v2608_v52 = vpop.f32.mrb[26].mxu0 }
 0x118   : > { %v1196_v53 = vpack.c.bf16 %v1144_v46, %v1143_v45  ;;  %v1019_v54 = vadd.f32 %v2909_v42, %v948_v47  ;;  %v949_v55 = vmul.f32 %v2608_v52, %v2904_v40  ;;  %v759_v56 = vpop.f32.mrb[27].mxu0 }
 0x119   : > { %v1195_v57 = vpack.c.bf16 %v1142_v50, %v1141_v49  ;;  %v1017_v58 = vadd.f32 %v2909_v42, %v946_v51  ;;  %v947_v59 = vmul.f32 %v2904_v40, %v759_v56 }
 0x11a   : > { %v1083_v60 = vmax.f32 %v1019_v54, 0.0  ;;  %v1020_v61 = vadd.f32 %v2909_v42, %v949_v55 }
 0x11b   : > { %v1081_v62 = vmax.f32 %v1017_v58, 0.0  ;;  %v1018_v63 = vadd.f32 %v2909_v42, %v947_v59  ;;  %2669 = vmatprep.mubr.msk.bf16.mxu1 %vm1233_vm3, %v1195_v57 }
 0x11c   : > { %v1084_v0 = vmax.f32 %v1020_v61, 0.0  ;;  %2670 = vmatmul.mubr.msk.bf16.gmra.mrb[20].mxu1 %vm1233_vm3, %v1196_v53  ;;  %v1147_v3 = vmin.f32 %v1083_v60, 6.0 }
 0x11d   : > { %v1082_v1 = vmax.f32 %v1018_v63, 0.0  ;;  %v2611_v2 = vpop.f32.mrb[28].mxu0  ;;  %v1145_v7 = vmin.f32 %v1081_v62, 6.0 }
 0x11e   : > { %v1148_v4 = vmin.f32 %v1084_v0, 6.0  ;;  %v952_v5 = vmul.f32 %v2611_v2, %v2904_v40  ;;  %v772_v6 = vpop.f32.mrb[29].mxu0 }
 0x11f   : > { %v1146_v8 = vmin.f32 %v1082_v1, 6.0  ;;  %v950_v9 = vmul.f32 %v2904_v40, %v772_v6  ;;  %v2612_v10 = vpop.f32.mrb[30].mxu0 }
 0x120   : > { %v1198_v11 = vpack.c.bf16 %v1148_v4, %v1147_v3  ;;  %v1023_v12 = vadd.f32 %v2909_v42, %v952_v5  ;;  %v953_v13 = vmul.f32 %v2612_v10, %v2904_v40  ;;  %v775_v14 = vpop.f32.mrb[31].mxu0 }
 0x121   : > { %v1197_v15 = vpack.c.bf16 %v1146_v8, %v1145_v7  ;;  %v1021_v16 = vadd.f32 %v2909_v42, %v950_v9  ;;  %v951_v17 = vmul.f32 %v2904_v40, %v775_v14 }
 0x122   : > { %v1087_v18 = vmax.f32 %v1023_v12, 0.0  ;;  %v1024_v19 = vadd.f32 %v2909_v42, %v953_v13 }
 0x123   : > { %v1085_v20 = vmax.f32 %v1021_v16, 0.0  ;;  %v1022_v21 = vadd.f32 %v2909_v42, %v951_v17  ;;  %2673 = vmatprep.mubr.msk.bf16.mxu1 %vm1233_vm3, %v1197_v15 }
 0x124   : > { %v1088_v22 = vmax.f32 %v1024_v19, 0.0  ;;  %2674 = vmatmul.mubr.msk.bf16.gmra.mrb[24].mxu1 %vm1233_vm3, %v1198_v11  ;;  %v1151_v25 = vmin.f32 %v1087_v18, 6.0 }
 0x125   : > { %v1086_v23 = vmax.f32 %v1022_v21, 0.0  ;;  %v2615_v24 = vpop.f32.mrb[32].mxu0  ;;  %v1149_v29 = vmin.f32 %v1085_v20, 6.0 }
 0x126   : > { %v1152_v26 = vmin.f32 %v1088_v22, 6.0  ;;  %v956_v27 = vmul.f32 %v2615_v24, %v2904_v40  ;;  %v788_v28 = vpop.f32.mrb[33].mxu0 }
 0x127   : > { %v1150_v30 = vmin.f32 %v1086_v23, 6.0  ;;  %v954_v31 = vmul.f32 %v2904_v40, %v788_v28  ;;  %v2616_v32 = vpop.f32.mrb[34].mxu0 }
 0x128   : > { %v1200_v33 = vpack.c.bf16 %v1152_v26, %v1151_v25  ;;  %v1027_v34 = vadd.f32 %v2909_v42, %v956_v27  ;;  %v957_v35 = vmul.f32 %v2616_v32, %v2904_v40  ;;  %v791_v36 = vpop.f32.mrb[35].mxu0 }
 0x129   : > { %v1199_v37 = vpack.c.bf16 %v1150_v30, %v1149_v29  ;;  %v1025_v38 = vadd.f32 %v2909_v42, %v954_v31  ;;  %v955_v39 = vmul.f32 %v2904_v40, %v791_v36 }
 0x12a   : > { %v1091_v41 = vmax.f32 %v1027_v34, 0.0  ;;  %v1028_v43 = vadd.f32 %v2909_v42, %v957_v35 }
 0x12b   : > { %v1089_v44 = vmax.f32 %v1025_v38, 0.0  ;;  %v1026_v45 = vadd.f32 %v2909_v42, %v955_v39  ;;  %2677 = vmatprep.mubr.msk.bf16.mxu1 %vm1233_vm3, %v1199_v37 }
 0x12c   : > { %v1092_v46 = vmax.f32 %v1028_v43, 0.0  ;;  %2678 = vmatmul.mubr.msk.bf16.gmra.mrb[28].mxu1 %vm1233_vm3, %v1200_v33  ;;  %v1155_v49 = vmin.f32 %v1091_v41, 6.0 }
 0x12d   : > { %v1090_v47 = vmax.f32 %v1026_v45, 0.0  ;;  %v2619_v48 = vpop.f32.mrb[36].mxu0  ;;  %v1153_v53 = vmin.f32 %v1089_v44, 6.0 }
 0x12e   : > { %v1156_v50 = vmin.f32 %v1092_v46, 6.0  ;;  %v960_v51 = vmul.f32 %v2619_v48, %v2904_v40  ;;  %v804_v52 = vpop.f32.mrb[37].mxu0 }
 0x12f   : > { %v1154_v54 = vmin.f32 %v1090_v47, 6.0  ;;  %v958_v55 = vmul.f32 %v2904_v40, %v804_v52  ;;  %v2620_v56 = vpop.f32.mrb[38].mxu0 }
 0x130   : > { %v1202_v57 = vpack.c.bf16 %v1156_v50, %v1155_v49  ;;  %v1031_v58 = vadd.f32 %v2909_v42, %v960_v51  ;;  %v961_v59 = vmul.f32 %v2620_v56, %v2904_v40  ;;  %v807_v60 = vpop.f32.mrb[39].mxu0 }
 0x131   : > { %v1201_v61 = vpack.c.bf16 %v1154_v54, %v1153_v53  ;;  %v1029_v62 = vadd.f32 %v2909_v42, %v958_v55  ;;  %v959_v63 = vmul.f32 %v2904_v40, %v807_v60 }
 0x132   : > { %v1095_v0 = vmax.f32 %v1031_v58, 0.0  ;;  %v1032_v1 = vadd.f32 %v2909_v42, %v961_v59 }
 0x133   : > { %v1093_v2 = vmax.f32 %v1029_v62, 0.0  ;;  %v1030_v3 = vadd.f32 %v2909_v42, %v959_v63  ;;  %2681 = vmatprep.mubr.msk.bf16.mxu1 %vm1233_vm3, %v1201_v61 }
 0x134   : > { %v1096_v4 = vmax.f32 %v1032_v1, 0.0  ;;  %2682 = vmatmul.mubr.msk.bf16.gmra.mrb[32].mxu1 %vm1233_vm3, %v1202_v57  ;;  %v1159_v7 = vmin.f32 %v1095_v0, 6.0 }
 0x135   : > { %v1094_v5 = vmax.f32 %v1030_v3, 0.0  ;;  %v2623_v6 = vpop.f32.mrb[40].mxu0  ;;  %v1157_v11 = vmin.f32 %v1093_v2, 6.0 }
 0x136   : > { %v1160_v8 = vmin.f32 %v1096_v4, 6.0  ;;  %v964_v9 = vmul.f32 %v2623_v6, %v2904_v40  ;;  %v820_v10 = vpop.f32.mrb[41].mxu0 }
 0x137   : > { %v1158_v12 = vmin.f32 %v1094_v5, 6.0  ;;  %v962_v13 = vmul.f32 %v2904_v40, %v820_v10  ;;  %v2624_v14 = vpop.f32.mrb[42].mxu0 }
 0x138   : > { %v1204_v15 = vpack.c.bf16 %v1160_v8, %v1159_v7  ;;  %v1035_v16 = vadd.f32 %v2909_v42, %v964_v9  ;;  %v965_v17 = vmul.f32 %v2624_v14, %v2904_v40  ;;  %v823_v18 = vpop.f32.mrb[43].mxu0 }
 0x139   : > { %v1203_v19 = vpack.c.bf16 %v1158_v12, %v1157_v11  ;;  %v1033_v20 = vadd.f32 %v2909_v42, %v962_v13  ;;  %v963_v21 = vmul.f32 %v2904_v40, %v823_v18 }
 0x13a   : > { %v1099_v22 = vmax.f32 %v1035_v16, 0.0  ;;  %v1036_v23 = vadd.f32 %v2909_v42, %v965_v17 }
 0x13b   : > { %v1097_v24 = vmax.f32 %v1033_v20, 0.0  ;;  %v1034_v25 = vadd.f32 %v2909_v42, %v963_v21  ;;  %2685 = vmatprep.mubr.msk.bf16.mxu1 %vm1233_vm3, %v1203_v19 }
 0x13c   : > { %v1100_v26 = vmax.f32 %v1036_v23, 0.0  ;;  %2686 = vmatmul.mubr.msk.bf16.gmra.mrb[36].mxu1 %vm1233_vm3, %v1204_v15  ;;  %v1163_v29 = vmin.f32 %v1099_v22, 6.0 }
 0x13d   : > { %v1098_v27 = vmax.f32 %v1034_v25, 0.0  ;;  %v2627_v28 = vpop.f32.mrb[44].mxu0  ;;  %v1161_v33 = vmin.f32 %v1097_v24, 6.0 }
 0x13e   : > { %v1164_v30 = vmin.f32 %v1100_v26, 6.0  ;;  %v968_v31 = vmul.f32 %v2627_v28, %v2904_v40  ;;  %v836_v32 = vpop.f32.mrb[45].mxu0 }
 0x13f   : > { %v1162_v34 = vmin.f32 %v1098_v27, 6.0  ;;  %v966_v35 = vmul.f32 %v2904_v40, %v836_v32  ;;  %v2628_v36 = vpop.f32.mrb[46].mxu0 }
 0x140   : > { %v1206_v37 = vpack.c.bf16 %v1164_v30, %v1163_v29  ;;  %v1039_v38 = vadd.f32 %v2909_v42, %v968_v31  ;;  %v969_v39 = vmul.f32 %v2628_v36, %v2904_v40  ;;  %v839_v41 = vpop.f32.mrb[47].mxu0 }
 0x141   : > { %v1205_v43 = vpack.c.bf16 %v1162_v34, %v1161_v33  ;;  %v1037_v44 = vadd.f32 %v2909_v42, %v966_v35  ;;  %v967_v45 = vmul.f32 %v2904_v40, %v839_v41 }
 0x142   : > { %v1103_v46 = vmax.f32 %v1039_v38, 0.0  ;;  %v1040_v47 = vadd.f32 %v2909_v42, %v969_v39 }
 0x143   : > { %v1101_v48 = vmax.f32 %v1037_v44, 0.0  ;;  %v1038_v49 = vadd.f32 %v2909_v42, %v967_v45  ;;  %2689 = vmatprep.mubr.msk.bf16.mxu1 %vm1233_vm3, %v1205_v43 }
 0x144   : > { %v1104_v50 = vmax.f32 %v1040_v47, 0.0  ;;  %2690 = vmatmul.mubr.msk.bf16.gmra.mrb[40].mxu1 %vm1233_vm3, %v1206_v37  ;;  %v1167_v53 = vmin.f32 %v1103_v46, 6.0 }
 0x145   : > { %v1102_v51 = vmax.f32 %v1038_v49, 0.0  ;;  %v2631_v52 = vpop.f32.mrb[48].mxu0  ;;  %v1165_v57 = vmin.f32 %v1101_v48, 6.0 }
 0x146   : > { %v1168_v54 = vmin.f32 %v1104_v50, 6.0  ;;  %v972_v55 = vmul.f32 %v2631_v52, %v2904_v40  ;;  %v852_v56 = vpop.f32.mrb[49].mxu0 }
 0x147   : > { %v1166_v58 = vmin.f32 %v1102_v51, 6.0  ;;  %v970_v59 = vmul.f32 %v2904_v40, %v852_v56  ;;  %v2632_v60 = vpop.f32.mrb[50].mxu0 }
 0x148   : > { %v1208_v61 = vpack.c.bf16 %v1168_v54, %v1167_v53  ;;  %v1043_v62 = vadd.f32 %v2909_v42, %v972_v55  ;;  %v973_v63 = vmul.f32 %v2632_v60, %v2904_v40  ;;  %v855_v0 = vpop.f32.mrb[51].mxu0 }
 0x149   : > { %v1207_v1 = vpack.c.bf16 %v1166_v58, %v1165_v57  ;;  %v1041_v2 = vadd.f32 %v2909_v42, %v970_v59  ;;  %v971_v3 = vmul.f32 %v2904_v40, %v855_v0 }
 0x14a   : > { %v1107_v4 = vmax.f32 %v1043_v62, 0.0  ;;  %v1044_v5 = vadd.f32 %v2909_v42, %v973_v63 }
 0x14b   : > { %v1105_v6 = vmax.f32 %v1041_v2, 0.0  ;;  %v1042_v7 = vadd.f32 %v2909_v42, %v971_v3  ;;  %2693 = vmatprep.mubr.msk.bf16.mxu1 %vm1233_vm3, %v1207_v1 }
 0x14c   : > { %v1108_v8 = vmax.f32 %v1044_v5, 0.0  ;;  %2694 = vmatmul.mubr.msk.bf16.gmra.mrb[44].mxu1 %vm1233_vm3, %v1208_v61  ;;  %v1171_v11 = vmin.f32 %v1107_v4, 6.0 }
 0x14d   : > { %v1106_v9 = vmax.f32 %v1042_v7, 0.0  ;;  %v2635_v10 = vpop.f32.mrb[52].mxu0  ;;  %v1169_v15 = vmin.f32 %v1105_v6, 6.0 }
 0x14e   : > { %v1172_v12 = vmin.f32 %v1108_v8, 6.0  ;;  %v976_v13 = vmul.f32 %v2635_v10, %v2904_v40  ;;  %v868_v14 = vpop.f32.mrb[53].mxu0 }
 0x14f   : > { %v1170_v16 = vmin.f32 %v1106_v9, 6.0  ;;  %v974_v17 = vmul.f32 %v2904_v40, %v868_v14  ;;  %v2636_v18 = vpop.f32.mrb[54].mxu0 }
 0x150   : > { %v1210_v19 = vpack.c.bf16 %v1172_v12, %v1171_v11  ;;  %v1047_v20 = vadd.f32 %v2909_v42, %v976_v13  ;;  %v977_v21 = vmul.f32 %v2636_v18, %v2904_v40  ;;  %v871_v22 = vpop.f32.mrb[55].mxu0 }
 0x151   : > { %v1209_v23 = vpack.c.bf16 %v1170_v16, %v1169_v15  ;;  %v1045_v24 = vadd.f32 %v2909_v42, %v974_v17  ;;  %v975_v25 = vmul.f32 %v2904_v40, %v871_v22 }
 0x152   : > { %v1111_v26 = vmax.f32 %v1047_v20, 0.0  ;;  %v1048_v27 = vadd.f32 %v2909_v42, %v977_v21  ;;  %v3079_v20 = vld [vmem:[%s3353_s6] ss:$0 sm:$0xff] }
 0x153   : > { %v1109_v28 = vmax.f32 %v1045_v24, 0.0  ;;  %v1046_v29 = vadd.f32 %v2909_v42, %v975_v25  ;;  %2697 = vmatprep.mubr.msk.bf16.mxu1 %vm1233_vm3, %v1209_v23 }
 0x154   : > { %v1112_v30 = vmax.f32 %v1048_v27, 0.0  ;;  %2698 = vmatmul.mubr.msk.bf16.gmra.mrb[48].mxu1 %vm1233_vm3, %v1210_v19  ;;  %v1175_v33 = vmin.f32 %v1111_v26, 6.0 }
 0x155   : > { %v1110_v31 = vmax.f32 %v1046_v29, 0.0  ;;  %v2639_v32 = vpop.f32.mrb[56].mxu0  ;;  %v1173_v37 = vmin.f32 %v1109_v28, 6.0 }
 0x156   : > { %v1176_v34 = vmin.f32 %v1112_v30, 6.0  ;;  %v980_v35 = vmul.f32 %v2639_v32, %v2904_v40  ;;  %v884_v36 = vpop.f32.mrb[57].mxu0 }
 0x157   : > { %v1174_v38 = vmin.f32 %v1110_v31, 6.0  ;;  %v978_v39 = vmul.f32 %v2904_v40, %v884_v36  ;;  %v2640_v41 = vpop.f32.mrb[58].mxu0 }
 0x158   : > { %v1212_v43 = vpack.c.bf16 %v1176_v34, %v1175_v33  ;;  %v1051_v44 = vadd.f32 %v2909_v42, %v980_v35  ;;  %v981_v45 = vmul.f32 %v2640_v41, %v2904_v40  ;;  %v887_v46 = vpop.f32.mrb[59].mxu0 }
 0x159   : > { %v1211_v47 = vpack.c.bf16 %v1174_v38, %v1173_v37  ;;  %v1049_v48 = vadd.f32 %v2909_v42, %v978_v39  ;;  %v979_v49 = vmul.f32 %v2904_v40, %v887_v46 }
 0x15a   : > { %v1115_v50 = vmax.f32 %v1051_v44, 0.0  ;;  %v1052_v51 = vadd.f32 %v2909_v42, %v981_v45 }
 0x15b   : > { %v1113_v52 = vmax.f32 %v1049_v48, 0.0  ;;  %v1050_v53 = vadd.f32 %v2909_v42, %v979_v49  ;;  %2701 = vmatprep.mubr.msk.bf16.mxu1 %vm1233_vm3, %v1211_v47 }
 0x15c   : > { %v1116_v54 = vmax.f32 %v1052_v51, 0.0  ;;  %2702 = vmatmul.mubr.msk.bf16.gmra.mrb[52].mxu1 %vm1233_vm3, %v1212_v43  ;;  %v1179_v57 = vmin.f32 %v1115_v50, 6.0 }
 0x15d   : > { %v1114_v55 = vmax.f32 %v1050_v53, 0.0  ;;  %v2643_v56 = vpop.f32.mrb[60].mxu0  ;;  %v1177_v61 = vmin.f32 %v1113_v52, 6.0 }
 0x15e   : > { %v1180_v58 = vmin.f32 %v1116_v54, 6.0  ;;  %v984_v59 = vmul.f32 %v2643_v56, %v2904_v40  ;;  %v900_v60 = vpop.f32.mrb[61].mxu0 }
 0x15f   : > { %v1178_v62 = vmin.f32 %v1114_v55, 6.0  ;;  %v982_v63 = vmul.f32 %v2904_v40, %v900_v60  ;;  %v2644_v0 = vpop.f32.mrb[62].mxu0 }
 0x160   : > { %v1214_v1 = vpack.c.bf16 %v1180_v58, %v1179_v57  ;;  %v1055_v2 = vadd.f32 %v2909_v42, %v984_v59  ;;  %v985_v3 = vmul.f32 %v2644_v0, %v2904_v40  ;;  %v903_v4 = vpop.f32.mrb[63].mxu0 }
 0x161   : > { %v1213_v5 = vpack.c.bf16 %v1178_v62, %v1177_v61  ;;  %v1053_v6 = vadd.f32 %v2909_v42, %v982_v63  ;;  %v983_v7 = vmul.f32 %v2904_v40, %v903_v4  ;;  %v3074_v40 = vld [vmem:[%s3352_s5] ss:$0 sm:$0xff] }
 0x162   : > { %v1119_v8 = vmax.f32 %v1055_v2, 0.0  ;;  %v1056_v9 = vadd.f32 %v2909_v42, %v985_v3 }
 0x163   : > { %v1117_v10 = vmax.f32 %v1053_v6, 0.0  ;;  %v1054_v11 = vadd.f32 %v2909_v42, %v983_v7  ;;  %2705 = vmatprep.mubr.msk.bf16.mxu1 %vm1233_vm3, %v1213_v5 }
 0x164   : > { %v1120_v12 = vmax.f32 %v1056_v9, 0.0  ;;  %2706 = vmatmul.mubr.msk.bf16.gmra.mrb[56].mxu1 %vm1233_vm3, %v1214_v1  ;;  %v1183_v14 = vmin.f32 %v1119_v8, 6.0 }
 0x165   : > { %v1118_v13 = vmax.f32 %v1054_v11, 0.0  ;;  %v1181_v16 = vmin.f32 %v1117_v10, 6.0 }
 0x166   : > { %v1184_v15 = vmin.f32 %v1120_v12, 6.0 }
 0x167   : > { %v1182_v17 = vmin.f32 %v1118_v13, 6.0 }
 0x168   : > { %v1216_v18 = vpack.c.bf16 %v1184_v15, %v1183_v14 }
 0x169   : > { %v1215_v19 = vpack.c.bf16 %v1182_v17, %v1181_v16 }
 0x16b   : > { %2709 = vmatprep.mubr.msk.bf16.mxu1 %vm1233_vm3, %v1215_v19 }
 0x16c   : > { %2710 = vmatmul.mubr.msk.bf16.gmra.mrb[60].mxu1 %vm1233_vm3, %v1216_v18 }
 0x1c7   : > { %v2651_v42 = vpop.f32.mrb[0].mxu1 }
 0x1c8   : > { %v1628_v21 = vmul.f32 %v2651_v42, %v3074_v40  ;;  %v1364_v22 = vpop.f32.mrb[1].mxu1 }
 0x1c9   : > { %v1626_v23 = vmul.f32 %v3074_v40, %v1364_v22  ;;  %v2652_v24 = vpop.f32.mrb[2].mxu1 }
 0x1ca   : > { %v1699_v25 = vadd.f32 %v3079_v20, %v1628_v21  ;;  %v1629_v26 = vmul.f32 %v2652_v24, %v3074_v40  ;;  %v1367_v27 = vpop.f32.mrb[3].mxu1 }
 0x1cb   : > { %v1697_v28 = vadd.f32 %v3079_v20, %v1626_v23  ;;  %v1627_v29 = vmul.f32 %v3074_v40, %v1367_v27 }
 0x1cc   : > { %v1763_v30 = vmax.f32 %v1699_v25, 0.0  ;;  %v1700_v31 = vadd.f32 %v3079_v20, %v1629_v26 }
 0x1cd   : > { %v1761_v32 = vmax.f32 %v1697_v28, 0.0  ;;  %v1698_v33 = vadd.f32 %v3079_v20, %v1627_v29 }
 0x1ce   : > { %v1827_v34 = vmin.f32 %v1763_v30, 6.0  ;;  %v1764_v35 = vmax.f32 %v1700_v31, 0.0 }
 0x1cf   : > { %v1825_v36 = vmin.f32 %v1761_v32, 6.0  ;;  %v1762_v37 = vmax.f32 %v1698_v33, 0.0  ;;  %v2655_v38 = vpop.f32.mrb[4].mxu1 }
 0x1d0   : > { %v2447_v39 = vpack.c.bf16 %v1827_v34, %v1827_v34  ;;  %v1828_v41 = vmin.f32 %v1764_v35, 6.0  ;;  %v1632_v43 = vmul.f32 %v2655_v38, %v3074_v40  ;;  %v1380_v44 = vpop.f32.mrb[5].mxu1 }
 0x1d1   : > { %v2445_v45 = vpack.c.bf16 %v1825_v36, %v1825_v36  ;;  %v1826_v46 = vmin.f32 %v1762_v37, 6.0  ;;  %v1630_v47 = vmul.f32 %v3074_v40, %v1380_v44  ;;  %v2656_v48 = vpop.f32.mrb[6].mxu1 }
 0x1d2   : > { %2148 = vst.msk [vmem:[%s3094_s27 + $0x8] sm:$0xf] %vm2145_vm4, %v2447_v39  ;;  %v2448_v49 = vpack.c.bf16 %v1828_v41, %v1828_v41  ;;  %v1703_v50 = vadd.f32 %v3079_v20, %v1632_v43  ;;  %v1633_v51 = vmul.f32 %v2656_v48, %v3074_v40  ;;  %v1383_v52 = vpop.f32.mrb[7].mxu1 }
 0x1d3   : > { %2146 = vst.msk [vmem:[%s3094_s27] sm:$0xf] %vm2145_vm4, %v2445_v45  ;;  %v2446_v53 = vpack.c.bf16 %v1826_v46, %v1826_v46  ;;  %v1701_v54 = vadd.f32 %v3079_v20, %v1630_v47  ;;  %v1631_v55 = vmul.f32 %v3074_v40, %v1383_v52 }
 0x1d4   : > { %2149 = vst.msk [vmem:[%s3094_s27 + $0xc] sm:$0xf] %vm2145_vm4, %v2448_v49  ;;  %v1767_v56 = vmax.f32 %v1703_v50, 0.0  ;;  %v1704_v57 = vadd.f32 %v3079_v20, %v1633_v51 }
 0x1d5   : > { %2147 = vst.msk [vmem:[%s3094_s27 + $0x4] sm:$0xf] %vm2145_vm4, %v2446_v53  ;;  %v1765_v58 = vmax.f32 %v1701_v54, 0.0  ;;  %v1702_v59 = vadd.f32 %v3079_v20, %v1631_v55 }
 0x1d6   : > { %v1831_v60 = vmin.f32 %v1767_v56, 6.0  ;;  %v1768_v61 = vmax.f32 %v1704_v57, 0.0 }
 0x1d7   : > { %v1829_v62 = vmin.f32 %v1765_v58, 6.0  ;;  %v1766_v63 = vmax.f32 %v1702_v59, 0.0  ;;  %v2659_v0 = vpop.f32.mrb[8].mxu1 }
 0x1d8   : > { %v2451_v1 = vpack.c.bf16 %v1831_v60, %v1831_v60  ;;  %v1832_v2 = vmin.f32 %v1768_v61, 6.0  ;;  %v1636_v3 = vmul.f32 %v2659_v0, %v3074_v40  ;;  %v1396_v4 = vpop.f32.mrb[9].mxu1 }
 0x1d9   : > { %v2449_v5 = vpack.c.bf16 %v1829_v62, %v1829_v62  ;;  %v1830_v6 = vmin.f32 %v1766_v63, 6.0  ;;  %v1634_v7 = vmul.f32 %v3074_v40, %v1396_v4  ;;  %v2660_v8 = vpop.f32.mrb[10].mxu1 }
 0x1da   : > { %2152 = vst.msk [vmem:[%s3094_s27 + $0x18] sm:$0xf] %vm2145_vm4, %v2451_v1  ;;  %v2452_v9 = vpack.c.bf16 %v1832_v2, %v1832_v2  ;;  %v1707_v10 = vadd.f32 %v3079_v20, %v1636_v3  ;;  %v1637_v11 = vmul.f32 %v2660_v8, %v3074_v40  ;;  %v1399_v12 = vpop.f32.mrb[11].mxu1 }
 0x1db   : > { %2150 = vst.msk [vmem:[%s3094_s27 + $0x10] sm:$0xf] %vm2145_vm4, %v2449_v5  ;;  %v2450_v13 = vpack.c.bf16 %v1830_v6, %v1830_v6  ;;  %v1705_v14 = vadd.f32 %v3079_v20, %v1634_v7  ;;  %v1635_v15 = vmul.f32 %v3074_v40, %v1399_v12 }
 0x1dc   : > { %2153 = vst.msk [vmem:[%s3094_s27 + $0x1c] sm:$0xf] %vm2145_vm4, %v2452_v9  ;;  %v1771_v16 = vmax.f32 %v1707_v10, 0.0  ;;  %v1708_v17 = vadd.f32 %v3079_v20, %v1637_v11 }
 0x1dd   : > { %2151 = vst.msk [vmem:[%s3094_s27 + $0x14] sm:$0xf] %vm2145_vm4, %v2450_v13  ;;  %v1769_v18 = vmax.f32 %v1705_v14, 0.0  ;;  %v1706_v19 = vadd.f32 %v3079_v20, %v1635_v15 }
 0x1de   : > { %v1835_v42 = vmin.f32 %v1771_v16, 6.0  ;;  %v1772_v21 = vmax.f32 %v1708_v17, 0.0 }
 0x1df   : > { %v1833_v22 = vmin.f32 %v1769_v18, 6.0  ;;  %v1770_v23 = vmax.f32 %v1706_v19, 0.0  ;;  %v2663_v24 = vpop.f32.mrb[12].mxu1 }
 0x1e0   : > { %v2455_v25 = vpack.c.bf16 %v1835_v42, %v1835_v42  ;;  %v1836_v26 = vmin.f32 %v1772_v21, 6.0  ;;  %v1640_v27 = vmul.f32 %v2663_v24, %v3074_v40  ;;  %v1412_v28 = vpop.f32.mrb[13].mxu1 }
 0x1e1   : > { %v2453_v29 = vpack.c.bf16 %v1833_v22, %v1833_v22  ;;  %v1834_v30 = vmin.f32 %v1770_v23, 6.0  ;;  %v1638_v31 = vmul.f32 %v3074_v40, %v1412_v28  ;;  %v2664_v32 = vpop.f32.mrb[14].mxu1 }
 0x1e2   : > { %2156 = vst.msk [vmem:[%s3094_s27 + $0x28] sm:$0xf] %vm2145_vm4, %v2455_v25  ;;  %v2456_v33 = vpack.c.bf16 %v1836_v26, %v1836_v26  ;;  %v1711_v34 = vadd.f32 %v3079_v20, %v1640_v27  ;;  %v1641_v35 = vmul.f32 %v2664_v32, %v3074_v40  ;;  %v1415_v36 = vpop.f32.mrb[15].mxu1 }
 0x1e3   : > { %2154 = vst.msk [vmem:[%s3094_s27 + $0x20] sm:$0xf] %vm2145_vm4, %v2453_v29  ;;  %v2454_v37 = vpack.c.bf16 %v1834_v30, %v1834_v30  ;;  %v1709_v38 = vadd.f32 %v3079_v20, %v1638_v31  ;;  %v1639_v39 = vmul.f32 %v3074_v40, %v1415_v36 }
 0x1e4   : > { %2157 = vst.msk [vmem:[%s3094_s27 + $0x2c] sm:$0xf] %vm2145_vm4, %v2456_v33  ;;  %v1775_v41 = vmax.f32 %v1711_v34, 0.0  ;;  %v1712_v43 = vadd.f32 %v3079_v20, %v1641_v35 }
 0x1e5   : > { %2155 = vst.msk [vmem:[%s3094_s27 + $0x24] sm:$0xf] %vm2145_vm4, %v2454_v37  ;;  %v1773_v44 = vmax.f32 %v1709_v38, 0.0  ;;  %v1710_v45 = vadd.f32 %v3079_v20, %v1639_v39 }
 0x1e6   : > { %v1839_v46 = vmin.f32 %v1775_v41, 6.0  ;;  %v1776_v47 = vmax.f32 %v1712_v43, 0.0 }
 0x1e7   : > { %v1837_v48 = vmin.f32 %v1773_v44, 6.0  ;;  %v1774_v49 = vmax.f32 %v1710_v45, 0.0  ;;  %v2667_v50 = vpop.f32.mrb[16].mxu1 }
 0x1e8   : > { %v2459_v51 = vpack.c.bf16 %v1839_v46, %v1839_v46  ;;  %v1840_v52 = vmin.f32 %v1776_v47, 6.0  ;;  %v1644_v53 = vmul.f32 %v2667_v50, %v3074_v40  ;;  %v1428_v54 = vpop.f32.mrb[17].mxu1 }
 0x1e9   : > { %v2457_v55 = vpack.c.bf16 %v1837_v48, %v1837_v48  ;;  %v1838_v56 = vmin.f32 %v1774_v49, 6.0  ;;  %v1642_v57 = vmul.f32 %v3074_v40, %v1428_v54  ;;  %v2668_v58 = vpop.f32.mrb[18].mxu1 }
 0x1ea   : > { %2160 = vst.msk [vmem:[%s3094_s27 + $0x38] sm:$0xf] %vm2145_vm4, %v2459_v51  ;;  %v2460_v59 = vpack.c.bf16 %v1840_v52, %v1840_v52  ;;  %v1715_v60 = vadd.f32 %v3079_v20, %v1644_v53  ;;  %v1645_v61 = vmul.f32 %v2668_v58, %v3074_v40  ;;  %v1431_v62 = vpop.f32.mrb[19].mxu1 }
 0x1eb   : > { %2158 = vst.msk [vmem:[%s3094_s27 + $0x30] sm:$0xf] %vm2145_vm4, %v2457_v55  ;;  %v2458_v63 = vpack.c.bf16 %v1838_v56, %v1838_v56  ;;  %v1713_v0 = vadd.f32 %v3079_v20, %v1642_v57  ;;  %v1643_v1 = vmul.f32 %v3074_v40, %v1431_v62 }
 0x1ec   : > { %2161 = vst.msk [vmem:[%s3094_s27 + $0x3c] sm:$0xf] %vm2145_vm4, %v2460_v59  ;;  %v1779_v2 = vmax.f32 %v1715_v60, 0.0  ;;  %v1716_v3 = vadd.f32 %v3079_v20, %v1645_v61 }
 0x1ed   : > { %2159 = vst.msk [vmem:[%s3094_s27 + $0x34] sm:$0xf] %vm2145_vm4, %v2458_v63  ;;  %v1777_v4 = vmax.f32 %v1713_v0, 0.0  ;;  %v1714_v5 = vadd.f32 %v3079_v20, %v1643_v1 }
 0x1ee   : > { %v1843_v6 = vmin.f32 %v1779_v2, 6.0  ;;  %v1780_v7 = vmax.f32 %v1716_v3, 0.0 }
 0x1ef   : > { %v1841_v8 = vmin.f32 %v1777_v4, 6.0  ;;  %v1778_v9 = vmax.f32 %v1714_v5, 0.0  ;;  %v2671_v10 = vpop.f32.mrb[20].mxu1 }
 0x1f0   : > { %v2463_v11 = vpack.c.bf16 %v1843_v6, %v1843_v6  ;;  %v1844_v12 = vmin.f32 %v1780_v7, 6.0  ;;  %v1648_v13 = vmul.f32 %v2671_v10, %v3074_v40  ;;  %v1444_v14 = vpop.f32.mrb[21].mxu1 }
 0x1f1   : > { %v2461_v15 = vpack.c.bf16 %v1841_v8, %v1841_v8  ;;  %v1842_v16 = vmin.f32 %v1778_v9, 6.0  ;;  %v1646_v17 = vmul.f32 %v3074_v40, %v1444_v14  ;;  %v2672_v18 = vpop.f32.mrb[22].mxu1 }
 0x1f2   : > { %2164 = vst.msk [vmem:[%s3094_s27 + $0x48] sm:$0xf] %vm2145_vm4, %v2463_v11  ;;  %v2464_v19 = vpack.c.bf16 %v1844_v12, %v1844_v12  ;;  %v1719_v42 = vadd.f32 %v3079_v20, %v1648_v13  ;;  %v1649_v21 = vmul.f32 %v2672_v18, %v3074_v40  ;;  %v1447_v22 = vpop.f32.mrb[23].mxu1 }
 0x1f3   : > { %2162 = vst.msk [vmem:[%s3094_s27 + $0x40] sm:$0xf] %vm2145_vm4, %v2461_v15  ;;  %v2462_v23 = vpack.c.bf16 %v1842_v16, %v1842_v16  ;;  %v1717_v24 = vadd.f32 %v3079_v20, %v1646_v17  ;;  %v1647_v25 = vmul.f32 %v3074_v40, %v1447_v22 }
 0x1f4   : > { %2165 = vst.msk [vmem:[%s3094_s27 + $0x4c] sm:$0xf] %vm2145_vm4, %v2464_v19  ;;  %v1783_v26 = vmax.f32 %v1719_v42, 0.0  ;;  %v1720_v27 = vadd.f32 %v3079_v20, %v1649_v21 }
 0x1f5   : > { %2163 = vst.msk [vmem:[%s3094_s27 + $0x44] sm:$0xf] %vm2145_vm4, %v2462_v23  ;;  %v1781_v28 = vmax.f32 %v1717_v24, 0.0  ;;  %v1718_v29 = vadd.f32 %v3079_v20, %v1647_v25 }
 0x1f6   : > { %v1847_v30 = vmin.f32 %v1783_v26, 6.0  ;;  %v1784_v31 = vmax.f32 %v1720_v27, 0.0 }
 0x1f7   : > { %v1845_v32 = vmin.f32 %v1781_v28, 6.0  ;;  %v1782_v33 = vmax.f32 %v1718_v29, 0.0  ;;  %v2675_v34 = vpop.f32.mrb[24].mxu1 }
 0x1f8   : > { %v2467_v35 = vpack.c.bf16 %v1847_v30, %v1847_v30  ;;  %v1848_v36 = vmin.f32 %v1784_v31, 6.0  ;;  %v1652_v37 = vmul.f32 %v2675_v34, %v3074_v40  ;;  %v1460_v38 = vpop.f32.mrb[25].mxu1 }
 0x1f9   : > { %v2465_v39 = vpack.c.bf16 %v1845_v32, %v1845_v32  ;;  %v1846_v41 = vmin.f32 %v1782_v33, 6.0  ;;  %v1650_v43 = vmul.f32 %v3074_v40, %v1460_v38  ;;  %v2676_v44 = vpop.f32.mrb[26].mxu1 }
 0x1fa   : > { %2168 = vst.msk [vmem:[%s3094_s27 + $0x58] sm:$0xf] %vm2145_vm4, %v2467_v35  ;;  %v2468_v45 = vpack.c.bf16 %v1848_v36, %v1848_v36  ;;  %v1723_v46 = vadd.f32 %v3079_v20, %v1652_v37  ;;  %v1653_v47 = vmul.f32 %v2676_v44, %v3074_v40  ;;  %v1463_v48 = vpop.f32.mrb[27].mxu1 }
 0x1fb   : > { %2166 = vst.msk [vmem:[%s3094_s27 + $0x50] sm:$0xf] %vm2145_vm4, %v2465_v39  ;;  %v2466_v49 = vpack.c.bf16 %v1846_v41, %v1846_v41  ;;  %v1721_v50 = vadd.f32 %v3079_v20, %v1650_v43  ;;  %v1651_v51 = vmul.f32 %v3074_v40, %v1463_v48 }
 0x1fc   : > { %2169 = vst.msk [vmem:[%s3094_s27 + $0x5c] sm:$0xf] %vm2145_vm4, %v2468_v45  ;;  %v1787_v52 = vmax.f32 %v1723_v46, 0.0  ;;  %v1724_v53 = vadd.f32 %v3079_v20, %v1653_v47 }
 0x1fd   : > { %2167 = vst.msk [vmem:[%s3094_s27 + $0x54] sm:$0xf] %vm2145_vm4, %v2466_v49  ;;  %v1785_v54 = vmax.f32 %v1721_v50, 0.0  ;;  %v1722_v55 = vadd.f32 %v3079_v20, %v1651_v51 }
 0x1fe   : > { %v1851_v56 = vmin.f32 %v1787_v52, 6.0  ;;  %v1788_v57 = vmax.f32 %v1724_v53, 0.0 }
 0x1ff   : > { %v1849_v58 = vmin.f32 %v1785_v54, 6.0  ;;  %v1786_v59 = vmax.f32 %v1722_v55, 0.0  ;;  %v2679_v60 = vpop.f32.mrb[28].mxu1 }
 0x200   : > { %v2471_v61 = vpack.c.bf16 %v1851_v56, %v1851_v56  ;;  %v1852_v62 = vmin.f32 %v1788_v57, 6.0  ;;  %v1656_v63 = vmul.f32 %v2679_v60, %v3074_v40  ;;  %v1476_v0 = vpop.f32.mrb[29].mxu1 }
 0x201   : > { %v2469_v1 = vpack.c.bf16 %v1849_v58, %v1849_v58  ;;  %v1850_v2 = vmin.f32 %v1786_v59, 6.0  ;;  %v1654_v3 = vmul.f32 %v3074_v40, %v1476_v0  ;;  %v2680_v4 = vpop.f32.mrb[30].mxu1 }
 0x202   : > { %2172 = vst.msk [vmem:[%s3094_s27 + $0x68] sm:$0xf] %vm2145_vm4, %v2471_v61  ;;  %v2472_v5 = vpack.c.bf16 %v1852_v62, %v1852_v62  ;;  %v1727_v6 = vadd.f32 %v3079_v20, %v1656_v63  ;;  %v1657_v7 = vmul.f32 %v2680_v4, %v3074_v40  ;;  %v1479_v8 = vpop.f32.mrb[31].mxu1 }
 0x203   : > { %2170 = vst.msk [vmem:[%s3094_s27 + $0x60] sm:$0xf] %vm2145_vm4, %v2469_v1  ;;  %v2470_v9 = vpack.c.bf16 %v1850_v2, %v1850_v2  ;;  %v1725_v10 = vadd.f32 %v3079_v20, %v1654_v3  ;;  %v1655_v11 = vmul.f32 %v3074_v40, %v1479_v8 }
 0x204   : > { %2173 = vst.msk [vmem:[%s3094_s27 + $0x6c] sm:$0xf] %vm2145_vm4, %v2472_v5  ;;  %v1791_v12 = vmax.f32 %v1727_v6, 0.0  ;;  %v1728_v13 = vadd.f32 %v3079_v20, %v1657_v7 }
 0x205   : > { %2171 = vst.msk [vmem:[%s3094_s27 + $0x64] sm:$0xf] %vm2145_vm4, %v2470_v9  ;;  %v1789_v14 = vmax.f32 %v1725_v10, 0.0  ;;  %v1726_v15 = vadd.f32 %v3079_v20, %v1655_v11 }
 0x206   : > { %v1855_v16 = vmin.f32 %v1791_v12, 6.0  ;;  %v1792_v17 = vmax.f32 %v1728_v13, 0.0 }
 0x207   : > { %v1853_v18 = vmin.f32 %v1789_v14, 6.0  ;;  %v1790_v19 = vmax.f32 %v1726_v15, 0.0  ;;  %v2683_v42 = vpop.f32.mrb[32].mxu1 }
 0x208   : > { %v2475_v21 = vpack.c.bf16 %v1855_v16, %v1855_v16  ;;  %v1856_v22 = vmin.f32 %v1792_v17, 6.0  ;;  %v1660_v23 = vmul.f32 %v2683_v42, %v3074_v40  ;;  %v1492_v24 = vpop.f32.mrb[33].mxu1 }
 0x209   : > { %v2473_v25 = vpack.c.bf16 %v1853_v18, %v1853_v18  ;;  %v1854_v26 = vmin.f32 %v1790_v19, 6.0  ;;  %v1658_v27 = vmul.f32 %v3074_v40, %v1492_v24  ;;  %v2684_v28 = vpop.f32.mrb[34].mxu1 }
 0x20a   : > { %2176 = vst.msk [vmem:[%s3094_s27 + $0x78] sm:$0xf] %vm2145_vm4, %v2475_v21  ;;  %v2476_v29 = vpack.c.bf16 %v1856_v22, %v1856_v22  ;;  %v1731_v30 = vadd.f32 %v3079_v20, %v1660_v23  ;;  %v1661_v31 = vmul.f32 %v2684_v28, %v3074_v40  ;;  %v1495_v32 = vpop.f32.mrb[35].mxu1 }
 0x20b   : > { %2174 = vst.msk [vmem:[%s3094_s27 + $0x70] sm:$0xf] %vm2145_vm4, %v2473_v25  ;;  %v2474_v33 = vpack.c.bf16 %v1854_v26, %v1854_v26  ;;  %v1729_v34 = vadd.f32 %v3079_v20, %v1658_v27  ;;  %v1659_v35 = vmul.f32 %v3074_v40, %v1495_v32 }
 0x20c   : > { %2177 = vst.msk [vmem:[%s3094_s27 + $0x7c] sm:$0xf] %vm2145_vm4, %v2476_v29  ;;  %v1795_v36 = vmax.f32 %v1731_v30, 0.0  ;;  %v1732_v37 = vadd.f32 %v3079_v20, %v1661_v31 }
 0x20d   : > { %2175 = vst.msk [vmem:[%s3094_s27 + $0x74] sm:$0xf] %vm2145_vm4, %v2474_v33  ;;  %v1793_v38 = vmax.f32 %v1729_v34, 0.0  ;;  %v1730_v39 = vadd.f32 %v3079_v20, %v1659_v35 }
 0x20e   : > { %v1859_v41 = vmin.f32 %v1795_v36, 6.0  ;;  %v1796_v43 = vmax.f32 %v1732_v37, 0.0 }
 0x20f   : > { %v1857_v44 = vmin.f32 %v1793_v38, 6.0  ;;  %v1794_v45 = vmax.f32 %v1730_v39, 0.0  ;;  %v2687_v46 = vpop.f32.mrb[36].mxu1 }
 0x210   : > { %v2479_v47 = vpack.c.bf16 %v1859_v41, %v1859_v41  ;;  %v1860_v48 = vmin.f32 %v1796_v43, 6.0  ;;  %v1664_v49 = vmul.f32 %v2687_v46, %v3074_v40  ;;  %v1508_v50 = vpop.f32.mrb[37].mxu1 }
 0x211   : > { %v2477_v51 = vpack.c.bf16 %v1857_v44, %v1857_v44  ;;  %v1858_v52 = vmin.f32 %v1794_v45, 6.0  ;;  %v1662_v53 = vmul.f32 %v3074_v40, %v1508_v50  ;;  %v2688_v54 = vpop.f32.mrb[38].mxu1 }
 0x212   : > { %2180 = vst.msk [vmem:[%s3094_s27 + $0x88] sm:$0xf] %vm2145_vm4, %v2479_v47  ;;  %v2480_v55 = vpack.c.bf16 %v1860_v48, %v1860_v48  ;;  %v1735_v56 = vadd.f32 %v3079_v20, %v1664_v49  ;;  %v1665_v57 = vmul.f32 %v2688_v54, %v3074_v40  ;;  %v1511_v58 = vpop.f32.mrb[39].mxu1 }
 0x213   : > { %2178 = vst.msk [vmem:[%s3094_s27 + $0x80] sm:$0xf] %vm2145_vm4, %v2477_v51  ;;  %v2478_v59 = vpack.c.bf16 %v1858_v52, %v1858_v52  ;;  %v1733_v60 = vadd.f32 %v3079_v20, %v1662_v53  ;;  %v1663_v61 = vmul.f32 %v3074_v40, %v1511_v58 }
 0x214   : > { %2181 = vst.msk [vmem:[%s3094_s27 + $0x8c] sm:$0xf] %vm2145_vm4, %v2480_v55  ;;  %v1799_v62 = vmax.f32 %v1735_v56, 0.0  ;;  %v1736_v63 = vadd.f32 %v3079_v20, %v1665_v57 }
 0x215   : > { %2179 = vst.msk [vmem:[%s3094_s27 + $0x84] sm:$0xf] %vm2145_vm4, %v2478_v59  ;;  %v1797_v0 = vmax.f32 %v1733_v60, 0.0  ;;  %v1734_v1 = vadd.f32 %v3079_v20, %v1663_v61 }
 0x216   : > { %v1863_v2 = vmin.f32 %v1799_v62, 6.0  ;;  %v1800_v3 = vmax.f32 %v1736_v63, 0.0 }
 0x217   : > { %v1861_v4 = vmin.f32 %v1797_v0, 6.0  ;;  %v1798_v5 = vmax.f32 %v1734_v1, 0.0  ;;  %v2691_v6 = vpop.f32.mrb[40].mxu1 }
 0x218   : > { %v2483_v7 = vpack.c.bf16 %v1863_v2, %v1863_v2  ;;  %v1864_v8 = vmin.f32 %v1800_v3, 6.0  ;;  %v1668_v9 = vmul.f32 %v2691_v6, %v3074_v40  ;;  %v1524_v10 = vpop.f32.mrb[41].mxu1 }
 0x219   : > { %v2481_v11 = vpack.c.bf16 %v1861_v4, %v1861_v4  ;;  %v1862_v12 = vmin.f32 %v1798_v5, 6.0  ;;  %v1666_v13 = vmul.f32 %v3074_v40, %v1524_v10  ;;  %v2692_v14 = vpop.f32.mrb[42].mxu1 }
 0x21a   : > { %2184 = vst.msk [vmem:[%s3094_s27 + $0x98] sm:$0xf] %vm2145_vm4, %v2483_v7  ;;  %v2484_v15 = vpack.c.bf16 %v1864_v8, %v1864_v8  ;;  %v1739_v16 = vadd.f32 %v3079_v20, %v1668_v9  ;;  %v1669_v17 = vmul.f32 %v2692_v14, %v3074_v40  ;;  %v1527_v18 = vpop.f32.mrb[43].mxu1 }
 0x21b   : > { %2182 = vst.msk [vmem:[%s3094_s27 + $0x90] sm:$0xf] %vm2145_vm4, %v2481_v11  ;;  %v2482_v19 = vpack.c.bf16 %v1862_v12, %v1862_v12  ;;  %v1737_v42 = vadd.f32 %v3079_v20, %v1666_v13  ;;  %v1667_v21 = vmul.f32 %v3074_v40, %v1527_v18 }
 0x21c   : > { %2185 = vst.msk [vmem:[%s3094_s27 + $0x9c] sm:$0xf] %vm2145_vm4, %v2484_v15  ;;  %v1803_v22 = vmax.f32 %v1739_v16, 0.0  ;;  %v1740_v23 = vadd.f32 %v3079_v20, %v1669_v17 }
 0x21d   : > { %2183 = vst.msk [vmem:[%s3094_s27 + $0x94] sm:$0xf] %vm2145_vm4, %v2482_v19  ;;  %v1801_v24 = vmax.f32 %v1737_v42, 0.0  ;;  %v1738_v25 = vadd.f32 %v3079_v20, %v1667_v21 }
 0x21e   : > { %v1867_v26 = vmin.f32 %v1803_v22, 6.0  ;;  %v1804_v27 = vmax.f32 %v1740_v23, 0.0 }
 0x21f   : > { %v1865_v28 = vmin.f32 %v1801_v24, 6.0  ;;  %v1802_v29 = vmax.f32 %v1738_v25, 0.0  ;;  %v2695_v30 = vpop.f32.mrb[44].mxu1 }
 0x220   : > { %v2487_v31 = vpack.c.bf16 %v1867_v26, %v1867_v26  ;;  %v1868_v32 = vmin.f32 %v1804_v27, 6.0  ;;  %v1672_v33 = vmul.f32 %v2695_v30, %v3074_v40  ;;  %v1540_v34 = vpop.f32.mrb[45].mxu1 }
 0x221   : > { %v2485_v35 = vpack.c.bf16 %v1865_v28, %v1865_v28  ;;  %v1866_v36 = vmin.f32 %v1802_v29, 6.0  ;;  %v1670_v37 = vmul.f32 %v3074_v40, %v1540_v34  ;;  %v2696_v38 = vpop.f32.mrb[46].mxu1 }
 0x222   : > { %2188 = vst.msk [vmem:[%s3094_s27 + $0xa8] sm:$0xf] %vm2145_vm4, %v2487_v31  ;;  %v2488_v39 = vpack.c.bf16 %v1868_v32, %v1868_v32  ;;  %v1743_v41 = vadd.f32 %v3079_v20, %v1672_v33  ;;  %v1673_v43 = vmul.f32 %v2696_v38, %v3074_v40  ;;  %v1543_v44 = vpop.f32.mrb[47].mxu1 }
 0x223   : > { %2186 = vst.msk [vmem:[%s3094_s27 + $0xa0] sm:$0xf] %vm2145_vm4, %v2485_v35  ;;  %v2486_v45 = vpack.c.bf16 %v1866_v36, %v1866_v36  ;;  %v1741_v46 = vadd.f32 %v3079_v20, %v1670_v37  ;;  %v1671_v47 = vmul.f32 %v3074_v40, %v1543_v44 }
 0x224   : > { %2189 = vst.msk [vmem:[%s3094_s27 + $0xac] sm:$0xf] %vm2145_vm4, %v2488_v39  ;;  %v1807_v48 = vmax.f32 %v1743_v41, 0.0  ;;  %v1744_v49 = vadd.f32 %v3079_v20, %v1673_v43 }
 0x225   : > { %2187 = vst.msk [vmem:[%s3094_s27 + $0xa4] sm:$0xf] %vm2145_vm4, %v2486_v45  ;;  %v1805_v50 = vmax.f32 %v1741_v46, 0.0  ;;  %v1742_v51 = vadd.f32 %v3079_v20, %v1671_v47 }
 0x226   : > { %v1871_v52 = vmin.f32 %v1807_v48, 6.0  ;;  %v1808_v53 = vmax.f32 %v1744_v49, 0.0 }
 0x227   : > { %v1869_v54 = vmin.f32 %v1805_v50, 6.0  ;;  %v1806_v55 = vmax.f32 %v1742_v51, 0.0  ;;  %v2699_v56 = vpop.f32.mrb[48].mxu1 }
 0x228   : > { %v2491_v57 = vpack.c.bf16 %v1871_v52, %v1871_v52  ;;  %v1872_v58 = vmin.f32 %v1808_v53, 6.0  ;;  %v1676_v59 = vmul.f32 %v2699_v56, %v3074_v40  ;;  %v1556_v60 = vpop.f32.mrb[49].mxu1 }
 0x229   : > { %v2489_v61 = vpack.c.bf16 %v1869_v54, %v1869_v54  ;;  %v1870_v62 = vmin.f32 %v1806_v55, 6.0  ;;  %v1674_v63 = vmul.f32 %v3074_v40, %v1556_v60  ;;  %v2700_v0 = vpop.f32.mrb[50].mxu1 }
 0x22a   : > { %2192 = vst.msk [vmem:[%s3094_s27 + $0xb8] sm:$0xf] %vm2145_vm4, %v2491_v57  ;;  %v2492_v1 = vpack.c.bf16 %v1872_v58, %v1872_v58  ;;  %v1747_v2 = vadd.f32 %v3079_v20, %v1676_v59  ;;  %v1677_v3 = vmul.f32 %v2700_v0, %v3074_v40  ;;  %v1559_v4 = vpop.f32.mrb[51].mxu1 }
 0x22b   : > { %2190 = vst.msk [vmem:[%s3094_s27 + $0xb0] sm:$0xf] %vm2145_vm4, %v2489_v61  ;;  %v2490_v5 = vpack.c.bf16 %v1870_v62, %v1870_v62  ;;  %v1745_v6 = vadd.f32 %v3079_v20, %v1674_v63  ;;  %v1675_v7 = vmul.f32 %v3074_v40, %v1559_v4 }
 0x22c   : > { %2193 = vst.msk [vmem:[%s3094_s27 + $0xbc] sm:$0xf] %vm2145_vm4, %v2492_v1  ;;  %v1811_v8 = vmax.f32 %v1747_v2, 0.0  ;;  %v1748_v9 = vadd.f32 %v3079_v20, %v1677_v3 }
 0x22d   : > { %2191 = vst.msk [vmem:[%s3094_s27 + $0xb4] sm:$0xf] %vm2145_vm4, %v2490_v5  ;;  %v1809_v10 = vmax.f32 %v1745_v6, 0.0  ;;  %v1746_v11 = vadd.f32 %v3079_v20, %v1675_v7 }
 0x22e   : > { %v1875_v12 = vmin.f32 %v1811_v8, 6.0  ;;  %v1812_v13 = vmax.f32 %v1748_v9, 0.0 }
 0x22f   : > { %v1873_v14 = vmin.f32 %v1809_v10, 6.0  ;;  %v1810_v15 = vmax.f32 %v1746_v11, 0.0  ;;  %v2703_v16 = vpop.f32.mrb[52].mxu1 }
 0x230   : > { %v2495_v17 = vpack.c.bf16 %v1875_v12, %v1875_v12  ;;  %v1876_v18 = vmin.f32 %v1812_v13, 6.0  ;;  %v1680_v19 = vmul.f32 %v2703_v16, %v3074_v40  ;;  %v1572_v42 = vpop.f32.mrb[53].mxu1 }
 0x231   : > { %v2493_v21 = vpack.c.bf16 %v1873_v14, %v1873_v14  ;;  %v1874_v22 = vmin.f32 %v1810_v15, 6.0  ;;  %v1678_v23 = vmul.f32 %v3074_v40, %v1572_v42  ;;  %v2704_v24 = vpop.f32.mrb[54].mxu1 }
 0x232   : > { %2196 = vst.msk [vmem:[%s3094_s27 + $0xc8] sm:$0xf] %vm2145_vm4, %v2495_v17  ;;  %v2496_v25 = vpack.c.bf16 %v1876_v18, %v1876_v18  ;;  %v1751_v26 = vadd.f32 %v3079_v20, %v1680_v19  ;;  %v1681_v27 = vmul.f32 %v2704_v24, %v3074_v40  ;;  %v1575_v28 = vpop.f32.mrb[55].mxu1 }
 0x233   : > { %2194 = vst.msk [vmem:[%s3094_s27 + $0xc0] sm:$0xf] %vm2145_vm4, %v2493_v21  ;;  %v2494_v29 = vpack.c.bf16 %v1874_v22, %v1874_v22  ;;  %v1749_v30 = vadd.f32 %v3079_v20, %v1678_v23  ;;  %v1679_v31 = vmul.f32 %v3074_v40, %v1575_v28 }
 0x234   : > { %2197 = vst.msk [vmem:[%s3094_s27 + $0xcc] sm:$0xf] %vm2145_vm4, %v2496_v25  ;;  %v1815_v32 = vmax.f32 %v1751_v26, 0.0  ;;  %v1752_v33 = vadd.f32 %v3079_v20, %v1681_v27 }
 0x235   : > { %2195 = vst.msk [vmem:[%s3094_s27 + $0xc4] sm:$0xf] %vm2145_vm4, %v2494_v29  ;;  %v1813_v34 = vmax.f32 %v1749_v30, 0.0  ;;  %v1750_v35 = vadd.f32 %v3079_v20, %v1679_v31 }
 0x236   : > { %v1879_v36 = vmin.f32 %v1815_v32, 6.0  ;;  %v1816_v37 = vmax.f32 %v1752_v33, 0.0 }
 0x237   : > { %v1877_v38 = vmin.f32 %v1813_v34, 6.0  ;;  %v1814_v39 = vmax.f32 %v1750_v35, 0.0  ;;  %v2707_v41 = vpop.f32.mrb[56].mxu1 }
 0x238   : > { %v2499_v43 = vpack.c.bf16 %v1879_v36, %v1879_v36  ;;  %v1880_v44 = vmin.f32 %v1816_v37, 6.0  ;;  %v1684_v45 = vmul.f32 %v2707_v41, %v3074_v40  ;;  %v1588_v46 = vpop.f32.mrb[57].mxu1 }
 0x239   : > { %v2497_v47 = vpack.c.bf16 %v1877_v38, %v1877_v38  ;;  %v1878_v48 = vmin.f32 %v1814_v39, 6.0  ;;  %v1682_v49 = vmul.f32 %v3074_v40, %v1588_v46  ;;  %v2708_v50 = vpop.f32.mrb[58].mxu1 }
 0x23a   : > { %2200 = vst.msk [vmem:[%s3094_s27 + $0xd8] sm:$0xf] %vm2145_vm4, %v2499_v43  ;;  %v2500_v51 = vpack.c.bf16 %v1880_v44, %v1880_v44  ;;  %v1755_v52 = vadd.f32 %v3079_v20, %v1684_v45  ;;  %v1685_v53 = vmul.f32 %v2708_v50, %v3074_v40  ;;  %v1591_v54 = vpop.f32.mrb[59].mxu1 }
 0x23b   : > { %2198 = vst.msk [vmem:[%s3094_s27 + $0xd0] sm:$0xf] %vm2145_vm4, %v2497_v47  ;;  %v2498_v55 = vpack.c.bf16 %v1878_v48, %v1878_v48  ;;  %v1753_v56 = vadd.f32 %v3079_v20, %v1682_v49  ;;  %v1683_v57 = vmul.f32 %v3074_v40, %v1591_v54 }
 0x23c   : > { %2201 = vst.msk [vmem:[%s3094_s27 + $0xdc] sm:$0xf] %vm2145_vm4, %v2500_v51  ;;  %v1819_v58 = vmax.f32 %v1755_v52, 0.0  ;;  %v1756_v59 = vadd.f32 %v3079_v20, %v1685_v53 }
 0x23d   : > { %2199 = vst.msk [vmem:[%s3094_s27 + $0xd4] sm:$0xf] %vm2145_vm4, %v2498_v55  ;;  %v1817_v60 = vmax.f32 %v1753_v56, 0.0  ;;  %v1754_v61 = vadd.f32 %v3079_v20, %v1683_v57 }
 0x23e   : > { %v1883_v62 = vmin.f32 %v1819_v58, 6.0  ;;  %v1820_v63 = vmax.f32 %v1756_v59, 0.0 }
 0x23f   : > { %v1881_v0 = vmin.f32 %v1817_v60, 6.0  ;;  %v1818_v1 = vmax.f32 %v1754_v61, 0.0  ;;  %v2711_v2 = vpop.f32.mrb[60].mxu1 }
 0x240   : > { %v2503_v3 = vpack.c.bf16 %v1883_v62, %v1883_v62  ;;  %v1884_v4 = vmin.f32 %v1820_v63, 6.0  ;;  %v1688_v5 = vmul.f32 %v2711_v2, %v3074_v40  ;;  %v1604_v6 = vpop.f32.mrb[61].mxu1 }
 0x241   : > { %v2501_v7 = vpack.c.bf16 %v1881_v0, %v1881_v0  ;;  %v1882_v8 = vmin.f32 %v1818_v1, 6.0  ;;  %v1686_v9 = vmul.f32 %v3074_v40, %v1604_v6  ;;  %v2712_v10 = vpop.f32.mrb[62].mxu1 }
 0x242   : > { %2204 = vst.msk [vmem:[%s3094_s27 + $0xe8] sm:$0xf] %vm2145_vm4, %v2503_v3  ;;  %v2504_v11 = vpack.c.bf16 %v1884_v4, %v1884_v4  ;;  %v1759_v12 = vadd.f32 %v3079_v20, %v1688_v5  ;;  %v1689_v13 = vmul.f32 %v2712_v10, %v3074_v40  ;;  %v1607_v14 = vpop.f32.mrb[63].mxu1 }
 0x243   : > { %2202 = vst.msk [vmem:[%s3094_s27 + $0xe0] sm:$0xf] %vm2145_vm4, %v2501_v7  ;;  %v2502_v15 = vpack.c.bf16 %v1882_v8, %v1882_v8  ;;  %v1757_v16 = vadd.f32 %v3079_v20, %v1686_v9  ;;  %v1687_v17 = vmul.f32 %v3074_v40, %v1607_v14 }
 0x244   : > { %2205 = vst.msk [vmem:[%s3094_s27 + $0xec] sm:$0xf] %vm2145_vm4, %v2504_v11  ;;  %v1823_v18 = vmax.f32 %v1759_v12, 0.0  ;;  %v1760_v19 = vadd.f32 %v3079_v20, %v1689_v13 }
 0x245   : > { %2203 = vst.msk [vmem:[%s3094_s27 + $0xe4] sm:$0xf] %vm2145_vm4, %v2502_v15  ;;  %v1821_v42 = vmax.f32 %v1757_v16, 0.0  ;;  %v1758_v21 = vadd.f32 %v3079_v20, %v1687_v17 }
 0x246   : > { %v1887_v22 = vmin.f32 %v1823_v18, 6.0  ;;  %v1824_v23 = vmax.f32 %v1760_v19, 0.0 }
 0x247   : > { %v1885_v24 = vmin.f32 %v1821_v42, 6.0  ;;  %v1822_v25 = vmax.f32 %v1758_v21, 0.0 }
 0x248   : > { %v2507_v26 = vpack.c.bf16 %v1887_v22, %v1887_v22  ;;  %v1888_v27 = vmin.f32 %v1824_v23, 6.0 }
 0x249   : > { %v2505_v40 = vpack.c.bf16 %v1885_v24, %v1885_v24  ;;  %v1886_v28 = vmin.f32 %v1822_v25, 6.0 }
 0x24a   : > { %2208 = vst.msk [vmem:[%s3094_s27 + $0xf8] sm:$0xf] %vm2145_vm4, %v2507_v26  ;;  %v2508_v29 = vpack.c.bf16 %v1888_v27, %v1888_v27 }
 0x24b   : > { %2206 = vst.msk [vmem:[%s3094_s27 + $0xf0] sm:$0xf] %vm2145_vm4, %v2505_v40  ;;  %v2506_v30 = vpack.c.bf16 %v1886_v28, %v1886_v28 }
 0x24c   : > { %2209 = vst.msk [vmem:[%s3094_s27 + $0xfc] sm:$0xf] %vm2145_vm4, %v2508_v29 }
 0x24d   : > { %2207 = vst.msk [vmem:[%s3094_s27 + $0xf4] sm:$0xf] %vm2145_vm4, %v2506_v30 }
 0x24e PF: > { %s17_s24 = sadd.s32 1, %s2764_s24  }
 0x24f   : > { %p14_p4 = scmp.ge.s32.totalorder %s17_s24, 6  }
 0x251   :  { %16 = sbr.rel (!%p14_p4) target bundleno = 1 (0x1), region = 78 }

// kernel: forward.9
= control target key start
LH: loop header
LB: loop body
LE: loop exit
PB: predicated region body
PF: predicated region fallthrough
CT: control target
= control target key end

     0   :  { %s5122_s13 = smov 0   ;;  %s5124_s14 = smov 0   ;;  %s6289_s0 = inlined_call_operand.vmem [shape: bf16[9,512,32], index: 0, kind: input, shape index: {}]   ;;  %s6290_s1 = inlined_call_operand.vmem [shape: f32[9,32], index: 1, kind: input, shape index: {}]   ;;  %s6291_s2 = inlined_call_operand.vmem [shape: f32[1,32], index: 2, kind: input, shape index: {}]   ;;  %s6292_s3 = inlined_call_operand.vmem [shape: f32[1,32], index: 3, kind: input, shape index: {}]   ;;  %s6293_s4 = inlined_call_operand.vmem [shape: bf16[32,16], index: 4, kind: input, shape index: {}]   ;;  %s6294_s5 = inlined_call_operand.vmem [shape: f32[1,16], index: 5, kind: input, shape index: {}]   ;;  %s6295_s6 = inlined_call_operand.vmem [shape: f32[1,16], index: 6, kind: input, shape index: {}]   ;;  %s6296_s7 = inlined_call_operand.vmem [shape: bf16[16,96], index: 7, kind: input, shape index: {}]   ;;  %s6297_s8 = inlined_call_operand.vmem [shape: f32[1,96], index: 8, kind: input, shape index: {}]   ;;  %s6298_s9 = inlined_call_operand.vmem [shape: f32[1,96], index: 9, kind: input, shape index: {}]   ;;  %s6299_s10 = inlined_call_operand.vmem [shape: bf16[512,96], index: 10, kind: output, shape index: {}]  }
   0x1   :  { %s5126_s15 = smov 0  }
   0x2 LB: > { %s3812_s16 = sadd.s32 4294967295, %s5065_s15   ;;  %s5139_s17 = sadd.s32 1, %s5065_s15   ;;  %s5065_s15 = sphi %s5126_s15, %s6302_s15   ;;  %s5061_s14 = sphi %s5124_s14, %s6301_s14   ;;  %s5057_s13 = sphi %s5122_s13, %s6300_s13  }
   0x3   : > { %s24_s18 = ssub.s32 %s5065_s15, %s5139_s17  ;;  %s27_s19 = sadd.s32 1, %s5061_s14 }
   0x4   : > { %p25_p0 = scmp.eq.s32.totalorder %s24_s18, 0  ;;  %p34_p1 = scmp.ne.s32.totalorder %s5061_s14, %s5057_s13 }
   0x5   : > { %p35_p2 = scmp.eq.s32.totalorder %s5065_s15, 0  ;;  %p3815_p4 = scmp.ge.s32.totalorder %s5065_s15, 2 }
   0x6   : > { %s5148_s20 = scalar_select %p25_p0, %s5061_s14, %s27_s19  }
   0x7   : > { %p36_p3 = por %p35_p2, %p34_p1  ;;  %302 = sbr.rel (%p3815_p4) target bundleno = 91 (0x5b), region = 52 }
   0xe   : > { %305 = sbr.rel (!%p36_p3) target bundleno = 91 (0x5b), region = 56  ;;  %s307_s21 = sand.u32 (%p36_p3), 1, %s5061_s14  }
   0xf   : > { %s4153_s22 = sshll.u32 (%p36_p3), %s5065_s15, 7  ;;  %s5010_s23 = smul.u32 (%p36_p3), 1152, %s307_s21 }
  0x10   : > { %s5156_s26 = scalar_lea.vmem (%p36_p3), %s6289_s0, %s4153_s22 }
  0x11   : > { %v328_v0 = vld [vmem:[%s5156_s26] sm:$0xff] (%p36_p3)   ;;  %v332_v1 = vld [vmem:[%s5156_s26 + $0x8] sm:$0xff] (%p36_p3)   ;;  %v336_v2 = vld [vmem:[%s5156_s26 + $0x10] sm:$0xff] (%p36_p3)   ;;  %s5164_s27 = scalar_lea.vmem (%p36_p3), [#allocation2], %s5010_s23 }
  0x12   : > { %v340_v3 = vld [vmem:[%s5156_s26 + $0x18] sm:$0xff] (%p36_p3)   ;;  %v344_v4 = vld [vmem:[%s5156_s26 + $0x20] sm:$0xff] (%p36_p3)   ;;  %v348_v5 = vld [vmem:[%s5156_s26 + $0x28] sm:$0xff] (%p36_p3)   ;;  %329 = vst [vmem:[%s5164_s27] sm:$0xff] (%p36_p3), %v328_v0  }
  0x13   : > { %333 = vst [vmem:[%s5164_s27 + $0x8] sm:$0xff] (%p36_p3), %v332_v1   ;;  %337 = vst [vmem:[%s5164_s27 + $0x10] sm:$0xff] (%p36_p3), %v336_v2   ;;  %v352_v6 = vld [vmem:[%s5156_s26 + $0x30] sm:$0xff] (%p36_p3)   ;;  %v356_v7 = vld [vmem:[%s5156_s26 + $0x38] sm:$0xff] (%p36_p3)  }
  0x14   : > { %341 = vst [vmem:[%s5164_s27 + $0x18] sm:$0xff] (%p36_p3), %v340_v3   ;;  %345 = vst [vmem:[%s5164_s27 + $0x20] sm:$0xff] (%p36_p3), %v344_v4   ;;  %v360_v8 = vld [vmem:[%s5156_s26 + $0x40] sm:$0xff] (%p36_p3)   ;;  %v364_v9 = vld [vmem:[%s5156_s26 + $0x48] sm:$0xff] (%p36_p3)  }
  0x15   : > { %349 = vst [vmem:[%s5164_s27 + $0x28] sm:$0xff] %v348_v5   ;;  %353 = vst [vmem:[%s5164_s27 + $0x30] sm:$0xff] %v352_v6   ;;  %v368_v10 = vld [vmem:[%s5156_s26 + $0x50] sm:$0xff]   ;;  %v372_v11 = vld [vmem:[%s5156_s26 + $0x58] sm:$0xff]  }
  0x16   : > { %357 = vst [vmem:[%s5164_s27 + $0x38] sm:$0xff] %v356_v7   ;;  %361 = vst [vmem:[%s5164_s27 + $0x40] sm:$0xff] %v360_v8   ;;  %v376_v12 = vld [vmem:[%s5156_s26 + $0x60] sm:$0xff]   ;;  %v380_v13 = vld [vmem:[%s5156_s26 + $0x68] sm:$0xff]  }
  0x17   : > { %365 = vst [vmem:[%s5164_s27 + $0x48] sm:$0xff] %v364_v9   ;;  %369 = vst [vmem:[%s5164_s27 + $0x50] sm:$0xff] %v368_v10   ;;  %v384_v14 = vld [vmem:[%s5156_s26 + $0x70] sm:$0xff]   ;;  %v388_v15 = vld [vmem:[%s5156_s26 + $0x78] sm:$0xff]  }
  0x18   : > { %373 = vst [vmem:[%s5164_s27 + $0x58] sm:$0xff] %v372_v11   ;;  %377 = vst [vmem:[%s5164_s27 + $0x60] sm:$0xff] %v376_v12   ;;  %v392_v16 = vld [vmem:[%s5156_s26 + $0x100] sm:$0xff]   ;;  %v396_v17 = vld [vmem:[%s5156_s26 + $0x108] sm:$0xff]  }
  0x19   : > { %381 = vst [vmem:[%s5164_s27 + $0x68] sm:$0xff] %v380_v13   ;;  %385 = vst [vmem:[%s5164_s27 + $0x70] sm:$0xff] %v384_v14   ;;  %v400_v18 = vld [vmem:[%s5156_s26 + $0x110] sm:$0xff]   ;;  %v404_v19 = vld [vmem:[%s5156_s26 + $0x118] sm:$0xff]  }
  0x1a   : > { %389 = vst [vmem:[%s5164_s27 + $0x78] sm:$0xff] %v388_v15   ;;  %393 = vst [vmem:[%s5164_s27 + $0x80] sm:$0xff] %v392_v16   ;;  %v408_v20 = vld [vmem:[%s5156_s26 + $0x120] sm:$0xff]   ;;  %v412_v21 = vld [vmem:[%s5156_s26 + $0x128] sm:$0xff]  }
  0x1b   : > { %397 = vst [vmem:[%s5164_s27 + $0x88] sm:$0xff] %v396_v17   ;;  %401 = vst [vmem:[%s5164_s27 + $0x90] sm:$0xff] %v400_v18   ;;  %v416_v22 = vld [vmem:[%s5156_s26 + $0x130] sm:$0xff]   ;;  %v420_v23 = vld [vmem:[%s5156_s26 + $0x138] sm:$0xff]  }
  0x1c   : > { %405 = vst [vmem:[%s5164_s27 + $0x98] sm:$0xff] %v404_v19   ;;  %409 = vst [vmem:[%s5164_s27 + $0xa0] sm:$0xff] %v408_v20   ;;  %v424_v24 = vld [vmem:[%s5156_s26 + $0x140] sm:$0xff]   ;;  %v428_v25 = vld [vmem:[%s5156_s26 + $0x148] sm:$0xff]  }
  0x1d   : > { %413 = vst [vmem:[%s5164_s27 + $0xa8] sm:$0xff] %v412_v21   ;;  %417 = vst [vmem:[%s5164_s27 + $0xb0] sm:$0xff] %v416_v22   ;;  %v432_v26 = vld [vmem:[%s5156_s26 + $0x150] sm:$0xff]   ;;  %v436_v27 = vld [vmem:[%s5156_s26 + $0x158] sm:$0xff]  }
  0x1e   : > { %421 = vst [vmem:[%s5164_s27 + $0xb8] sm:$0xff] %v420_v23   ;;  %425 = vst [vmem:[%s5164_s27 + $0xc0] sm:$0xff] %v424_v24   ;;  %v440_v28 = vld [vmem:[%s5156_s26 + $0x160] sm:$0xff]   ;;  %v444_v29 = vld [vmem:[%s5156_s26 + $0x168] sm:$0xff]  }
  0x1f   : > { %429 = vst [vmem:[%s5164_s27 + $0xc8] sm:$0xff] %v428_v25   ;;  %433 = vst [vmem:[%s5164_s27 + $0xd0] sm:$0xff] %v432_v26   ;;  %v448_v30 = vld [vmem:[%s5156_s26 + $0x170] sm:$0xff]   ;;  %v452_v31 = vld [vmem:[%s5156_s26 + $0x178] sm:$0xff]  }
  0x20   : > { %437 = vst [vmem:[%s5164_s27 + $0xd8] sm:$0xff] %v436_v27   ;;  %441 = vst [vmem:[%s5164_s27 + $0xe0] sm:$0xff] %v440_v28   ;;  %v456_v32 = vld [vmem:[%s5156_s26 + $0x200] sm:$0xff]   ;;  %v460_v33 = vld [vmem:[%s5156_s26 + $0x208] sm:$0xff]  }
  0x21   : > { %445 = vst [vmem:[%s5164_s27 + $0xe8] sm:$0xff] %v444_v29   ;;  %449 = vst [vmem:[%s5164_s27 + $0xf0] sm:$0xff] %v448_v30   ;;  %v464_v34 = vld [vmem:[%s5156_s26 + $0x210] sm:$0xff]   ;;  %v468_v35 = vld [vmem:[%s5156_s26 + $0x218] sm:$0xff]  }
  0x22   : > { %453 = vst [vmem:[%s5164_s27 + $0xf8] sm:$0xff] %v452_v31   ;;  %457 = vst [vmem:[%s5164_s27 + $0x100] sm:$0xff] %v456_v32   ;;  %v472_v36 = vld [vmem:[%s5156_s26 + $0x220] sm:$0xff]   ;;  %v476_v37 = vld [vmem:[%s5156_s26 + $0x228] sm:$0xff]  }
  0x23   : > { %461 = vst [vmem:[%s5164_s27 + $0x108] sm:$0xff] %v460_v33   ;;  %465 = vst [vmem:[%s5164_s27 + $0x110] sm:$0xff] %v464_v34   ;;  %v480_v38 = vld [vmem:[%s5156_s26 + $0x230] sm:$0xff]   ;;  %v484_v39 = vld [vmem:[%s5156_s26 + $0x238] sm:$0xff]  }
  0x24   : > { %469 = vst [vmem:[%s5164_s27 + $0x118] sm:$0xff] %v468_v35   ;;  %473 = vst [vmem:[%s5164_s27 + $0x120] sm:$0xff] %v472_v36   ;;  %v488_v40 = vld [vmem:[%s5156_s26 + $0x240] sm:$0xff]   ;;  %v492_v41 = vld [vmem:[%s5156_s26 + $0x248] sm:$0xff]  }
  0x25   : > { %477 = vst [vmem:[%s5164_s27 + $0x128] sm:$0xff] %v476_v37   ;;  %481 = vst [vmem:[%s5164_s27 + $0x130] sm:$0xff] %v480_v38   ;;  %v496_v42 = vld [vmem:[%s5156_s26 + $0x250] sm:$0xff]   ;;  %v500_v43 = vld [vmem:[%s5156_s26 + $0x258] sm:$0xff]  }
  0x26   : > { %485 = vst [vmem:[%s5164_s27 + $0x138] sm:$0xff] %v484_v39   ;;  %489 = vst [vmem:[%s5164_s27 + $0x140] sm:$0xff] %v488_v40   ;;  %v504_v44 = vld [vmem:[%s5156_s26 + $0x260] sm:$0xff]   ;;  %v508_v45 = vld [vmem:[%s5156_s26 + $0x268] sm:$0xff]  }
  0x27   : > { %493 = vst [vmem:[%s5164_s27 + $0x148] sm:$0xff] %v492_v41   ;;  %497 = vst [vmem:[%s5164_s27 + $0x150] sm:$0xff] %v496_v42   ;;  %v512_v46 = vld [vmem:[%s5156_s26 + $0x270] sm:$0xff]   ;;  %v516_v47 = vld [vmem:[%s5156_s26 + $0x278] sm:$0xff]  }
  0x28   : > { %501 = vst [vmem:[%s5164_s27 + $0x158] sm:$0xff] %v500_v43   ;;  %505 = vst [vmem:[%s5164_s27 + $0x160] sm:$0xff] %v504_v44   ;;  %v520_v48 = vld [vmem:[%s5156_s26 + $0x300] sm:$0xff]   ;;  %v524_v49 = vld [vmem:[%s5156_s26 + $0x308] sm:$0xff]  }
  0x29   : > { %509 = vst [vmem:[%s5164_s27 + $0x168] sm:$0xff] %v508_v45   ;;  %513 = vst [vmem:[%s5164_s27 + $0x170] sm:$0xff] %v512_v46   ;;  %v528_v50 = vld [vmem:[%s5156_s26 + $0x310] sm:$0xff]   ;;  %v532_v51 = vld [vmem:[%s5156_s26 + $0x318] sm:$0xff]  }
  0x2a   : > { %517 = vst [vmem:[%s5164_s27 + $0x178] sm:$0xff] %v516_v47   ;;  %521 = vst [vmem:[%s5164_s27 + $0x180] sm:$0xff] %v520_v48   ;;  %v536_v52 = vld [vmem:[%s5156_s26 + $0x320] sm:$0xff]   ;;  %v540_v53 = vld [vmem:[%s5156_s26 + $0x328] sm:$0xff]  }
  0x2b   : > { %525 = vst [vmem:[%s5164_s27 + $0x188] sm:$0xff] %v524_v49   ;;  %529 = vst [vmem:[%s5164_s27 + $0x190] sm:$0xff] %v528_v50   ;;  %v544_v54 = vld [vmem:[%s5156_s26 + $0x330] sm:$0xff]   ;;  %v548_v55 = vld [vmem:[%s5156_s26 + $0x338] sm:$0xff]  }
  0x2c   : > { %533 = vst [vmem:[%s5164_s27 + $0x198] sm:$0xff] %v532_v51   ;;  %537 = vst [vmem:[%s5164_s27 + $0x1a0] sm:$0xff] %v536_v52   ;;  %v552_v56 = vld [vmem:[%s5156_s26 + $0x340] sm:$0xff]   ;;  %v556_v57 = vld [vmem:[%s5156_s26 + $0x348] sm:$0xff]  }
  0x2d   : > { %541 = vst [vmem:[%s5164_s27 + $0x1a8] sm:$0xff] %v540_v53   ;;  %545 = vst [vmem:[%s5164_s27 + $0x1b0] sm:$0xff] %v544_v54   ;;  %v560_v58 = vld [vmem:[%s5156_s26 + $0x350] sm:$0xff]   ;;  %v564_v59 = vld [vmem:[%s5156_s26 + $0x358] sm:$0xff]  }
  0x2e   : > { %549 = vst [vmem:[%s5164_s27 + $0x1b8] sm:$0xff] %v548_v55   ;;  %553 = vst [vmem:[%s5164_s27 + $0x1c0] sm:$0xff] %v552_v56   ;;  %v568_v60 = vld [vmem:[%s5156_s26 + $0x360] sm:$0xff]   ;;  %v572_v61 = vld [vmem:[%s5156_s26 + $0x368] sm:$0xff]  }
  0x2f   : > { %557 = vst [vmem:[%s5164_s27 + $0x1c8] sm:$0xff] %v556_v57   ;;  %561 = vst [vmem:[%s5164_s27 + $0x1d0] sm:$0xff] %v560_v58   ;;  %v576_v62 = vld [vmem:[%s5156_s26 + $0x370] sm:$0xff]   ;;  %v580_v63 = vld [vmem:[%s5156_s26 + $0x378] sm:$0xff]  }
  0x30   : > { %565 = vst [vmem:[%s5164_s27 + $0x1d8] sm:$0xff] %v564_v59   ;;  %569 = vst [vmem:[%s5164_s27 + $0x1e0] sm:$0xff] %v568_v60   ;;  %v584_v0 = vld [vmem:[%s5156_s26 + $0x400] sm:$0xff]   ;;  %v588_v1 = vld [vmem:[%s5156_s26 + $0x408] sm:$0xff]  }
  0x31   : > { %573 = vst [vmem:[%s5164_s27 + $0x1e8] sm:$0xff] %v572_v61   ;;  %577 = vst [vmem:[%s5164_s27 + $0x1f0] sm:$0xff] %v576_v62   ;;  %v592_v2 = vld [vmem:[%s5156_s26 + $0x410] sm:$0xff]   ;;  %v596_v3 = vld [vmem:[%s5156_s26 + $0x418] sm:$0xff]  }
  0x32   : > { %581 = vst [vmem:[%s5164_s27 + $0x1f8] sm:$0xff] %v580_v63   ;;  %585 = vst [vmem:[%s5164_s27 + $0x200] sm:$0xff] %v584_v0   ;;  %v600_v4 = vld [vmem:[%s5156_s26 + $0x420] sm:$0xff]   ;;  %v604_v5 = vld [vmem:[%s5156_s26 + $0x428] sm:$0xff]  }
  0x33   : > { %589 = vst [vmem:[%s5164_s27 + $0x208] sm:$0xff] %v588_v1   ;;  %593 = vst [vmem:[%s5164_s27 + $0x210] sm:$0xff] %v592_v2   ;;  %v608_v6 = vld [vmem:[%s5156_s26 + $0x430] sm:$0xff]   ;;  %v612_v7 = vld [vmem:[%s5156_s26 + $0x438] sm:$0xff]  }
  0x34   : > { %597 = vst [vmem:[%s5164_s27 + $0x218] sm:$0xff] %v596_v3   ;;  %601 = vst [vmem:[%s5164_s27 + $0x220] sm:$0xff] %v600_v4   ;;  %v616_v8 = vld [vmem:[%s5156_s26 + $0x440] sm:$0xff]   ;;  %v620_v9 = vld [vmem:[%s5156_s26 + $0x448] sm:$0xff]  }
  0x35   : > { %605 = vst [vmem:[%s5164_s27 + $0x228] sm:$0xff] %v604_v5   ;;  %609 = vst [vmem:[%s5164_s27 + $0x230] sm:$0xff] %v608_v6   ;;  %v624_v10 = vld [vmem:[%s5156_s26 + $0x450] sm:$0xff]   ;;  %v628_v11 = vld [vmem:[%s5156_s26 + $0x458] sm:$0xff]  }
  0x36   : > { %613 = vst [vmem:[%s5164_s27 + $0x238] sm:$0xff] %v612_v7   ;;  %617 = vst [vmem:[%s5164_s27 + $0x240] sm:$0xff] %v616_v8   ;;  %v632_v12 = vld [vmem:[%s5156_s26 + $0x460] sm:$0xff]   ;;  %v636_v13 = vld [vmem:[%s5156_s26 + $0x468] sm:$0xff]  }
  0x37   : > { %621 = vst [vmem:[%s5164_s27 + $0x248] sm:$0xff] %v620_v9   ;;  %625 = vst [vmem:[%s5164_s27 + $0x250] sm:$0xff] %v624_v10   ;;  %v640_v14 = vld [vmem:[%s5156_s26 + $0x470] sm:$0xff]   ;;  %v644_v15 = vld [vmem:[%s5156_s26 + $0x478] sm:$0xff]  }
  0x38   : > { %629 = vst [vmem:[%s5164_s27 + $0x258] sm:$0xff] %v628_v11   ;;  %633 = vst [vmem:[%s5164_s27 + $0x260] sm:$0xff] %v632_v12   ;;  %v648_v16 = vld [vmem:[%s5156_s26 + $0x500] sm:$0xff]   ;;  %v652_v17 = vld [vmem:[%s5156_s26 + $0x508] sm:$0xff]  }
  0x39   : > { %637 = vst [vmem:[%s5164_s27 + $0x268] sm:$0xff] %v636_v13   ;;  %641 = vst [vmem:[%s5164_s27 + $0x270] sm:$0xff] %v640_v14   ;;  %v656_v18 = vld [vmem:[%s5156_s26 + $0x510] sm:$0xff]   ;;  %v660_v19 = vld [vmem:[%s5156_s26 + $0x518] sm:$0xff]  }
  0x3a   : > { %645 = vst [vmem:[%s5164_s27 + $0x278] sm:$0xff] %v644_v15   ;;  %649 = vst [vmem:[%s5164_s27 + $0x280] sm:$0xff] %v648_v16   ;;  %v664_v20 = vld [vmem:[%s5156_s26 + $0x520] sm:$0xff]   ;;  %v668_v21 = vld [vmem:[%s5156_s26 + $0x528] sm:$0xff]  }
  0x3b   : > { %653 = vst [vmem:[%s5164_s27 + $0x288] sm:$0xff] %v652_v17   ;;  %657 = vst [vmem:[%s5164_s27 + $0x290] sm:$0xff] %v656_v18   ;;  %v672_v22 = vld [vmem:[%s5156_s26 + $0x530] sm:$0xff]   ;;  %v676_v23 = vld [vmem:[%s5156_s26 + $0x538] sm:$0xff]  }
  0x3c   : > { %661 = vst [vmem:[%s5164_s27 + $0x298] sm:$0xff] %v660_v19   ;;  %665 = vst [vmem:[%s5164_s27 + $0x2a0] sm:$0xff] %v664_v20   ;;  %v680_v24 = vld [vmem:[%s5156_s26 + $0x540] sm:$0xff]   ;;  %v684_v25 = vld [vmem:[%s5156_s26 + $0x548] sm:$0xff]  }
  0x3d   : > { %669 = vst [vmem:[%s5164_s27 + $0x2a8] sm:$0xff] %v668_v21   ;;  %673 = vst [vmem:[%s5164_s27 + $0x2b0] sm:$0xff] %v672_v22   ;;  %v688_v26 = vld [vmem:[%s5156_s26 + $0x550] sm:$0xff]   ;;  %v692_v27 = vld [vmem:[%s5156_s26 + $0x558] sm:$0xff]  }
  0x3e   : > { %677 = vst [vmem:[%s5164_s27 + $0x2b8] sm:$0xff] %v676_v23   ;;  %681 = vst [vmem:[%s5164_s27 + $0x2c0] sm:$0xff] %v680_v24   ;;  %v696_v28 = vld [vmem:[%s5156_s26 + $0x560] sm:$0xff]   ;;  %v700_v29 = vld [vmem:[%s5156_s26 + $0x568] sm:$0xff]  }
  0x3f   : > { %685 = vst [vmem:[%s5164_s27 + $0x2c8] sm:$0xff] %v684_v25   ;;  %689 = vst [vmem:[%s5164_s27 + $0x2d0] sm:$0xff] %v688_v26   ;;  %v704_v30 = vld [vmem:[%s5156_s26 + $0x570] sm:$0xff]   ;;  %v708_v31 = vld [vmem:[%s5156_s26 + $0x578] sm:$0xff]  }
  0x40   : > { %693 = vst [vmem:[%s5164_s27 + $0x2d8] sm:$0xff] %v692_v27   ;;  %697 = vst [vmem:[%s5164_s27 + $0x2e0] sm:$0xff] %v696_v28   ;;  %v712_v32 = vld [vmem:[%s5156_s26 + $0x600] sm:$0xff]   ;;  %v716_v33 = vld [vmem:[%s5156_s26 + $0x608] sm:$0xff]  }
  0x41   : > { %701 = vst [vmem:[%s5164_s27 + $0x2e8] sm:$0xff] %v700_v29   ;;  %705 = vst [vmem:[%s5164_s27 + $0x2f0] sm:$0xff] %v704_v30   ;;  %v720_v34 = vld [vmem:[%s5156_s26 + $0x610] sm:$0xff]   ;;  %v724_v35 = vld [vmem:[%s5156_s26 + $0x618] sm:$0xff]  }
  0x42   : > { %709 = vst [vmem:[%s5164_s27 + $0x2f8] sm:$0xff] %v708_v31   ;;  %713 = vst [vmem:[%s5164_s27 + $0x300] sm:$0xff] %v712_v32   ;;  %v728_v36 = vld [vmem:[%s5156_s26 + $0x620] sm:$0xff]   ;;  %v732_v37 = vld [vmem:[%s5156_s26 + $0x628] sm:$0xff]  }
  0x43   : > { %717 = vst [vmem:[%s5164_s27 + $0x308] sm:$0xff] %v716_v33   ;;  %721 = vst [vmem:[%s5164_s27 + $0x310] sm:$0xff] %v720_v34   ;;  %v736_v38 = vld [vmem:[%s5156_s26 + $0x630] sm:$0xff]   ;;  %v740_v39 = vld [vmem:[%s5156_s26 + $0x638] sm:$0xff]  }
  0x44   : > { %725 = vst [vmem:[%s5164_s27 + $0x318] sm:$0xff] %v724_v35   ;;  %729 = vst [vmem:[%s5164_s27 + $0x320] sm:$0xff] %v728_v36   ;;  %v744_v40 = vld [vmem:[%s5156_s26 + $0x640] sm:$0xff]   ;;  %v748_v41 = vld [vmem:[%s5156_s26 + $0x648] sm:$0xff]  }
  0x45   : > { %733 = vst [vmem:[%s5164_s27 + $0x328] sm:$0xff] %v732_v37   ;;  %737 = vst [vmem:[%s5164_s27 + $0x330] sm:$0xff] %v736_v38   ;;  %v752_v42 = vld [vmem:[%s5156_s26 + $0x650] sm:$0xff]   ;;  %v756_v43 = vld [vmem:[%s5156_s26 + $0x658] sm:$0xff]  }
  0x46   : > { %741 = vst [vmem:[%s5164_s27 + $0x338] sm:$0xff] %v740_v39   ;;  %745 = vst [vmem:[%s5164_s27 + $0x340] sm:$0xff] %v744_v40   ;;  %v760_v44 = vld [vmem:[%s5156_s26 + $0x660] sm:$0xff]   ;;  %v764_v45 = vld [vmem:[%s5156_s26 + $0x668] sm:$0xff]  }
  0x47   : > { %749 = vst [vmem:[%s5164_s27 + $0x348] sm:$0xff] %v748_v41   ;;  %753 = vst [vmem:[%s5164_s27 + $0x350] sm:$0xff] %v752_v42   ;;  %v768_v46 = vld [vmem:[%s5156_s26 + $0x670] sm:$0xff]   ;;  %v772_v47 = vld [vmem:[%s5156_s26 + $0x678] sm:$0xff]  }
  0x48   : > { %757 = vst [vmem:[%s5164_s27 + $0x358] sm:$0xff] %v756_v43   ;;  %761 = vst [vmem:[%s5164_s27 + $0x360] sm:$0xff] %v760_v44   ;;  %v776_v48 = vld [vmem:[%s5156_s26 + $0x700] sm:$0xff]   ;;  %v780_v49 = vld [vmem:[%s5156_s26 + $0x708] sm:$0xff]  }
  0x49   : > { %765 = vst [vmem:[%s5164_s27 + $0x368] sm:$0xff] %v764_v45   ;;  %769 = vst [vmem:[%s5164_s27 + $0x370] sm:$0xff] %v768_v46   ;;  %v784_v50 = vld [vmem:[%s5156_s26 + $0x710] sm:$0xff]   ;;  %v788_v51 = vld [vmem:[%s5156_s26 + $0x718] sm:$0xff]  }
  0x4a   : > { %773 = vst [vmem:[%s5164_s27 + $0x378] sm:$0xff] %v772_v47   ;;  %777 = vst [vmem:[%s5164_s27 + $0x380] sm:$0xff] %v776_v48   ;;  %v792_v52 = vld [vmem:[%s5156_s26 + $0x720] sm:$0xff]   ;;  %v796_v53 = vld [vmem:[%s5156_s26 + $0x728] sm:$0xff]  }
  0x4b   : > { %781 = vst [vmem:[%s5164_s27 + $0x388] sm:$0xff] %v780_v49   ;;  %785 = vst [vmem:[%s5164_s27 + $0x390] sm:$0xff] %v784_v50   ;;  %v800_v54 = vld [vmem:[%s5156_s26 + $0x730] sm:$0xff]   ;;  %v804_v55 = vld [vmem:[%s5156_s26 + $0x738] sm:$0xff]  }
  0x4c   : > { %789 = vst [vmem:[%s5164_s27 + $0x398] sm:$0xff] %v788_v51   ;;  %793 = vst [vmem:[%s5164_s27 + $0x3a0] sm:$0xff] %v792_v52   ;;  %v808_v56 = vld [vmem:[%s5156_s26 + $0x740] sm:$0xff]   ;;  %v812_v57 = vld [vmem:[%s5156_s26 + $0x748] sm:$0xff]  }
  0x4d   : > { %797 = vst [vmem:[%s5164_s27 + $0x3a8] sm:$0xff] %v796_v53   ;;  %801 = vst [vmem:[%s5164_s27 + $0x3b0] sm:$0xff] %v800_v54   ;;  %v816_v58 = vld [vmem:[%s5156_s26 + $0x750] sm:$0xff]   ;;  %v820_v59 = vld [vmem:[%s5156_s26 + $0x758] sm:$0xff]  }
  0x4e   : > { %805 = vst [vmem:[%s5164_s27 + $0x3b8] sm:$0xff] %v804_v55   ;;  %809 = vst [vmem:[%s5164_s27 + $0x3c0] sm:$0xff] %v808_v56   ;;  %v824_v60 = vld [vmem:[%s5156_s26 + $0x760] sm:$0xff]   ;;  %v828_v61 = vld [vmem:[%s5156_s26 + $0x768] sm:$0xff]  }
  0x4f   : > { %813 = vst [vmem:[%s5164_s27 + $0x3c8] sm:$0xff] %v812_v57   ;;  %817 = vst [vmem:[%s5164_s27 + $0x3d0] sm:$0xff] %v816_v58   ;;  %v832_v62 = vld [vmem:[%s5156_s26 + $0x770] sm:$0xff]   ;;  %v836_v63 = vld [vmem:[%s5156_s26 + $0x778] sm:$0xff]  }
  0x50   : > { %821 = vst [vmem:[%s5164_s27 + $0x3d8] sm:$0xff] %v820_v59   ;;  %825 = vst [vmem:[%s5164_s27 + $0x3e0] sm:$0xff] %v824_v60   ;;  %v840_v0 = vld [vmem:[%s5156_s26 + $0x800] sm:$0xff]   ;;  %v844_v1 = vld [vmem:[%s5156_s26 + $0x808] sm:$0xff]  }
  0x51   : > { %829 = vst [vmem:[%s5164_s27 + $0x3e8] sm:$0xff] %v828_v61   ;;  %833 = vst [vmem:[%s5164_s27 + $0x3f0] sm:$0xff] %v832_v62   ;;  %v848_v2 = vld [vmem:[%s5156_s26 + $0x810] sm:$0xff]   ;;  %v852_v3 = vld [vmem:[%s5156_s26 + $0x818] sm:$0xff]  }
  0x52   : > { %837 = vst [vmem:[%s5164_s27 + $0x3f8] sm:$0xff] %v836_v63   ;;  %841 = vst [vmem:[%s5164_s27 + $0x400] sm:$0xff] %v840_v0   ;;  %v856_v4 = vld [vmem:[%s5156_s26 + $0x820] sm:$0xff]   ;;  %v860_v5 = vld [vmem:[%s5156_s26 + $0x828] sm:$0xff]  }
  0x53   : > { %845 = vst [vmem:[%s5164_s27 + $0x408] sm:$0xff] %v844_v1   ;;  %849 = vst [vmem:[%s5164_s27 + $0x410] sm:$0xff] %v848_v2   ;;  %v864_v6 = vld [vmem:[%s5156_s26 + $0x830] sm:$0xff]   ;;  %v868_v7 = vld [vmem:[%s5156_s26 + $0x838] sm:$0xff]  }
  0x54   : > { %853 = vst [vmem:[%s5164_s27 + $0x418] sm:$0xff] %v852_v3   ;;  %857 = vst [vmem:[%s5164_s27 + $0x420] sm:$0xff] %v856_v4   ;;  %v872_v8 = vld [vmem:[%s5156_s26 + $0x840] sm:$0xff]   ;;  %v876_v9 = vld [vmem:[%s5156_s26 + $0x848] sm:$0xff]  }
  0x55   : > { %861 = vst [vmem:[%s5164_s27 + $0x428] sm:$0xff] %v860_v5   ;;  %865 = vst [vmem:[%s5164_s27 + $0x430] sm:$0xff] %v864_v6   ;;  %v880_v10 = vld [vmem:[%s5156_s26 + $0x850] sm:$0xff]   ;;  %v884_v11 = vld [vmem:[%s5156_s26 + $0x858] sm:$0xff]  }
  0x56   : > { %869 = vst [vmem:[%s5164_s27 + $0x438] sm:$0xff] %v868_v7   ;;  %873 = vst [vmem:[%s5164_s27 + $0x440] sm:$0xff] %v872_v8   ;;  %v888_v12 = vld [vmem:[%s5156_s26 + $0x860] sm:$0xff]   ;;  %v892_v13 = vld [vmem:[%s5156_s26 + $0x868] sm:$0xff]  }
  0x57   : > { %877 = vst [vmem:[%s5164_s27 + $0x448] sm:$0xff] %v876_v9   ;;  %881 = vst [vmem:[%s5164_s27 + $0x450] sm:$0xff] %v880_v10   ;;  %v896_v14 = vld [vmem:[%s5156_s26 + $0x870] sm:$0xff]   ;;  %v900_v15 = vld [vmem:[%s5156_s26 + $0x878] sm:$0xff]  }
  0x58   : > { %885 = vst [vmem:[%s5164_s27 + $0x458] sm:$0xff] %v884_v11   ;;  %889 = vst [vmem:[%s5164_s27 + $0x460] sm:$0xff] %v888_v12  }
  0x59   : > { %893 = vst [vmem:[%s5164_s27 + $0x468] sm:$0xff] %v892_v13   ;;  %897 = vst [vmem:[%s5164_s27 + $0x470] sm:$0xff] %v896_v14  }
  0x5a   : > { %901 = vst [vmem:[%s5164_s27 + $0x478] sm:$0xff] %v900_v15  }
  0x5b PF: > { %p3818_p5 = scmp.ge.s32.totalorder %s5065_s15, 1  ;;  %p1501_p6 = scmp.lt.s32.totalorder %s5065_s15, 3 }
  0x5d   : > { %p1502_p7 = pnand %p3818_p5, %p1501_p6 }
  0x5e   : > { %v5036_v16 = vld [vmem:[%s6293_s4] sm:$0xff] (!%p1502_p7)   ;;  %s1508_s30 = sand.u32 (!%p1502_p7), 1, %s5057_s13   ;;  %v1619_v17 = vlaneseq (!%p1502_p7)  ;;  %v5037_v18 = vld [vmem:[%s6293_s4 + $0x8] sm:$0xff] (!%p1502_p7)   ;;  %vm2925_vm0 = vcmask (!%p1502_p7), 261120   ;;  %vm3237_vm1 = vcmask (!%p1502_p7), 130048   ;;  %s3819_s27 = sshll.u32 (!%p1502_p7), %s3812_s16, 5 }
  0x5f   : > { %1505 = sbr.rel (%p1502_p7) target bundleno = 806 (0x326), region = 97  ;;  %4940 = vmatprep.subr.bf16.mxu0 (!%p1502_p7), %v5036_v16  ;;  %v5462_v20 = vld [vmem:[%s6290_s1] sm:$0xff] (!%p1502_p7)  ;;  %v5510_v9 = vld [vmem:[%s6290_s1 + $0x8] ss:$0 sm:$0xff] (!%p1502_p7)  ;;  %p1547_p8 = scmp.lt.s32.totalorder (!%p1502_p7), %s3819_s27, 63  ;;  %vm3717_vm2 = vcmask (!%p1502_p7), 781312  }
  0x60   : > { %s5011_s18 = smul.u32 (!%p1502_p7), 1152, %s1508_s30  ;;  %v5457_v19 = vshrl.u32 (!%p1502_p7), %v1619_v17, 7  ;;  %4941 = vmatpush3.bf16.msra.mxu0 (!%p1502_p7), %v5036_v16 }
  0x61   : > { %4942 = vmatprep.subr.bf16.mxu0 (!%p1502_p7), %v5037_v18 }
  0x62   : > { %s5464_s22 = scalar_lea.vmem (!%p1502_p7), [#allocation2], %s5011_s18  ;;  %v1621_v22 = vsub.s32 (!%p1502_p7), 0, %v5457_v19  ;;  %v1754_v24 = vsub.s32 (!%p1502_p7), 1, %v5457_v19  ;;  %v1887_v26 = vsub.s32 (!%p1502_p7), 2, %v5457_v19  ;;  %v2020_v40 = vsub.s32 (!%p1502_p7), 3, %v5457_v19 }
  0x63   : > { %v4187_v21 = vld [vmem:[%s5464_s22] sm:$0xff] (!%p1502_p7)   ;;  %v2153_v53 = vsub.s32 (!%p1502_p7), 4, %v5457_v19  ;;  %v2286_v63 = vsub.s32 (!%p1502_p7), 5, %v5457_v19  ;;  %v2419_v2 = vsub.s32 (!%p1502_p7), 6, %v5457_v19  ;;  %v2552_v13 = vsub.s32 (!%p1502_p7), 7, %v5457_v19  ;;  %v4762_v14 = vld [vmem:[%s5464_s22 + $0x8] sm:$0xff] (!%p1502_p7)  }
  0x64   : > { %v4777_v23 = vld [vmem:[%s5464_s22 + $0x80] sm:$0xff] (!%p1502_p7)   ;;  %v4188_v27 = vunpack.c.l.bf16 (!%p1502_p7), %v4187_v21  ;;  %v4189_v28 = vunpack.c.h.bf16 (!%p1502_p7), %v4187_v21  ;;  %v5474_v32 = vrot.slane (!%p1502_p7), %v5462_v20, %v1621_v22  ;;  %v5477_v33 = vrot.slane (!%p1502_p7), %v5462_v20, %v1754_v24  ;;  %4943 = vmatpush3.bf16.msra.mxu0 (!%p1502_p7), %v5037_v18  ;;  %v4778_v21 = vld [vmem:[%s5464_s22 + $0x88] sm:$0xff] (!%p1502_p7)  }
  0x65   : > { %v4793_v25 = vld [vmem:[%s5464_s22 + $0x100] sm:$0xff] (!%p1502_p7)   ;;  %v4252_v29 = vunpack.c.l.bf16 (!%p1502_p7), %v4777_v23  ;;  %v4253_v30 = vunpack.c.h.bf16 (!%p1502_p7), %v4777_v23  ;;  %v5481_v37 = vrot.slane (!%p1502_p7), %v5462_v20, %v1887_v26  ;;  %v5492_v48 = vrot.slane (!%p1502_p7), %v5462_v20, %v2020_v40 }
  0x66   : > { %v4809_v31 = vld [vmem:[%s5464_s22 + $0x180] sm:$0xff]   ;;  %v4316_v34 = vunpack.c.l.bf16 %v4793_v25  ;;  %v4317_v35 = vunpack.c.h.bf16 %v4793_v25  ;;  %v1623_v41 = vmul.f32 %v4188_v27, %v5474_v32  ;;  %v1624_v42 = vmul.f32 %v4189_v28, %v5474_v32  ;;  %s6304_s27 = smov (!%p1547_p8, %s3819_s27), 63 }
  0x67   : > { %v4825_v36 = vld [vmem:[%s5464_s22 + $0x200] sm:$0xff]   ;;  %v4380_v38 = vunpack.c.l.bf16 %v4809_v31  ;;  %v4381_v39 = vunpack.c.h.bf16 %v4809_v31  ;;  %v1756_v43 = vmul.f32 %v4252_v29, %v5477_v33  ;;  %v1757_v44 = vmul.f32 %v4253_v30, %v5477_v33  ;;  %s3820_s30 = sshll.u32 %s6304_s27, 2 }
  0x68   : > { %v4841_v45 = vld [vmem:[%s5464_s22 + $0x280] sm:$0xff]   ;;  %v1889_v46 = vmul.f32 %v4316_v34, %v5481_v37  ;;  %v1890_v47 = vmul.f32 %v4317_v35, %v5481_v37  ;;  %v4444_v49 = vunpack.c.l.bf16 %v4825_v36  ;;  %v4445_v52 = vunpack.c.h.bf16 %v4825_v36  ;;  %v4794_v35 = vld [vmem:[%s5464_s22 + $0x108] sm:$0xff]   ;;  %s6157_s18 = scalar_lea.vmem %s6299_s10, %s3820_s30 }
  0x69   : > { %v1788_v50 = vadd.f32 %v1756_v43, %v1623_v41  ;;  %v1789_v51 = vadd.f32 %v1757_v44, %v1624_v42  ;;  %v4857_v54 = vld [vmem:[%s5464_s22 + $0x300] sm:$0xff]   ;;  %v2022_v56 = vmul.f32 %v4380_v38, %v5492_v48  ;;  %v2023_v57 = vmul.f32 %v4381_v39, %v5492_v48  ;;  %v4810_v36 = vld [vmem:[%s5464_s22 + $0x188] sm:$0xff]  }
  0x6a   : > { %v4873_v55 = vld [vmem:[%s5464_s22 + $0x380] sm:$0xff]   ;;  %v4508_v58 = vunpack.c.l.bf16 %v4841_v45  ;;  %v4509_v59 = vunpack.c.h.bf16 %v4841_v45  ;;  %v5500_v62 = vrot.slane %v5462_v20, %v2153_v53  ;;  %v4572_v0 = vunpack.c.l.bf16 %v4857_v54 }
  0x6b   : > { %v1921_v60 = vadd.f32 %v1889_v46, %v1788_v50  ;;  %v1922_v61 = vadd.f32 %v1890_v47, %v1789_v51  ;;  %v4573_v1 = vunpack.c.h.bf16 %v4857_v54  ;;  %v4636_v3 = vunpack.c.l.bf16 %v4873_v55  ;;  %v4889_v4 = vld [vmem:[%s5464_s22 + $0x400] sm:$0xff]   ;;  %v4826_v50 = vld [vmem:[%s5464_s22 + $0x208] sm:$0xff]  }
  0x6c   : > { %v2155_v7 = vmul.f32 %v4444_v49, %v5500_v62  ;;  %v2156_v8 = vmul.f32 %v4445_v52, %v5500_v62  ;;  %v5513_v10 = vrot.slane %v5462_v20, %v2286_v63  ;;  %v5516_v11 = vrot.slane %v5462_v20, %v2419_v2  ;;  %v5552_v2 = vld [vmem:[%s6292_s3] ss:$0 sm:$0xff] }
  0x6d   : > { %v2054_v5 = vadd.f32 %v2022_v56, %v1921_v60  ;;  %v2055_v6 = vadd.f32 %v2023_v57, %v1922_v61  ;;  %v4637_v12 = vunpack.c.h.bf16 %v4873_v55  ;;  %v4700_v17 = vunpack.c.l.bf16 %v4889_v4  ;;  %v4842_v55 = vld [vmem:[%s5464_s22 + $0x288] sm:$0xff]   ;;  %v5543_v56 = vld [vmem:[%s6291_s2] ss:$0 sm:$0xff] }
  0x6e   : > { %v4701_v18 = vunpack.c.h.bf16 %v4889_v4  ;;  %v2288_v22 = vmul.f32 %v4508_v58, %v5513_v10  ;;  %v2289_v23 = vmul.f32 %v4509_v59, %v5513_v10  ;;  %v2421_v24 = vmul.f32 %v4572_v0, %v5516_v11 }
  0x6f   : > { %v2187_v15 = vadd.f32 %v2155_v7, %v2054_v5  ;;  %v2188_v16 = vadd.f32 %v2156_v8, %v2055_v6  ;;  %v2422_v25 = vmul.f32 %v4573_v1, %v5516_v11  ;;  %v5526_v26 = vrot.slane %v5462_v20, %v2552_v13  ;;  %v4858_v7 = vld [vmem:[%s5464_s22 + $0x308] sm:$0xff]  }
  0x70   : > { %v2687_v19 = vmul.f32 %v4700_v17, %v5510_v9  ;;  %v2688_v27 = vmul.f32 %v4701_v18, %v5510_v9  ;;  %v4192_v28 = vunpack.c.l.bf16 %v4762_v14  ;;  %v4193_v31 = vunpack.c.h.bf16 %v4762_v14 }
  0x71   : > { %v2320_v29 = vadd.f32 %v2288_v22, %v2187_v15  ;;  %v2321_v30 = vadd.f32 %v2289_v23, %v2188_v16  ;;  %v4256_v34 = vunpack.c.l.bf16 %v4778_v21  ;;  %v2554_v38 = vmul.f32 %v4636_v3, %v5526_v26  ;;  %v4874_v15 = vld [vmem:[%s5464_s22 + $0x388] sm:$0xff]  }
  0x72   : > { %v2555_v39 = vmul.f32 %v4637_v12, %v5526_v26  ;;  %v1625_v20 = vmul.f32 %v4192_v28, %v5474_v32  ;;  %v4257_v40 = vunpack.c.h.bf16 %v4778_v21  ;;  %v1626_v43 = vmul.f32 %v4193_v31, %v5474_v32 }
  0x73   : > { %v2453_v41 = vadd.f32 %v2421_v24, %v2320_v29  ;;  %v2454_v42 = vadd.f32 %v2422_v25, %v2321_v30  ;;  %v1758_v44 = vmul.f32 %v4256_v34, %v5477_v33  ;;  %v4320_v46 = vunpack.c.l.bf16 %v4794_v35  ;;  %v4890_v30 = vld [vmem:[%s5464_s22 + $0x408] sm:$0xff]  }
  0x74   : > { %v1759_v45 = vmul.f32 %v4257_v40, %v5477_v33  ;;  %v4321_v47 = vunpack.c.h.bf16 %v4794_v35  ;;  %v4384_v49 = vunpack.c.l.bf16 %v4810_v36  ;;  %v4385_v54 = vunpack.c.h.bf16 %v4810_v36 }
  0x75   : > { %v2586_v51 = vadd.f32 %v2554_v38, %v2453_v41  ;;  %v2587_v52 = vadd.f32 %v2555_v39, %v2454_v42  ;;  %v1790_v53 = vadd.f32 %v1758_v44, %v1625_v20  ;;  %v1891_v58 = vmul.f32 %v4320_v46, %v5481_v37  ;;  %v4763_v38 = vld [vmem:[%s5464_s22 + $0x10] sm:$0xff]  }
  0x76   : > { %v1791_v57 = vadd.f32 %v1759_v45, %v1626_v43  ;;  %v1892_v59 = vmul.f32 %v4321_v47, %v5481_v37  ;;  %v2024_v60 = vmul.f32 %v4384_v49, %v5492_v48  ;;  %v2025_v0 = vmul.f32 %v4385_v54, %v5492_v48  ;;  %v4779_v42 = vld [vmem:[%s5464_s22 + $0x90] sm:$0xff]  }
  0x77   : > { %v2719_v61 = vadd.f32 %v2687_v19, %v2586_v51  ;;  %v2720_v63 = vadd.f32 %v2688_v27, %v2587_v52  ;;  %v4448_v1 = vunpack.c.l.bf16 %v4826_v50  ;;  %v1923_v3 = vadd.f32 %v1891_v58, %v1790_v53  ;;  %v4795_v52 = vld [vmem:[%s5464_s22 + $0x110] sm:$0xff]  }
  0x78   : > { %v1924_v4 = vadd.f32 %v1892_v59, %v1791_v57  ;;  %v4449_v5 = vunpack.c.h.bf16 %v4826_v50  ;;  %v4512_v6 = vunpack.c.l.bf16 %v4842_v55  ;;  %v4513_v14 = vunpack.c.h.bf16 %v4842_v55  ;;  %v4811_v58 = vld [vmem:[%s5464_s22 + $0x190] sm:$0xff]  }
  0x79   : > { %v2758_v8 = vmul.f32 %v5543_v56, %v2719_v61  ;;  %v2759_v12 = vmul.f32 %v5543_v56, %v2720_v63  ;;  %v2157_v13 = vmul.f32 %v4448_v1, %v5500_v62  ;;  %v2056_v16 = vadd.f32 %v2024_v60, %v1923_v3 }
  0x7a   : > { %v2057_v17 = vadd.f32 %v2025_v0, %v1924_v4  ;;  %v2158_v18 = vmul.f32 %v4449_v5, %v5500_v62  ;;  %v2290_v21 = vmul.f32 %v4512_v6, %v5513_v10  ;;  %v2291_v24 = vmul.f32 %v4513_v14, %v5513_v10 }
  0x7b   : > { %v2797_v22 = vadd.f32 %v5552_v2, %v2758_v8  ;;  %v2798_v23 = vadd.f32 %v5552_v2, %v2759_v12  ;;  %v4576_v25 = vunpack.c.l.bf16 %v4858_v7  ;;  %v2189_v19 = vadd.f32 %v2157_v13, %v2056_v16  ;;  %v4827_v12 = vld [vmem:[%s5464_s22 + $0x210] sm:$0xff]  }
  0x7c   : > { %v2190_v27 = vadd.f32 %v2158_v18, %v2057_v17  ;;  %v4577_v28 = vunpack.c.h.bf16 %v4858_v7  ;;  %v4640_v29 = vunpack.c.l.bf16 %v4874_v15  ;;  %v4641_v36 = vunpack.c.h.bf16 %v4874_v15  ;;  %v4843_v17 = vld [vmem:[%s5464_s22 + $0x290] sm:$0xff]  }
  0x7d   : > { %v2829_v31 = vmax.f32 %v2797_v22, 0.0  ;;  %v2830_v34 = vmax.f32 %v2798_v23, 0.0  ;;  %v2423_v35 = vmul.f32 %v4576_v25, %v5516_v11  ;;  %v2322_v39 = vadd.f32 %v2290_v21, %v2189_v19 }
  0x7e   : > { %v2323_v20 = vadd.f32 %v2291_v24, %v2190_v27  ;;  %v2424_v40 = vmul.f32 %v4577_v28, %v5516_v11  ;;  %v2556_v41 = vmul.f32 %v4640_v29, %v5526_v26  ;;  %v2557_v45 = vmul.f32 %v4641_v36, %v5526_v26 }
  0x7f   : > { %v2861_v43 = vmin.f32 %v2829_v31, 6.0  ;;  %v2862_v44 = vmin.f32 %v2830_v34, 6.0  ;;  %v4704_v46 = vunpack.c.l.bf16 %v4890_v30  ;;  %v2455_v47 = vadd.f32 %v2423_v35, %v2322_v39  ;;  %v4859_v34 = vld [vmem:[%s5464_s22 + $0x310] sm:$0xff]  }
  0x80   : > { %v2456_v49 = vadd.f32 %v2424_v40, %v2323_v20  ;;  %v4705_v50 = vunpack.c.h.bf16 %v4890_v30  ;;  %v4196_v51 = vunpack.c.l.bf16 %v4763_v38  ;;  %v4197_v55 = vunpack.c.h.bf16 %v4763_v38  ;;  %v4875_v20 = vld [vmem:[%s5464_s22 + $0x390] sm:$0xff]  }
  0x81   : > { %v2893_v53 = vpack.c.bf16 %v2862_v44, %v2861_v43  ;;  %v2689_v54 = vmul.f32 %v4704_v46, %v5510_v9  ;;  %v4260_v57 = vunpack.c.l.bf16 %v4779_v42  ;;  %v2588_v59 = vadd.f32 %v2556_v41, %v2455_v47 }
  0x82   : > { %v2589_v60 = vadd.f32 %v2557_v45, %v2456_v49  ;;  %v2690_v61 = vmul.f32 %v4705_v50, %v5510_v9  ;;  %v1627_v63 = vmul.f32 %v4196_v51, %v5474_v32  ;;  %v1628_v0 = vmul.f32 %v4197_v55, %v5474_v32  ;;  %v4891_v49 = vld [vmem:[%s5464_s22 + $0x410] sm:$0xff]  }
  0x83   : > { %4944 = vmatprep.mubr.msk.bf16.mxu0 %vm2925_vm0, %v2893_v53  ;;  %v4261_v1 = vunpack.c.h.bf16 %v4779_v42  ;;  %v1760_v3 = vmul.f32 %v4260_v57, %v5477_v33  ;;  %v4324_v4 = vunpack.c.l.bf16 %v4795_v52  ;;  %v2721_v5 = vadd.f32 %v2689_v54, %v2588_v59  ;;  %v4764_v59 = vld [vmem:[%s5464_s22 + $0x18] sm:$0xff]  }
  0x84   : > { %v2722_v6 = vadd.f32 %v2690_v61, %v2589_v60  ;;  %v4325_v7 = vunpack.c.h.bf16 %v4795_v52  ;;  %v4388_v8 = vunpack.c.l.bf16 %v4811_v58  ;;  %v4389_v16 = vunpack.c.h.bf16 %v4811_v58  ;;  %v4780_v60 = vld [vmem:[%s5464_s22 + $0x98] sm:$0xff]  }
  0x85   : > { %v1761_v13 = vmul.f32 %v4261_v1, %v5477_v33  ;;  %v1792_v14 = vadd.f32 %v1760_v3, %v1627_v63  ;;  %v1893_v15 = vmul.f32 %v4324_v4, %v5481_v37  ;;  %v2760_v18 = vmul.f32 %v5543_v56, %v2721_v5 }
  0x86   : > { %v2761_v21 = vmul.f32 %v5543_v56, %v2722_v6  ;;  %v1894_v22 = vmul.f32 %v4325_v7, %v5481_v37  ;;  %v2026_v23 = vmul.f32 %v4388_v8, %v5492_v48  ;;  %v2027_v19 = vmul.f32 %v4389_v16, %v5492_v48  ;;  %v4796_v7 = vld [vmem:[%s5464_s22 + $0x118] sm:$0xff]  }
  0x87   : > { %v1793_v24 = vadd.f32 %v1761_v13, %v1628_v0  ;;  %v1925_v25 = vadd.f32 %v1893_v15, %v1792_v14  ;;  %v4452_v27 = vunpack.c.l.bf16 %v4827_v12  ;;  %v2799_v28 = vadd.f32 %v5552_v2, %v2760_v18 }
  0x88   : > { %v2800_v29 = vadd.f32 %v5552_v2, %v2761_v21  ;;  %v4453_v30 = vunpack.c.h.bf16 %v4827_v12  ;;  %v4516_v31 = vunpack.c.l.bf16 %v4843_v17  ;;  %v4517_v39 = vunpack.c.h.bf16 %v4843_v17  ;;  %v4812_v21 = vld [vmem:[%s5464_s22 + $0x198] sm:$0xff]  }
  0x89   : > { %v1926_v35 = vadd.f32 %v1894_v22, %v1793_v24  ;;  %v2058_v36 = vadd.f32 %v2026_v23, %v1925_v25  ;;  %v2159_v38 = vmul.f32 %v4452_v27, %v5500_v62  ;;  %v2831_v40 = vmax.f32 %v2799_v28, 0.0 }
  0x8a   : > { %v2832_v41 = vmax.f32 %v2800_v29, 0.0  ;;  %v2160_v42 = vmul.f32 %v4453_v30, %v5500_v62  ;;  %v2292_v43 = vmul.f32 %v4516_v31, %v5513_v10  ;;  %v2293_v46 = vmul.f32 %v4517_v39, %v5513_v10  ;;  %v4828_v30 = vld [vmem:[%s5464_s22 + $0x218] sm:$0xff]  }
  0x8b   : > { %v2059_v44 = vadd.f32 %v2027_v19, %v1926_v35  ;;  %v2191_v45 = vadd.f32 %v2159_v38, %v2058_v36  ;;  %v4580_v47 = vunpack.c.l.bf16 %v4859_v34  ;;  %v2863_v50 = vmin.f32 %v2831_v40, 6.0 }
  0x8c   : > { %v2864_v51 = vmin.f32 %v2832_v41, 6.0  ;;  %v4581_v52 = vunpack.c.h.bf16 %v4859_v34  ;;  %v4644_v53 = vunpack.c.l.bf16 %v4875_v20  ;;  %v4645_v58 = vunpack.c.h.bf16 %v4875_v20  ;;  %v4844_v41 = vld [vmem:[%s5464_s22 + $0x298] sm:$0xff]  }
  0x8d   : > { %v2192_v54 = vadd.f32 %v2160_v42, %v2059_v44  ;;  %v2324_v55 = vadd.f32 %v2292_v43, %v2191_v45  ;;  %v2425_v57 = vmul.f32 %v4580_v47, %v5516_v11  ;;  %v4708_v1 = vunpack.c.l.bf16 %v4891_v49 }
  0x8e   : > { %v2894_v61 = vpack.c.bf16 %v2864_v51, %v2863_v50  ;;  %v2426_v63 = vmul.f32 %v4581_v52, %v5516_v11  ;;  %v2558_v0 = vmul.f32 %v4644_v53, %v5526_v26  ;;  %v2559_v5 = vmul.f32 %v4645_v58, %v5526_v26  ;;  %v4860_v51 = vld [vmem:[%s5464_s22 + $0x318] sm:$0xff]  }
  0x8f   : > { %v2325_v3 = vadd.f32 %v2293_v46, %v2192_v54  ;;  %v2457_v4 = vadd.f32 %v2425_v57, %v2324_v55  ;;  %v4709_v6 = vunpack.c.h.bf16 %v4891_v49  ;;  %v2691_v8 = vmul.f32 %v4708_v1, %v5510_v9 }
  0x90   : > { %4945 = vmatmul.mubr.msk.bf16.vlgmr.msra.gmra.mrb[0].mxu0 %vm2925_vm0, %v2894_v61  ;;  %v4200_v12 = vunpack.c.l.bf16 %v4764_v59  ;;  %v4201_v13 = vunpack.c.h.bf16 %v4764_v59  ;;  %v4264_v14 = vunpack.c.l.bf16 %v4780_v60  ;;  %v4265_v18 = vunpack.c.h.bf16 %v4780_v60  ;;  %v4876_v61 = vld [vmem:[%s5464_s22 + $0x398] sm:$0xff]  }
  0x91   : > { %v2458_v15 = vadd.f32 %v2426_v63, %v2325_v3  ;;  %v2590_v16 = vadd.f32 %v2558_v0, %v2457_v4  ;;  %v2692_v17 = vmul.f32 %v4709_v6, %v5510_v9  ;;  %v4328_v25 = vunpack.c.l.bf16 %v4796_v7  ;;  %v4892_v4 = vld [vmem:[%s5464_s22 + $0x418] sm:$0xff]  }
  0x92   : > { %v1629_v22 = vmul.f32 %v4200_v12, %v5474_v32  ;;  %v1630_v23 = vmul.f32 %v4201_v13, %v5474_v32  ;;  %v1762_v24 = vmul.f32 %v4264_v14, %v5477_v33  ;;  %v1763_v28 = vmul.f32 %v4265_v18, %v5477_v33 }
  0x93   : > { %v2591_v19 = vadd.f32 %v2559_v5, %v2458_v15  ;;  %v2723_v27 = vadd.f32 %v2691_v8, %v2590_v16  ;;  %v4329_v29 = vunpack.c.h.bf16 %v4796_v7  ;;  %v1895_v34 = vmul.f32 %v4328_v25, %v5481_v37  ;;  %v4765_v16 = vld [vmem:[%s5464_s22 + $0x20] sm:$0xff]  }
  0x94   : > { %v1794_v31 = vadd.f32 %v1762_v24, %v1629_v22  ;;  %v4392_v35 = vunpack.c.l.bf16 %v4812_v21  ;;  %v4393_v36 = vunpack.c.h.bf16 %v4812_v21  ;;  %v1795_v20 = vadd.f32 %v1763_v28, %v1630_v23  ;;  %v4781_v23 = vld [vmem:[%s5464_s22 + $0xa0] sm:$0xff]  }
  0x95   : > { %v2724_v38 = vadd.f32 %v2692_v17, %v2591_v19  ;;  %v2762_v39 = vmul.f32 %v5543_v56, %v2723_v27  ;;  %v1896_v40 = vmul.f32 %v4329_v29, %v5481_v37  ;;  %v4456_v45 = vunpack.c.l.bf16 %v4828_v30  ;;  %v4797_v28 = vld [vmem:[%s5464_s22 + $0x120] sm:$0xff]  }
  0x96   : > { %v1927_v42 = vadd.f32 %v1895_v34, %v1794_v31  ;;  %v2028_v43 = vmul.f32 %v4392_v35, %v5492_v48  ;;  %v2029_v44 = vmul.f32 %v4393_v36, %v5492_v48  ;;  %v4457_v50 = vunpack.c.h.bf16 %v4828_v30 }
  0x97   : > { %v2763_v46 = vmul.f32 %v5543_v56, %v2724_v38  ;;  %v2801_v47 = vadd.f32 %v5552_v2, %v2762_v39  ;;  %v1928_v49 = vadd.f32 %v1896_v40, %v1795_v20  ;;  %v2161_v53 = vmul.f32 %v4456_v45, %v5500_v62  ;;  %v4813_v20 = vld [vmem:[%s5464_s22 + $0x1a0] sm:$0xff]  }
  0x98   : > { %v2060_v52 = vadd.f32 %v2028_v43, %v1927_v42  ;;  %v4520_v54 = vunpack.c.l.bf16 %v4844_v41  ;;  %v4521_v55 = vunpack.c.h.bf16 %v4844_v41  ;;  %v2162_v60 = vmul.f32 %v4457_v50, %v5500_v62 }
  0x99   : > { %v2802_v57 = vadd.f32 %v5552_v2, %v2763_v46  ;;  %v2833_v58 = vmax.f32 %v2801_v47, 0.0  ;;  %v2061_v59 = vadd.f32 %v2029_v44, %v1928_v49  ;;  %v4584_v3 = vunpack.c.l.bf16 %v4860_v51  ;;  %v4829_v49 = vld [vmem:[%s5464_s22 + $0x220] sm:$0xff]  }
  0x9a   : > { %v2193_v63 = vadd.f32 %v2161_v53, %v2060_v52  ;;  %v2294_v0 = vmul.f32 %v4520_v54, %v5513_v10  ;;  %v2295_v1 = vmul.f32 %v4521_v55, %v5513_v10  ;;  %v4585_v8 = vunpack.c.h.bf16 %v4860_v51 }
  0x9b   : > { %v2834_v5 = vmax.f32 %v2802_v57, 0.0  ;;  %v2865_v6 = vmin.f32 %v2833_v58, 6.0  ;;  %v2194_v7 = vadd.f32 %v2162_v60, %v2061_v59  ;;  %v2427_v13 = vmul.f32 %v4584_v3, %v5516_v11  ;;  %v4845_v59 = vld [vmem:[%s5464_s22 + $0x2a0] sm:$0xff]  }
  0x9c   : > { %v2326_v12 = vadd.f32 %v2294_v0, %v2193_v63  ;;  %v4648_v14 = vunpack.c.l.bf16 %v4876_v61  ;;  %v4649_v15 = vunpack.c.h.bf16 %v4876_v61  ;;  %v2428_v21 = vmul.f32 %v4585_v8, %v5516_v11 }
  0x9d   : > { %v2866_v17 = vmin.f32 %v2834_v5, 6.0  ;;  %v2327_v18 = vadd.f32 %v2295_v1, %v2194_v7  ;;  %v4712_v22 = vunpack.c.l.bf16 %v4892_v4  ;;  %v4713_v27 = vunpack.c.h.bf16 %v4892_v4 }
  0x9e   : > { %v2459_v24 = vadd.f32 %v2427_v13, %v2326_v12  ;;  %v2560_v25 = vmul.f32 %v4648_v14, %v5526_v26  ;;  %v2561_v19 = vmul.f32 %v4649_v15, %v5526_v26  ;;  %v4204_v34 = vunpack.c.l.bf16 %v4765_v16 }
  0x9f   : > { %v2895_v29 = vpack.c.bf16 %v2866_v17, %v2865_v6  ;;  %v2460_v30 = vadd.f32 %v2428_v21, %v2327_v18  ;;  %v2693_v31 = vmul.f32 %v4712_v22, %v5510_v9  ;;  %v2694_v36 = vmul.f32 %v4713_v27, %v5510_v9  ;;  %v4861_v6 = vld [vmem:[%s5464_s22 + $0x320] sm:$0xff]  }
  0xa0   : > { %v2592_v35 = vadd.f32 %v2560_v25, %v2459_v24  ;;  %v4205_v38 = vunpack.c.h.bf16 %v4765_v16  ;;  %v4268_v39 = vunpack.c.l.bf16 %v4781_v23  ;;  %v1631_v41 = vmul.f32 %v4204_v34, %v5474_v32  ;;  %v4877_v18 = vld [vmem:[%s5464_s22 + $0x3a0] sm:$0xff]  }
  0xa1   : > { %4948 = vmatprep.mubr.msk.bf16.mxu0 %vm2925_vm0, %v2895_v29  ;;  %v2593_v40 = vadd.f32 %v2561_v19, %v2460_v30  ;;  %v4269_v42 = vunpack.c.h.bf16 %v4781_v23  ;;  %v4332_v43 = vunpack.c.l.bf16 %v4797_v28  ;;  %v4333_v47 = vunpack.c.h.bf16 %v4797_v28  ;;  %v4893_v25 = vld [vmem:[%s5464_s22 + $0x420] sm:$0xff]  }
  0xa2   : > { %v2725_v44 = vadd.f32 %v2693_v31, %v2592_v35  ;;  %v1632_v45 = vmul.f32 %v4205_v38, %v5474_v32  ;;  %v1764_v46 = vmul.f32 %v4268_v39, %v5477_v33  ;;  %v4396_v53 = vunpack.c.l.bf16 %v4813_v20 }
  0xa3   : > { %v2726_v50 = vadd.f32 %v2694_v36, %v2593_v40  ;;  %v1765_v51 = vmul.f32 %v4269_v42, %v5477_v33  ;;  %v1897_v52 = vmul.f32 %v4332_v43, %v5481_v37  ;;  %v1898_v57 = vmul.f32 %v4333_v47, %v5481_v37  ;;  %v4766_v36 = vld [vmem:[%s5464_s22 + $0x28] sm:$0xff]  }
  0xa4   : > { %v2764_v54 = vmul.f32 %v5543_v56, %v2725_v44  ;;  %v1796_v55 = vadd.f32 %v1764_v46, %v1631_v41  ;;  %v4397_v58 = vunpack.c.h.bf16 %v4813_v20  ;;  %v2030_v63 = vmul.f32 %v4396_v53, %v5492_v48  ;;  %v4782_v41 = vld [vmem:[%s5464_s22 + $0xa8] sm:$0xff]  }
  0xa5   : > { %v2765_v60 = vmul.f32 %v5543_v56, %v2726_v50  ;;  %v1797_v61 = vadd.f32 %v1765_v51, %v1632_v45  ;;  %v4460_v0 = vunpack.c.l.bf16 %v4829_v49  ;;  %v4461_v5 = vunpack.c.h.bf16 %v4829_v49  ;;  %v4798_v46 = vld [vmem:[%s5464_s22 + $0x128] sm:$0xff]  }
  0xa6   : > { %v2803_v1 = vadd.f32 %v5552_v2, %v2764_v54  ;;  %v1929_v3 = vadd.f32 %v1897_v52, %v1796_v55  ;;  %v2031_v4 = vmul.f32 %v4397_v58, %v5492_v48  ;;  %v4524_v13 = vunpack.c.l.bf16 %v4845_v59 }
  0xa7   : > { %v2804_v7 = vadd.f32 %v5552_v2, %v2765_v60  ;;  %v1930_v8 = vadd.f32 %v1898_v57, %v1797_v61  ;;  %v2163_v12 = vmul.f32 %v4460_v0, %v5500_v62  ;;  %v2164_v16 = vmul.f32 %v4461_v5, %v5500_v62  ;;  %v4814_v57 = vld [vmem:[%s5464_s22 + $0x1a8] sm:$0xff]  }
  0xa8   : > { %v2835_v14 = vmax.f32 %v2803_v1, 0.0  ;;  %v2062_v15 = vadd.f32 %v2030_v63, %v1929_v3  ;;  %v4525_v17 = vunpack.c.h.bf16 %v4845_v59  ;;  %v2296_v23 = vmul.f32 %v4524_v13, %v5513_v10 }
  0xa9   : > { %v2836_v21 = vmax.f32 %v2804_v7, 0.0  ;;  %v2063_v22 = vadd.f32 %v2031_v4, %v1930_v8  ;;  %v4588_v24 = vunpack.c.l.bf16 %v4861_v6  ;;  %v4589_v29 = vunpack.c.h.bf16 %v4861_v6  ;;  %v4830_v4 = vld [vmem:[%s5464_s22 + $0x228] sm:$0xff]  }
  0xaa   : > { %v2867_v19 = vmin.f32 %v2835_v14, 6.0  ;;  %v2195_v27 = vadd.f32 %v2163_v12, %v2062_v15  ;;  %v2297_v28 = vmul.f32 %v4525_v17, %v5513_v10  ;;  %v4652_v35 = vunpack.c.l.bf16 %v4877_v18 }
  0xab   : > { %v2868_v30 = vmin.f32 %v2836_v21, 6.0  ;;  %v2196_v31 = vadd.f32 %v2164_v16, %v2063_v22  ;;  %v2429_v34 = vmul.f32 %v4588_v24, %v5516_v11  ;;  %v2430_v39 = vmul.f32 %v4589_v29, %v5516_v11  ;;  %v4846_v16 = vld [vmem:[%s5464_s22 + $0x2a8] sm:$0xff]  }
  0xac   : > { %v2328_v38 = vadd.f32 %v2296_v23, %v2195_v27  ;;  %v4653_v20 = vunpack.c.h.bf16 %v4877_v18  ;;  %v4716_v40 = vunpack.c.l.bf16 %v4893_v25  ;;  %v2562_v44 = vmul.f32 %v4652_v35, %v5526_v26  ;;  %v4862_v27 = vld [vmem:[%s5464_s22 + $0x328] sm:$0xff]  }
  0xad   : > { %v2896_v42 = vpack.c.bf16 %v2868_v30, %v2867_v19  ;;  %v2329_v43 = vadd.f32 %v2297_v28, %v2196_v31  ;;  %v4717_v45 = vunpack.c.h.bf16 %v4893_v25  ;;  %v4208_v51 = vunpack.c.l.bf16 %v4766_v36 }
  0xae   : > { %v2461_v47 = vadd.f32 %v2429_v34, %v2328_v38  ;;  %v2563_v49 = vmul.f32 %v4653_v20, %v5526_v26  ;;  %v2695_v50 = vmul.f32 %v4716_v40, %v5510_v9  ;;  %v4209_v54 = vunpack.c.h.bf16 %v4766_v36 }
  0xaf   : > { %4949 = vmatmul.mubr.msk.bf16.gmra.mrb[4].mxu0 %vm2925_vm0, %v2896_v42  ;;  %v2462_v52 = vadd.f32 %v2430_v39, %v2329_v43  ;;  %v2696_v53 = vmul.f32 %v4717_v45, %v5510_v9  ;;  %v4272_v55 = vunpack.c.l.bf16 %v4782_v41  ;;  %v1633_v59 = vmul.f32 %v4208_v51, %v5474_v32  ;;  %v4878_v39 = vld [vmem:[%s5464_s22 + $0x3a8] sm:$0xff]  }
  0xb0   : > { %v2594_v58 = vadd.f32 %v2562_v44, %v2461_v47  ;;  %v4273_v60 = vunpack.c.h.bf16 %v4782_v41  ;;  %v4336_v61 = vunpack.c.l.bf16 %v4798_v46  ;;  %v1634_v0 = vmul.f32 %v4209_v54, %v5474_v32  ;;  %v4894_v47 = vld [vmem:[%s5464_s22 + $0x428] sm:$0xff]  }
  0xb1   : > { %v2595_v63 = vadd.f32 %v2563_v49, %v2462_v52  ;;  %v1766_v1 = vmul.f32 %v4272_v55, %v5477_v33  ;;  %v4337_v3 = vunpack.c.h.bf16 %v4798_v46  ;;  %v4400_v8 = vunpack.c.l.bf16 %v4814_v57 }
  0xb2   : > { %v2727_v5 = vadd.f32 %v2695_v50, %v2594_v58  ;;  %v1767_v6 = vmul.f32 %v4273_v60, %v5477_v33  ;;  %v1899_v7 = vmul.f32 %v4336_v61, %v5481_v37  ;;  %v4401_v15 = vunpack.c.h.bf16 %v4814_v57 }
  0xb3   : > { %v2728_v12 = vadd.f32 %v2696_v53, %v2595_v63  ;;  %v1798_v13 = vadd.f32 %v1766_v1, %v1633_v59  ;;  %v1900_v14 = vmul.f32 %v4337_v3, %v5481_v37  ;;  %v2032_v21 = vmul.f32 %v4400_v8, %v5492_v48  ;;  %v4767_v53 = vld [vmem:[%s5464_s22 + $0x30] sm:$0xff]  }
  0xb4   : > { %v2766_v17 = vmul.f32 %v5543_v56, %v2727_v5  ;;  %v1799_v18 = vadd.f32 %v1767_v6, %v1634_v0  ;;  %v4464_v22 = vunpack.c.l.bf16 %v4830_v4  ;;  %v2033_v25 = vmul.f32 %v4401_v15, %v5492_v48  ;;  %v4783_v0 = vld [vmem:[%s5464_s22 + $0xb0] sm:$0xff]  }
  0xb5   : > { %v2767_v23 = vmul.f32 %v5543_v56, %v2728_v12  ;;  %v1931_v24 = vadd.f32 %v1899_v7, %v1798_v13  ;;  %v4465_v19 = vunpack.c.h.bf16 %v4830_v4  ;;  %v4528_v31 = vunpack.c.l.bf16 %v4846_v16  ;;  %v4799_v6 = vld [vmem:[%s5464_s22 + $0x130] sm:$0xff]  }
  0xb6   : > { %v2805_v28 = vadd.f32 %v5552_v2, %v2766_v17  ;;  %v1932_v29 = vadd.f32 %v1900_v14, %v1799_v18  ;;  %v2165_v30 = vmul.f32 %v4464_v22, %v5500_v62  ;;  %v4529_v38 = vunpack.c.h.bf16 %v4846_v16  ;;  %v4815_v14 = vld [vmem:[%s5464_s22 + $0x1b0] sm:$0xff]  }
  0xb7   : > { %v2806_v34 = vadd.f32 %v5552_v2, %v2767_v23  ;;  %v2064_v35 = vadd.f32 %v2032_v21, %v1931_v24  ;;  %v2166_v36 = vmul.f32 %v4465_v19, %v5500_v62  ;;  %v2298_v41 = vmul.f32 %v4528_v31, %v5513_v10 }
  0xb8   : > { %v2837_v20 = vmax.f32 %v2805_v28, 0.0  ;;  %v2065_v40 = vadd.f32 %v2033_v25, %v1932_v29  ;;  %v4592_v42 = vunpack.c.l.bf16 %v4862_v27  ;;  %v2299_v45 = vmul.f32 %v4529_v38, %v5513_v10  ;;  %v4831_v29 = vld [vmem:[%s5464_s22 + $0x230] sm:$0xff]  }
  0xb9   : > { %v2838_v43 = vmax.f32 %v2806_v34, 0.0  ;;  %v2197_v44 = vadd.f32 %v2165_v30, %v2064_v35  ;;  %v4593_v46 = vunpack.c.h.bf16 %v4862_v27  ;;  %v4656_v52 = vunpack.c.l.bf16 %v4878_v39 }
  0xba   : > { %v2869_v49 = vmin.f32 %v2837_v20, 6.0  ;;  %v2198_v50 = vadd.f32 %v2166_v36, %v2065_v40  ;;  %v2431_v51 = vmul.f32 %v4592_v42, %v5516_v11  ;;  %v4657_v58 = vunpack.c.h.bf16 %v4878_v39  ;;  %v4847_v36 = vld [vmem:[%s5464_s22 + $0x2b0] sm:$0xff]  }
  0xbb   : > { %v2870_v54 = vmin.f32 %v2838_v43, 6.0  ;;  %v2330_v55 = vadd.f32 %v2298_v41, %v2197_v44  ;;  %v2432_v57 = vmul.f32 %v4593_v46, %v5516_v11  ;;  %v2564_v60 = vmul.f32 %v4656_v52, %v5526_v26 }
  0xbc   : > { %v2331_v59 = vadd.f32 %v2299_v45, %v2198_v50  ;;  %v4720_v61 = vunpack.c.l.bf16 %v4894_v47  ;;  %v4721_v63 = vunpack.c.h.bf16 %v4894_v47  ;;  %v2565_v4 = vmul.f32 %v4657_v58, %v5526_v26  ;;  %v4863_v50 = vld [vmem:[%s5464_s22 + $0x330] sm:$0xff]  }
  0xbd   : > { %v2897_v1 = vpack.c.bf16 %v2870_v54, %v2869_v49  ;;  %v2463_v3 = vadd.f32 %v2431_v51, %v2330_v55  ;;  %v4212_v5 = vunpack.c.l.bf16 %v4767_v53  ;;  %v4213_v13 = vunpack.c.h.bf16 %v4767_v53  ;;  %v4879_v55 = vld [vmem:[%s5464_s22 + $0x3b0] sm:$0xff]  }
  0xbe   : > { %v2464_v7 = vadd.f32 %v2432_v57, %v2331_v59  ;;  %v2697_v8 = vmul.f32 %v4720_v61, %v5510_v9  ;;  %v2698_v12 = vmul.f32 %v4721_v63, %v5510_v9  ;;  %v4276_v17 = vunpack.c.l.bf16 %v4783_v0 }
  0xbf   : > { %4952 = vmatprep.mubr.msk.bf16.mxu0 %vm2925_vm0, %v2897_v1  ;;  %v2596_v15 = vadd.f32 %v2564_v60, %v2463_v3  ;;  %v1635_v16 = vmul.f32 %v4212_v5, %v5474_v32  ;;  %v4277_v18 = vunpack.c.h.bf16 %v4783_v0  ;;  %v1636_v22 = vmul.f32 %v4213_v13, %v5474_v32  ;;  %v4895_v3 = vld [vmem:[%s5464_s22 + $0x430] sm:$0xff]  }
  0xc0   : > { %v2597_v21 = vadd.f32 %v2565_v4, %v2464_v7  ;;  %v4340_v23 = vunpack.c.l.bf16 %v4799_v6  ;;  %v4341_v24 = vunpack.c.h.bf16 %v4799_v6  ;;  %v1768_v19 = vmul.f32 %v4276_v17, %v5477_v33 }
  0xc1   : > { %v2729_v25 = vadd.f32 %v2697_v8, %v2596_v15  ;;  %v1769_v27 = vmul.f32 %v4277_v18, %v5477_v33  ;;  %v4404_v28 = vunpack.c.l.bf16 %v4815_v14  ;;  %v4405_v35 = vunpack.c.h.bf16 %v4815_v14  ;;  %v4768_v8 = vld [vmem:[%s5464_s22 + $0x38] sm:$0xff]  }
  0xc2   : > { %v2730_v30 = vadd.f32 %v2698_v12, %v2597_v21  ;;  %v1901_v31 = vmul.f32 %v4340_v23, %v5481_v37  ;;  %v1902_v34 = vmul.f32 %v4341_v24, %v5481_v37  ;;  %v1800_v39 = vadd.f32 %v1768_v19, %v1635_v16 }
  0xc3   : > { %v2768_v38 = vmul.f32 %v5543_v56, %v2729_v25  ;;  %v1801_v20 = vadd.f32 %v1769_v27, %v1636_v22  ;;  %v2034_v40 = vmul.f32 %v4404_v28, %v5492_v48  ;;  %v2035_v42 = vmul.f32 %v4405_v35, %v5492_v48  ;;  %v4784_v22 = vld [vmem:[%s5464_s22 + $0xb8] sm:$0xff]  }
  0xc4   : > { %v2769_v41 = vmul.f32 %v5543_v56, %v2730_v30  ;;  %v4468_v43 = vunpack.c.l.bf16 %v4831_v29  ;;  %v4469_v44 = vunpack.c.h.bf16 %v4831_v29  ;;  %v1933_v46 = vadd.f32 %v1901_v31, %v1800_v39  ;;  %v4800_v27 = vld [vmem:[%s5464_s22 + $0x138] sm:$0xff]  }
  0xc5   : > { %v2807_v45 = vadd.f32 %v5552_v2, %v2768_v38  ;;  %v1934_v47 = vadd.f32 %v1902_v34, %v1801_v20  ;;  %v4532_v49 = vunpack.c.l.bf16 %v4847_v36  ;;  %v4533_v54 = vunpack.c.h.bf16 %v4847_v36  ;;  %v4816_v34 = vld [vmem:[%s5464_s22 + $0x1b8] sm:$0xff]  }
  0xc6   : > { %v2808_v51 = vadd.f32 %v5552_v2, %v2769_v41  ;;  %v2167_v52 = vmul.f32 %v4468_v43, %v5500_v62  ;;  %v2168_v53 = vmul.f32 %v4469_v44, %v5500_v62  ;;  %v2066_v58 = vadd.f32 %v2034_v40, %v1933_v46 }
  0xc7   : > { %v2839_v57 = vmax.f32 %v2807_v45, 0.0  ;;  %v2067_v59 = vadd.f32 %v2035_v42, %v1934_v47  ;;  %v2300_v60 = vmul.f32 %v4532_v49, %v5513_v10  ;;  %v2301_v63 = vmul.f32 %v4533_v54, %v5513_v10  ;;  %v4832_v47 = vld [vmem:[%s5464_s22 + $0x238] sm:$0xff]  }
  0xc8   : > { %v2840_v61 = vmax.f32 %v2808_v51, 0.0  ;;  %v4596_v0 = vunpack.c.l.bf16 %v4863_v50  ;;  %v4597_v1 = vunpack.c.h.bf16 %v4863_v50  ;;  %v2199_v5 = vadd.f32 %v2167_v52, %v2066_v58  ;;  %v4848_v52 = vld [vmem:[%s5464_s22 + $0x2b8] sm:$0xff]  }
  0xc9   : > { %v2871_v4 = vmin.f32 %v2839_v57, 6.0  ;;  %v2200_v6 = vadd.f32 %v2168_v53, %v2067_v59  ;;  %v4660_v7 = vunpack.c.l.bf16 %v4879_v55  ;;  %v4661_v15 = vunpack.c.h.bf16 %v4879_v55 }
  0xca   : > { %v2872_v12 = vmin.f32 %v2840_v61, 6.0  ;;  %v2433_v13 = vmul.f32 %v4596_v0, %v5516_v11  ;;  %v2434_v14 = vmul.f32 %v4597_v1, %v5516_v11  ;;  %v2332_v16 = vadd.f32 %v2300_v60, %v2199_v5 }
  0xcb   : > { %v2333_v17 = vadd.f32 %v2301_v63, %v2200_v6  ;;  %v2566_v18 = vmul.f32 %v4660_v7, %v5526_v26  ;;  %v4724_v21 = vunpack.c.l.bf16 %v4895_v3  ;;  %v2567_v24 = vmul.f32 %v4661_v15, %v5526_v26 }
  0xcc   : > { %v2898_v23 = vpack.c.bf16 %v2872_v12, %v2871_v4  ;;  %v4725_v25 = vunpack.c.h.bf16 %v4895_v3  ;;  %v4216_v19 = vunpack.c.l.bf16 %v4768_v8  ;;  %v2465_v28 = vadd.f32 %v2433_v13, %v2332_v16  ;;  %v4864_v4 = vld [vmem:[%s5464_s22 + $0x338] sm:$0xff]  }
  0xcd   : > { %v2466_v29 = vadd.f32 %v2434_v14, %v2333_v17  ;;  %v2699_v30 = vmul.f32 %v4724_v21, %v5510_v9  ;;  %v4217_v31 = vunpack.c.h.bf16 %v4768_v8  ;;  %v4280_v38 = vunpack.c.l.bf16 %v4784_v22  ;;  %v4880_v12 = vld [vmem:[%s5464_s22 + $0x3b8] sm:$0xff]  }
  0xce   : > { %4953 = vmatmul.mubr.msk.bf16.gmra.mrb[8].mxu0 %vm2925_vm0, %v2898_v23  ;;  %v2700_v35 = vmul.f32 %v4725_v25, %v5510_v9  ;;  %v1637_v36 = vmul.f32 %v4216_v19, %v5474_v32  ;;  %v4281_v39 = vunpack.c.h.bf16 %v4784_v22  ;;  %v2598_v20 = vadd.f32 %v2566_v18, %v2465_v28 }
  0xcf   : > { %v2599_v40 = vadd.f32 %v2567_v24, %v2466_v29  ;;  %v1638_v41 = vmul.f32 %v4217_v31, %v5474_v32  ;;  %v4344_v42 = vunpack.c.l.bf16 %v4800_v27  ;;  %v1770_v43 = vmul.f32 %v4280_v38, %v5477_v33 }
  0xd0   : > { %v1771_v44 = vmul.f32 %v4281_v39, %v5477_v33  ;;  %v4345_v45 = vunpack.c.h.bf16 %v4800_v27  ;;  %v4408_v46 = vunpack.c.l.bf16 %v4816_v34  ;;  %v2731_v49 = vadd.f32 %v2699_v30, %v2598_v20  ;;  %v4896_v27 = vld [vmem:[%s5464_s22 + $0x438] sm:$0xff]   ;;  %v4785_v20 = vld [vmem:[%s5464_s22 + $0xc0] sm:$0xff]  }
  0xd1   : > { %v2732_v50 = vadd.f32 %v2700_v35, %v2599_v40  ;;  %v1903_v9 = vmul.f32 %v4344_v42, %v5481_v37  ;;  %v4409_v51 = vunpack.c.h.bf16 %v4816_v34  ;;  %v1802_v53 = vadd.f32 %v1770_v43, %v1637_v36  ;;  %v4769_v34 = vld [vmem:[%s5464_s22 + $0x40] sm:$0xff]  }
  0xd2   : > { %v1803_v54 = vadd.f32 %v1771_v44, %v1638_v41  ;;  %v1904_v55 = vmul.f32 %v4345_v45, %v5481_v37  ;;  %v2036_v57 = vmul.f32 %v4408_v46, %v5492_v48  ;;  %v2770_v58 = vmul.f32 %v5543_v56, %v2731_v49  ;;  %v4801_v49 = vld [vmem:[%s5464_s22 + $0x140] sm:$0xff]  }
  0xd3   : > { %v2771_v59 = vmul.f32 %v5543_v56, %v2732_v50  ;;  %v2037_v60 = vmul.f32 %v4409_v51, %v5492_v48  ;;  %v4472_v61 = vunpack.c.l.bf16 %v4832_v47  ;;  %v1935_v63 = vadd.f32 %v1903_v9, %v1802_v53  ;;  %v5768_v50 = vld [vmem:[%s6290_s1 + $0x8] ss:$0 sm:$0xff] }
  0xd4   : > { %v1936_v0 = vadd.f32 %v1904_v55, %v1803_v54  ;;  %v4473_v1 = vunpack.c.h.bf16 %v4832_v47  ;;  %v4536_v3 = vunpack.c.l.bf16 %v4848_v52  ;;  %v2809_v5 = vadd.f32 %v5552_v2, %v2770_v58  ;;  %v4817_v54 = vld [vmem:[%s5464_s22 + $0x1c0] sm:$0xff]  }
  0xd5   : > { %v2810_v6 = vadd.f32 %v5552_v2, %v2771_v59  ;;  %v2169_v7 = vmul.f32 %v4472_v61, %v5500_v62  ;;  %v4537_v8 = vunpack.c.h.bf16 %v4848_v52  ;;  %v2068_v13 = vadd.f32 %v2036_v57, %v1935_v63 }
  0xd6   : > { %v2069_v14 = vadd.f32 %v2037_v60, %v1936_v0  ;;  %v2170_v15 = vmul.f32 %v4473_v1, %v5500_v62  ;;  %v2302_v16 = vmul.f32 %v4536_v3, %v5513_v10  ;;  %v2841_v17 = vmax.f32 %v2809_v5, 0.0 }
  0xd7   : > { %v2842_v18 = vmax.f32 %v2810_v6, 0.0  ;;  %v2303_v21 = vmul.f32 %v4537_v8, %v5513_v10  ;;  %v4600_v22 = vunpack.c.l.bf16 %v4864_v4  ;;  %v2201_v23 = vadd.f32 %v2169_v7, %v2068_v13  ;;  %v4833_v6 = vld [vmem:[%s5464_s22 + $0x240] sm:$0xff]  }
  0xd8   : > { %v2202_v24 = vadd.f32 %v2170_v15, %v2069_v14  ;;  %v4601_v25 = vunpack.c.h.bf16 %v4864_v4  ;;  %v4664_v19 = vunpack.c.l.bf16 %v4880_v12  ;;  %v2873_v28 = vmin.f32 %v2841_v17, 6.0  ;;  %v4849_v14 = vld [vmem:[%s5464_s22 + $0x2c0] sm:$0xff]  }
  0xd9   : > { %v2874_v29 = vmin.f32 %v2842_v18, 6.0  ;;  %v2435_v30 = vmul.f32 %v4600_v22, %v5516_v11  ;;  %v4665_v31 = vunpack.c.h.bf16 %v4880_v12  ;;  %v2334_v35 = vadd.f32 %v2302_v16, %v2201_v23 }
  0xda   : > { %v2335_v36 = vadd.f32 %v2303_v21, %v2202_v24  ;;  %v2436_v38 = vmul.f32 %v4601_v25, %v5516_v11  ;;  %v2568_v39 = vmul.f32 %v4664_v19, %v5526_v26  ;;  %v4728_v42 = vunpack.c.l.bf16 %v4896_v27 }
  0xdb   : > { %v2899_v40 = vpack.c.bf16 %v2874_v29, %v2873_v28  ;;  %v2569_v41 = vmul.f32 %v4665_v31, %v5526_v26  ;;  %v4729_v43 = vunpack.c.h.bf16 %v4896_v27  ;;  %v2467_v44 = vadd.f32 %v2435_v30, %v2334_v35  ;;  %v4865_v29 = vld [vmem:[%s5464_s22 + $0x340] sm:$0xff]  }
  0xdc   : > { %v2468_v45 = vadd.f32 %v2436_v38, %v2335_v36  ;;  %v4220_v46 = vunpack.c.l.bf16 %v4769_v34  ;;  %v4221_v47 = vunpack.c.h.bf16 %v4769_v34  ;;  %v2701_v9 = vmul.f32 %v5768_v50, %v4728_v42  ;;  %v4881_v35 = vld [vmem:[%s5464_s22 + $0x3c0] sm:$0xff]  }
  0xdd   : > { %4956 = vmatprep.mubr.msk.bf16.mxu0 %vm2925_vm0, %v2899_v40  ;;  %v2702_v51 = vmul.f32 %v5768_v50, %v4729_v43  ;;  %v4284_v52 = vunpack.c.l.bf16 %v4785_v20  ;;  %v4285_v53 = vunpack.c.h.bf16 %v4785_v20  ;;  %v2600_v55 = vadd.f32 %v2568_v39, %v2467_v44  ;;  %v4897_v43 = vld [vmem:[%s5464_s22 + $0x440] sm:$0xff]  }
  0xde   : > { %v2601_v57 = vadd.f32 %v2569_v41, %v2468_v45  ;;  %v1639_v58 = vmul.f32 %v4220_v46, %v5474_v32  ;;  %v1640_v59 = vmul.f32 %v4221_v47, %v5474_v32  ;;  %v4348_v63 = vunpack.c.l.bf16 %v4801_v49 }
  0xdf   : > { %v1772_v60 = vmul.f32 %v4284_v52, %v5477_v33  ;;  %v1773_v61 = vmul.f32 %v4285_v53, %v5477_v33  ;;  %v4349_v0 = vunpack.c.h.bf16 %v4801_v49  ;;  %v2733_v1 = vadd.f32 %v2701_v9, %v2600_v55  ;;  %v4770_v49 = vld [vmem:[%s5464_s22 + $0x48] sm:$0xff]  }
  0xe0   : > { %v2734_v3 = vadd.f32 %v2702_v51, %v2601_v57  ;;  %v4412_v4 = vunpack.c.l.bf16 %v4817_v54  ;;  %v4413_v5 = vunpack.c.h.bf16 %v4817_v54  ;;  %v1905_v12 = vmul.f32 %v4348_v63, %v5481_v37  ;;  %v4786_v54 = vld [vmem:[%s5464_s22 + $0xc8] sm:$0xff]  }
  0xe1   : > { %v1804_v7 = vadd.f32 %v1772_v60, %v1639_v58  ;;  %v1805_v8 = vadd.f32 %v1773_v61, %v1640_v59  ;;  %v1906_v13 = vmul.f32 %v4349_v0, %v5481_v37  ;;  %v2772_v15 = vmul.f32 %v5543_v56, %v2733_v1  ;;  %v5038_v60 = vld [vmem:[%s6296_s7] sm:$0xff]  }
  0xe2   : > { %v2773_v16 = vmul.f32 %v5543_v56, %v2734_v3  ;;  %v2038_v17 = vmul.f32 %v4412_v4, %v5492_v48  ;;  %v2039_v18 = vmul.f32 %v4413_v5, %v5492_v48  ;;  %v4476_v23 = vunpack.c.l.bf16 %v4833_v6  ;;  %v4802_v3 = vld [vmem:[%s5464_s22 + $0x148] sm:$0xff]   ;;  %4976 = vmatprep.subr.bf16.mxu1 %v5038_v60 }
  0xe3   : > { %v1937_v21 = vadd.f32 %v1905_v12, %v1804_v7  ;;  %v1938_v22 = vadd.f32 %v1906_v13, %v1805_v8  ;;  %v4477_v24 = vunpack.c.h.bf16 %v4833_v6  ;;  %v2811_v25 = vadd.f32 %v5552_v2, %v2772_v15  ;;  %v4818_v8 = vld [vmem:[%s5464_s22 + $0x1c8] sm:$0xff]   ;;  %4977 = vmatpush3.bf16.msra.mxu1 %v5038_v60 }
  0xe4   : > { %v2812_v19 = vadd.f32 %v5552_v2, %v2773_v16  ;;  %v4540_v27 = vunpack.c.l.bf16 %v4849_v14  ;;  %v4541_v28 = vunpack.c.h.bf16 %v4849_v14  ;;  %v2171_v56 = vmul.f32 %v4476_v23, %v5500_v62 }
  0xe5   : > { %v2070_v30 = vadd.f32 %v2038_v17, %v1937_v21  ;;  %v2071_v31 = vadd.f32 %v2039_v18, %v1938_v22  ;;  %v2172_v34 = vmul.f32 %v4477_v24, %v5500_v62  ;;  %v2843_v36 = vmax.f32 %v2811_v25, 0.0 }
  0xe6   : > { %v2844_v38 = vmax.f32 %v2812_v19, 0.0  ;;  %v2304_v39 = vmul.f32 %v4540_v27, %v5513_v10  ;;  %v2305_v20 = vmul.f32 %v4541_v28, %v5513_v10  ;;  %v4604_v41 = vunpack.c.l.bf16 %v4865_v29  ;;  %v4834_v19 = vld [vmem:[%s5464_s22 + $0x248] sm:$0xff]  }
  0xe7   : > { %v2203_v2 = vadd.f32 %v2171_v56, %v2070_v30  ;;  %v2204_v40 = vadd.f32 %v2172_v34, %v2071_v31  ;;  %v4605_v42 = vunpack.c.h.bf16 %v4865_v29  ;;  %v2875_v44 = vmin.f32 %v2843_v36, 6.0  ;;  %v4850_v31 = vld [vmem:[%s5464_s22 + $0x2c8] sm:$0xff]   ;;  %v5818_v56 = vld [vmem:[%s6291_s2] ss:$0 sm:$0xff] }
  0xe8   : > { %v2876_v45 = vmin.f32 %v2844_v38, 6.0  ;;  %v4668_v46 = vunpack.c.l.bf16 %v4881_v35  ;;  %v4669_v47 = vunpack.c.h.bf16 %v4881_v35  ;;  %v2437_v52 = vmul.f32 %v4604_v41, %v5516_v11  ;;  %v5828_v41 = vld [vmem:[%s6292_s3] ss:$0 sm:$0xff] }
  0xe9   : > { %v2336_v9 = vadd.f32 %v2304_v39, %v2203_v2  ;;  %v2337_v51 = vadd.f32 %v2305_v20, %v2204_v40  ;;  %v2438_v53 = vmul.f32 %v4605_v42, %v5516_v11  ;;  %v4732_v59 = vunpack.c.l.bf16 %v4897_v43 }
  0xea   : > { %v2900_v55 = vpack.c.bf16 %v2876_v45, %v2875_v44  ;;  %v2570_v57 = vmul.f32 %v4668_v46, %v5526_v26  ;;  %v2571_v58 = vmul.f32 %v4669_v47, %v5526_v26  ;;  %v4733_v0 = vunpack.c.h.bf16 %v4897_v43  ;;  %v4866_v46 = vld [vmem:[%s5464_s22 + $0x348] sm:$0xff]  }
  0xeb   : > { %v2469_v61 = vadd.f32 %v2437_v52, %v2336_v9  ;;  %v2470_v63 = vadd.f32 %v2438_v53, %v2337_v51  ;;  %v4224_v1 = vunpack.c.l.bf16 %v4770_v49  ;;  %v2703_v4 = vmul.f32 %v5768_v50, %v4732_v59  ;;  %v4882_v52 = vld [vmem:[%s5464_s22 + $0x3c8] sm:$0xff]  }
  0xec   : > { %4957 = vmatmul.mubr.msk.bf16.gmra.mrb[12].mxu0 %vm2925_vm0, %v2900_v55  ;;  %v4225_v5 = vunpack.c.h.bf16 %v4770_v49  ;;  %v4288_v6 = vunpack.c.l.bf16 %v4786_v54  ;;  %v4289_v7 = vunpack.c.h.bf16 %v4786_v54  ;;  %v2704_v14 = vmul.f32 %v5768_v50, %v4733_v0 }
  0xed   : > { %v2602_v12 = vadd.f32 %v2570_v57, %v2469_v61  ;;  %v2603_v13 = vadd.f32 %v2571_v58, %v2470_v63  ;;  %v1641_v15 = vmul.f32 %v4224_v1, %v5474_v32  ;;  %v4352_v21 = vunpack.c.l.bf16 %v4802_v3  ;;  %v4898_v63 = vld [vmem:[%s5464_s22 + $0x448] sm:$0xff]  }
  0xee   : > { %v1642_v16 = vmul.f32 %v4225_v5, %v5474_v32  ;;  %v1774_v17 = vmul.f32 %v4288_v6, %v5477_v33  ;;  %v1775_v18 = vmul.f32 %v4289_v7, %v5477_v33  ;;  %v4353_v24 = vunpack.c.h.bf16 %v4802_v3  ;;  %v4771_v5 = vld [vmem:[%s5464_s22 + $0x50] sm:$0xff]  }
  0xef   : > { %v2735_v22 = vadd.f32 %v2703_v4, %v2602_v12  ;;  %v2736_v23 = vadd.f32 %v2704_v14, %v2603_v13  ;;  %v4416_v25 = vunpack.c.l.bf16 %v4818_v8  ;;  %v1907_v29 = vmul.f32 %v4352_v21, %v5481_v37  ;;  %v4787_v13 = vld [vmem:[%s5464_s22 + $0xd0] sm:$0xff]  }
  0xf0   : > { %v1806_v27 = vadd.f32 %v1774_v17, %v1641_v15  ;;  %v1807_v28 = vadd.f32 %v1775_v18, %v1642_v16  ;;  %v4417_v30 = vunpack.c.h.bf16 %v4818_v8  ;;  %v1908_v36 = vmul.f32 %v4353_v24, %v5481_v37  ;;  %v4803_v24 = vld [vmem:[%s5464_s22 + $0x150] sm:$0xff]  }
  0xf1   : > { %v2774_v34 = vmul.f32 %v5818_v56, %v2735_v22  ;;  %v2775_v35 = vmul.f32 %v5818_v56, %v2736_v23  ;;  %v2040_v38 = vmul.f32 %v4416_v25, %v5492_v48  ;;  %v4480_v2 = vunpack.c.l.bf16 %v4834_v19 }
  0xf2   : > { %v1939_v39 = vadd.f32 %v1907_v29, %v1806_v27  ;;  %v2041_v20 = vmul.f32 %v4417_v30, %v5492_v48  ;;  %v4481_v40 = vunpack.c.h.bf16 %v4834_v19  ;;  %v1940_v44 = vadd.f32 %v1908_v36, %v1807_v28  ;;  %v4819_v29 = vld [vmem:[%s5464_s22 + $0x1d0] sm:$0xff]  }
  0xf3   : > { %v2813_v42 = vadd.f32 %v5828_v41, %v2774_v34  ;;  %v2814_v43 = vadd.f32 %v5828_v41, %v2775_v35  ;;  %v4544_v45 = vunpack.c.l.bf16 %v4850_v31  ;;  %v2173_v49 = vmul.f32 %v4480_v2, %v5500_v62 }
  0xf4   : > { %v2072_v47 = vadd.f32 %v2040_v38, %v1939_v39  ;;  %v2174_v9 = vmul.f32 %v4481_v40, %v5500_v62  ;;  %v4545_v51 = vunpack.c.h.bf16 %v4850_v31  ;;  %v2073_v55 = vadd.f32 %v2041_v20, %v1940_v44  ;;  %v4835_v44 = vld [vmem:[%s5464_s22 + $0x250] sm:$0xff]  }
  0xf5   : > { %v2845_v53 = vmax.f32 %v2813_v42, 0.0  ;;  %v2846_v54 = vmax.f32 %v2814_v43, 0.0  ;;  %v2306_v57 = vmul.f32 %v4544_v45, %v5513_v10  ;;  %v4608_v60 = vunpack.c.l.bf16 %v4866_v46 }
  0xf6   : > { %v2205_v58 = vadd.f32 %v2173_v49, %v2072_v47  ;;  %v2307_v59 = vmul.f32 %v4545_v51, %v5513_v10  ;;  %v4609_v61 = vunpack.c.h.bf16 %v4866_v46  ;;  %v2206_v3 = vadd.f32 %v2174_v9, %v2073_v55  ;;  %v4851_v9 = vld [vmem:[%s5464_s22 + $0x2d0] sm:$0xff]  }
  0xf7   : > { %v2877_v0 = vmin.f32 %v2845_v53, 6.0  ;;  %v2878_v1 = vmin.f32 %v2846_v54, 6.0  ;;  %v4672_v4 = vunpack.c.l.bf16 %v4882_v52  ;;  %v2439_v7 = vmul.f32 %v4608_v60, %v5516_v11 }
  0xf8   : > { %v2338_v6 = vadd.f32 %v2306_v57, %v2205_v58  ;;  %v2440_v8 = vmul.f32 %v4609_v61, %v5516_v11  ;;  %v4673_v12 = vunpack.c.h.bf16 %v4882_v52  ;;  %v2339_v15 = vadd.f32 %v2307_v59, %v2206_v3 }
  0xf9   : > { %v2901_v14 = vpack.c.bf16 %v2878_v1, %v2877_v0  ;;  %v2572_v16 = vmul.f32 %v4672_v4, %v5526_v26  ;;  %v4736_v17 = vunpack.c.l.bf16 %v4898_v63  ;;  %v4737_v22 = vunpack.c.h.bf16 %v4898_v63  ;;  %v4867_v1 = vld [vmem:[%s5464_s22 + $0x350] sm:$0xff]  }
  0xfa   : > { %v2471_v18 = vadd.f32 %v2439_v7, %v2338_v6  ;;  %v2573_v21 = vmul.f32 %v4673_v12, %v5526_v26  ;;  %v4228_v23 = vunpack.c.l.bf16 %v4771_v5  ;;  %v2472_v25 = vadd.f32 %v2440_v8, %v2339_v15  ;;  %v4883_v7 = vld [vmem:[%s5464_s22 + $0x3d0] sm:$0xff]  }
  0xfb   : > { %4960 = vmatprep.mubr.msk.bf16.mxu0 %vm2925_vm0, %v2901_v14  ;;  %v2705_v19 = vmul.f32 %v5768_v50, %v4736_v17  ;;  %v4229_v27 = vunpack.c.h.bf16 %v4771_v5  ;;  %v4292_v28 = vunpack.c.l.bf16 %v4787_v13  ;;  %v2706_v31 = vmul.f32 %v5768_v50, %v4737_v22 }
  0xfc   : > { %v2604_v30 = vadd.f32 %v2572_v16, %v2471_v18  ;;  %v1643_v34 = vmul.f32 %v4228_v23, %v5474_v32  ;;  %v4293_v35 = vunpack.c.h.bf16 %v4787_v13  ;;  %v2605_v36 = vadd.f32 %v2573_v21, %v2472_v25  ;;  %v4899_v21 = vld [vmem:[%s5464_s22 + $0x450] sm:$0xff]  }
  0xfd   : > { %v1644_v38 = vmul.f32 %v4229_v27, %v5474_v32  ;;  %v1776_v39 = vmul.f32 %v4292_v28, %v5477_v33  ;;  %v4356_v20 = vunpack.c.l.bf16 %v4803_v24  ;;  %v4357_v42 = vunpack.c.h.bf16 %v4803_v24 }
  0xfe   : > { %v2737_v2 = vadd.f32 %v2705_v19, %v2604_v30  ;;  %v1777_v40 = vmul.f32 %v4293_v35, %v5477_v33  ;;  %v4420_v43 = vunpack.c.l.bf16 %v4819_v29  ;;  %v2738_v45 = vadd.f32 %v2706_v31, %v2605_v36  ;;  %v4772_v30 = vld [vmem:[%s5464_s22 + $0x58] sm:$0xff]  }
  0xff   : > { %v1808_v46 = vadd.f32 %v1776_v39, %v1643_v34  ;;  %v1909_v47 = vmul.f32 %v4356_v20, %v5481_v37  ;;  %v4421_v49 = vunpack.c.h.bf16 %v4819_v29  ;;  %v1910_v53 = vmul.f32 %v4357_v42, %v5481_v37  ;;  %v4804_v42 = vld [vmem:[%s5464_s22 + $0x158] sm:$0xff]  }
 0x100   : > { %v2776_v51 = vmul.f32 %v5818_v56, %v2737_v2  ;;  %v1809_v52 = vadd.f32 %v1777_v40, %v1644_v38  ;;  %v2042_v54 = vmul.f32 %v4420_v43, %v5492_v48  ;;  %v2777_v55 = vmul.f32 %v5818_v56, %v2738_v45  ;;  %v4788_v38 = vld [vmem:[%s5464_s22 + $0xd8] sm:$0xff]  }
 0x101   : > { %v1941_v57 = vadd.f32 %v1909_v47, %v1808_v46  ;;  %v2043_v58 = vmul.f32 %v4421_v49, %v5492_v48  ;;  %v4484_v59 = vunpack.c.l.bf16 %v4835_v44  ;;  %v4485_v63 = vunpack.c.h.bf16 %v4835_v44 }
 0x102   : > { %v2815_v60 = vadd.f32 %v5828_v41, %v2776_v51  ;;  %v1942_v61 = vadd.f32 %v1910_v53, %v1809_v52  ;;  %v4548_v0 = vunpack.c.l.bf16 %v4851_v9  ;;  %v2816_v3 = vadd.f32 %v5828_v41, %v2777_v55  ;;  %v4820_v52 = vld [vmem:[%s5464_s22 + $0x1d8] sm:$0xff]  }
 0x103   : > { %v2074_v4 = vadd.f32 %v2042_v54, %v1941_v57  ;;  %v2175_v5 = vmul.f32 %v4484_v59, %v5500_v62  ;;  %v4549_v6 = vunpack.c.h.bf16 %v4851_v9  ;;  %v2176_v13 = vmul.f32 %v4485_v63, %v5500_v62  ;;  %v4836_v63 = vld [vmem:[%s5464_s22 + $0x258] sm:$0xff]  }
 0x104   : > { %v2847_v8 = vmax.f32 %v2815_v60, 0.0  ;;  %v2075_v12 = vadd.f32 %v2043_v58, %v1942_v61  ;;  %v2308_v14 = vmul.f32 %v4548_v0, %v5513_v10  ;;  %v2848_v15 = vmax.f32 %v2816_v3, 0.0 }
 0x105   : > { %v2207_v16 = vadd.f32 %v2175_v5, %v2074_v4  ;;  %v2309_v17 = vmul.f32 %v4549_v6, %v5513_v10  ;;  %v4612_v18 = vunpack.c.l.bf16 %v4867_v1  ;;  %v4613_v24 = vunpack.c.h.bf16 %v4867_v1 }
 0x106   : > { %v2879_v22 = vmin.f32 %v2847_v8, 6.0  ;;  %v2208_v23 = vadd.f32 %v2176_v13, %v2075_v12  ;;  %v4676_v25 = vunpack.c.l.bf16 %v4883_v7  ;;  %v2880_v19 = vmin.f32 %v2848_v15, 6.0  ;;  %v4852_v12 = vld [vmem:[%s5464_s22 + $0x2d8] sm:$0xff]  }
 0x107   : > { %v2340_v27 = vadd.f32 %v2308_v14, %v2207_v16  ;;  %v2441_v28 = vmul.f32 %v4612_v18, %v5516_v11  ;;  %v4677_v29 = vunpack.c.h.bf16 %v4883_v7  ;;  %v2442_v34 = vmul.f32 %v4613_v24, %v5516_v11 }
 0x108   : > { %v2341_v31 = vadd.f32 %v2309_v17, %v2208_v23  ;;  %v2574_v35 = vmul.f32 %v4676_v25, %v5526_v26  ;;  %v4740_v36 = vunpack.c.l.bf16 %v4899_v21  ;;  %v2902_v39 = vpack.c.bf16 %v2880_v19, %v2879_v22  ;;  %v4868_v23 = vld [vmem:[%s5464_s22 + $0x358] sm:$0xff]  }
 0x109   : > { %v2473_v20 = vadd.f32 %v2441_v28, %v2340_v27  ;;  %v2575_v2 = vmul.f32 %v4677_v29, %v5526_v26  ;;  %v4741_v40 = vunpack.c.h.bf16 %v4899_v21  ;;  %v4232_v45 = vunpack.c.l.bf16 %v4772_v30 }
 0x10a   : > { %v2474_v43 = vadd.f32 %v2442_v34, %v2341_v31  ;;  %v2707_v44 = vmul.f32 %v5768_v50, %v4740_v36  ;;  %v4233_v46 = vunpack.c.h.bf16 %v4772_v30  ;;  %4961 = vmatmul.mubr.msk.bf16.gmra.mrb[16].mxu0 %vm2925_vm0, %v2902_v39  ;;  %v4296_v9 = vunpack.c.l.bf16 %v4788_v38  ;;  %v4884_v34 = vld [vmem:[%s5464_s22 + $0x3d8] sm:$0xff]  }
 0x10b   : > { %v2606_v47 = vadd.f32 %v2574_v35, %v2473_v20  ;;  %v2708_v49 = vmul.f32 %v5768_v50, %v4741_v40  ;;  %v4297_v51 = vunpack.c.h.bf16 %v4788_v38  ;;  %v1645_v54 = vmul.f32 %v4232_v45, %v5474_v32  ;;  %v4900_v20 = vld [vmem:[%s5464_s22 + $0x458] sm:$0xff]  }
 0x10c   : > { %v2607_v53 = vadd.f32 %v2575_v2, %v2474_v43  ;;  %v1646_v55 = vmul.f32 %v4233_v46, %v5474_v32  ;;  %v4360_v57 = vunpack.c.l.bf16 %v4804_v42  ;;  %v1778_v59 = vmul.f32 %v4296_v9, %v5477_v33 }
 0x10d   : > { %v2739_v58 = vadd.f32 %v2707_v44, %v2606_v47  ;;  %v1779_v60 = vmul.f32 %v4297_v51, %v5477_v33  ;;  %v4361_v61 = vunpack.c.h.bf16 %v4804_v42  ;;  %v4424_v3 = vunpack.c.l.bf16 %v4820_v52 }
 0x10e   : > { %v2740_v0 = vadd.f32 %v2708_v49, %v2607_v53  ;;  %v1911_v1 = vmul.f32 %v4360_v57, %v5481_v37  ;;  %v4425_v4 = vunpack.c.h.bf16 %v4820_v52  ;;  %v1810_v6 = vadd.f32 %v1778_v59, %v1645_v54  ;;  %v4773_v49 = vld [vmem:[%s5464_s22 + $0x60] sm:$0xff]  }
 0x10f   : > { %v2778_v5 = vmul.f32 %v5818_v56, %v2739_v58  ;;  %v1811_v7 = vadd.f32 %v1779_v60, %v1646_v55  ;;  %v1912_v8 = vmul.f32 %v4361_v61, %v5481_v37  ;;  %v2044_v14 = vmul.f32 %v4424_v3, %v5492_v48  ;;  %v4789_v54 = vld [vmem:[%s5464_s22 + $0xe0] sm:$0xff]  }
 0x110   : > { %v2779_v13 = vmul.f32 %v5818_v56, %v2740_v0  ;;  %v2045_v15 = vmul.f32 %v4425_v4, %v5492_v48  ;;  %v4488_v16 = vunpack.c.l.bf16 %v4836_v63  ;;  %v1943_v18 = vadd.f32 %v1911_v1, %v1810_v6  ;;  %v4805_v60 = vld [vmem:[%s5464_s22 + $0x160] sm:$0xff]  }
 0x111   : > { %v2817_v17 = vadd.f32 %v5828_v41, %v2778_v5  ;;  %v1944_v21 = vadd.f32 %v1912_v8, %v1811_v7  ;;  %v4489_v22 = vunpack.c.h.bf16 %v4836_v63  ;;  %v4552_v19 = vunpack.c.l.bf16 %v4852_v12  ;;  %v4821_v7 = vld [vmem:[%s5464_s22 + $0x1e0] sm:$0xff]  }
 0x112   : > { %v2818_v24 = vadd.f32 %v5828_v41, %v2779_v13  ;;  %v2177_v25 = vmul.f32 %v4488_v16, %v5500_v62  ;;  %v4553_v27 = vunpack.c.h.bf16 %v4852_v12  ;;  %v2076_v29 = vadd.f32 %v2044_v14, %v1943_v18 }
 0x113   : > { %v2849_v28 = vmax.f32 %v2817_v17, 0.0  ;;  %v2077_v30 = vadd.f32 %v2045_v15, %v1944_v21  ;;  %v2178_v31 = vmul.f32 %v4489_v22, %v5500_v62  ;;  %v2310_v36 = vmul.f32 %v4552_v19, %v5513_v10  ;;  %v4837_v21 = vld [vmem:[%s5464_s22 + $0x260] sm:$0xff]  }
 0x114   : > { %v2850_v35 = vmax.f32 %v2818_v24, 0.0  ;;  %v2311_v38 = vmul.f32 %v4553_v27, %v5513_v10  ;;  %v4616_v39 = vunpack.c.l.bf16 %v4868_v23  ;;  %v2209_v40 = vadd.f32 %v2177_v25, %v2076_v29 }
 0x115   : > { %v2881_v2 = vmin.f32 %v2849_v28, 6.0  ;;  %v2210_v42 = vadd.f32 %v2178_v31, %v2077_v30  ;;  %v4617_v43 = vunpack.c.h.bf16 %v4868_v23  ;;  %v4680_v46 = vunpack.c.l.bf16 %v4884_v34  ;;  %v4853_v30 = vld [vmem:[%s5464_s22 + $0x2e0] sm:$0xff]  }
 0x116   : > { %v2882_v44 = vmin.f32 %v2850_v35, 6.0  ;;  %v2443_v45 = vmul.f32 %v4616_v39, %v5516_v11  ;;  %v4681_v47 = vunpack.c.h.bf16 %v4884_v34  ;;  %v2342_v9 = vadd.f32 %v2310_v36, %v2209_v40  ;;  %v4869_v40 = vld [vmem:[%s5464_s22 + $0x360] sm:$0xff]  }
 0x117   : > { %v2343_v51 = vadd.f32 %v2311_v38, %v2210_v42  ;;  %v2444_v52 = vmul.f32 %v4617_v43, %v5516_v11  ;;  %v4744_v53 = vunpack.c.l.bf16 %v4900_v20  ;;  %v2576_v57 = vmul.f32 %v4680_v46, %v5526_v26 }
 0x118   : > { %v2903_v55 = vpack.c.bf16 %v2882_v44, %v2881_v2  ;;  %v2577_v58 = vmul.f32 %v4681_v47, %v5526_v26  ;;  %v4745_v59 = vunpack.c.h.bf16 %v4900_v20  ;;  %v2475_v61 = vadd.f32 %v2443_v45, %v2342_v9 }
 0x119   : > { %v2476_v63 = vadd.f32 %v2444_v52, %v2343_v51  ;;  %v2709_v0 = vmul.f32 %v5768_v50, %v4744_v53  ;;  %v4236_v1 = vunpack.c.l.bf16 %v4773_v49  ;;  %v4237_v4 = vunpack.c.h.bf16 %v4773_v49  ;;  %v4885_v51 = vld [vmem:[%s5464_s22 + $0x3e0] sm:$0xff]  }
 0x11a   : > { %4964 = vmatprep.mubr.msk.bf16.mxu0 %vm2925_vm0, %v2903_v55  ;;  %v2710_v3 = vmul.f32 %v5768_v50, %v4745_v59  ;;  %v4300_v5 = vunpack.c.l.bf16 %v4789_v54  ;;  %v4301_v6 = vunpack.c.h.bf16 %v4789_v54  ;;  %v2608_v8 = vadd.f32 %v2576_v57, %v2475_v61  ;;  %v4901_v61 = vld [vmem:[%s5464_s22 + $0x460] sm:$0xff]  }
 0x11b   : > { %v2609_v12 = vadd.f32 %v2577_v58, %v2476_v63  ;;  %v1647_v13 = vmul.f32 %v4236_v1, %v5474_v32  ;;  %v4364_v14 = vunpack.c.l.bf16 %v4805_v60  ;;  %v1648_v15 = vmul.f32 %v4237_v4, %v5474_v32  ;;  %v4774_v4 = vld [vmem:[%s5464_s22 + $0x68] sm:$0xff]  }
 0x11c   : > { %v1780_v16 = vmul.f32 %v4300_v5, %v5477_v33  ;;  %v1781_v17 = vmul.f32 %v4301_v6, %v5477_v33  ;;  %v4365_v18 = vunpack.c.h.bf16 %v4805_v60  ;;  %v2741_v22 = vadd.f32 %v2709_v0, %v2608_v8 }
 0x11d   : > { %v2742_v23 = vadd.f32 %v2710_v3, %v2609_v12  ;;  %v1913_v24 = vmul.f32 %v4364_v14, %v5481_v37  ;;  %v4428_v25 = vunpack.c.l.bf16 %v4821_v7  ;;  %v4429_v29 = vunpack.c.h.bf16 %v4821_v7  ;;  %v4790_v12 = vld [vmem:[%s5464_s22 + $0xe8] sm:$0xff]  }
 0x11e   : > { %v1812_v19 = vadd.f32 %v1780_v16, %v1647_v13  ;;  %v1813_v27 = vadd.f32 %v1781_v17, %v1648_v15  ;;  %v1914_v28 = vmul.f32 %v4365_v18, %v5481_v37  ;;  %v2780_v31 = vmul.f32 %v5818_v56, %v2741_v22 }
 0x11f   : > { %v2781_v34 = vmul.f32 %v5818_v56, %v2742_v23  ;;  %v2046_v35 = vmul.f32 %v4428_v25, %v5492_v48  ;;  %v4492_v36 = vunpack.c.l.bf16 %v4837_v21  ;;  %v2047_v20 = vmul.f32 %v4429_v29, %v5492_v48  ;;  %v4806_v23 = vld [vmem:[%s5464_s22 + $0x168] sm:$0xff]  }
 0x120   : > { %v1945_v38 = vadd.f32 %v1913_v24, %v1812_v19  ;;  %v1946_v39 = vadd.f32 %v1914_v28, %v1813_v27  ;;  %v4493_v2 = vunpack.c.h.bf16 %v4837_v21  ;;  %v2819_v42 = vadd.f32 %v5828_v41, %v2780_v31  ;;  %v4822_v28 = vld [vmem:[%s5464_s22 + $0x1e8] sm:$0xff]  }
 0x121   : > { %v2820_v43 = vadd.f32 %v5828_v41, %v2781_v34  ;;  %v2179_v44 = vmul.f32 %v4492_v36, %v5500_v62  ;;  %v4556_v45 = vunpack.c.l.bf16 %v4853_v30  ;;  %v4557_v9 = vunpack.c.h.bf16 %v4853_v30 }
 0x122   : > { %v2078_v46 = vadd.f32 %v2046_v35, %v1945_v38  ;;  %v2079_v47 = vadd.f32 %v2047_v20, %v1946_v39  ;;  %v2180_v49 = vmul.f32 %v4493_v2, %v5500_v62  ;;  %v2851_v52 = vmax.f32 %v2819_v42, 0.0 }
 0x123   : > { %v2852_v53 = vmax.f32 %v2820_v43, 0.0  ;;  %v2312_v54 = vmul.f32 %v4556_v45, %v5513_v10  ;;  %v4620_v55 = vunpack.c.l.bf16 %v4869_v40  ;;  %v2313_v59 = vmul.f32 %v4557_v9, %v5513_v10  ;;  %v4838_v43 = vld [vmem:[%s5464_s22 + $0x268] sm:$0xff]  }
 0x124   : > { %v2211_v57 = vadd.f32 %v2179_v44, %v2078_v46  ;;  %v2212_v58 = vadd.f32 %v2180_v49, %v2079_v47  ;;  %v4621_v60 = vunpack.c.h.bf16 %v4869_v40  ;;  %v2883_v63 = vmin.f32 %v2851_v52, 6.0  ;;  %v4854_v49 = vld [vmem:[%s5464_s22 + $0x2e8] sm:$0xff]  }
 0x125   : > { %v2884_v0 = vmin.f32 %v2852_v53, 6.0  ;;  %v2445_v1 = vmul.f32 %v4620_v55, %v5516_v11  ;;  %v4684_v3 = vunpack.c.l.bf16 %v4885_v51  ;;  %v4685_v8 = vunpack.c.h.bf16 %v4885_v51 }
 0x126   : > { %v2344_v5 = vadd.f32 %v2312_v54, %v2211_v57  ;;  %v2345_v6 = vadd.f32 %v2313_v59, %v2212_v58  ;;  %v2446_v7 = vmul.f32 %v4621_v60, %v5516_v11  ;;  %v4748_v15 = vunpack.c.l.bf16 %v4901_v61 }
 0x127   : > { %v2904_v13 = vpack.c.bf16 %v2884_v0, %v2883_v63  ;;  %v2578_v14 = vmul.f32 %v4684_v3, %v5526_v26  ;;  %v4749_v16 = vunpack.c.h.bf16 %v4901_v61  ;;  %v2579_v21 = vmul.f32 %v4685_v8, %v5526_v26  ;;  %v4870_v0 = vld [vmem:[%s5464_s22 + $0x368] sm:$0xff]  }
 0x128   : > { %v2477_v17 = vadd.f32 %v2445_v1, %v2344_v5  ;;  %v2478_v18 = vadd.f32 %v2446_v7, %v2345_v6  ;;  %v4240_v22 = vunpack.c.l.bf16 %v4774_v4  ;;  %v2711_v24 = vmul.f32 %v5768_v50, %v4748_v15  ;;  %v4886_v6 = vld [vmem:[%s5464_s22 + $0x3e8] sm:$0xff]  }
 0x129   : > { %4965 = vmatmul.mubr.msk.bf16.gmra.mrb[20].mxu0 %vm2925_vm0, %v2904_v13  ;;  %v2712_v25 = vmul.f32 %v5768_v50, %v4749_v16  ;;  %v4241_v19 = vunpack.c.h.bf16 %v4774_v4  ;;  %v4304_v27 = vunpack.c.l.bf16 %v4790_v12  ;;  %v4305_v34 = vunpack.c.h.bf16 %v4790_v12 }
 0x12a   : > { %v2610_v29 = vadd.f32 %v2578_v14, %v2477_v17  ;;  %v2611_v30 = vadd.f32 %v2579_v21, %v2478_v18  ;;  %v1649_v31 = vmul.f32 %v4240_v22, %v5474_v32  ;;  %v4368_v38 = vunpack.c.l.bf16 %v4806_v23  ;;  %v4902_v18 = vld [vmem:[%s5464_s22 + $0x468] sm:$0xff]  }
 0x12b   : > { %v1650_v35 = vmul.f32 %v4241_v19, %v5474_v32  ;;  %v1782_v36 = vmul.f32 %v4304_v27, %v5477_v33  ;;  %v4369_v39 = vunpack.c.h.bf16 %v4806_v23  ;;  %v1783_v40 = vmul.f32 %v4305_v34, %v5477_v33 }
 0x12c   : > { %v2743_v20 = vadd.f32 %v2711_v24, %v2610_v29  ;;  %v2744_v2 = vadd.f32 %v2712_v25, %v2611_v30  ;;  %v4432_v42 = vunpack.c.l.bf16 %v4822_v28  ;;  %v1915_v45 = vmul.f32 %v4368_v38, %v5481_v37  ;;  %v4775_v25 = vld [vmem:[%s5464_s22 + $0x70] sm:$0xff]  }
 0x12d   : > { %v1814_v44 = vadd.f32 %v1782_v36, %v1649_v31  ;;  %v1916_v46 = vmul.f32 %v4369_v39, %v5481_v37  ;;  %v4433_v47 = vunpack.c.h.bf16 %v4822_v28  ;;  %v1815_v52 = vadd.f32 %v1783_v40, %v1650_v35  ;;  %v4791_v30 = vld [vmem:[%s5464_s22 + $0xf0] sm:$0xff]  }
 0x12e   : > { %v2782_v9 = vmul.f32 %v5818_v56, %v2743_v20  ;;  %v2783_v51 = vmul.f32 %v5818_v56, %v2744_v2  ;;  %v2048_v53 = vmul.f32 %v4432_v42, %v5492_v48  ;;  %v4496_v57 = vunpack.c.l.bf16 %v4838_v43  ;;  %v4807_v40 = vld [vmem:[%s5464_s22 + $0x170] sm:$0xff]  }
 0x12f   : > { %v1947_v54 = vadd.f32 %v1915_v45, %v1814_v44  ;;  %v2049_v55 = vmul.f32 %v4433_v47, %v5492_v48  ;;  %v4497_v58 = vunpack.c.h.bf16 %v4838_v43  ;;  %v1948_v61 = vadd.f32 %v1916_v46, %v1815_v52  ;;  %v4823_v46 = vld [vmem:[%s5464_s22 + $0x1f0] sm:$0xff]  }
 0x130   : > { %v2821_v59 = vadd.f32 %v5828_v41, %v2782_v9  ;;  %v2822_v60 = vadd.f32 %v5828_v41, %v2783_v51  ;;  %v4560_v63 = vunpack.c.l.bf16 %v4854_v49  ;;  %v2181_v3 = vmul.f32 %v4496_v57, %v5500_v62 }
 0x131   : > { %v2080_v1 = vadd.f32 %v2048_v53, %v1947_v54  ;;  %v2182_v4 = vmul.f32 %v4497_v58, %v5500_v62  ;;  %v4561_v5 = vunpack.c.h.bf16 %v4854_v49  ;;  %v2081_v12 = vadd.f32 %v2049_v55, %v1948_v61  ;;  %v4839_v61 = vld [vmem:[%s5464_s22 + $0x270] sm:$0xff]  }
 0x132   : > { %v2853_v7 = vmax.f32 %v2821_v59, 0.0  ;;  %v2854_v8 = vmax.f32 %v2822_v60, 0.0  ;;  %v2314_v13 = vmul.f32 %v4560_v63, %v5513_v10  ;;  %v4624_v16 = vunpack.c.l.bf16 %v4870_v0 }
 0x133   : > { %v2213_v14 = vadd.f32 %v2181_v3, %v2080_v1  ;;  %v2315_v15 = vmul.f32 %v4561_v5, %v5513_v10  ;;  %v4625_v17 = vunpack.c.h.bf16 %v4870_v0  ;;  %v2214_v23 = vadd.f32 %v2182_v4, %v2081_v12  ;;  %v4855_v4 = vld [vmem:[%s5464_s22 + $0x2f0] sm:$0xff]  }
 0x134   : > { %v2885_v21 = vmin.f32 %v2853_v7, 6.0  ;;  %v2886_v22 = vmin.f32 %v2854_v8, 6.0  ;;  %v4688_v24 = vunpack.c.l.bf16 %v4886_v6  ;;  %v2447_v27 = vmul.f32 %v4624_v16, %v5516_v11 }
 0x135   : > { %v2346_v19 = vadd.f32 %v2314_v13, %v2213_v14  ;;  %v2448_v28 = vmul.f32 %v4625_v17, %v5516_v11  ;;  %v4689_v29 = vunpack.c.h.bf16 %v4886_v6  ;;  %v2347_v34 = vadd.f32 %v2315_v15, %v2214_v23 }
 0x136   : > { %v2905_v31 = vpack.c.bf16 %v2886_v22, %v2885_v21  ;;  %v2580_v35 = vmul.f32 %v4688_v24, %v5526_v26  ;;  %v4752_v36 = vunpack.c.l.bf16 %v4902_v18  ;;  %v4753_v20 = vunpack.c.h.bf16 %v4902_v18  ;;  %v4871_v22 = vld [vmem:[%s5464_s22 + $0x370] sm:$0xff]  }
 0x137   : > { %v2479_v38 = vadd.f32 %v2447_v27, %v2346_v19  ;;  %v2581_v39 = vmul.f32 %v4689_v29, %v5526_v26  ;;  %v4244_v2 = vunpack.c.l.bf16 %v4775_v25  ;;  %v2480_v42 = vadd.f32 %v2448_v28, %v2347_v34  ;;  %v4887_v27 = vld [vmem:[%s5464_s22 + $0x3f0] sm:$0xff]  }
 0x138   : > { %4968 = vmatprep.mubr.msk.bf16.mxu0 %vm2925_vm0, %v2905_v31  ;;  %v2713_v43 = vmul.f32 %v5768_v50, %v4752_v36  ;;  %v4245_v44 = vunpack.c.h.bf16 %v4775_v25  ;;  %v4308_v45 = vunpack.c.l.bf16 %v4791_v30  ;;  %v2714_v49 = vmul.f32 %v5768_v50, %v4753_v20 }
 0x139   : > { %v2612_v47 = vadd.f32 %v2580_v35, %v2479_v38  ;;  %v1651_v9 = vmul.f32 %v4244_v2, %v5474_v32  ;;  %v4309_v51 = vunpack.c.h.bf16 %v4791_v30  ;;  %v2613_v52 = vadd.f32 %v2581_v39, %v2480_v42  ;;  %v4903_v39 = vld [vmem:[%s5464_s22 + $0x470] sm:$0xff]  }
 0x13a   : > { %v1652_v53 = vmul.f32 %v4245_v44, %v5474_v32  ;;  %v1784_v54 = vmul.f32 %v4308_v45, %v5477_v33  ;;  %v4372_v55 = vunpack.c.l.bf16 %v4807_v40  ;;  %v4373_v59 = vunpack.c.h.bf16 %v4807_v40 }
 0x13b   : > { %v2745_v57 = vadd.f32 %v2713_v43, %v2612_v47  ;;  %v1785_v58 = vmul.f32 %v4309_v51, %v5477_v33  ;;  %v4436_v60 = vunpack.c.l.bf16 %v4823_v46  ;;  %v2746_v63 = vadd.f32 %v2714_v49, %v2613_v52  ;;  %v4776_v47 = vld [vmem:[%s5464_s22 + $0x78] sm:$0xff]  }
 0x13c   : > { %v1816_v0 = vadd.f32 %v1784_v54, %v1651_v9  ;;  %v1917_v1 = vmul.f32 %v4372_v55, %v5481_v37  ;;  %v4437_v3 = vunpack.c.h.bf16 %v4823_v46  ;;  %v1918_v7 = vmul.f32 %v4373_v59, %v5481_v37  ;;  %v4808_v59 = vld [vmem:[%s5464_s22 + $0x178] sm:$0xff]  }
 0x13d   : > { %v2784_v5 = vmul.f32 %v5818_v56, %v2745_v57  ;;  %v1817_v6 = vadd.f32 %v1785_v58, %v1652_v53  ;;  %v2050_v8 = vmul.f32 %v4436_v60, %v5492_v48  ;;  %v2785_v12 = vmul.f32 %v5818_v56, %v2746_v63  ;;  %v4792_v53 = vld [vmem:[%s5464_s22 + $0xf8] sm:$0xff]  }
 0x13e   : > { %v1949_v13 = vadd.f32 %v1917_v1, %v1816_v0  ;;  %v2051_v14 = vmul.f32 %v4437_v3, %v5492_v48  ;;  %v4500_v15 = vunpack.c.l.bf16 %v4839_v61  ;;  %v4501_v18 = vunpack.c.h.bf16 %v4839_v61 }
 0x13f   : > { %v2823_v16 = vadd.f32 %v5828_v41, %v2784_v5  ;;  %v1950_v17 = vadd.f32 %v1918_v7, %v1817_v6  ;;  %v4564_v21 = vunpack.c.l.bf16 %v4855_v4  ;;  %v2824_v23 = vadd.f32 %v5828_v41, %v2785_v12  ;;  %v4824_v6 = vld [vmem:[%s5464_s22 + $0x1f8] sm:$0xff]  }
 0x140   : > { %v2082_v24 = vadd.f32 %v2050_v8, %v1949_v13  ;;  %v2183_v25 = vmul.f32 %v4500_v15, %v5500_v62  ;;  %v4565_v19 = vunpack.c.h.bf16 %v4855_v4  ;;  %v2184_v30 = vmul.f32 %v4501_v18, %v5500_v62  ;;  %v4840_v18 = vld [vmem:[%s5464_s22 + $0x278] sm:$0xff]  }
 0x141   : > { %v2855_v28 = vmax.f32 %v2823_v16, 0.0  ;;  %v2083_v29 = vadd.f32 %v2051_v14, %v1950_v17  ;;  %v2316_v31 = vmul.f32 %v4564_v21, %v5513_v10  ;;  %v2856_v34 = vmax.f32 %v2824_v23, 0.0 }
 0x142   : > { %v2215_v35 = vadd.f32 %v2183_v25, %v2082_v24  ;;  %v2317_v36 = vmul.f32 %v4565_v19, %v5513_v10  ;;  %v4628_v38 = vunpack.c.l.bf16 %v4871_v22  ;;  %v4629_v40 = vunpack.c.h.bf16 %v4871_v22 }
 0x143   : > { %v2887_v20 = vmin.f32 %v2855_v28, 6.0  ;;  %v2216_v2 = vadd.f32 %v2184_v30, %v2083_v29  ;;  %v4692_v42 = vunpack.c.l.bf16 %v4887_v27  ;;  %v2888_v43 = vmin.f32 %v2856_v34, 6.0 }
 0x144   : > { %v2348_v44 = vadd.f32 %v2316_v31, %v2215_v35  ;;  %v2449_v45 = vmul.f32 %v4628_v38, %v5516_v11  ;;  %v4693_v46 = vunpack.c.h.bf16 %v4887_v27  ;;  %v2450_v9 = vmul.f32 %v4629_v40, %v5516_v11  ;;  %v4856_v27 = vld [vmem:[%s5464_s22 + $0x2f8] sm:$0xff]  }
 0x145   : > { %v2349_v49 = vadd.f32 %v2317_v36, %v2216_v2  ;;  %v2582_v51 = vmul.f32 %v4692_v42, %v5526_v26  ;;  %v4756_v52 = vunpack.c.l.bf16 %v4903_v39  ;;  %v2906_v54 = vpack.c.bf16 %v2888_v43, %v2887_v20  ;;  %v4872_v38 = vld [vmem:[%s5464_s22 + $0x378] sm:$0xff]  }
 0x146   : > { %v2481_v55 = vadd.f32 %v2449_v45, %v2348_v44  ;;  %v2583_v57 = vmul.f32 %v4693_v46, %v5526_v26  ;;  %v4757_v58 = vunpack.c.h.bf16 %v4903_v39  ;;  %v4248_v63 = vunpack.c.l.bf16 %v4776_v47 }
 0x147   : > { %v2482_v60 = vadd.f32 %v2450_v9, %v2349_v49  ;;  %v2715_v61 = vmul.f32 %v5768_v50, %v4756_v52  ;;  %v4249_v0 = vunpack.c.h.bf16 %v4776_v47  ;;  %4969 = vmatmul.mubr.msk.bf16.gmra.mrb[24].mxu0 %vm2925_vm0, %v2906_v54  ;;  %v4312_v4 = vunpack.c.l.bf16 %v4792_v53  ;;  %v4904_v9 = vld [vmem:[%s5464_s22 + $0x478] sm:$0xff]  }
 0x148   : > { %v2614_v1 = vadd.f32 %v2582_v51, %v2481_v55  ;;  %v2716_v3 = vmul.f32 %v5768_v50, %v4757_v58  ;;  %v4313_v5 = vunpack.c.h.bf16 %v4792_v53  ;;  %v1653_v8 = vmul.f32 %v4248_v63, %v5474_v32 }
 0x149   : > { %v2615_v7 = vadd.f32 %v2583_v57, %v2482_v60  ;;  %v1654_v12 = vmul.f32 %v4249_v0, %v5474_v32  ;;  %v4376_v13 = vunpack.c.l.bf16 %v4808_v59  ;;  %v1786_v15 = vmul.f32 %v4312_v4, %v5477_v33 }
 0x14a   : > { %v2747_v14 = vadd.f32 %v2715_v61, %v2614_v1  ;;  %v1787_v16 = vmul.f32 %v4313_v5, %v5477_v33  ;;  %v4377_v17 = vunpack.c.h.bf16 %v4808_v59  ;;  %v4440_v22 = vunpack.c.l.bf16 %v4824_v6 }
 0x14b   : > { %v2748_v21 = vadd.f32 %v2716_v3, %v2615_v7  ;;  %v1919_v50 = vmul.f32 %v4376_v13, %v5481_v37  ;;  %v4441_v23 = vunpack.c.h.bf16 %v4824_v6  ;;  %v1818_v25 = vadd.f32 %v1786_v15, %v1653_v8  ;;  %v5042_v6 = vld [vmem:[%s6290_s1 + $0x8] ss:$0 sm:$0xff] }
 0x14c   : > { %v2786_v24 = vmul.f32 %v5818_v56, %v2747_v14  ;;  %v1819_v19 = vadd.f32 %v1787_v16, %v1654_v12  ;;  %v1920_v32 = vmul.f32 %v4377_v17, %v5481_v37  ;;  %v2052_v29 = vmul.f32 %v4440_v22, %v5492_v48 }
 0x14d   : > { %v2787_v28 = vmul.f32 %v5818_v56, %v2748_v21  ;;  %v2053_v33 = vmul.f32 %v4441_v23, %v5492_v48  ;;  %v4504_v30 = vunpack.c.l.bf16 %v4840_v18  ;;  %v1951_v34 = vadd.f32 %v1919_v50, %v1818_v25  ;;  %v4888_v48 = vld [vmem:[%s5464_s22 + $0x3f8] sm:$0xff]   ;;  %v6046_v50 = vld [vmem:[%s6294_s5] ss:$0 sm:$0xff] }
 0x14e   : > { %v2825_v31 = vadd.f32 %v5828_v41, %v2786_v24  ;;  %v1952_v35 = vadd.f32 %v1920_v32, %v1819_v19  ;;  %v4505_v36 = vunpack.c.h.bf16 %v4840_v18  ;;  %v4568_v20 = vunpack.c.l.bf16 %v4856_v27 }
 0x14f   : > { %v2826_v39 = vadd.f32 %v5828_v41, %v2787_v28  ;;  %v2185_v37 = vmul.f32 %v4504_v30, %v5500_v62  ;;  %v4569_v2 = vunpack.c.h.bf16 %v4856_v27  ;;  %v2084_v42 = vadd.f32 %v2052_v29, %v1951_v34 }
 0x150   : > { %v2857_v40 = vmax.f32 %v2825_v31, 0.0  ;;  %v2085_v43 = vadd.f32 %v2053_v33, %v1952_v35  ;;  %v2186_v44 = vmul.f32 %v4505_v36, %v5500_v62  ;;  %v2318_v46 = vmul.f32 %v4568_v20, %v5513_v10 }
 0x151   : > { %v2858_v45 = vmax.f32 %v2826_v39, 0.0  ;;  %v2319_v47 = vmul.f32 %v4569_v2, %v5513_v10  ;;  %v4632_v49 = vunpack.c.l.bf16 %v4872_v38  ;;  %v2217_v52 = vadd.f32 %v2185_v37, %v2084_v42 }
 0x152   : > { %v2889_v51 = vmin.f32 %v2857_v40, 6.0  ;;  %v2218_v53 = vadd.f32 %v2186_v44, %v2085_v43  ;;  %v4633_v54 = vunpack.c.h.bf16 %v4872_v38  ;;  %v4696_v58 = vunpack.c.l.bf16 %v4888_v48 }
 0x153   : > { %v2890_v55 = vmin.f32 %v2858_v45, 6.0  ;;  %v2451_v57 = vmul.f32 %v4632_v49, %v5516_v11  ;;  %v4697_v59 = vunpack.c.h.bf16 %v4888_v48  ;;  %v2350_v60 = vadd.f32 %v2318_v46, %v2217_v52 }
 0x154   : > { %v2351_v61 = vadd.f32 %v2319_v47, %v2218_v53  ;;  %v2452_v62 = vmul.f32 %v4633_v54, %v5516_v11  ;;  %v4760_v63 = vunpack.c.l.bf16 %v4904_v9  ;;  %v2584_v1 = vmul.f32 %v4696_v58, %v5526_v26 }
 0x155   : > { %v2907_v0 = vpack.c.bf16 %v2890_v55, %v2889_v51  ;;  %v2585_v10 = vmul.f32 %v4697_v59, %v5526_v26  ;;  %v4761_v3 = vunpack.c.h.bf16 %v4904_v9  ;;  %v2483_v4 = vadd.f32 %v2451_v57, %v2350_v60 }
 0x156   : > { %v2484_v5 = vadd.f32 %v2452_v62, %v2351_v61  ;;  %v2717_v7 = vmul.f32 %v5042_v6, %v4760_v63 }
 0x157   : > { %4972 = vmatprep.mubr.msk.bf16.mxu0 %vm2925_vm0, %v2907_v0  ;;  %v2718_v8 = vmul.f32 %v5042_v6, %v4761_v3  ;;  %v2616_v12 = vadd.f32 %v2584_v1, %v2483_v4 }
 0x158   : > { %v2617_v13 = vadd.f32 %v2585_v10, %v2484_v5 }
 0x159   : > { %v2749_v11 = vadd.f32 %v2717_v7, %v2616_v12 }
 0x15a   : > { %v2750_v14 = vadd.f32 %v2718_v8, %v2617_v13 }
 0x15b   : > { %v2788_v15 = vmul.f32 %v5818_v56, %v2749_v11 }
 0x15c   : > { %v2789_v16 = vmul.f32 %v5818_v56, %v2750_v14  ;;  %v6052_v56 = vld [vmem:[%s6295_s6] ss:$0 sm:$0xff] }
 0x15d   : > { %v2827_v26 = vadd.f32 %v5828_v41, %v2788_v15 }
 0x15e   : > { %v2828_v17 = vadd.f32 %v5828_v41, %v2789_v16 }
 0x15f   : > { %v2859_v18 = vmax.f32 %v2827_v26, 0.0 }
 0x160   : > { %v2860_v21 = vmax.f32 %v2828_v17, 0.0 }
 0x161   : > { %v2891_v22 = vmin.f32 %v2859_v18, 6.0 }
 0x162   : > { %v2892_v23 = vmin.f32 %v2860_v21, 6.0 }
 0x163   : > { %v4946_v24 = vpop.f32.mrb[0].mxu0 }
 0x164   : > { %v2908_v25 = vpack.c.bf16 %v2892_v23, %v2891_v22  ;;  %v3144_v19 = vmul.f32 %v4946_v24, %v6046_v50  ;;  %v3008_v32 = vpop.f32.mrb[1].mxu0 }
 0x165   : > { %v3142_v41 = vmul.f32 %v6046_v50, %v3008_v32  ;;  %v4947_v27 = vpop.f32.mrb[2].mxu0 }
 0x166   : > { %4973 = vmatmul.mubr.msk.bf16.gmra.mrb[28].mxu0 %vm2925_vm0, %v2908_v25  ;;  %v3145_v28 = vmul.f32 %v4947_v27, %v6046_v50  ;;  %v3011_v29 = vpop.f32.mrb[3].mxu0  ;;  %v3183_v30 = vadd.f32 %v6052_v56, %v3144_v19 }
 0x167   : > { %v3143_v33 = vmul.f32 %v6046_v50, %v3011_v29  ;;  %v3181_v34 = vadd.f32 %v6052_v56, %v3142_v41 }
 0x168   : > { %v3184_v31 = vadd.f32 %v6052_v56, %v3145_v28 }
 0x169   : > { %v3182_v35 = vadd.f32 %v6052_v56, %v3143_v33 }
 0x16a   : > { %v3214_v36 = vpack.c.bf16 %v3184_v31, %v3183_v30 }
 0x16b   : > { %v3213_v38 = vpack.c.bf16 %v3182_v35, %v3181_v34 }
 0x16d   : > { %4978 = vmatprep.mubr.msk.bf16.mxu1 %vm3237_vm1, %v3213_v38 }
 0x16e   : > { %4979 = vmatmul.mubr.msk.bf16.vlgmr.msra.gmra.mrb[0].mxu1 %vm3237_vm1, %v3214_v36 }
 0x182   : > { %v4950_v39 = vpop.f32.mrb[4].mxu0 }
 0x183   : > { %v3148_v37 = vmul.f32 %v4950_v39, %v6046_v50  ;;  %v3024_v20 = vpop.f32.mrb[5].mxu0 }
 0x184   : > { %v3146_v2 = vmul.f32 %v6046_v50, %v3024_v20  ;;  %v4951_v40 = vpop.f32.mrb[6].mxu0 }
 0x185   : > { %v3149_v42 = vmul.f32 %v4951_v40, %v6046_v50  ;;  %v3027_v43 = vpop.f32.mrb[7].mxu0  ;;  %v3187_v48 = vadd.f32 %v6052_v56, %v3148_v37 }
 0x186   : > { %v3147_v44 = vmul.f32 %v6046_v50, %v3027_v43  ;;  %v3185_v46 = vadd.f32 %v6052_v56, %v3146_v2 }
 0x187   : > { %v3188_v45 = vadd.f32 %v6052_v56, %v3149_v42 }
 0x188   : > { %v3186_v47 = vadd.f32 %v6052_v56, %v3147_v44 }
 0x189   : > { %v3216_v49 = vpack.c.bf16 %v3188_v45, %v3187_v48 }
 0x18a   : > { %v3215_v9 = vpack.c.bf16 %v3186_v47, %v3185_v46 }
 0x18c   : > { %4982 = vmatprep.mubr.msk.bf16.mxu1 %vm3237_vm1, %v3215_v9 }
 0x18d   : > { %4983 = vmatmul.mubr.msk.bf16.gmra.mrb[4].mxu1 %vm3237_vm1, %v3216_v49 }
 0x1a1   : > { %v4954_v51 = vpop.f32.mrb[8].mxu0 }
 0x1a2   : > { %v3152_v52 = vmul.f32 %v4954_v51, %v6046_v50  ;;  %v3040_v53 = vpop.f32.mrb[9].mxu0 }
 0x1a3   : > { %v3150_v54 = vmul.f32 %v6046_v50, %v3040_v53  ;;  %v4955_v55 = vpop.f32.mrb[10].mxu0 }
 0x1a4   : > { %v3153_v57 = vmul.f32 %v4955_v55, %v6046_v50  ;;  %v3043_v58 = vpop.f32.mrb[11].mxu0  ;;  %v3191_v60 = vadd.f32 %v6052_v56, %v3152_v52 }
 0x1a5   : > { %v3151_v59 = vmul.f32 %v6046_v50, %v3043_v58  ;;  %v3189_v62 = vadd.f32 %v6052_v56, %v3150_v54 }
 0x1a6   : > { %v3192_v61 = vadd.f32 %v6052_v56, %v3153_v57 }
 0x1a7   : > { %v3190_v63 = vadd.f32 %v6052_v56, %v3151_v59 }
 0x1a8   : > { %v3218_v0 = vpack.c.bf16 %v3192_v61, %v3191_v60 }
 0x1a9   : > { %v3217_v1 = vpack.c.bf16 %v3190_v63, %v3189_v62 }
 0x1ab   : > { %4986 = vmatprep.mubr.msk.bf16.mxu1 %vm3237_vm1, %v3217_v1 }
 0x1ac   : > { %4987 = vmatmul.mubr.msk.bf16.gmra.mrb[8].mxu1 %vm3237_vm1, %v3218_v0 }
 0x1bf   : > { %v4958_v10 = vpop.f32.mrb[12].mxu0 }
 0x1c0   : > { %v3156_v3 = vmul.f32 %v4958_v10, %v6046_v50  ;;  %v3056_v4 = vpop.f32.mrb[13].mxu0 }
 0x1c1   : > { %v3154_v5 = vmul.f32 %v6046_v50, %v3056_v4  ;;  %v4959_v6 = vpop.f32.mrb[14].mxu0 }
 0x1c2   : > { %v3157_v7 = vmul.f32 %v4959_v6, %v6046_v50  ;;  %v3059_v8 = vpop.f32.mrb[15].mxu0  ;;  %v3195_v13 = vadd.f32 %v6052_v56, %v3156_v3 }
 0x1c3   : > { %v3155_v12 = vmul.f32 %v6046_v50, %v3059_v8  ;;  %v3193_v14 = vadd.f32 %v6052_v56, %v3154_v5  ;;  %v6137_v8 = vld [vmem:[%s6297_s8] ss:$0 sm:$0xff] }
 0x1c4   : > { %v3196_v11 = vadd.f32 %v6052_v56, %v3157_v7 }
 0x1c5   : > { %v3194_v15 = vadd.f32 %v6052_v56, %v3155_v12 }
 0x1c6   : > { %v3220_v16 = vpack.c.bf16 %v3196_v11, %v3195_v13 }
 0x1c7   : > { %v3219_v26 = vpack.c.bf16 %v3194_v15, %v3193_v14 }
 0x1c9   : > { %4990 = vmatprep.mubr.msk.bf16.mxu1 %vm3237_vm1, %v3219_v26 }
 0x1ca   : > { %4991 = vmatmul.mubr.msk.bf16.gmra.mrb[12].mxu1 %vm3237_vm1, %v3220_v16 }
 0x1dd   : > { %v4962_v17 = vpop.f32.mrb[16].mxu0 }
 0x1de   : > { %v3160_v18 = vmul.f32 %v4962_v17, %v6046_v50  ;;  %v3072_v21 = vpop.f32.mrb[17].mxu0 }
 0x1df   : > { %v3158_v22 = vmul.f32 %v6046_v50, %v3072_v21  ;;  %v4963_v23 = vpop.f32.mrb[18].mxu0 }
 0x1e0   : > { %v3161_v24 = vmul.f32 %v4963_v23, %v6046_v50  ;;  %v3075_v25 = vpop.f32.mrb[19].mxu0  ;;  %v3199_v32 = vadd.f32 %v6052_v56, %v3160_v18 }
 0x1e1   : > { %v3159_v19 = vmul.f32 %v6046_v50, %v3075_v25  ;;  %v3197_v27 = vadd.f32 %v6052_v56, %v3158_v22 }
 0x1e2   : > { %v3200_v41 = vadd.f32 %v6052_v56, %v3161_v24 }
 0x1e3   : > { %v3198_v28 = vadd.f32 %v6052_v56, %v3159_v19 }
 0x1e4   : > { %v3222_v29 = vpack.c.bf16 %v3200_v41, %v3199_v32 }
 0x1e5   : > { %v3221_v33 = vpack.c.bf16 %v3198_v28, %v3197_v27 }
 0x1e7   : > { %4994 = vmatprep.mubr.msk.bf16.mxu1 %vm3237_vm1, %v3221_v33 }
 0x1e8   : > { %4995 = vmatmul.mubr.msk.bf16.gmra.mrb[16].mxu1 %vm3237_vm1, %v3222_v29 }
 0x1fc   : > { %v4966_v30 = vpop.f32.mrb[20].mxu0 }
 0x1fd   : > { %v3164_v31 = vmul.f32 %v4966_v30, %v6046_v50  ;;  %v3088_v34 = vpop.f32.mrb[21].mxu0 }
 0x1fe   : > { %v3162_v35 = vmul.f32 %v6046_v50, %v3088_v34  ;;  %v4967_v36 = vpop.f32.mrb[22].mxu0 }
 0x1ff   : > { %v3165_v38 = vmul.f32 %v4967_v36, %v6046_v50  ;;  %v3091_v39 = vpop.f32.mrb[23].mxu0  ;;  %v3203_v20 = vadd.f32 %v6052_v56, %v3164_v31 }
 0x200   : > { %v3163_v37 = vmul.f32 %v6046_v50, %v3091_v39  ;;  %v3201_v40 = vadd.f32 %v6052_v56, %v3162_v35 }
 0x201   : > { %v3204_v2 = vadd.f32 %v6052_v56, %v3165_v38 }
 0x202   : > { %v3202_v42 = vadd.f32 %v6052_v56, %v3163_v37 }
 0x203   : > { %v3224_v43 = vpack.c.bf16 %v3204_v2, %v3203_v20 }
 0x204   : > { %v3223_v44 = vpack.c.bf16 %v3202_v42, %v3201_v40 }
 0x206   : > { %4998 = vmatprep.mubr.msk.bf16.mxu1 %vm3237_vm1, %v3223_v44 }
 0x207   : > { %4999 = vmatmul.mubr.msk.bf16.gmra.mrb[20].mxu1 %vm3237_vm1, %v3224_v43 }
 0x21a   : > { %v4970_v48 = vpop.f32.mrb[24].mxu0 }
 0x21b   : > { %v3168_v45 = vmul.f32 %v4970_v48, %v6046_v50  ;;  %v3104_v46 = vpop.f32.mrb[25].mxu0 }
 0x21c   : > { %v3166_v47 = vmul.f32 %v6046_v50, %v3104_v46  ;;  %v4971_v49 = vpop.f32.mrb[26].mxu0 }
 0x21d   : > { %v3169_v9 = vmul.f32 %v4971_v49, %v6046_v50  ;;  %v3107_v51 = vpop.f32.mrb[27].mxu0  ;;  %v3207_v53 = vadd.f32 %v6052_v56, %v3168_v45 }
 0x21e   : > { %v3167_v52 = vmul.f32 %v6046_v50, %v3107_v51  ;;  %v3205_v55 = vadd.f32 %v6052_v56, %v3166_v47 }
 0x21f   : > { %v3208_v54 = vadd.f32 %v6052_v56, %v3169_v9 }
 0x220   : > { %v3206_v57 = vadd.f32 %v6052_v56, %v3167_v52 }
 0x221   : > { %v3226_v58 = vpack.c.bf16 %v3208_v54, %v3207_v53 }
 0x222   : > { %v3225_v59 = vpack.c.bf16 %v3206_v57, %v3205_v55 }
 0x224   : > { %5002 = vmatprep.mubr.msk.bf16.mxu1 %vm3237_vm1, %v3225_v59 }
 0x225   : > { %5003 = vmatmul.mubr.msk.bf16.gmra.mrb[24].mxu1 %vm3237_vm1, %v3226_v58 }
 0x239   : > { %v4974_v60 = vpop.f32.mrb[28].mxu0 }
 0x23a   : > { %v3172_v61 = vmul.f32 %v4974_v60, %v6046_v50  ;;  %v3120_v62 = vpop.f32.mrb[29].mxu0 }
 0x23b   : > { %v3170_v63 = vmul.f32 %v6046_v50, %v3120_v62  ;;  %v4975_v0 = vpop.f32.mrb[30].mxu0 }
 0x23c   : > { %v3173_v1 = vmul.f32 %v4975_v0, %v6046_v50  ;;  %v3123_v10 = vpop.f32.mrb[31].mxu0  ;;  %v3211_v4 = vadd.f32 %v6052_v56, %v3172_v61 }
 0x23d   : > { %v3171_v3 = vmul.f32 %v6046_v50, %v3123_v10  ;;  %v3209_v6 = vadd.f32 %v6052_v56, %v3170_v63  ;;  %v6142_v50 = vld [vmem:[%s6298_s9] ss:$0 sm:$0xff] }
 0x23e   : > { %v3212_v5 = vadd.f32 %v6052_v56, %v3173_v1 }
 0x23f   : > { %v3210_v7 = vadd.f32 %v6052_v56, %v3171_v3 }
 0x240   : > { %v3228_v12 = vpack.c.bf16 %v3212_v5, %v3211_v4 }
 0x241   : > { %v3227_v13 = vpack.c.bf16 %v3210_v7, %v3209_v6  ;;  %v4980_v11 = vpop.f32.mrb[0].mxu1 }
 0x242   : > { %v3456_v14 = vmul.f32 %v4980_v11, %v6137_v8  ;;  %v3320_v15 = vpop.f32.mrb[1].mxu1 }
 0x243   : > { %5006 = vmatprep.mubr.msk.bf16.mxu1 %vm3237_vm1, %v3227_v13  ;;  %v3454_v56 = vmul.f32 %v6137_v8, %v3320_v15  ;;  %v4981_v16 = vpop.f32.mrb[2].mxu1 }
 0x244   : > { %5007 = vmatmul.mubr.msk.bf16.gmra.mrb[28].mxu1 %vm3237_vm1, %v3228_v12  ;;  %v3495_v26 = vadd.f32 %v6142_v50, %v3456_v14  ;;  %v3457_v17 = vmul.f32 %v4981_v16, %v6137_v8  ;;  %v3323_v18 = vpop.f32.mrb[3].mxu1 }
 0x245   : > { %v3493_v21 = vadd.f32 %v6142_v50, %v3454_v56  ;;  %v3455_v22 = vmul.f32 %v6137_v8, %v3323_v18 }
 0x246   : > { %v3527_v23 = vmax.f32 %v3495_v26, 0.0  ;;  %v3496_v24 = vadd.f32 %v6142_v50, %v3457_v17 }
 0x247   : > { %v3525_v25 = vmax.f32 %v3493_v21, 0.0  ;;  %v3494_v19 = vadd.f32 %v6142_v50, %v3455_v22 }
 0x248   : > { %v3559_v32 = vmin.f32 %v3527_v23, 6.0  ;;  %v3528_v41 = vmax.f32 %v3496_v24, 0.0 }
 0x249   : > { %v3557_v27 = vmin.f32 %v3525_v25, 6.0  ;;  %v3526_v28 = vmax.f32 %v3494_v19, 0.0 }
 0x24a   : > { %v4156_v29 = vpack.c.bf16 %v3559_v32, %v3559_v32  ;;  %v3560_v33 = vmin.f32 %v3528_v41, 6.0 }
 0x24b   : > { %v4154_v30 = vpack.c.bf16 %v3557_v27, %v3557_v27  ;;  %v3558_v31 = vmin.f32 %v3526_v28, 6.0 }
 0x24c   : > { %3720 = vst.msk [vmem:[%s6157_s18 + $0x8] sm:$0xf] %vm3717_vm2, %v4156_v29  ;;  %v4157_v34 = vpack.c.bf16 %v3560_v33, %v3560_v33 }
 0x24d   : > { %3718 = vst.msk [vmem:[%s6157_s18] sm:$0xf] %vm3717_vm2, %v4154_v30  ;;  %v4155_v35 = vpack.c.bf16 %v3558_v31, %v3558_v31 }
 0x24e   : > { %3721 = vst.msk [vmem:[%s6157_s18 + $0xc] sm:$0xf] %vm3717_vm2, %v4157_v34 }
 0x24f   : > { %3719 = vst.msk [vmem:[%s6157_s18 + $0x4] sm:$0xf] %vm3717_vm2, %v4155_v35 }
 0x260   : > { %v4984_v36 = vpop.f32.mrb[4].mxu1 }
 0x261   : > { %v3460_v38 = vmul.f32 %v4984_v36, %v6137_v8  ;;  %v3336_v39 = vpop.f32.mrb[5].mxu1 }
 0x262   : > { %v3458_v37 = vmul.f32 %v6137_v8, %v3336_v39  ;;  %v4985_v20 = vpop.f32.mrb[6].mxu1 }
 0x263   : > { %v3499_v2 = vadd.f32 %v6142_v50, %v3460_v38  ;;  %v3461_v40 = vmul.f32 %v4985_v20, %v6137_v8  ;;  %v3339_v42 = vpop.f32.mrb[7].mxu1 }
 0x264   : > { %v3497_v43 = vadd.f32 %v6142_v50, %v3458_v37  ;;  %v3459_v44 = vmul.f32 %v6137_v8, %v3339_v42 }
 0x265   : > { %v3531_v48 = vmax.f32 %v3499_v2, 0.0  ;;  %v3500_v45 = vadd.f32 %v6142_v50, %v3461_v40 }
 0x266   : > { %v3529_v46 = vmax.f32 %v3497_v43, 0.0  ;;  %v3498_v47 = vadd.f32 %v6142_v50, %v3459_v44 }
 0x267   : > { %v3563_v49 = vmin.f32 %v3531_v48, 6.0  ;;  %v3532_v9 = vmax.f32 %v3500_v45, 0.0 }
 0x268   : > { %v3561_v51 = vmin.f32 %v3529_v46, 6.0  ;;  %v3530_v52 = vmax.f32 %v3498_v47, 0.0 }
 0x269   : > { %v4160_v53 = vpack.c.bf16 %v3563_v49, %v3563_v49  ;;  %v3564_v54 = vmin.f32 %v3532_v9, 6.0 }
 0x26a   : > { %v4158_v55 = vpack.c.bf16 %v3561_v51, %v3561_v51  ;;  %v3562_v57 = vmin.f32 %v3530_v52, 6.0 }
 0x26b   : > { %3724 = vst.msk [vmem:[%s6157_s18 + $0x18] sm:$0xf] %vm3717_vm2, %v4160_v53  ;;  %v4161_v58 = vpack.c.bf16 %v3564_v54, %v3564_v54 }
 0x26c   : > { %3722 = vst.msk [vmem:[%s6157_s18 + $0x10] sm:$0xf] %vm3717_vm2, %v4158_v55  ;;  %v4159_v59 = vpack.c.bf16 %v3562_v57, %v3562_v57 }
 0x26d   : > { %3725 = vst.msk [vmem:[%s6157_s18 + $0x1c] sm:$0xf] %vm3717_vm2, %v4161_v58 }
 0x26e   : > { %3723 = vst.msk [vmem:[%s6157_s18 + $0x14] sm:$0xf] %vm3717_vm2, %v4159_v59 }
 0x27f   : > { %v4988_v60 = vpop.f32.mrb[8].mxu1 }
 0x280   : > { %v3464_v61 = vmul.f32 %v4988_v60, %v6137_v8  ;;  %v3352_v62 = vpop.f32.mrb[9].mxu1 }
 0x281   : > { %v3462_v63 = vmul.f32 %v6137_v8, %v3352_v62  ;;  %v4989_v0 = vpop.f32.mrb[10].mxu1 }
 0x282   : > { %v3503_v1 = vadd.f32 %v6142_v50, %v3464_v61  ;;  %v3465_v10 = vmul.f32 %v4989_v0, %v6137_v8  ;;  %v3355_v3 = vpop.f32.mrb[11].mxu1 }
 0x283   : > { %v3501_v4 = vadd.f32 %v6142_v50, %v3462_v63  ;;  %v3463_v5 = vmul.f32 %v6137_v8, %v3355_v3 }
 0x284   : > { %v3535_v6 = vmax.f32 %v3503_v1, 0.0  ;;  %v3504_v7 = vadd.f32 %v6142_v50, %v3465_v10 }
 0x285   : > { %v3533_v12 = vmax.f32 %v3501_v4, 0.0  ;;  %v3502_v13 = vadd.f32 %v6142_v50, %v3463_v5 }
 0x286   : > { %v3567_v11 = vmin.f32 %v3535_v6, 6.0  ;;  %v3536_v14 = vmax.f32 %v3504_v7, 0.0 }
 0x287   : > { %v3565_v15 = vmin.f32 %v3533_v12, 6.0  ;;  %v3534_v56 = vmax.f32 %v3502_v13, 0.0 }
 0x288   : > { %v4164_v16 = vpack.c.bf16 %v3567_v11, %v3567_v11  ;;  %v3568_v26 = vmin.f32 %v3536_v14, 6.0 }
 0x289   : > { %v4162_v17 = vpack.c.bf16 %v3565_v15, %v3565_v15  ;;  %v3566_v18 = vmin.f32 %v3534_v56, 6.0 }
 0x28a   : > { %3728 = vst.msk [vmem:[%s6157_s18 + $0x28] sm:$0xf] %vm3717_vm2, %v4164_v16  ;;  %v4165_v21 = vpack.c.bf16 %v3568_v26, %v3568_v26 }
 0x28b   : > { %3726 = vst.msk [vmem:[%s6157_s18 + $0x20] sm:$0xf] %vm3717_vm2, %v4162_v17  ;;  %v4163_v22 = vpack.c.bf16 %v3566_v18, %v3566_v18 }
 0x28c   : > { %3729 = vst.msk [vmem:[%s6157_s18 + $0x2c] sm:$0xf] %vm3717_vm2, %v4165_v21 }
 0x28d   : > { %3727 = vst.msk [vmem:[%s6157_s18 + $0x24] sm:$0xf] %vm3717_vm2, %v4163_v22 }
 0x29d   : > { %v4992_v23 = vpop.f32.mrb[12].mxu1 }
 0x29e   : > { %v3468_v24 = vmul.f32 %v4992_v23, %v6137_v8  ;;  %v3368_v25 = vpop.f32.mrb[13].mxu1 }
 0x29f   : > { %v3466_v19 = vmul.f32 %v6137_v8, %v3368_v25  ;;  %v4993_v32 = vpop.f32.mrb[14].mxu1 }
 0x2a0   : > { %v3507_v41 = vadd.f32 %v6142_v50, %v3468_v24  ;;  %v3469_v27 = vmul.f32 %v4993_v32, %v6137_v8  ;;  %v3371_v28 = vpop.f32.mrb[15].mxu1 }
 0x2a1   : > { %v3505_v29 = vadd.f32 %v6142_v50, %v3466_v19  ;;  %v3467_v33 = vmul.f32 %v6137_v8, %v3371_v28 }
 0x2a2   : > { %v3539_v30 = vmax.f32 %v3507_v41, 0.0  ;;  %v3508_v31 = vadd.f32 %v6142_v50, %v3469_v27 }
 0x2a3   : > { %v3537_v34 = vmax.f32 %v3505_v29, 0.0  ;;  %v3506_v35 = vadd.f32 %v6142_v50, %v3467_v33 }
 0x2a4   : > { %v3571_v36 = vmin.f32 %v3539_v30, 6.0  ;;  %v3540_v38 = vmax.f32 %v3508_v31, 0.0 }
 0x2a5   : > { %v3569_v39 = vmin.f32 %v3537_v34, 6.0  ;;  %v3538_v37 = vmax.f32 %v3506_v35, 0.0 }
 0x2a6   : > { %v4168_v20 = vpack.c.bf16 %v3571_v36, %v3571_v36  ;;  %v3572_v2 = vmin.f32 %v3540_v38, 6.0 }
 0x2a7   : > { %v4166_v40 = vpack.c.bf16 %v3569_v39, %v3569_v39  ;;  %v3570_v42 = vmin.f32 %v3538_v37, 6.0 }
 0x2a8   : > { %3732 = vst.msk [vmem:[%s6157_s18 + $0x38] sm:$0xf] %vm3717_vm2, %v4168_v20  ;;  %v4169_v43 = vpack.c.bf16 %v3572_v2, %v3572_v2 }
 0x2a9   : > { %3730 = vst.msk [vmem:[%s6157_s18 + $0x30] sm:$0xf] %vm3717_vm2, %v4166_v40  ;;  %v4167_v44 = vpack.c.bf16 %v3570_v42, %v3570_v42 }
 0x2aa   : > { %3733 = vst.msk [vmem:[%s6157_s18 + $0x3c] sm:$0xf] %vm3717_vm2, %v4169_v43 }
 0x2ab   : > { %3731 = vst.msk [vmem:[%s6157_s18 + $0x34] sm:$0xf] %vm3717_vm2, %v4167_v44 }
 0x2bb   : > { %v4996_v48 = vpop.f32.mrb[16].mxu1 }
 0x2bc   : > { %v3472_v45 = vmul.f32 %v4996_v48, %v6137_v8  ;;  %v3384_v46 = vpop.f32.mrb[17].mxu1 }
 0x2bd   : > { %v3470_v47 = vmul.f32 %v6137_v8, %v3384_v46  ;;  %v4997_v49 = vpop.f32.mrb[18].mxu1 }
 0x2be   : > { %v3511_v9 = vadd.f32 %v6142_v50, %v3472_v45  ;;  %v3473_v51 = vmul.f32 %v4997_v49, %v6137_v8  ;;  %v3387_v52 = vpop.f32.mrb[19].mxu1 }
 0x2bf   : > { %v3509_v53 = vadd.f32 %v6142_v50, %v3470_v47  ;;  %v3471_v54 = vmul.f32 %v6137_v8, %v3387_v52 }
 0x2c0   : > { %v3543_v55 = vmax.f32 %v3511_v9, 0.0  ;;  %v3512_v57 = vadd.f32 %v6142_v50, %v3473_v51 }
 0x2c1   : > { %v3541_v58 = vmax.f32 %v3509_v53, 0.0  ;;  %v3510_v59 = vadd.f32 %v6142_v50, %v3471_v54 }
 0x2c2   : > { %v3575_v60 = vmin.f32 %v3543_v55, 6.0  ;;  %v3544_v61 = vmax.f32 %v3512_v57, 0.0 }
 0x2c3   : > { %v3573_v62 = vmin.f32 %v3541_v58, 6.0  ;;  %v3542_v63 = vmax.f32 %v3510_v59, 0.0 }
 0x2c4   : > { %v4172_v0 = vpack.c.bf16 %v3575_v60, %v3575_v60  ;;  %v3576_v1 = vmin.f32 %v3544_v61, 6.0 }
 0x2c5   : > { %v4170_v10 = vpack.c.bf16 %v3573_v62, %v3573_v62  ;;  %v3574_v3 = vmin.f32 %v3542_v63, 6.0 }
 0x2c6   : > { %3736 = vst.msk [vmem:[%s6157_s18 + $0x48] sm:$0xf] %vm3717_vm2, %v4172_v0  ;;  %v4173_v4 = vpack.c.bf16 %v3576_v1, %v3576_v1 }
 0x2c7   : > { %3734 = vst.msk [vmem:[%s6157_s18 + $0x40] sm:$0xf] %vm3717_vm2, %v4170_v10  ;;  %v4171_v5 = vpack.c.bf16 %v3574_v3, %v3574_v3 }
 0x2c8   : > { %3737 = vst.msk [vmem:[%s6157_s18 + $0x4c] sm:$0xf] %vm3717_vm2, %v4173_v4 }
 0x2c9   : > { %3735 = vst.msk [vmem:[%s6157_s18 + $0x44] sm:$0xf] %vm3717_vm2, %v4171_v5 }
 0x2da   : > { %v5000_v6 = vpop.f32.mrb[20].mxu1 }
 0x2db   : > { %v3476_v7 = vmul.f32 %v5000_v6, %v6137_v8  ;;  %v3400_v12 = vpop.f32.mrb[21].mxu1 }
 0x2dc   : > { %v3474_v13 = vmul.f32 %v6137_v8, %v3400_v12  ;;  %v5001_v11 = vpop.f32.mrb[22].mxu1 }
 0x2dd   : > { %v3515_v14 = vadd.f32 %v6142_v50, %v3476_v7  ;;  %v3477_v15 = vmul.f32 %v5001_v11, %v6137_v8  ;;  %v3403_v56 = vpop.f32.mrb[23].mxu1 }
 0x2de   : > { %v3513_v16 = vadd.f32 %v6142_v50, %v3474_v13  ;;  %v3475_v26 = vmul.f32 %v6137_v8, %v3403_v56 }
 0x2df   : > { %v3547_v17 = vmax.f32 %v3515_v14, 0.0  ;;  %v3516_v18 = vadd.f32 %v6142_v50, %v3477_v15 }
 0x2e0   : > { %v3545_v21 = vmax.f32 %v3513_v16, 0.0  ;;  %v3514_v22 = vadd.f32 %v6142_v50, %v3475_v26 }
 0x2e1   : > { %v3579_v23 = vmin.f32 %v3547_v17, 6.0  ;;  %v3548_v24 = vmax.f32 %v3516_v18, 0.0 }
 0x2e2   : > { %v3577_v25 = vmin.f32 %v3545_v21, 6.0  ;;  %v3546_v19 = vmax.f32 %v3514_v22, 0.0 }
 0x2e3   : > { %v4176_v32 = vpack.c.bf16 %v3579_v23, %v3579_v23  ;;  %v3580_v41 = vmin.f32 %v3548_v24, 6.0 }
 0x2e4   : > { %v4174_v27 = vpack.c.bf16 %v3577_v25, %v3577_v25  ;;  %v3578_v28 = vmin.f32 %v3546_v19, 6.0 }
 0x2e5   : > { %3740 = vst.msk [vmem:[%s6157_s18 + $0x58] sm:$0xf] %vm3717_vm2, %v4176_v32  ;;  %v4177_v29 = vpack.c.bf16 %v3580_v41, %v3580_v41 }
 0x2e6   : > { %3738 = vst.msk [vmem:[%s6157_s18 + $0x50] sm:$0xf] %vm3717_vm2, %v4174_v27  ;;  %v4175_v33 = vpack.c.bf16 %v3578_v28, %v3578_v28 }
 0x2e7   : > { %3741 = vst.msk [vmem:[%s6157_s18 + $0x5c] sm:$0xf] %vm3717_vm2, %v4177_v29 }
 0x2e8   : > { %3739 = vst.msk [vmem:[%s6157_s18 + $0x54] sm:$0xf] %vm3717_vm2, %v4175_v33 }
 0x2f8   : > { %v5004_v30 = vpop.f32.mrb[24].mxu1 }
 0x2f9   : > { %v3480_v31 = vmul.f32 %v5004_v30, %v6137_v8  ;;  %v3416_v34 = vpop.f32.mrb[25].mxu1 }
 0x2fa   : > { %v3478_v35 = vmul.f32 %v6137_v8, %v3416_v34  ;;  %v5005_v36 = vpop.f32.mrb[26].mxu1 }
 0x2fb   : > { %v3519_v38 = vadd.f32 %v6142_v50, %v3480_v31  ;;  %v3481_v39 = vmul.f32 %v5005_v36, %v6137_v8  ;;  %v3419_v37 = vpop.f32.mrb[27].mxu1 }
 0x2fc   : > { %v3517_v20 = vadd.f32 %v6142_v50, %v3478_v35  ;;  %v3479_v2 = vmul.f32 %v6137_v8, %v3419_v37 }
 0x2fd   : > { %v3551_v40 = vmax.f32 %v3519_v38, 0.0  ;;  %v3520_v42 = vadd.f32 %v6142_v50, %v3481_v39 }
 0x2fe   : > { %v3549_v43 = vmax.f32 %v3517_v20, 0.0  ;;  %v3518_v44 = vadd.f32 %v6142_v50, %v3479_v2 }
 0x2ff   : > { %v3583_v48 = vmin.f32 %v3551_v40, 6.0  ;;  %v3552_v45 = vmax.f32 %v3520_v42, 0.0 }
 0x300   : > { %v3581_v46 = vmin.f32 %v3549_v43, 6.0  ;;  %v3550_v47 = vmax.f32 %v3518_v44, 0.0 }
 0x301   : > { %v4180_v49 = vpack.c.bf16 %v3583_v48, %v3583_v48  ;;  %v3584_v9 = vmin.f32 %v3552_v45, 6.0 }
 0x302   : > { %v4178_v51 = vpack.c.bf16 %v3581_v46, %v3581_v46  ;;  %v3582_v52 = vmin.f32 %v3550_v47, 6.0 }
 0x303   : > { %3744 = vst.msk [vmem:[%s6157_s18 + $0x68] sm:$0xf] %vm3717_vm2, %v4180_v49  ;;  %v4181_v53 = vpack.c.bf16 %v3584_v9, %v3584_v9 }
 0x304   : > { %3742 = vst.msk [vmem:[%s6157_s18 + $0x60] sm:$0xf] %vm3717_vm2, %v4178_v51  ;;  %v4179_v54 = vpack.c.bf16 %v3582_v52, %v3582_v52 }
 0x305   : > { %3745 = vst.msk [vmem:[%s6157_s18 + $0x6c] sm:$0xf] %vm3717_vm2, %v4181_v53 }
 0x306   : > { %3743 = vst.msk [vmem:[%s6157_s18 + $0x64] sm:$0xf] %vm3717_vm2, %v4179_v54 }
 0x317   : > { %v5008_v55 = vpop.f32.mrb[28].mxu1 }
 0x318   : > { %v3484_v57 = vmul.f32 %v5008_v55, %v6137_v8  ;;  %v3432_v58 = vpop.f32.mrb[29].mxu1 }
 0x319   : > { %v3482_v59 = vmul.f32 %v6137_v8, %v3432_v58  ;;  %v5009_v60 = vpop.f32.mrb[30].mxu1 }
 0x31a   : > { %v3523_v61 = vadd.f32 %v6142_v50, %v3484_v57  ;;  %v3485_v62 = vmul.f32 %v5009_v60, %v6137_v8  ;;  %v3435_v63 = vpop.f32.mrb[31].mxu1 }
 0x31b   : > { %v3521_v0 = vadd.f32 %v6142_v50, %v3482_v59  ;;  %v3483_v1 = vmul.f32 %v6137_v8, %v3435_v63 }
 0x31c   : > { %v3555_v10 = vmax.f32 %v3523_v61, 0.0  ;;  %v3524_v3 = vadd.f32 %v6142_v50, %v3485_v62 }
 0x31d   : > { %v3553_v4 = vmax.f32 %v3521_v0, 0.0  ;;  %v3522_v5 = vadd.f32 %v6142_v50, %v3483_v1 }
 0x31e   : > { %v3587_v6 = vmin.f32 %v3555_v10, 6.0  ;;  %v3556_v7 = vmax.f32 %v3524_v3, 0.0 }
 0x31f   : > { %v3585_v12 = vmin.f32 %v3553_v4, 6.0  ;;  %v3554_v13 = vmax.f32 %v3522_v5, 0.0 }
 0x320   : > { %v4184_v11 = vpack.c.bf16 %v3587_v6, %v3587_v6  ;;  %v3588_v14 = vmin.f32 %v3556_v7, 6.0 }
 0x321   : > { %v4182_v15 = vpack.c.bf16 %v3585_v12, %v3585_v12  ;;  %v3586_v56 = vmin.f32 %v3554_v13, 6.0 }
 0x322   : > { %3748 = vst.msk [vmem:[%s6157_s18 + $0x78] sm:$0xf] %vm3717_vm2, %v4184_v11  ;;  %v4185_v16 = vpack.c.bf16 %v3588_v14, %v3588_v14 }
 0x323   : > { %3746 = vst.msk [vmem:[%s6157_s18 + $0x70] sm:$0xf] %vm3717_vm2, %v4182_v15  ;;  %v4183_v8 = vpack.c.bf16 %v3586_v56, %v3586_v56 }
 0x324   : > { %3749 = vst.msk [vmem:[%s6157_s18 + $0x7c] sm:$0xf] %vm3717_vm2, %v4185_v16 }
 0x325   : > { %3747 = vst.msk [vmem:[%s6157_s18 + $0x74] sm:$0xf] %vm3717_vm2, %v4183_v8 }
 0x326 PF: > { %p17_p9 = scmp.ge.s32.totalorder %s5139_s17, 4   ;;  %s6300_s13 = smov %s5061_s14 }
 0x327   : > { %s6301_s14 = smov %s5148_s20  ;;  %s6302_s15 = smov %s5139_s17 }
 0x328   :  { %19 = sbr.rel (!%p17_p9) target bundleno = 2 (0x2), region = 144 }

// kernel: forward.10
= control target key start
LH: loop header
LB: loop body
LE: loop exit
PB: predicated region body
PF: predicated region fallthrough
CT: control target
= control target key end

     0   :  { %v70_v0 = vlaneseq  ;;  %vm792_vm0 = vcmask 785408   ;;  %vm1011_vm1 = vcmask 1043456   ;;  %vm986_vm2 = vcmask 195584   ;;  %s2784_s4 = inlined_call_operand.vmem [shape: bf16[96,24], index: 4, kind: input, shape index: {}]   ;;  %s2785_s0 = inlined_call_operand.vmem [shape: bf16[9,128,96], index: 0, kind: input, shape index: {}]   ;;  %s2786_s1 = inlined_call_operand.vmem [shape: f32[9,96], index: 1, kind: input, shape index: {}]   ;;  %s2787_s2 = inlined_call_operand.vmem [shape: f32[1,96], index: 2, kind: input, shape index: {}]   ;;  %s2788_s3 = inlined_call_operand.vmem [shape: f32[1,96], index: 3, kind: input, shape index: {}]   ;;  %s2789_s7 = inlined_call_operand.vmem [shape: bf16[24,144], index: 7, kind: input, shape index: {}]   ;;  %s2790_s5 = inlined_call_operand.vmem [shape: f32[1,24], index: 5, kind: input, shape index: {}]   ;;  %s2791_s6 = inlined_call_operand.vmem [shape: f32[1,24], index: 6, kind: input, shape index: {}]   ;;  %s2792_s8 = inlined_call_operand.vmem [shape: f32[1,144], index: 8, kind: input, shape index: {}]   ;;  %s2793_s9 = inlined_call_operand.vmem [shape: f32[1,144], index: 9, kind: input, shape index: {}]   ;;  %s2794_s10 = inlined_call_operand.vmem [shape: bf16[128,144], index: 10, kind: output, shape index: {}]  }
   0x1   :  { %v1999_v1 = vld [vmem:[%s2784_s4] sm:$0xff]   ;;  %v2000_v2 = vld [vmem:[%s2784_s4 + $0x8] sm:$0xff]   ;;  %v2001_v5 = vld [vmem:[%s2784_s4 + $0x10] sm:$0xff]   ;;  %vm1379_vm3 = vcmask 130052  }
   0x2   :  { %v2073_v3 = vshrl.u32 %v70_v0, 7  ;;  %1966 = vmatprep.subr.bf16.mxu0 %v1999_v1  ;;  %v2088_v8 = vld [vmem:[%s2786_s1] sm:$0xff]  ;;  %v2002_v19 = vld [vmem:[%s2784_s4 + $0x18] sm:$0xff]   ;;  %v2004_v58 = vld [vmem:[%s2784_s4 + $0x28] sm:$0xff]  }
   0x3   :  { %1967 = vmatpush3.bf16.msra.mxu0 %v1999_v1  ;;  %v1594_v9 = vld [vmem:[%s2785_s0] sm:$0xff]   ;;  %vm2652_vm4 = vmor %vm1379_vm3, %vm1011_vm1 }
   0x4   :  { %v2076_v4 = vsub.s32 0, %v2073_v3  ;;  %1968 = vmatprep.subr.bf16.mxu0 %v2000_v2  ;;  %v2082_v6 = vsub.s32 1, %v2073_v3  ;;  %v210_v7 = vsub.s32 2, %v2073_v3  ;;  %v279_v10 = vsub.s32 3, %v2073_v3  ;;  %v1888_v15 = vld [vmem:[%s2785_s0 + $0x40] sm:$0xff]  }
   0x5   :  { %v348_v11 = vsub.s32 4, %v2073_v3  ;;  %v1595_v12 = vunpack.c.l.bf16 %v1594_v9  ;;  %v1596_v13 = vunpack.c.h.bf16 %v1594_v9  ;;  %v1896_v17 = vld [vmem:[%s2785_s0 + $0x80] sm:$0xff]   ;;  %v1627_v20 = vunpack.c.l.bf16 %v1888_v15 }
   0x6   :  { %v2097_v14 = vrot.slane %v2088_v8, %v2076_v4  ;;  %v2104_v16 = vrot.slane %v2088_v8, %v2082_v6  ;;  %v1904_v18 = vld [vmem:[%s2785_s0 + $0xc0] sm:$0xff]   ;;  %v1628_v21 = vunpack.c.h.bf16 %v1888_v15  ;;  %v1659_v22 = vunpack.c.l.bf16 %v1896_v17 }
   0x7   :  { %1969 = vmatpush3.bf16.msra.mxu0 %v2000_v2  ;;  %v1660_v23 = vunpack.c.h.bf16 %v1896_v17  ;;  %v1912_v24 = vld [vmem:[%s2785_s0 + $0x100] sm:$0xff]   ;;  %v2121_v27 = vrot.slane %v2088_v8, %v210_v7  ;;  %v1691_v28 = vunpack.c.l.bf16 %v1904_v18  ;;  %v1692_v31 = vunpack.c.h.bf16 %v1904_v18 }
   0x8   :  { %1970 = vmatprep.subr.bf16.mxu0 %v2001_v5  ;;  %v74_v25 = vmul.f32 %v1595_v12, %v2097_v14  ;;  %v75_v26 = vmul.f32 %v1596_v13, %v2097_v14  ;;  %v143_v29 = vmul.f32 %v1627_v20, %v2104_v16  ;;  %v144_v30 = vmul.f32 %v1628_v21, %v2104_v16  ;;  %v1920_v33 = vld [vmem:[%s2785_s0 + $0x140] sm:$0xff]   ;;  %v1897_v20 = vld [vmem:[%s2785_s0 + $0x88] sm:$0xff]  }
   0x9   :  { %v2126_v32 = vrot.slane %v2088_v8, %v279_v10  ;;  %v212_v34 = vmul.f32 %v1659_v22, %v2121_v27  ;;  %v213_v35 = vmul.f32 %v1660_v23, %v2121_v27  ;;  %v1723_v36 = vunpack.c.l.bf16 %v1912_v24  ;;  %v1928_v38 = vld [vmem:[%s2785_s0 + $0x180] sm:$0xff]  }
   0xa   :  { %v1724_v37 = vunpack.c.h.bf16 %v1912_v24  ;;  %v2003_v39 = vld [vmem:[%s2784_s4 + $0x20] sm:$0xff]   ;;  %v159_v40 = vadd.f32 %v143_v29, %v74_v25  ;;  %v160_v41 = vadd.f32 %v144_v30, %v75_v26  ;;  %v2142_v44 = vrot.slane %v2088_v8, %v348_v11 }
   0xb   :  { %1971 = vmatpush3.bf16.msra.mxu0 %v2001_v5  ;;  %v281_v42 = vmul.f32 %v1691_v28, %v2126_v32  ;;  %v282_v43 = vmul.f32 %v1692_v31, %v2126_v32  ;;  %v1755_v45 = vunpack.c.l.bf16 %v1920_v33  ;;  %v1756_v46 = vunpack.c.h.bf16 %v1920_v33  ;;  %v1936_v48 = vld [vmem:[%s2785_s0 + $0x1c0] sm:$0xff]   ;;  %v2169_v5 = vld [vmem:[%s2786_s1 + $0x8] ss:$0 sm:$0xff] }
   0xc   :  { %1972 = vmatprep.subr.bf16.mxu0 %v2002_v19  ;;  %v417_v47 = vsub.s32 5, %v2073_v3  ;;  %v228_v49 = vadd.f32 %v212_v34, %v159_v40  ;;  %v229_v50 = vadd.f32 %v213_v35, %v160_v41  ;;  %v1787_v51 = vunpack.c.l.bf16 %v1928_v38  ;;  %v1944_v57 = vld [vmem:[%s2785_s0 + $0x200] sm:$0xff]   ;;  %v1905_v33 = vld [vmem:[%s2785_s0 + $0xc8] sm:$0xff]  }
   0xd   :  { %v1788_v52 = vunpack.c.h.bf16 %v1928_v38  ;;  %v350_v53 = vmul.f32 %v1723_v36, %v2142_v44  ;;  %v351_v54 = vmul.f32 %v1724_v37, %v2142_v44  ;;  %v486_v56 = vsub.s32 6, %v2073_v3  ;;  %v1913_v38 = vld [vmem:[%s2785_s0 + $0x108] sm:$0xff]  }
   0xe   :  { %v2151_v55 = vrot.slane %v2088_v8, %v417_v47  ;;  %v297_v59 = vadd.f32 %v281_v42, %v228_v49  ;;  %v298_v60 = vadd.f32 %v282_v43, %v229_v50  ;;  %v1819_v61 = vunpack.c.l.bf16 %v1936_v48  ;;  %v2209_v49 = vld [vmem:[%s2788_s3] ss:$0 sm:$0xff] }
   0xf   :  { %1973 = vmatpush3.bf16.msra.mxu0 %v2002_v19  ;;  %v1820_v62 = vunpack.c.h.bf16 %v1936_v48  ;;  %v2163_v1 = vrot.slane %v2088_v8, %v486_v56  ;;  %v555_v2 = vsub.s32 7, %v2073_v3  ;;  %v1851_v10 = vunpack.c.l.bf16 %v1944_v57  ;;  %v1881_v3 = vld [vmem:[%s2785_s0 + $0x8] sm:$0xff]  }
  0x10   :  { %1974 = vmatprep.subr.bf16.mxu0 %v2003_v39  ;;  %v419_v63 = vmul.f32 %v1755_v45, %v2151_v55  ;;  %v420_v0 = vmul.f32 %v1756_v46, %v2151_v55  ;;  %v366_v7 = vadd.f32 %v350_v53, %v297_v59  ;;  %v367_v9 = vadd.f32 %v351_v54, %v298_v60  ;;  %v1889_v19 = vld [vmem:[%s2785_s0 + $0x48] sm:$0xff]  }
  0x11   :  { %v1852_v11 = vunpack.c.h.bf16 %v1944_v57  ;;  %v488_v12 = vmul.f32 %v1787_v51, %v2163_v1  ;;  %v489_v13 = vmul.f32 %v1788_v52, %v2163_v1  ;;  %v2174_v15 = vrot.slane %v2088_v8, %v555_v2  ;;  %v1921_v54 = vld [vmem:[%s2785_s0 + $0x148] sm:$0xff]  }
  0x12   :  { %v435_v17 = vadd.f32 %v419_v63, %v366_v7  ;;  %v436_v18 = vadd.f32 %v420_v0, %v367_v9  ;;  %v626_v22 = vmul.f32 %v1851_v10, %v2169_v5  ;;  %v1599_v26 = vunpack.c.l.bf16 %v1881_v3  ;;  %v1929_v60 = vld [vmem:[%s2785_s0 + $0x188] sm:$0xff]  }
  0x13   :  { %1975 = vmatpush3.bf16.msra.mxu0 %v2003_v39  ;;  %v557_v21 = vmul.f32 %v1819_v61, %v2174_v15  ;;  %v558_v8 = vmul.f32 %v1820_v62, %v2174_v15  ;;  %v627_v25 = vmul.f32 %v1852_v11, %v2169_v5  ;;  %v1600_v28 = vunpack.c.h.bf16 %v1881_v3  ;;  %v2199_v39 = vld [vmem:[%s2787_s2] ss:$0 sm:$0xff] }
  0x14   :  { %1976 = vmatprep.subr.bf16.mxu0 %v2004_v58  ;;  %v504_v23 = vadd.f32 %v488_v12, %v435_v17  ;;  %v505_v24 = vadd.f32 %v489_v13, %v436_v18  ;;  %v1631_v29 = vunpack.c.l.bf16 %v1889_v19  ;;  %v1632_v30 = vunpack.c.h.bf16 %v1889_v19  ;;  %v1937_v17 = vld [vmem:[%s2785_s0 + $0x1c8] sm:$0xff]  }
  0x15   :  { %v1663_v31 = vunpack.c.l.bf16 %v1897_v20  ;;  %v76_v36 = vmul.f32 %v1599_v26, %v2097_v14  ;;  %v1664_v37 = vunpack.c.h.bf16 %v1897_v20  ;;  %v77_v40 = vmul.f32 %v1600_v28, %v2097_v14  ;;  %v1882_v26 = vld [vmem:[%s2785_s0 + $0x10] sm:$0xff]  }
  0x16   :  { %v573_v34 = vadd.f32 %v557_v21, %v504_v23  ;;  %v574_v35 = vadd.f32 %v558_v8, %v505_v24  ;;  %v145_v41 = vmul.f32 %v1631_v29, %v2104_v16  ;;  %v146_v42 = vmul.f32 %v1632_v30, %v2104_v16  ;;  %v1945_v8 = vld [vmem:[%s2785_s0 + $0x208] sm:$0xff]  }
  0x17   :  { %1977 = vmatpush3.bf16.msra.mxu0 %v2004_v58  ;;  %v214_v43 = vmul.f32 %v1663_v31, %v2121_v27  ;;  %v215_v47 = vmul.f32 %v1664_v37, %v2121_v27  ;;  %v1695_v48 = vunpack.c.l.bf16 %v1905_v33  ;;  %v1696_v52 = vunpack.c.h.bf16 %v1905_v33  ;;  %v1890_v37 = vld [vmem:[%s2785_s0 + $0x50] sm:$0xff]  }
  0x18   :  { %v642_v45 = vadd.f32 %v626_v22, %v573_v34  ;;  %v643_v46 = vadd.f32 %v627_v25, %v574_v35  ;;  %v161_v50 = vadd.f32 %v145_v41, %v76_v36  ;;  %v162_v51 = vadd.f32 %v146_v42, %v77_v40 }
  0x19   :  { %v1727_v53 = vunpack.c.l.bf16 %v1913_v38  ;;  %v283_v58 = vmul.f32 %v1695_v48, %v2126_v32  ;;  %v1728_v59 = vunpack.c.h.bf16 %v1913_v38  ;;  %v284_v63 = vmul.f32 %v1696_v52, %v2126_v32 }
  0x1a   :  { %v665_v56 = vmul.f32 %v2199_v39, %v642_v45  ;;  %v666_v57 = vmul.f32 %v2199_v39, %v643_v46  ;;  %v230_v61 = vadd.f32 %v214_v43, %v161_v50  ;;  %v231_v62 = vadd.f32 %v215_v47, %v162_v51  ;;  %v1898_v43 = vld [vmem:[%s2785_s0 + $0x90] sm:$0xff]  }
  0x1b   :  { %v352_v0 = vmul.f32 %v1727_v53, %v2142_v44  ;;  %v353_v9 = vmul.f32 %v1728_v59, %v2142_v44  ;;  %v1759_v10 = vunpack.c.l.bf16 %v1921_v54  ;;  %v1760_v13 = vunpack.c.h.bf16 %v1921_v54  ;;  %v1906_v50 = vld [vmem:[%s2785_s0 + $0xd0] sm:$0xff]  }
  0x1c   :  { %v688_v2 = vadd.f32 %v2209_v49, %v665_v56  ;;  %v689_v7 = vadd.f32 %v2209_v49, %v666_v57  ;;  %v299_v11 = vadd.f32 %v283_v58, %v230_v61  ;;  %v300_v12 = vadd.f32 %v284_v63, %v231_v62 }
  0x1d   :  { %v1791_v3 = vunpack.c.l.bf16 %v1929_v60  ;;  %v421_v20 = vmul.f32 %v1759_v10, %v2151_v55  ;;  %v1792_v21 = vunpack.c.h.bf16 %v1929_v60  ;;  %v422_v24 = vmul.f32 %v1760_v13, %v2151_v55 }
  0x1e   :  { %v704_v18 = vmax.f32 %v688_v2, 0.0  ;;  %v705_v19 = vmax.f32 %v689_v7, 0.0  ;;  %v368_v22 = vadd.f32 %v352_v0, %v299_v11  ;;  %v369_v23 = vadd.f32 %v353_v9, %v300_v12  ;;  %v1914_v0 = vld [vmem:[%s2785_s0 + $0x110] sm:$0xff]  }
  0x1f   :  { %v490_v25 = vmul.f32 %v1791_v3, %v2163_v1  ;;  %v491_v30 = vmul.f32 %v1792_v21, %v2163_v1  ;;  %v1823_v31 = vunpack.c.l.bf16 %v1937_v17  ;;  %v1824_v35 = vunpack.c.h.bf16 %v1937_v17  ;;  %v1922_v11 = vld [vmem:[%s2785_s0 + $0x150] sm:$0xff]  }
  0x20   :  { %v720_v28 = vmin.f32 %v704_v18, 6.0  ;;  %v721_v29 = vmin.f32 %v705_v19, 6.0  ;;  %v437_v33 = vadd.f32 %v421_v20, %v368_v22  ;;  %v438_v34 = vadd.f32 %v422_v24, %v369_v23 }
  0x21   :  { %v1855_v36 = vunpack.c.l.bf16 %v1945_v8  ;;  %v559_v40 = vmul.f32 %v1823_v31, %v2174_v15  ;;  %v1856_v41 = vunpack.c.h.bf16 %v1945_v8  ;;  %v1603_v42 = vunpack.c.l.bf16 %v1882_v26  ;;  %v1938_v31 = vld [vmem:[%s2785_s0 + $0x1d0] sm:$0xff]  }
  0x22   :  { %v736_v38 = vpack.c.bf16 %v721_v29, %v720_v28  ;;  %v506_v45 = vadd.f32 %v490_v25, %v437_v33  ;;  %v507_v46 = vadd.f32 %v491_v30, %v438_v34  ;;  %v560_v47 = vmul.f32 %v1824_v35, %v2174_v15  ;;  %v1930_v25 = vld [vmem:[%s2785_s0 + $0x190] sm:$0xff]  }
  0x23   :  { %v628_v48 = vmul.f32 %v1855_v36, %v2169_v5  ;;  %v629_v51 = vmul.f32 %v1856_v41, %v2169_v5  ;;  %v1604_v52 = vunpack.c.h.bf16 %v1882_v26  ;;  %v78_v53 = vmul.f32 %v1603_v42, %v2097_v14 }
  0x24   :  { %1978 = vmatprep.mubr.msk.bf16.mxu0 %vm792_vm0, %v736_v38  ;;  %v1635_v54 = vunpack.c.l.bf16 %v1890_v37  ;;  %v575_v56 = vadd.f32 %v559_v40, %v506_v45  ;;  %v576_v57 = vadd.f32 %v560_v47, %v507_v46  ;;  %v1636_v58 = vunpack.c.h.bf16 %v1890_v37  ;;  %v1946_v47 = vld [vmem:[%s2785_s0 + $0x210] sm:$0xff]  }
  0x25   :  { %v1667_v59 = vunpack.c.l.bf16 %v1898_v43  ;;  %v79_v60 = vmul.f32 %v1604_v52, %v2097_v14  ;;  %v1668_v62 = vunpack.c.h.bf16 %v1898_v43  ;;  %v1699_v63 = vunpack.c.l.bf16 %v1906_v50 }
  0x26   :  { %v147_v61 = vmul.f32 %v1635_v54, %v2104_v16  ;;  %v644_v2 = vadd.f32 %v628_v48, %v575_v56  ;;  %v645_v7 = vadd.f32 %v629_v51, %v576_v57  ;;  %v148_v9 = vmul.f32 %v1636_v58, %v2104_v16 }
  0x27   :  { %v216_v10 = vmul.f32 %v1667_v59, %v2121_v27  ;;  %v217_v13 = vmul.f32 %v1668_v62, %v2121_v27  ;;  %v1700_v3 = vunpack.c.h.bf16 %v1906_v50  ;;  %v285_v17 = vmul.f32 %v1699_v63, %v2126_v32  ;;  %v1891_v59 = vld [vmem:[%s2785_s0 + $0x58] sm:$0xff]  }
  0x28   :  { %v163_v12 = vadd.f32 %v147_v61, %v78_v53  ;;  %v667_v18 = vmul.f32 %v2199_v39, %v644_v2  ;;  %v668_v19 = vmul.f32 %v2199_v39, %v645_v7  ;;  %v164_v20 = vadd.f32 %v148_v9, %v79_v60  ;;  %v1883_v53 = vld [vmem:[%s2785_s0 + $0x18] sm:$0xff]  }
  0x29   :  { %v1731_v21 = vunpack.c.l.bf16 %v1914_v0  ;;  %v286_v22 = vmul.f32 %v1700_v3, %v2126_v32  ;;  %v1732_v23 = vunpack.c.h.bf16 %v1914_v0  ;;  %v1763_v24 = vunpack.c.l.bf16 %v1922_v11 }
  0x2a   :  { %v232_v8 = vadd.f32 %v216_v10, %v163_v12  ;;  %v690_v26 = vadd.f32 %v2209_v49, %v667_v18  ;;  %v691_v28 = vadd.f32 %v2209_v49, %v668_v19  ;;  %v233_v29 = vadd.f32 %v217_v13, %v164_v20  ;;  %v1899_v10 = vld [vmem:[%s2785_s0 + $0x98] sm:$0xff]  }
  0x2b   :  { %v354_v30 = vmul.f32 %v1731_v21, %v2142_v44  ;;  %v355_v34 = vmul.f32 %v1732_v23, %v2142_v44  ;;  %v1764_v35 = vunpack.c.h.bf16 %v1922_v11  ;;  %v423_v36 = vmul.f32 %v1763_v24, %v2151_v55 }
  0x2c   :  { %v301_v33 = vadd.f32 %v285_v17, %v232_v8  ;;  %v706_v37 = vmax.f32 %v690_v26, 0.0  ;;  %v707_v38 = vmax.f32 %v691_v28, 0.0  ;;  %v302_v40 = vadd.f32 %v286_v22, %v233_v29  ;;  %v1907_v17 = vld [vmem:[%s2785_s0 + $0xd8] sm:$0xff]  }
  0x2d   :  { %v1795_v41 = vunpack.c.l.bf16 %v1930_v25  ;;  %v424_v43 = vmul.f32 %v1764_v35, %v2151_v55  ;;  %v1796_v45 = vunpack.c.h.bf16 %v1930_v25  ;;  %v1827_v46 = vunpack.c.l.bf16 %v1938_v31 }
  0x2e   :  { %v370_v42 = vadd.f32 %v354_v30, %v301_v33  ;;  %v722_v48 = vmin.f32 %v706_v37, 6.0  ;;  %v723_v50 = vmin.f32 %v707_v38, 6.0  ;;  %v371_v51 = vadd.f32 %v355_v34, %v302_v40  ;;  %v1915_v30 = vld [vmem:[%s2785_s0 + $0x118] sm:$0xff]  }
  0x2f   :  { %v492_v52 = vmul.f32 %v1795_v41, %v2163_v1  ;;  %v493_v56 = vmul.f32 %v1796_v45, %v2163_v1  ;;  %v1828_v57 = vunpack.c.h.bf16 %v1938_v31  ;;  %v561_v58 = vmul.f32 %v1827_v46, %v2174_v15 }
  0x30   :  { %v439_v54 = vadd.f32 %v423_v36, %v370_v42  ;;  %v737_v60 = vpack.c.bf16 %v723_v50, %v722_v48  ;;  %v440_v61 = vadd.f32 %v424_v43, %v371_v51  ;;  %v1859_v62 = vunpack.c.l.bf16 %v1946_v47  ;;  %v1923_v36 = vld [vmem:[%s2785_s0 + $0x158] sm:$0xff]  }
  0x31   :  { %v1860_v63 = vunpack.c.h.bf16 %v1946_v47  ;;  %v562_v2 = vmul.f32 %v1828_v57, %v2174_v15  ;;  %v1607_v7 = vunpack.c.l.bf16 %v1883_v53  ;;  %v1608_v9 = vunpack.c.h.bf16 %v1883_v53 }
  0x32   :  { %v508_v0 = vadd.f32 %v492_v52, %v439_v54  ;;  %1979 = vmatmul.mubr.msk.bf16.vlgmr.msra.gmra.mrb[0].mxu0 %vm792_vm0, %v737_v60  ;;  %v509_v11 = vadd.f32 %v493_v56, %v440_v61  ;;  %v630_v12 = vmul.f32 %v1859_v62, %v2169_v5  ;;  %v1639_v3 = vunpack.c.l.bf16 %v1891_v59  ;;  %v1931_v52 = vld [vmem:[%s2785_s0 + $0x198] sm:$0xff]  }
  0x33   :  { %v631_v13 = vmul.f32 %v1860_v63, %v2169_v5  ;;  %v80_v19 = vmul.f32 %v1607_v7, %v2097_v14  ;;  %v81_v20 = vmul.f32 %v1608_v9, %v2097_v14  ;;  %v1640_v21 = vunpack.c.h.bf16 %v1891_v59  ;;  %v1947_v9 = vld [vmem:[%s2785_s0 + $0x218] sm:$0xff]  }
  0x34   :  { %v577_v18 = vadd.f32 %v561_v58, %v508_v0  ;;  %v578_v8 = vadd.f32 %v562_v2, %v509_v11  ;;  %v149_v22 = vmul.f32 %v1639_v3, %v2104_v16  ;;  %v1671_v23 = vunpack.c.l.bf16 %v1899_v10  ;;  %v1939_v58 = vld [vmem:[%s2785_s0 + $0x1d8] sm:$0xff]   ;;  %v1884_v3 = vld [vmem:[%s2785_s0 + $0x20] sm:$0xff]  }
  0x35   :  { %v1672_v24 = vunpack.c.h.bf16 %v1899_v10  ;;  %v150_v26 = vmul.f32 %v1640_v21, %v2104_v16  ;;  %v1703_v28 = vunpack.c.l.bf16 %v1907_v17  ;;  %v1704_v29 = vunpack.c.h.bf16 %v1907_v17  ;;  %v1892_v21 = vld [vmem:[%s2785_s0 + $0x60] sm:$0xff]  }
  0x36   :  { %v646_v25 = vadd.f32 %v630_v12, %v577_v18  ;;  %v647_v31 = vadd.f32 %v631_v13, %v578_v8  ;;  %v165_v33 = vadd.f32 %v149_v22, %v80_v19  ;;  %v218_v34 = vmul.f32 %v1671_v23, %v2121_v27 }
  0x37   :  { %v219_v35 = vmul.f32 %v1672_v24, %v2121_v27  ;;  %v166_v38 = vadd.f32 %v150_v26, %v81_v20  ;;  %v287_v40 = vmul.f32 %v1703_v28, %v2126_v32  ;;  %v288_v41 = vmul.f32 %v1704_v29, %v2126_v32 }
  0x38   :  { %v669_v37 = vmul.f32 %v2199_v39, %v646_v25  ;;  %v670_v42 = vmul.f32 %v2199_v39, %v647_v31  ;;  %v234_v43 = vadd.f32 %v218_v34, %v165_v33  ;;  %v1735_v45 = vunpack.c.l.bf16 %v1915_v30 }
  0x39   :  { %v1736_v46 = vunpack.c.h.bf16 %v1915_v30  ;;  %v235_v48 = vadd.f32 %v219_v35, %v166_v38  ;;  %v1767_v50 = vunpack.c.l.bf16 %v1923_v36  ;;  %v1768_v51 = vunpack.c.h.bf16 %v1923_v36  ;;  %v1900_v30 = vld [vmem:[%s2785_s0 + $0xa0] sm:$0xff]  }
  0x3a   :  { %v692_v47 = vadd.f32 %v2209_v49, %v669_v37  ;;  %v693_v53 = vadd.f32 %v2209_v49, %v670_v42  ;;  %v303_v54 = vadd.f32 %v287_v40, %v234_v43  ;;  %v356_v56 = vmul.f32 %v1735_v45, %v2142_v44  ;;  %v1908_v36 = vld [vmem:[%s2785_s0 + $0xe0] sm:$0xff]  }
  0x3b   :  { %v357_v57 = vmul.f32 %v1736_v46, %v2142_v44  ;;  %v304_v60 = vadd.f32 %v288_v41, %v235_v48  ;;  %v425_v61 = vmul.f32 %v1767_v50, %v2151_v55  ;;  %v426_v62 = vmul.f32 %v1768_v51, %v2151_v55 }
  0x3c   :  { %v708_v59 = vmax.f32 %v692_v47, 0.0  ;;  %v709_v63 = vmax.f32 %v693_v53, 0.0  ;;  %v372_v0 = vadd.f32 %v356_v56, %v303_v54  ;;  %v1799_v2 = vunpack.c.l.bf16 %v1931_v52 }
  0x3d   :  { %v1800_v7 = vunpack.c.h.bf16 %v1931_v52  ;;  %v373_v11 = vadd.f32 %v357_v57, %v304_v60  ;;  %v1831_v12 = vunpack.c.l.bf16 %v1939_v58  ;;  %v1832_v13 = vunpack.c.h.bf16 %v1939_v58  ;;  %v1916_v52 = vld [vmem:[%s2785_s0 + $0x120] sm:$0xff]  }
  0x3e   :  { %v724_v10 = vmin.f32 %v708_v59, 6.0  ;;  %v725_v17 = vmin.f32 %v709_v63, 6.0  ;;  %v441_v18 = vadd.f32 %v425_v61, %v372_v0  ;;  %v494_v19 = vmul.f32 %v1799_v2, %v2163_v1  ;;  %v1924_v58 = vld [vmem:[%s2785_s0 + $0x160] sm:$0xff]  }
  0x3f   :  { %v495_v20 = vmul.f32 %v1800_v7, %v2163_v1  ;;  %v442_v8 = vadd.f32 %v426_v62, %v373_v11  ;;  %v563_v22 = vmul.f32 %v1831_v12, %v2174_v15  ;;  %v564_v23 = vmul.f32 %v1832_v13, %v2174_v15  ;;  %v1932_v13 = vld [vmem:[%s2785_s0 + $0x1a0] sm:$0xff]  }
  0x40   :  { %v1863_v24 = vunpack.c.l.bf16 %v1947_v9  ;;  %v738_v25 = vpack.c.bf16 %v725_v17, %v724_v10  ;;  %v510_v26 = vadd.f32 %v494_v19, %v441_v18  ;;  %v1864_v28 = vunpack.c.h.bf16 %v1947_v9 }
  0x41   :  { %v1611_v29 = vunpack.c.l.bf16 %v1884_v3  ;;  %v511_v31 = vadd.f32 %v495_v20, %v442_v8  ;;  %v1612_v34 = vunpack.c.h.bf16 %v1884_v3  ;;  %v1643_v35 = vunpack.c.l.bf16 %v1892_v21  ;;  %v1940_v20 = vld [vmem:[%s2785_s0 + $0x1e0] sm:$0xff]  }
  0x42   :  { %v632_v33 = vmul.f32 %v1863_v24, %v2169_v5  ;;  %1982 = vmatprep.mubr.msk.bf16.mxu0 %vm792_vm0, %v738_v25  ;;  %v579_v37 = vadd.f32 %v563_v22, %v510_v26  ;;  %v633_v38 = vmul.f32 %v1864_v28, %v2169_v5  ;;  %v1644_v41 = vunpack.c.h.bf16 %v1892_v21 }
  0x43   :  { %v82_v40 = vmul.f32 %v1611_v29, %v2097_v14  ;;  %v580_v42 = vadd.f32 %v564_v23, %v511_v31  ;;  %v83_v43 = vmul.f32 %v1612_v34, %v2097_v14  ;;  %v151_v45 = vmul.f32 %v1643_v35, %v2104_v16  ;;  %v1948_v29 = vld [vmem:[%s2785_s0 + $0x220] sm:$0xff]  }
  0x44   :  { %v1675_v46 = vunpack.c.l.bf16 %v1900_v30  ;;  %v648_v47 = vadd.f32 %v632_v33, %v579_v37  ;;  %v152_v48 = vmul.f32 %v1644_v41, %v2104_v16  ;;  %v1676_v50 = vunpack.c.h.bf16 %v1900_v30 }
  0x45   :  { %v1707_v51 = vunpack.c.l.bf16 %v1908_v36  ;;  %v649_v53 = vadd.f32 %v633_v38, %v580_v42  ;;  %v167_v54 = vadd.f32 %v151_v45, %v82_v40  ;;  %v1708_v57 = vunpack.c.h.bf16 %v1908_v36  ;;  %v1885_v40 = vld [vmem:[%s2785_s0 + $0x28] sm:$0xff]  }
  0x46   :  { %v220_v56 = vmul.f32 %v1675_v46, %v2121_v27  ;;  %v671_v59 = vmul.f32 %v2199_v39, %v648_v47  ;;  %v168_v60 = vadd.f32 %v152_v48, %v83_v43  ;;  %v221_v61 = vmul.f32 %v1676_v50, %v2121_v27  ;;  %v1893_v46 = vld [vmem:[%s2785_s0 + $0x68] sm:$0xff]  }
  0x47   :  { %v289_v62 = vmul.f32 %v1707_v51, %v2126_v32  ;;  %v672_v63 = vmul.f32 %v2199_v39, %v649_v53  ;;  %v290_v2 = vmul.f32 %v1708_v57, %v2126_v32  ;;  %v1739_v7 = vunpack.c.l.bf16 %v1916_v52 }
  0x48   :  { %v236_v0 = vadd.f32 %v220_v56, %v167_v54  ;;  %v694_v9 = vadd.f32 %v2209_v49, %v671_v59  ;;  %v237_v10 = vadd.f32 %v221_v61, %v168_v60  ;;  %v1740_v11 = vunpack.c.h.bf16 %v1916_v52  ;;  %v1901_v52 = vld [vmem:[%s2785_s0 + $0xa8] sm:$0xff]  }
  0x49   :  { %v1771_v12 = vunpack.c.l.bf16 %v1924_v58  ;;  %v695_v3 = vadd.f32 %v2209_v49, %v672_v63  ;;  %v358_v18 = vmul.f32 %v1739_v7, %v2142_v44  ;;  %v1772_v19 = vunpack.c.h.bf16 %v1924_v58 }
  0x4a   :  { %v305_v17 = vadd.f32 %v289_v62, %v236_v0  ;;  %v710_v21 = vmax.f32 %v694_v9, 0.0  ;;  %v306_v8 = vadd.f32 %v290_v2, %v237_v10  ;;  %v359_v22 = vmul.f32 %v1740_v11, %v2142_v44  ;;  %v1909_v62 = vld [vmem:[%s2785_s0 + $0xe8] sm:$0xff]  }
  0x4b   :  { %v427_v23 = vmul.f32 %v1771_v12, %v2151_v55  ;;  %v711_v24 = vmax.f32 %v695_v3, 0.0  ;;  %v428_v26 = vmul.f32 %v1772_v19, %v2151_v55  ;;  %v1803_v28 = vunpack.c.l.bf16 %v1932_v13 }
  0x4c   :  { %v374_v25 = vadd.f32 %v358_v18, %v305_v17  ;;  %v726_v30 = vmin.f32 %v710_v21, 6.0  ;;  %v375_v31 = vadd.f32 %v359_v22, %v306_v8  ;;  %v1804_v33 = vunpack.c.h.bf16 %v1932_v13  ;;  %v1917_v13 = vld [vmem:[%s2785_s0 + $0x128] sm:$0xff]  }
  0x4d   :  { %v1835_v34 = vunpack.c.l.bf16 %v1940_v20  ;;  %v727_v35 = vmin.f32 %v711_v24, 6.0  ;;  %v496_v37 = vmul.f32 %v1803_v28, %v2163_v1  ;;  %v1836_v38 = vunpack.c.h.bf16 %v1940_v20 }
  0x4e   :  { %v443_v36 = vadd.f32 %v427_v23, %v374_v25  ;;  %v444_v41 = vadd.f32 %v428_v26, %v375_v31  ;;  %v497_v42 = vmul.f32 %v1804_v33, %v2163_v1  ;;  %v1867_v45 = vunpack.c.l.bf16 %v1948_v29  ;;  %v1925_v23 = vld [vmem:[%s2785_s0 + $0x168] sm:$0xff]  }
  0x4f   :  { %v565_v43 = vmul.f32 %v1835_v34, %v2174_v15  ;;  %v739_v47 = vpack.c.bf16 %v727_v35, %v726_v30  ;;  %v566_v50 = vmul.f32 %v1836_v38, %v2174_v15  ;;  %v1868_v51 = vunpack.c.h.bf16 %v1948_v29  ;;  %v1933_v34 = vld [vmem:[%s2785_s0 + $0x1a8] sm:$0xff]  }
  0x50   :  { %v512_v48 = vadd.f32 %v496_v37, %v443_v36  ;;  %v513_v53 = vadd.f32 %v497_v42, %v444_v41  ;;  %v634_v54 = vmul.f32 %v1867_v45, %v2169_v5  ;;  %v1615_v56 = vunpack.c.l.bf16 %v1885_v40  ;;  %v1941_v45 = vld [vmem:[%s2785_s0 + $0x1e8] sm:$0xff]  }
  0x51   :  { %v1616_v57 = vunpack.c.h.bf16 %v1885_v40  ;;  %1983 = vmatmul.mubr.msk.bf16.gmra.mrb[4].mxu0 %vm792_vm0, %v739_v47  ;;  %v635_v59 = vmul.f32 %v1868_v51, %v2169_v5  ;;  %v1647_v60 = vunpack.c.l.bf16 %v1893_v46  ;;  %v1648_v61 = vunpack.c.h.bf16 %v1893_v46  ;;  %v1949_v51 = vld [vmem:[%s2785_s0 + $0x228] sm:$0xff]  }
  0x52   :  { %v581_v58 = vadd.f32 %v565_v43, %v512_v48  ;;  %v582_v63 = vadd.f32 %v566_v50, %v513_v53  ;;  %v84_v0 = vmul.f32 %v1615_v56, %v2097_v14  ;;  %v1679_v7 = vunpack.c.l.bf16 %v1901_v52 }
  0x53   :  { %v85_v2 = vmul.f32 %v1616_v57, %v2097_v14  ;;  %v153_v10 = vmul.f32 %v1647_v60, %v2104_v16  ;;  %v154_v11 = vmul.f32 %v1648_v61, %v2104_v16  ;;  %v1680_v12 = vunpack.c.h.bf16 %v1901_v52  ;;  %v1886_v61 = vld [vmem:[%s2785_s0 + $0x30] sm:$0xff]  }
  0x54   :  { %v650_v9 = vadd.f32 %v634_v54, %v581_v58  ;;  %v651_v3 = vadd.f32 %v635_v59, %v582_v63  ;;  %v222_v17 = vmul.f32 %v1679_v7, %v2121_v27  ;;  %v1711_v18 = vunpack.c.l.bf16 %v1909_v62  ;;  %v1894_v7 = vld [vmem:[%s2785_s0 + $0x70] sm:$0xff]  }
  0x55   :  { %v1712_v19 = vunpack.c.h.bf16 %v1909_v62  ;;  %v169_v21 = vadd.f32 %v153_v10, %v84_v0  ;;  %v170_v8 = vadd.f32 %v154_v11, %v85_v2  ;;  %v223_v22 = vmul.f32 %v1680_v12, %v2121_v27 }
  0x56   :  { %v673_v20 = vmul.f32 %v2199_v39, %v650_v9  ;;  %v674_v24 = vmul.f32 %v2199_v39, %v651_v3  ;;  %v291_v25 = vmul.f32 %v1711_v18, %v2126_v32  ;;  %v1743_v28 = vunpack.c.l.bf16 %v1917_v13 }
  0x57   :  { %v292_v26 = vmul.f32 %v1712_v19, %v2126_v32  ;;  %v238_v30 = vadd.f32 %v222_v17, %v169_v21  ;;  %v239_v31 = vadd.f32 %v223_v22, %v170_v8  ;;  %v1744_v33 = vunpack.c.h.bf16 %v1917_v13  ;;  %v1902_v13 = vld [vmem:[%s2785_s0 + $0xb0] sm:$0xff]  }
  0x58   :  { %v696_v29 = vadd.f32 %v2209_v49, %v673_v20  ;;  %v697_v35 = vadd.f32 %v2209_v49, %v674_v24  ;;  %v360_v36 = vmul.f32 %v1743_v28, %v2142_v44  ;;  %v1775_v37 = vunpack.c.l.bf16 %v1925_v23 }
  0x59   :  { %v1776_v38 = vunpack.c.h.bf16 %v1925_v23  ;;  %v307_v41 = vadd.f32 %v291_v25, %v238_v30  ;;  %v308_v42 = vadd.f32 %v292_v26, %v239_v31  ;;  %v361_v43 = vmul.f32 %v1744_v33, %v2142_v44  ;;  %v1910_v23 = vld [vmem:[%s2785_s0 + $0xf0] sm:$0xff]  }
  0x5a   :  { %v712_v40 = vmax.f32 %v696_v29, 0.0  ;;  %v713_v46 = vmax.f32 %v697_v35, 0.0  ;;  %v429_v47 = vmul.f32 %v1775_v37, %v2151_v55  ;;  %v1807_v50 = vunpack.c.l.bf16 %v1933_v34 }
  0x5b   :  { %v430_v48 = vmul.f32 %v1776_v38, %v2151_v55  ;;  %v376_v53 = vadd.f32 %v360_v36, %v307_v41  ;;  %v377_v54 = vadd.f32 %v361_v43, %v308_v42  ;;  %v1808_v56 = vunpack.c.h.bf16 %v1933_v34  ;;  %v1918_v34 = vld [vmem:[%s2785_s0 + $0x130] sm:$0xff]  }
  0x5c   :  { %v728_v52 = vmin.f32 %v712_v40, 6.0  ;;  %v729_v57 = vmin.f32 %v713_v46, 6.0  ;;  %v498_v58 = vmul.f32 %v1807_v50, %v2163_v1  ;;  %v1839_v59 = vunpack.c.l.bf16 %v1941_v45 }
  0x5d   :  { %v1840_v60 = vunpack.c.h.bf16 %v1941_v45  ;;  %v445_v62 = vadd.f32 %v429_v47, %v376_v53  ;;  %v446_v63 = vadd.f32 %v430_v48, %v377_v54  ;;  %v499_v0 = vmul.f32 %v1808_v56, %v2163_v1  ;;  %v1926_v45 = vld [vmem:[%s2785_s0 + $0x170] sm:$0xff]  }
  0x5e   :  { %v1871_v2 = vunpack.c.l.bf16 %v1949_v51  ;;  %v740_v9 = vpack.c.bf16 %v729_v57, %v728_v52  ;;  %v567_v10 = vmul.f32 %v1839_v59, %v2174_v15  ;;  %v1872_v12 = vunpack.c.h.bf16 %v1949_v51  ;;  %v1934_v56 = vld [vmem:[%s2785_s0 + $0x1b0] sm:$0xff]  }
  0x5f   :  { %v568_v11 = vmul.f32 %v1840_v60, %v2174_v15  ;;  %v514_v3 = vadd.f32 %v498_v58, %v445_v62  ;;  %v515_v17 = vadd.f32 %v499_v0, %v446_v63  ;;  %v1619_v19 = vunpack.c.l.bf16 %v1886_v61 }
  0x60   :  { %v636_v18 = vmul.f32 %v1871_v2, %v2169_v5  ;;  %1986 = vmatprep.mubr.msk.bf16.mxu0 %vm792_vm0, %v740_v9  ;;  %v637_v20 = vmul.f32 %v1872_v12, %v2169_v5  ;;  %v1620_v21 = vunpack.c.h.bf16 %v1886_v61  ;;  %v1651_v8 = vunpack.c.l.bf16 %v1894_v7  ;;  %v1942_v2 = vld [vmem:[%s2785_s0 + $0x1f0] sm:$0xff]  }
  0x61   :  { %v1652_v22 = vunpack.c.h.bf16 %v1894_v7  ;;  %v583_v24 = vadd.f32 %v567_v10, %v514_v3  ;;  %v584_v25 = vadd.f32 %v568_v11, %v515_v17  ;;  %v86_v26 = vmul.f32 %v1619_v19, %v2097_v14 }
  0x62   :  { %v1683_v28 = vunpack.c.l.bf16 %v1902_v13  ;;  %v87_v29 = vmul.f32 %v1620_v21, %v2097_v14  ;;  %v155_v30 = vmul.f32 %v1651_v8, %v2104_v16  ;;  %v1684_v33 = vunpack.c.h.bf16 %v1902_v13 }
  0x63   :  { %v156_v31 = vmul.f32 %v1652_v22, %v2104_v16  ;;  %v652_v35 = vadd.f32 %v636_v18, %v583_v24  ;;  %v653_v36 = vadd.f32 %v637_v20, %v584_v25  ;;  %v1715_v38 = vunpack.c.l.bf16 %v1910_v23  ;;  %v1950_v18 = vld [vmem:[%s2785_s0 + $0x230] sm:$0xff]   ;;  %v1887_v22 = vld [vmem:[%s2785_s0 + $0x38] sm:$0xff]  }
  0x64   :  { %v224_v37 = vmul.f32 %v1683_v28, %v2121_v27  ;;  %v171_v40 = vadd.f32 %v155_v30, %v86_v26  ;;  %v225_v42 = vmul.f32 %v1684_v33, %v2121_v27  ;;  %v1716_v43 = vunpack.c.h.bf16 %v1910_v23  ;;  %v1895_v28 = vld [vmem:[%s2785_s0 + $0x78] sm:$0xff]  }
  0x65   :  { %v172_v41 = vadd.f32 %v156_v31, %v87_v29  ;;  %v675_v46 = vmul.f32 %v2199_v39, %v652_v35  ;;  %v676_v47 = vmul.f32 %v2199_v39, %v653_v36  ;;  %v293_v48 = vmul.f32 %v1715_v38, %v2126_v32  ;;  %v1903_v38 = vld [vmem:[%s2785_s0 + $0xb8] sm:$0xff]  }
  0x66   :  { %v1747_v50 = vunpack.c.l.bf16 %v1918_v34  ;;  %v240_v51 = vadd.f32 %v224_v37, %v171_v40  ;;  %v294_v53 = vmul.f32 %v1716_v43, %v2126_v32  ;;  %v1748_v54 = vunpack.c.h.bf16 %v1918_v34 }
  0x67   :  { %v241_v52 = vadd.f32 %v225_v42, %v172_v41  ;;  %v698_v57 = vadd.f32 %v2209_v49, %v675_v46  ;;  %v699_v58 = vadd.f32 %v2209_v49, %v676_v47  ;;  %v1779_v60 = vunpack.c.l.bf16 %v1926_v45 }
  0x68   :  { %v362_v59 = vmul.f32 %v1747_v50, %v2142_v44  ;;  %v309_v61 = vadd.f32 %v293_v48, %v240_v51  ;;  %v363_v63 = vmul.f32 %v1748_v54, %v2142_v44  ;;  %v1780_v0 = vunpack.c.h.bf16 %v1926_v45  ;;  %v1911_v45 = vld [vmem:[%s2785_s0 + $0xf8] sm:$0xff]  }
  0x69   :  { %v310_v62 = vadd.f32 %v294_v53, %v241_v52  ;;  %v714_v7 = vmax.f32 %v698_v57, 0.0  ;;  %v715_v9 = vmax.f32 %v699_v58, 0.0  ;;  %v431_v10 = vmul.f32 %v1779_v60, %v2151_v55 }
  0x6a   :  { %v1811_v11 = vunpack.c.l.bf16 %v1934_v56  ;;  %v378_v12 = vadd.f32 %v362_v59, %v309_v61  ;;  %v432_v3 = vmul.f32 %v1780_v0, %v2151_v55  ;;  %v1812_v17 = vunpack.c.h.bf16 %v1934_v56  ;;  %v1919_v59 = vld [vmem:[%s2785_s0 + $0x138] sm:$0xff]  }
  0x6b   :  { %v379_v13 = vadd.f32 %v363_v63, %v310_v62  ;;  %v730_v19 = vmin.f32 %v714_v7, 6.0  ;;  %v731_v20 = vmin.f32 %v715_v9, 6.0  ;;  %v1843_v8 = vunpack.c.l.bf16 %v1942_v2 }
  0x6c   :  { %v500_v21 = vmul.f32 %v1811_v11, %v2163_v1  ;;  %v447_v23 = vadd.f32 %v431_v10, %v378_v12  ;;  %v501_v25 = vmul.f32 %v1812_v17, %v2163_v1  ;;  %v1844_v26 = vunpack.c.h.bf16 %v1942_v2 }
  0x6d   :  { %v448_v24 = vadd.f32 %v432_v3, %v379_v13  ;;  %v741_v29 = vpack.c.bf16 %v731_v20, %v730_v19  ;;  %v569_v30 = vmul.f32 %v1843_v8, %v2174_v15  ;;  %v1875_v31 = vunpack.c.l.bf16 %v1950_v18 }
  0x6e   :  { %v1876_v33 = vunpack.c.h.bf16 %v1950_v18  ;;  %v516_v34 = vadd.f32 %v500_v21, %v447_v23  ;;  %v570_v36 = vmul.f32 %v1844_v26, %v2174_v15  ;;  %v1623_v37 = vunpack.c.l.bf16 %v1887_v22  ;;  %v1935_v18 = vld [vmem:[%s2785_s0 + $0x1b8] sm:$0xff]  }
  0x6f   :  { %v517_v35 = vadd.f32 %v501_v25, %v448_v24  ;;  %1987 = vmatmul.mubr.msk.bf16.gmra.mrb[8].mxu0 %vm792_vm0, %v741_v29  ;;  %v638_v40 = vmul.f32 %v1875_v31, %v2169_v5  ;;  %v1624_v42 = vunpack.c.h.bf16 %v1887_v22  ;;  %v1655_v43 = vunpack.c.l.bf16 %v1895_v28  ;;  %v1951_v31 = vld [vmem:[%s2785_s0 + $0x238] sm:$0xff]  }
  0x70   :  { %v639_v41 = vmul.f32 %v1876_v33, %v2169_v5  ;;  %v585_v46 = vadd.f32 %v569_v30, %v516_v34  ;;  %v88_v48 = vmul.f32 %v1623_v37, %v2097_v14  ;;  %v1656_v50 = vunpack.c.h.bf16 %v1895_v28 }
  0x71   :  { %v586_v47 = vadd.f32 %v570_v36, %v517_v35  ;;  %v89_v51 = vmul.f32 %v1624_v42, %v2097_v14  ;;  %v157_v52 = vmul.f32 %v1655_v43, %v2104_v16  ;;  %v1687_v53 = vunpack.c.l.bf16 %v1903_v38  ;;  %v1927_v14 = vld [vmem:[%s2785_s0 + $0x178] sm:$0xff]  }
  0x72   :  { %v1688_v54 = vunpack.c.h.bf16 %v1903_v38  ;;  %v654_v56 = vadd.f32 %v638_v40, %v585_v46  ;;  %v158_v5 = vmul.f32 %v1656_v50, %v2104_v16  ;;  %v1719_v58 = vunpack.c.l.bf16 %v1911_v45  ;;  %v2010_v50 = vld [vmem:[%s2786_s1 + $0x8] ss:$0 sm:$0xff] }
  0x73   :  { %v655_v57 = vadd.f32 %v639_v41, %v586_v47  ;;  %v173_v60 = vadd.f32 %v157_v52, %v88_v48  ;;  %v226_v61 = vmul.f32 %v1687_v53, %v2121_v27  ;;  %v1720_v63 = vunpack.c.h.bf16 %v1911_v45 }
  0x74   :  { %v227_v62 = vmul.f32 %v1688_v54, %v2121_v27  ;;  %v677_v0 = vmul.f32 %v2199_v39, %v654_v56  ;;  %v174_v16 = vadd.f32 %v158_v5, %v89_v51  ;;  %v295_v7 = vmul.f32 %v1719_v58, %v2126_v32 }
  0x75   :  { %v678_v2 = vmul.f32 %v2199_v39, %v655_v57  ;;  %v242_v9 = vadd.f32 %v226_v61, %v173_v60  ;;  %v296_v10 = vmul.f32 %v1720_v63, %v2126_v32  ;;  %v1751_v11 = vunpack.c.l.bf16 %v1919_v59  ;;  %v1943_v32 = vld [vmem:[%s2785_s0 + $0x1f8] sm:$0xff]   ;;  %v970_v63 = vld [vmem:[%s2789_s7 + $0x10] sm:$0xff] }
  0x76   :  { %v1752_v12 = vunpack.c.h.bf16 %v1919_v59  ;;  %v700_v13 = vadd.f32 %v2209_v49, %v677_v0  ;;  %v243_v3 = vadd.f32 %v227_v62, %v174_v16  ;;  %v1783_v17 = vunpack.c.l.bf16 %v1927_v14 }
  0x77   :  { %v701_v27 = vadd.f32 %v2209_v49, %v678_v2  ;;  %v311_v19 = vadd.f32 %v295_v7, %v242_v9  ;;  %v364_v20 = vmul.f32 %v1751_v11, %v2142_v44  ;;  %v1784_v8 = vunpack.c.h.bf16 %v1927_v14  ;;  %v2005_v14 = vld [vmem:[%s2789_s7 + $0x4] ss:$8 sps:$4 sm:$0xff]   ;;  %v2563_v9 = vld [vmem:[%s2790_s5] ss:$0 sm:$0xff] }
  0x78   :  { %v365_v21 = vmul.f32 %v1752_v12, %v2142_v44  ;;  %v716_v22 = vmax.f32 %v700_v13, 0.0  ;;  %v312_v24 = vadd.f32 %v296_v10, %v243_v3  ;;  %v433_v25 = vmul.f32 %v1783_v17, %v2151_v55  ;;  %1994 = vmatprep.subr.bf16.mxu1 %v2005_v14  ;;  %1018 = vmatprep.subr.bf16.mxu0 %v2005_v14  ;;  %v2569_v13 = vld [vmem:[%s2791_s6] ss:$0 sm:$0xff] }
  0x79   :  { %v717_v23 = vmax.f32 %v701_v27, 0.0  ;;  %v380_v26 = vadd.f32 %v364_v20, %v311_v19  ;;  %v434_v28 = vmul.f32 %v1784_v8, %v2151_v55  ;;  %v1815_v29 = vunpack.c.l.bf16 %v1935_v18 }
  0x7a   :  { %v1816_v30 = vunpack.c.h.bf16 %v1935_v18  ;;  %v732_v44 = vmin.f32 %v716_v22, 6.0  ;;  %v381_v34 = vadd.f32 %v365_v21, %v312_v24  ;;  %v1847_v35 = vunpack.c.l.bf16 %v1943_v32 }
  0x7b   :  { %v733_v33 = vmin.f32 %v717_v23, 6.0  ;;  %v449_v36 = vadd.f32 %v433_v25, %v380_v26  ;;  %v502_v37 = vmul.f32 %v1815_v29, %v2163_v1  ;;  %v1848_v40 = vunpack.c.h.bf16 %v1943_v32 }
  0x7c   :  { %v503_v38 = vmul.f32 %v1816_v30, %v2163_v1  ;;  %v450_v42 = vadd.f32 %v434_v28, %v381_v34  ;;  %v571_v55 = vmul.f32 %v1847_v35, %v2174_v15  ;;  %v1879_v43 = vunpack.c.l.bf16 %v1951_v31 }
  0x7d   :  { %v742_v41 = vpack.c.bf16 %v733_v33, %v732_v44  ;;  %v518_v45 = vadd.f32 %v502_v37, %v449_v36  ;;  %v572_v46 = vmul.f32 %v1848_v40, %v2174_v15  ;;  %v1880_v47 = vunpack.c.h.bf16 %v1951_v31 }
  0x7e   :  { %v519_v48 = vadd.f32 %v503_v38, %v450_v42  ;;  %v640_v51 = vmul.f32 %v2010_v50, %v1879_v43  ;;  %v1550_v2 = vcombine.low %v970_v63, %v970_v63  ;;  %v2011_v7 = vmov 0  }
  0x7f   :  { %1990 = vmatprep.mubr.msk.bf16.mxu0 %vm792_vm0, %v742_v41  ;;  %v587_v52 = vadd.f32 %v571_v55, %v518_v45  ;;  %v641_v1 = vmul.f32 %v2010_v50, %v1880_v47  ;;  %1060 = vmatprep.mubr.bf16.mxu1 %v2011_v7 }
  0x80   :  { %v588_v53 = vadd.f32 %v572_v46, %v519_v48  ;;  %v1013_v16 = vsel %vm1011_vm1, %v1550_v2, 0  ;;  %v1175_v2 = vld [vmem:[%s2793_s9] sm:$0x3] }
  0x81   :  { %v656_v54 = vadd.f32 %v640_v51, %v587_v52 }
  0x82   :  { %v657_v56 = vadd.f32 %v641_v1, %v588_v53 }
  0x83   :  { %v679_v57 = vmul.f32 %v2199_v39, %v656_v54 }
  0x84   :  { %v680_v5 = vmul.f32 %v2199_v39, %v657_v56  ;;  %v2007_v39 = vld [vmem:[%s2789_s7] ss:$8 sps:$4 sm:$0xff]  }
  0x85   :  { %v702_v15 = vadd.f32 %v2209_v49, %v679_v57  ;;  %1996 = vmatpush1.bf16.msra.mxu1 %v2007_v39  ;;  %1019 = vmatpush1.bf16.msra.mxu0 %v2007_v39 }
  0x86   :  { %v703_v58 = vadd.f32 %v2209_v49, %v680_v5  ;;  %v1551_v49 = vcombine.high %v970_v63, %v970_v63 }
  0x87   :  { %v718_v59 = vmax.f32 %v702_v15, 0.0 }
  0x88   :  { %v719_v60 = vmax.f32 %v703_v58, 0.0  ;;  %1995 = vmatprep.subr.msk.bf16.mxu1 %vm1011_vm1, %v1551_v49  ;;  %1552 = vmatprep.subr.msk.bf16.mxu0 %vm1011_vm1, %v1551_v49  ;;  %v1131_v49 = vld [vmem:[%s2792_s8] sm:$0x3] }
  0x89   :  { %v734_v61 = vmin.f32 %v718_v59, 6.0  ;;  %1997 = vmatpush1.bf16.msra.mxu1 %v1013_v16  ;;  %1021 = vmatpush1.bf16.msra.mxu0 %v1013_v16  ;;  %v2623_v16 = vrot.slane %v1131_v49, %v2076_v4 }
  0x8a   :  { %v735_v62 = vmin.f32 %v719_v60, 6.0 }
  0x8c   :  { %v743_v0 = vpack.c.bf16 %v735_v62, %v734_v61 }
  0x8e   :  { %1991 = vmatmul.mubr.msk.bf16.gmra.mrb[12].mxu0 %vm792_vm0, %v743_v0 }
  0x8f   :  { %1050 = vmatprep.mubr.bf16.mxu0 %v2011_v7 }
 0x105   :  { %v1980_v10 = vpop.f32.mrb[0].mxu0 }
 0x106   :  { %v923_v11 = vmul.f32 %v1980_v10, %v2563_v9  ;;  %v851_v12 = vpop.f32.mrb[1].mxu0  ;;  %v2629_v10 = vrot.slane %v1175_v2, %v2076_v4 }
 0x107   :  { %v921_v27 = vmul.f32 %v2563_v9, %v851_v12  ;;  %v1981_v3 = vpop.f32.mrb[2].mxu0 }
 0x108   :  { %v924_v17 = vmul.f32 %v1981_v3, %v2563_v9  ;;  %v854_v18 = vpop.f32.mrb[3].mxu0  ;;  %v946_v20 = vadd.f32 %v2569_v13, %v923_v11 }
 0x109   :  { %v922_v19 = vmul.f32 %v2563_v9, %v854_v18  ;;  %v944_v8 = vadd.f32 %v2569_v13, %v921_v27 }
 0x10a   :  { %v947_v21 = vadd.f32 %v2569_v13, %v924_v17 }
 0x10b   :  { %v945_v32 = vadd.f32 %v2569_v13, %v922_v19 }
 0x10c   :  { %v961_v22 = vpack.c.bf16 %v947_v21, %v946_v20 }
 0x10d   :  { %v960_v23 = vpack.c.bf16 %v945_v32, %v944_v8 }
 0x10e   :  { %1554 = vmatmul.mubr.msk.bf16.vlgmr.msra.gmra.mrb[0].mxu1 %vm986_vm2, %v961_v22 }
 0x10f   :  { %1553 = vmatmul.mubr.msk.bf16.vlgmr.msra.gmra.mrb[16].mxu0 %vm986_vm2, %v960_v23  ;;  %1070 = vmatprep.mubr.bf16.mxu1 %v2011_v7 }
 0x124   :  { %v1984_v24 = vpop.f32.mrb[4].mxu0 }
 0x125   :  { %v927_v25 = vmul.f32 %v1984_v24, %v2563_v9  ;;  %v867_v26 = vpop.f32.mrb[5].mxu0 }
 0x126   :  { %v925_v28 = vmul.f32 %v2563_v9, %v867_v26  ;;  %v1985_v29 = vpop.f32.mrb[6].mxu0 }
 0x127   :  { %v928_v30 = vmul.f32 %v1985_v29, %v2563_v9  ;;  %v870_v31 = vpop.f32.mrb[7].mxu0  ;;  %v950_v33 = vadd.f32 %v2569_v13, %v927_v25 }
 0x128   :  { %v926_v44 = vmul.f32 %v2563_v9, %v870_v31  ;;  %v948_v35 = vadd.f32 %v2569_v13, %v925_v28 }
 0x129   :  { %v951_v34 = vadd.f32 %v2569_v13, %v928_v30 }
 0x12a   :  { %v949_v36 = vadd.f32 %v2569_v13, %v926_v44 }
 0x12b   :  { %v963_v37 = vpack.c.bf16 %v951_v34, %v950_v33 }
 0x12c   :  { %v962_v38 = vpack.c.bf16 %v949_v36, %v948_v35 }
 0x12e   :  { %1555 = vmatmul.mubr.msk.bf16.gmra.mrb[4].mxu1 %vm986_vm2, %v962_v38 }
 0x12f   :  { %1080 = vmatprep.mubr.bf16.mxu1 %v2011_v7 }
 0x136   :  { %1556 = vmatmul.mubr.msk.bf16.gmra.mrb[8].mxu1 %vm986_vm2, %v963_v37 }
 0x137   :  { %1090 = vmatprep.mubr.bf16.mxu1 %v2011_v7 }
 0x142   :  { %v1988_v40 = vpop.f32.mrb[8].mxu0 }
 0x143   :  { %v931_v41 = vmul.f32 %v1988_v40, %v2563_v9  ;;  %v883_v42 = vpop.f32.mrb[9].mxu0 }
 0x144   :  { %v929_v55 = vmul.f32 %v2563_v9, %v883_v42  ;;  %v1989_v43 = vpop.f32.mrb[10].mxu0 }
 0x145   :  { %v954_v45 = vadd.f32 %v2569_v13, %v931_v41  ;;  %v932_v46 = vmul.f32 %v1989_v43, %v2563_v9  ;;  %v886_v47 = vpop.f32.mrb[11].mxu0 }
 0x146   :  { %v952_v48 = vadd.f32 %v2569_v13, %v929_v55  ;;  %v930_v50 = vmul.f32 %v2563_v9, %v886_v47 }
 0x147   :  { %v955_v51 = vadd.f32 %v2569_v13, %v932_v46 }
 0x148   :  { %v953_v52 = vadd.f32 %v2569_v13, %v930_v50 }
 0x149   :  { %v965_v1 = vpack.c.bf16 %v955_v51, %v954_v45 }
 0x14a   :  { %v964_v53 = vpack.c.bf16 %v953_v52, %v952_v48 }
 0x14c   :  { %1557 = vmatmul.mubr.msk.bf16.gmra.mrb[12].mxu1 %vm986_vm2, %v964_v53 }
 0x14d   :  { %1100 = vmatprep.mubr.bf16.mxu1 %v2011_v7 }
 0x154   :  { %1558 = vmatmul.mubr.msk.bf16.gmra.mrb[16].mxu1 %vm986_vm2, %v965_v1 }
 0x155   :  { %1110 = vmatprep.mubr.bf16.mxu1 %v2011_v7 }
 0x161   :  { %v1992_v54 = vpop.f32.mrb[12].mxu0 }
 0x162   :  { %v935_v56 = vmul.f32 %v1992_v54, %v2563_v9  ;;  %v899_v57 = vpop.f32.mrb[13].mxu0 }
 0x163   :  { %v933_v5 = vmul.f32 %v2563_v9, %v899_v57  ;;  %v1993_v15 = vpop.f32.mrb[14].mxu0 }
 0x164   :  { %v958_v58 = vadd.f32 %v2569_v13, %v935_v56  ;;  %v936_v59 = vmul.f32 %v1993_v15, %v2563_v9  ;;  %v902_v60 = vpop.f32.mrb[15].mxu0 }
 0x165   :  { %v956_v61 = vadd.f32 %v2569_v13, %v933_v5  ;;  %v934_v62 = vmul.f32 %v2563_v9, %v902_v60  ;;  %v2626_v9 = vrot.slane %v1131_v49, %v2082_v6 }
 0x166   :  { %v959_v63 = vadd.f32 %v2569_v13, %v936_v59 }
 0x167   :  { %v957_v14 = vadd.f32 %v2569_v13, %v934_v62 }
 0x168   :  { %v967_v0 = vpack.c.bf16 %v959_v63, %v958_v58 }
 0x169   :  { %v966_v39 = vpack.c.bf16 %v957_v14, %v956_v61 }
 0x16b   :  { %1559 = vmatmul.mubr.msk.bf16.gmra.mrb[20].mxu1 %vm986_vm2, %v966_v39 }
 0x16c   :  { %1120 = vmatprep.mubr.bf16.mxu1 %v2011_v7  ;;  %v2632_v7 = vrot.slane %v1175_v2, %v2082_v6 }
 0x173   :  { %1560 = vmatmul.mubr.msk.bf16.gmra.mrb[24].mxu1 %vm986_vm2, %v967_v0 }
 0x1e1   :  { %v1062_v11 = vpop.f32.mrb[0].mxu1 }
 0x1e2   :  { %v1147_v12 = vmul.f32 %v2623_v16, %v1062_v11  ;;  %v1052_v13 = vpop.f32.mrb[16].mxu0  ;;  %v1064_v27 = vpop.f32.mrb[1].mxu1 }
 0x1e3   :  { %v1143_v3 = vmul.f32 %v2623_v16, %v1052_v13  ;;  %v1148_v17 = vmul.f32 %v2626_v9, %v1064_v27  ;;  %v1054_v18 = vpop.f32.mrb[17].mxu0  ;;  %v1066_v19 = vpop.f32.mrb[2].mxu1 }
 0x1e4   :  { %v1191_v20 = vadd.f32 %v2629_v10, %v1147_v12  ;;  %v1144_v4 = vmul.f32 %v2626_v9, %v1054_v18  ;;  %v1149_v21 = vmul.f32 %v2623_v16, %v1066_v19  ;;  %v1056_v6 = vpop.f32.mrb[18].mxu0  ;;  %v1068_v8 = vpop.f32.mrb[3].mxu1 }
 0x1e5   :  { %v1187_v32 = vadd.f32 %v2629_v10, %v1143_v3  ;;  %v1192_v22 = vadd.f32 %v2632_v7, %v1148_v17  ;;  %v1145_v23 = vmul.f32 %v2623_v16, %v1056_v6  ;;  %v1150_v24 = vmul.f32 %v2626_v9, %v1068_v8  ;;  %v1058_v25 = vpop.f32.mrb[19].mxu0 }
 0x1e6   :  { %v1223_v26 = vmax.f32 %v1191_v20, 0.0  ;;  %v1188_v28 = vadd.f32 %v2632_v7, %v1144_v4  ;;  %v1193_v29 = vadd.f32 %v2629_v10, %v1149_v21  ;;  %v1146_v30 = vmul.f32 %v2626_v9, %v1058_v25 }
 0x1e7   :  { %v1219_v31 = vmax.f32 %v1187_v32, 0.0  ;;  %v1224_v44 = vmax.f32 %v1192_v22, 0.0  ;;  %v1189_v33 = vadd.f32 %v2629_v10, %v1145_v23  ;;  %v1194_v34 = vadd.f32 %v2632_v7, %v1150_v24 }
 0x1e8   :  { %v1255_v35 = vmin.f32 %v1223_v26, 6.0  ;;  %v1220_v36 = vmax.f32 %v1188_v28, 0.0  ;;  %v1225_v37 = vmax.f32 %v1193_v29, 0.0  ;;  %v1190_v38 = vadd.f32 %v2632_v7, %v1146_v30 }
 0x1e9   :  { %v1251_v40 = vmin.f32 %v1219_v31, 6.0  ;;  %v1256_v41 = vmin.f32 %v1224_v44, 6.0  ;;  %v1221_v42 = vmax.f32 %v1189_v33, 0.0  ;;  %v1226_v55 = vmax.f32 %v1194_v34, 0.0 }
 0x1ea   :  { %v1252_v45 = vmin.f32 %v1220_v36, 6.0  ;;  %v1257_v46 = vmin.f32 %v1225_v37, 6.0  ;;  %v1222_v47 = vmax.f32 %v1190_v38, 0.0 }
 0x1eb   :  { %v1579_v48 = vpack.c.bf16 %v1256_v41, %v1255_v35  ;;  %v1253_v50 = vmin.f32 %v1221_v42, 6.0  ;;  %v1258_v51 = vmin.f32 %v1226_v55, 6.0 }
 0x1ec   :  { %v1577_v52 = vpack.c.bf16 %v1252_v45, %v1251_v40  ;;  %v1254_v1 = vmin.f32 %v1222_v47, 6.0 }
 0x1ed   :  { %1383 = vst.msk [vmem:[%s2794_s10 + $0x10] sm:$0xff] %vm2652_vm4, %v1579_v48  ;;  %v1580_v53 = vpack.c.bf16 %v1258_v51, %v1257_v46 }
 0x1ee   :  { %1381 = vst.msk [vmem:[%s2794_s10] sm:$0xff] %vm2652_vm4, %v1577_v52  ;;  %v1578_v54 = vpack.c.bf16 %v1254_v1, %v1253_v50 }
 0x1ef   :  { %1384 = vst.msk [vmem:[%s2794_s10 + $0x18] sm:$0xff] %vm2652_vm4, %v1580_v53 }
 0x1f0   :  { %1382 = vst.msk [vmem:[%s2794_s10 + $0x8] sm:$0xff] %vm2652_vm4, %v1578_v54 }
 0x201   :  { %v1072_v56 = vpop.f32.mrb[4].mxu1 }
 0x202   :  { %v1151_v57 = vmul.f32 %v2623_v16, %v1072_v56  ;;  %v1074_v5 = vpop.f32.mrb[5].mxu1 }
 0x203   :  { %v1152_v15 = vmul.f32 %v2626_v9, %v1074_v5  ;;  %v1076_v58 = vpop.f32.mrb[6].mxu1 }
 0x204   :  { %v1195_v59 = vadd.f32 %v2629_v10, %v1151_v57  ;;  %v1153_v60 = vmul.f32 %v2623_v16, %v1076_v58  ;;  %v1078_v61 = vpop.f32.mrb[7].mxu1 }
 0x205   :  { %v1196_v62 = vadd.f32 %v2632_v7, %v1152_v15  ;;  %v1154_v63 = vmul.f32 %v2626_v9, %v1078_v61 }
 0x206   :  { %v1227_v14 = vmax.f32 %v1195_v59, 0.0  ;;  %v1197_v0 = vadd.f32 %v2629_v10, %v1153_v60 }
 0x207   :  { %v1228_v39 = vmax.f32 %v1196_v62, 0.0  ;;  %v1198_v49 = vadd.f32 %v2632_v7, %v1154_v63 }
 0x208   :  { %v1259_v2 = vmin.f32 %v1227_v14, 6.0  ;;  %v1229_v11 = vmax.f32 %v1197_v0, 0.0 }
 0x209   :  { %v1260_v12 = vmin.f32 %v1228_v39, 6.0  ;;  %v1230_v13 = vmax.f32 %v1198_v49, 0.0  ;;  %v1082_v27 = vpop.f32.mrb[8].mxu1 }
 0x20a   :  { %v1261_v3 = vmin.f32 %v1229_v11, 6.0  ;;  %v1155_v17 = vmul.f32 %v2623_v16, %v1082_v27  ;;  %v1084_v18 = vpop.f32.mrb[9].mxu1 }
 0x20b   :  { %v1581_v19 = vpack.c.bf16 %v1260_v12, %v1259_v2  ;;  %v1262_v20 = vmin.f32 %v1230_v13, 6.0  ;;  %v1156_v4 = vmul.f32 %v2626_v9, %v1084_v18  ;;  %v1086_v21 = vpop.f32.mrb[10].mxu1 }
 0x20c   :  { %v1199_v6 = vadd.f32 %v2629_v10, %v1155_v17  ;;  %v1157_v8 = vmul.f32 %v2623_v16, %v1086_v21  ;;  %v1088_v32 = vpop.f32.mrb[11].mxu1 }
 0x20d   :  { %1385 = vst.msk [vmem:[%s2794_s10 + $0x20] sm:$0xff] %vm2652_vm4, %v1581_v19  ;;  %v1582_v22 = vpack.c.bf16 %v1262_v20, %v1261_v3  ;;  %v1200_v23 = vadd.f32 %v2632_v7, %v1156_v4  ;;  %v1158_v24 = vmul.f32 %v2626_v9, %v1088_v32 }
 0x20e   :  { %v1231_v25 = vmax.f32 %v1199_v6, 0.0  ;;  %v1201_v26 = vadd.f32 %v2629_v10, %v1157_v8 }
 0x20f   :  { %1386 = vst.msk [vmem:[%s2794_s10 + $0x28] sm:$0xff] %vm2652_vm4, %v1582_v22  ;;  %v1232_v28 = vmax.f32 %v1200_v23, 0.0  ;;  %v1202_v29 = vadd.f32 %v2632_v7, %v1158_v24 }
 0x210   :  { %v1263_v30 = vmin.f32 %v1231_v25, 6.0  ;;  %v1233_v31 = vmax.f32 %v1201_v26, 0.0 }
 0x211   :  { %v1264_v44 = vmin.f32 %v1232_v28, 6.0  ;;  %v1234_v33 = vmax.f32 %v1202_v29, 0.0 }
 0x212   :  { %v1265_v34 = vmin.f32 %v1233_v31, 6.0 }
 0x213   :  { %v1583_v35 = vpack.c.bf16 %v1264_v44, %v1263_v30  ;;  %v1266_v36 = vmin.f32 %v1234_v33, 6.0 }
 0x215   :  { %1387 = vst.msk [vmem:[%s2794_s10 + $0x30] sm:$0xff] %vm2652_vm4, %v1583_v35  ;;  %v1584_v37 = vpack.c.bf16 %v1266_v36, %v1265_v34 }
 0x217   :  { %1388 = vst.msk [vmem:[%s2794_s10 + $0x38] sm:$0xff] %vm2652_vm4, %v1584_v37 }
 0x21f   :  { %v1092_v38 = vpop.f32.mrb[12].mxu1 }
 0x220   :  { %v1159_v40 = vmul.f32 %v2623_v16, %v1092_v38  ;;  %v1094_v41 = vpop.f32.mrb[13].mxu1 }
 0x221   :  { %v1160_v42 = vmul.f32 %v2626_v9, %v1094_v41  ;;  %v1096_v55 = vpop.f32.mrb[14].mxu1 }
 0x222   :  { %v1203_v45 = vadd.f32 %v2629_v10, %v1159_v40  ;;  %v1161_v46 = vmul.f32 %v2623_v16, %v1096_v55  ;;  %v1098_v47 = vpop.f32.mrb[15].mxu1 }
 0x223   :  { %v1204_v48 = vadd.f32 %v2632_v7, %v1160_v42  ;;  %v1162_v50 = vmul.f32 %v2626_v9, %v1098_v47 }
 0x224   :  { %v1235_v51 = vmax.f32 %v1203_v45, 0.0  ;;  %v1205_v52 = vadd.f32 %v2629_v10, %v1161_v46 }
 0x225   :  { %v1236_v1 = vmax.f32 %v1204_v48, 0.0  ;;  %v1206_v53 = vadd.f32 %v2632_v7, %v1162_v50 }
 0x226   :  { %v1267_v54 = vmin.f32 %v1235_v51, 6.0  ;;  %v1237_v56 = vmax.f32 %v1205_v52, 0.0 }
 0x227   :  { %v1268_v57 = vmin.f32 %v1236_v1, 6.0  ;;  %v1238_v5 = vmax.f32 %v1206_v53, 0.0  ;;  %v1102_v15 = vpop.f32.mrb[16].mxu1 }
 0x228   :  { %v1269_v58 = vmin.f32 %v1237_v56, 6.0  ;;  %v1163_v59 = vmul.f32 %v2623_v16, %v1102_v15  ;;  %v1104_v60 = vpop.f32.mrb[17].mxu1 }
 0x229   :  { %v1585_v61 = vpack.c.bf16 %v1268_v57, %v1267_v54  ;;  %v1270_v62 = vmin.f32 %v1238_v5, 6.0  ;;  %v1164_v63 = vmul.f32 %v2626_v9, %v1104_v60  ;;  %v1106_v14 = vpop.f32.mrb[18].mxu1 }
 0x22a   :  { %v1207_v0 = vadd.f32 %v2629_v10, %v1163_v59  ;;  %v1165_v39 = vmul.f32 %v2623_v16, %v1106_v14  ;;  %v1108_v49 = vpop.f32.mrb[19].mxu1 }
 0x22b   :  { %1389 = vst.msk [vmem:[%s2794_s10 + $0x40] sm:$0xff] %vm2652_vm4, %v1585_v61  ;;  %v1586_v2 = vpack.c.bf16 %v1270_v62, %v1269_v58  ;;  %v1208_v11 = vadd.f32 %v2632_v7, %v1164_v63  ;;  %v1166_v12 = vmul.f32 %v2626_v9, %v1108_v49 }
 0x22c   :  { %v1239_v13 = vmax.f32 %v1207_v0, 0.0  ;;  %v1209_v27 = vadd.f32 %v2629_v10, %v1165_v39 }
 0x22d   :  { %1390 = vst.msk [vmem:[%s2794_s10 + $0x48] sm:$0xff] %vm2652_vm4, %v1586_v2  ;;  %v1240_v3 = vmax.f32 %v1208_v11, 0.0  ;;  %v1210_v17 = vadd.f32 %v2632_v7, %v1166_v12 }
 0x22e   :  { %v1271_v18 = vmin.f32 %v1239_v13, 6.0  ;;  %v1241_v19 = vmax.f32 %v1209_v27, 0.0 }
 0x22f   :  { %v1272_v20 = vmin.f32 %v1240_v3, 6.0  ;;  %v1242_v4 = vmax.f32 %v1210_v17, 0.0 }
 0x230   :  { %v1273_v21 = vmin.f32 %v1241_v19, 6.0 }
 0x231   :  { %v1587_v6 = vpack.c.bf16 %v1272_v20, %v1271_v18  ;;  %v1274_v8 = vmin.f32 %v1242_v4, 6.0 }
 0x233   :  { %1391 = vst.msk [vmem:[%s2794_s10 + $0x50] sm:$0xff] %vm2652_vm4, %v1587_v6  ;;  %v1588_v32 = vpack.c.bf16 %v1274_v8, %v1273_v21 }
 0x235   :  { %1392 = vst.msk [vmem:[%s2794_s10 + $0x58] sm:$0xff] %vm2652_vm4, %v1588_v32 }
 0x23e   :  { %v1112_v22 = vpop.f32.mrb[20].mxu1 }
 0x23f   :  { %v1167_v23 = vmul.f32 %v2623_v16, %v1112_v22  ;;  %v1114_v24 = vpop.f32.mrb[21].mxu1 }
 0x240   :  { %v1168_v25 = vmul.f32 %v2626_v9, %v1114_v24  ;;  %v1116_v26 = vpop.f32.mrb[22].mxu1 }
 0x241   :  { %v1211_v28 = vadd.f32 %v2629_v10, %v1167_v23  ;;  %v1169_v29 = vmul.f32 %v2623_v16, %v1116_v26  ;;  %v1118_v30 = vpop.f32.mrb[23].mxu1 }
 0x242   :  { %v1212_v31 = vadd.f32 %v2632_v7, %v1168_v25  ;;  %v1170_v44 = vmul.f32 %v2626_v9, %v1118_v30 }
 0x243   :  { %v1243_v33 = vmax.f32 %v1211_v28, 0.0  ;;  %v1213_v34 = vadd.f32 %v2629_v10, %v1169_v29 }
 0x244   :  { %v1244_v35 = vmax.f32 %v1212_v31, 0.0  ;;  %v1214_v36 = vadd.f32 %v2632_v7, %v1170_v44 }
 0x245   :  { %v1275_v37 = vmin.f32 %v1243_v33, 6.0  ;;  %v1245_v38 = vmax.f32 %v1213_v34, 0.0 }
 0x246   :  { %v1276_v40 = vmin.f32 %v1244_v35, 6.0  ;;  %v1246_v41 = vmax.f32 %v1214_v36, 0.0  ;;  %v1122_v42 = vpop.f32.mrb[24].mxu1 }
 0x247   :  { %v1277_v55 = vmin.f32 %v1245_v38, 6.0  ;;  %v1171_v45 = vmul.f32 %v2623_v16, %v1122_v42  ;;  %v1124_v46 = vpop.f32.mrb[25].mxu1 }
 0x248   :  { %v1589_v47 = vpack.c.bf16 %v1276_v40, %v1275_v37  ;;  %v1278_v48 = vmin.f32 %v1246_v41, 6.0  ;;  %v1172_v50 = vmul.f32 %v2626_v9, %v1124_v46  ;;  %v1126_v51 = vpop.f32.mrb[26].mxu1 }
 0x249   :  { %v1215_v52 = vadd.f32 %v2629_v10, %v1171_v45  ;;  %v1173_v1 = vmul.f32 %v2623_v16, %v1126_v51  ;;  %v1128_v53 = vpop.f32.mrb[27].mxu1 }
 0x24a   :  { %1393 = vst.msk [vmem:[%s2794_s10 + $0x60] sm:$0xff] %vm2652_vm4, %v1589_v47  ;;  %v1590_v54 = vpack.c.bf16 %v1278_v48, %v1277_v55  ;;  %v1216_v56 = vadd.f32 %v2632_v7, %v1172_v50  ;;  %v1174_v57 = vmul.f32 %v2626_v9, %v1128_v53 }
 0x24b   :  { %v1247_v5 = vmax.f32 %v1215_v52, 0.0  ;;  %v1217_v15 = vadd.f32 %v2629_v10, %v1173_v1 }
 0x24c   :  { %1394 = vst.msk [vmem:[%s2794_s10 + $0x68] sm:$0xff] %vm2652_vm4, %v1590_v54  ;;  %v1248_v16 = vmax.f32 %v1216_v56, 0.0  ;;  %v1218_v58 = vadd.f32 %v2632_v7, %v1174_v57 }
 0x24d   :  { %v1279_v59 = vmin.f32 %v1247_v5, 6.0  ;;  %v1249_v60 = vmax.f32 %v1217_v15, 0.0 }
 0x24e   :  { %v1280_v61 = vmin.f32 %v1248_v16, 6.0  ;;  %v1250_v62 = vmax.f32 %v1218_v58, 0.0 }
 0x24f   :  { %v1281_v63 = vmin.f32 %v1249_v60, 6.0 }
 0x250   :  { %v1591_v14 = vpack.c.bf16 %v1280_v61, %v1279_v59  ;;  %v1282_v0 = vmin.f32 %v1250_v62, 6.0 }
 0x252   :  { %1395 = vst.msk [vmem:[%s2794_s10 + $0x70] sm:$0xff] %vm2652_vm4, %v1591_v14  ;;  %v1592_v9 = vpack.c.bf16 %v1282_v0, %v1281_v63 }
 0x254   :  { %1396 = vst.msk [vmem:[%s2794_s10 + $0x78] sm:$0xff] %vm2652_vm4, %v1592_v9 }

// kernel: forward.11
= control target key start
LH: loop header
LB: loop body
LE: loop exit
PB: predicated region body
PF: predicated region fallthrough
CT: control target
= control target key end

     0   :  { %v52_v0 = vlaneseq  ;;  %v836_v1 = vmov 0   ;;  %vm504_vm0 = vcmask 130048   ;;  %vm608_vm1 = vcmask 261120   ;;  %s1474_s4 = inlined_call_operand.vmem [shape: bf16[144,32], index: 4, kind: input, shape index: {}]   ;;  %s1475_s1 = inlined_call_operand.vmem [shape: f32[9,144], index: 1, kind: input, shape index: {}]   ;;  %s1476_s0 = inlined_call_operand.vmem [shape: bf16[9,32,144], index: 0, kind: input, shape index: {}]   ;;  %s1477_s2 = inlined_call_operand.vmem [shape: f32[1,144], index: 2, kind: input, shape index: {}]   ;;  %s1478_s3 = inlined_call_operand.vmem [shape: f32[1,144], index: 3, kind: input, shape index: {}]   ;;  %s1479_s7 = inlined_call_operand.vmem [shape: bf16[32,192], index: 7, kind: input, shape index: {}]   ;;  %s1480_s5 = inlined_call_operand.vmem [shape: f32[1,32], index: 5, kind: input, shape index: {}]   ;;  %s1481_s6 = inlined_call_operand.vmem [shape: f32[1,32], index: 6, kind: input, shape index: {}]   ;;  %s1482_s8 = inlined_call_operand.vmem [shape: f32[1,192], index: 8, kind: input, shape index: {}]   ;;  %s1483_s9 = inlined_call_operand.vmem [shape: f32[1,192], index: 9, kind: input, shape index: {}]   ;;  %s1484_s10 = inlined_call_operand.vmem [shape: bf16[32,192], index: 10, kind: output, shape index: {}]  }
   0x1   :  { %511 = vmatprep.subr.bf16.mxu0 %v836_v1  ;;  %v821_v2 = vld [vmem:[%s1474_s4] sm:$0xff]   ;;  %647 = vmatprep.mubr.bf16.mxu1 %v836_v1  ;;  %v822_v4 = vld [vmem:[%s1474_s4 + $0x8] sm:$0xff]   ;;  %v823_v5 = vld [vmem:[%s1474_s4 + $0x10] sm:$0xff]   ;;  %vm748_vm2 = vcmask 1043456   ;;  %vm749_vm3 = vcmask 523268  }
   0x2   :  { %v897_v3 = vshrl.u32 %v52_v0, 7  ;;  %512 = vmatpush1.bf16.msra.mxu0 %v821_v2  ;;  %v824_v10 = vld [vmem:[%s1474_s4 + $0x18] sm:$0xff]   ;;  %v921_v11 = vld [vmem:[%s1475_s1 + $0x8] sm:$0xff]  ;;  %v930_v16 = vld [vmem:[%s1476_s0] sm:$0xff] }
   0x3   :  { %513 = vmatprep.subr.bf16.mxu0 %v836_v1  ;;  %v935_v17 = vld [vmem:[%s1476_s0 + $0x8] sm:$0xff]  ;;  %v944_v19 = vld [vmem:[%s1476_s0 + $0x20] sm:$0xff]  ;;  %v44_v23 = vunpack.c.l.bf16 %v930_v16  ;;  %v45_v24 = vunpack.c.h.bf16 %v930_v16  ;;  %vm1450_vm4 = vmor %vm749_vm3, %vm748_vm2 }
   0x4   :  { %v907_v6 = vsub.s32 0, %v897_v3  ;;  %v910_v7 = vsub.s32 1, %v897_v3  ;;  %v128_v8 = vsub.s32 2, %v897_v3  ;;  %v165_v9 = vsub.s32 3, %v897_v3  ;;  %v968_v27 = vld [vmem:[%s1476_s0 + $0x28] sm:$0xff]  ;;  %v973_v28 = vld [vmem:[%s1476_s0 + $0x40] sm:$0xff] }
   0x5   :  { %v202_v12 = vsub.s32 4, %v897_v3  ;;  %v239_v13 = vsub.s32 5, %v897_v3  ;;  %v1486_v14 = vsub.s32 6, %v897_v3  ;;  %v1485_v15 = vsub.s32 7, %v897_v3  ;;  %v978_v29 = vld [vmem:[%s1476_s0 + $0x48] sm:$0xff]  ;;  %v987_v34 = vld [vmem:[%s1476_s0 + $0x60] sm:$0xff] }
   0x6   :  { %514 = vmatpush1.bf16.msra.mxu0 %v822_v4  ;;  %v939_v18 = vrot.slane %v921_v11, %v907_v6  ;;  %v948_v20 = vrot.slane %v921_v11, %v910_v7  ;;  %v953_v21 = vrot.slane %v921_v11, %v128_v8  ;;  %v958_v22 = vrot.slane %v921_v11, %v165_v9  ;;  %v992_v35 = vld [vmem:[%s1476_s0 + $0x68] sm:$0xff]  ;;  %v825_v40 = vld [vmem:[%s1474_s4 + $0x20] sm:$0xff]  }
   0x7   :  { %515 = vmatprep.subr.bf16.mxu0 %v836_v1  ;;  %v46_v25 = vunpack.c.l.bf16 %v935_v17  ;;  %v47_v26 = vunpack.c.h.bf16 %v935_v17  ;;  %v81_v30 = vunpack.c.l.bf16 %v944_v19  ;;  %v82_v31 = vunpack.c.h.bf16 %v944_v19  ;;  %v1008_v45 = vld [vmem:[%s1476_s0 + $0x80] sm:$0xff]  ;;  %v1013_v46 = vld [vmem:[%s1476_s0 + $0x88] sm:$0xff] }
   0x8   :  { %v83_v32 = vunpack.c.l.bf16 %v968_v27  ;;  %v84_v33 = vunpack.c.h.bf16 %v968_v27  ;;  %v61_v36 = vmul.f32 %v939_v18, %v45_v24  ;;  %v118_v38 = vunpack.c.l.bf16 %v973_v28  ;;  %v1025_v55 = vld [vmem:[%s1476_s0 + $0xa0] sm:$0xff]  ;;  %v1030_v56 = vld [vmem:[%s1476_s0 + $0xa8] sm:$0xff] }
   0x9   :  { %v63_v37 = vmul.f32 %v939_v18, %v47_v26  ;;  %v119_v39 = vunpack.c.h.bf16 %v973_v28  ;;  %v98_v41 = vmul.f32 %v948_v20, %v82_v31  ;;  %v120_v43 = vunpack.c.l.bf16 %v978_v29  ;;  %v826_v61 = vld [vmem:[%s1474_s4 + $0x28] sm:$0xff]   ;;  %v1044_v4 = vld [vmem:[%s1476_s0 + $0xc0] sm:$0xff] }
   0xa   :  { %516 = vmatpush1.bf16.msra.mxu0 %v823_v5  ;;  %v100_v42 = vmul.f32 %v948_v20, %v84_v33  ;;  %v121_v44 = vunpack.c.h.bf16 %v978_v29  ;;  %v155_v48 = vunpack.c.l.bf16 %v987_v34  ;;  %v156_v49 = vunpack.c.h.bf16 %v987_v34  ;;  %v1058_v31 = vld [vmem:[%s1476_s0 + $0xc8] sm:$0xff]  ;;  %v1209_v29 = vld [vmem:[%s1475_s1 + $0x10] ss:$0 sm:$0xff] }
   0xb   :  { %517 = vmatprep.subr.bf16.mxu0 %v836_v1  ;;  %v135_v47 = vmul.f32 %v953_v21, %v119_v39  ;;  %v157_v50 = vunpack.c.l.bf16 %v992_v35  ;;  %v106_v51 = vadd.f32 %v98_v41, %v61_v36  ;;  %v158_v54 = vunpack.c.h.bf16 %v992_v35 }
   0xc   :  { %v108_v52 = vadd.f32 %v100_v42, %v63_v37  ;;  %v137_v53 = vmul.f32 %v953_v21, %v121_v44  ;;  %v172_v57 = vmul.f32 %v958_v22, %v156_v49  ;;  %v193_v59 = vunpack.c.h.bf16 %v1008_v45  ;;  %v1078_v49 = vld [vmem:[%s1476_s0 + $0xe8] sm:$0xff]  ;;  %v392_v44 = vld [vmem:[%s1478_s3] sm:$0x3] }
   0xd   :  { %v143_v62 = vadd.f32 %v135_v47, %v106_v51  ;;  %v174_v0 = vmul.f32 %v958_v22, %v158_v54  ;;  %v195_v2 = vunpack.c.h.bf16 %v1013_v46  ;;  %v1050_v5 = vrot.slane %v921_v11, %v202_v12  ;;  %v827_v51 = vld [vmem:[%s1474_s4 + $0x30] sm:$0xff]  }
   0xe   :  { %518 = vmatpush1.bf16.msra.mxu0 %v824_v10  ;;  %v145_v63 = vadd.f32 %v137_v53, %v108_v52  ;;  %v230_v24 = vunpack.c.h.bf16 %v1025_v55  ;;  %v232_v37 = vunpack.c.h.bf16 %v1030_v56  ;;  %v1064_v39 = vrot.slane %v921_v11, %v239_v13 }
   0xf   :  { %519 = vmatprep.subr.bf16.mxu0 %v836_v1  ;;  %v180_v33 = vadd.f32 %v172_v57, %v143_v62  ;;  %v209_v41 = vmul.f32 %v1050_v5, %v193_v59  ;;  %v211_v42 = vmul.f32 %v1050_v5, %v195_v2  ;;  %v267_v47 = vunpack.c.h.bf16 %v1044_v4 }
  0x10   :  { %v182_v36 = vadd.f32 %v174_v0, %v145_v63  ;;  %v246_v52 = vmul.f32 %v1064_v39, %v230_v24  ;;  %v248_v53 = vmul.f32 %v1064_v39, %v232_v37  ;;  %v269_v57 = vunpack.c.h.bf16 %v1058_v31  ;;  %v1097_v0 = vld [vmem:[%s1476_s0 + $0x100] sm:$0xff] }
  0x11   :  { %v217_v59 = vadd.f32 %v209_v41, %v180_v33  ;;  %v306_v37 = vunpack.c.h.bf16 %v1078_v49  ;;  %v1105_v33 = vrot.slane %v921_v11, %v1485_v15  ;;  %v1115_v41 = vld [vmem:[%s1475_s1 + $0x18] ss:$0 sm:$0xff]  ;;  %v1488_v34 = vunpack.c.l.bf16 %v1013_v46 }
  0x12   :  { %520 = vmatpush1.bf16.msra.mxu0 %v825_v40  ;;  %v1069_v40 = vld [vmem:[%s1476_s0 + $0xe0] sm:$0xff]  ;;  %v219_v62 = vadd.f32 %v211_v42, %v182_v36  ;;  %v1110_v36 = vld [vmem:[%s1476_s0 + $0x108] sm:$0xff]  ;;  %v828_v15 = vld [vmem:[%s1474_s4 + $0x38] sm:$0xff]   ;;  %v1492_v46 = vsub.s32 7, %v897_v3 }
  0x13   :  { %521 = vmatprep.subr.bf16.mxu0 %v836_v1  ;;  %v304_v2 = vunpack.c.h.bf16 %v1069_v40  ;;  %v254_v42 = vadd.f32 %v246_v52, %v217_v59  ;;  %v36_v59 = vld [vmem:[%s1475_s1] sm:$0xff]  ;;  %v343_v26 = vunpack.c.h.bf16 %v1110_v36 }
  0x14   :  { %v256_v63 = vadd.f32 %v248_v53, %v219_v62  ;;  %v322_v53 = vmul.f32 %v1105_v33, %v306_v37 }
  0x15   :  { %v320_v52 = vmul.f32 %v1105_v33, %v304_v2 }
  0x16   :  { %522 = vmatpush1.bf16.msra.mxu0 %v826_v61  ;;  %v1091_v61 = vrot.slane %v921_v11, %v1486_v14  ;;  %v372_v11 = vld [vmem:[%s1477_s2] sm:$0x3]  ;;  %v342_v14 = vunpack.c.l.bf16 %v1110_v36  ;;  %v1156_v36 = vrot.slane %v36_v59, %v907_v6 }
  0x17   :  { %523 = vmatprep.subr.bf16.mxu0 %v836_v1  ;;  %v1140_v37 = vrot.slane %v372_v11, %v907_v6  ;;  %v1143_v10 = vrot.slane %v372_v11, %v910_v7  ;;  %v1163_v11 = vrot.slane %v36_v59, %v128_v8 }
  0x18   :  { %v283_v24 = vmul.f32 %v1091_v61, %v267_v47  ;;  %v285_v54 = vmul.f32 %v1091_v61, %v269_v57  ;;  %v340_v47 = vunpack.c.l.bf16 %v1097_v0  ;;  %v341_v57 = vunpack.c.h.bf16 %v1097_v0 }
  0x19   :  { %v1146_v0 = vrot.slane %v392_v44, %v907_v6  ;;  %v60_v8 = vmul.f32 %v1156_v36, %v44_v23  ;;  %v134_v16 = vmul.f32 %v1163_v11, %v118_v38  ;;  %v136_v17 = vmul.f32 %v1163_v11, %v120_v43 }
  0x1a   :  { %524 = vmatpush1.bf16.msra.mxu0 %v827_v51  ;;  %v291_v62 = vadd.f32 %v283_v24, %v254_v42  ;;  %v293_v51 = vadd.f32 %v285_v54, %v256_v63  ;;  %v357_v2 = vmul.f32 %v1115_v41, %v341_v57  ;;  %v359_v24 = vmul.f32 %v1115_v41, %v343_v26  ;;  %v829_v63 = vld [vmem:[%s1474_s4 + $0x40] sm:$0xff]  }
  0x1b   :  { %525 = vmatprep.subr.bf16.mxu0 %v836_v1  ;;  %v1150_v54 = vrot.slane %v392_v44, %v910_v7  ;;  %v1159_v42 = vrot.slane %v36_v59, %v910_v7  ;;  %v1167_v26 = vrot.slane %v36_v59, %v165_v9  ;;  %v62_v9 = vmul.f32 %v1156_v36, %v46_v25 }
  0x1c   :  { %v328_v60 = vadd.f32 %v320_v52, %v291_v62  ;;  %v330_v58 = vadd.f32 %v322_v53, %v293_v51  ;;  %v1172_v52 = vrot.slane %v36_v59, %v202_v12  ;;  %v1176_v53 = vrot.slane %v36_v59, %v239_v13 }
  0x1d   :  { %v99_v12 = vmul.f32 %v1159_v42, %v83_v32  ;;  %v171_v25 = vmul.f32 %v1167_v26, %v155_v48  ;;  %v173_v27 = vmul.f32 %v1167_v26, %v157_v50  ;;  %v1487_v32 = vunpack.c.l.bf16 %v1008_v45 }
  0x1e   :  { %526 = vmatpush1.bf16.msra.mxu0 %v828_v15  ;;  %v365_v15 = vadd.f32 %v357_v2, %v328_v60  ;;  %v367_v44 = vadd.f32 %v359_v24, %v330_v58  ;;  %v97_v58 = vmul.f32 %v1159_v42, %v81_v30  ;;  %v210_v43 = vmul.f32 %v1172_v52, %v1488_v34 }
  0x1f   :  { %527 = vmatprep.subr.bf16.mxu0 %v836_v1  ;;  %v107_v23 = vadd.f32 %v99_v12, %v62_v9  ;;  %v208_v38 = vmul.f32 %v1172_v52, %v1487_v32  ;;  %v1489_v50 = vunpack.c.l.bf16 %v1025_v55  ;;  %v1490_v62 = vunpack.c.l.bf16 %v1030_v56  ;;  %v1236_v56 = vld [vmem:[%s1476_s0 + $0x10] sm:$0xff] }
  0x20   :  { %v385_v13 = vmul.f32 %v1143_v10, %v365_v15  ;;  %v387_v60 = vmul.f32 %v1143_v10, %v367_v44  ;;  %v105_v19 = vadd.f32 %v97_v58, %v60_v8  ;;  %v1491_v45 = vsub.s32 6, %v897_v3  ;;  %v1241_v58 = vld [vmem:[%s1476_s0 + $0x18] sm:$0xff]  ;;  %v1246_v3 = vld [vmem:[%s1476_s0 + $0x30] sm:$0xff] }
  0x21   :  { %v144_v48 = vadd.f32 %v136_v17, %v107_v23  ;;  %v245_v57 = vmul.f32 %v1176_v53, %v1489_v50  ;;  %v247_v51 = vmul.f32 %v1176_v53, %v1490_v62  ;;  %v1229_v15 = vrot.slane %v36_v59, %v1492_v46  ;;  %v1262_v17 = vld [vmem:[%s1476_s0 + $0x50] sm:$0xff]  ;;  %v1288_v50 = vld [vmem:[%s1476_s0 + $0x78] sm:$0xff] }
  0x22   :  { %528 = vmatpush1.bf16.msra.mxu0 %v829_v63  ;;  %v405_v30 = vadd.f32 %v1150_v54, %v385_v13  ;;  %v407_v28 = vadd.f32 %v1150_v54, %v387_v60  ;;  %v142_v35 = vadd.f32 %v134_v16, %v105_v19  ;;  %v1225_v63 = vrot.slane %v36_v59, %v1491_v45  ;;  %v1257_v16 = vld [vmem:[%s1476_s0 + $0x38] sm:$0xff] }
  0x23   :  { %v181_v8 = vadd.f32 %v173_v27, %v144_v48  ;;  %v356_v55 = vmul.f32 %v1209_v29, %v340_v47  ;;  %v358_v9 = vmul.f32 %v1209_v29, %v342_v14  ;;  %v1493_v47 = vunpack.c.l.bf16 %v1044_v4  ;;  %v1283_v48 = vld [vmem:[%s1476_s0 + $0x70] sm:$0xff] }
  0x24   :  { %v413_v2 = vmax.f32 %v405_v30, 0.0  ;;  %v415_v24 = vmax.f32 %v407_v28, 0.0  ;;  %v179_v44 = vadd.f32 %v171_v25, %v142_v35  ;;  %v1494_v13 = vunpack.c.l.bf16 %v1058_v31  ;;  %v1273_v30 = vld [vmem:[%s1476_s0 + $0x58] sm:$0xff] }
  0x25   :  { %v282_v14 = vmul.f32 %v1225_v63, %v1493_v47  ;;  %v218_v23 = vadd.f32 %v210_v43, %v181_v8  ;;  %v1495_v4 = vunpack.c.l.bf16 %v1069_v40  ;;  %v1496_v31 = vunpack.c.l.bf16 %v1078_v49 }
  0x26   :  { %v421_v59 = vmin.f32 %v413_v2, 6.0  ;;  %v423_v12 = vmin.f32 %v415_v24, 6.0  ;;  %v284_v60 = vmul.f32 %v1225_v63, %v1494_v13  ;;  %v216_v19 = vadd.f32 %v208_v38, %v179_v44  ;;  %v1298_v24 = vld [vmem:[%s1476_s0 + $0x90] sm:$0xff] }
  0x27   :  { %v319_v25 = vmul.f32 %v1229_v15, %v1495_v4  ;;  %v321_v27 = vmul.f32 %v1229_v15, %v1496_v31  ;;  %v49_v32 = vunpack.c.h.bf16 %v1236_v56  ;;  %v51_v34 = vunpack.c.h.bf16 %v1241_v58  ;;  %v1319_v4 = vld [vmem:[%s1476_s0 + $0xb8] sm:$0xff] }
  0x28   :  { %v429_v28 = vpack.c.bf16 %v423_v12, %v421_v59  ;;  %v86_v38 = vunpack.c.h.bf16 %v1246_v3  ;;  %v253_v43 = vadd.f32 %v245_v57, %v216_v19  ;;  %v255_v40 = vadd.f32 %v247_v51, %v218_v23  ;;  %v1305_v59 = vld [vmem:[%s1476_s0 + $0x98] sm:$0xff] }
  0x29   :  { %v88_v35 = vunpack.c.h.bf16 %v1257_v16  ;;  %v123_v49 = vunpack.c.h.bf16 %v1262_v17  ;;  %v65_v62 = vmul.f32 %v939_v18, %v49_v32  ;;  %v67_v57 = vmul.f32 %v939_v18, %v51_v34 }
  0x2a   :  { %802 = vmatprep.mubr.msk.bf16.mxu0 %vm504_vm0, %v429_v28  ;;  %v102_v51 = vmul.f32 %v948_v20, %v86_v38  ;;  %v125_v2 = vunpack.c.h.bf16 %v1273_v30  ;;  %v290_v45 = vadd.f32 %v282_v14, %v253_v43  ;;  %v292_v46 = vadd.f32 %v284_v60, %v255_v40  ;;  %v1333_v40 = vld [vmem:[%s1476_s0 + $0xd8] sm:$0xff] }
  0x2b   :  { %v104_v44 = vmul.f32 %v948_v20, %v88_v35  ;;  %v139_v8 = vmul.f32 %v953_v21, %v123_v49  ;;  %v160_v47 = vunpack.c.h.bf16 %v1283_v48  ;;  %v162_v13 = vunpack.c.h.bf16 %v1288_v50  ;;  %v1314_v20 = vld [vmem:[%s1476_s0 + $0xb0] sm:$0xff] }
  0x2c   :  { %v110_v18 = vadd.f32 %v102_v51, %v65_v62  ;;  %v141_v12 = vmul.f32 %v953_v21, %v125_v2  ;;  %v327_v19 = vadd.f32 %v319_v25, %v290_v45  ;;  %v329_v23 = vadd.f32 %v321_v27, %v292_v46  ;;  %v1327_v27 = vld [vmem:[%s1476_s0 + $0xd0] sm:$0xff] }
  0x2d   :  { %v112_v14 = vadd.f32 %v104_v44, %v67_v57  ;;  %v197_v60 = vunpack.c.h.bf16 %v1298_v24  ;;  %v176_v31 = vmul.f32 %v958_v22, %v160_v47  ;;  %v178_v28 = vmul.f32 %v958_v22, %v162_v13  ;;  %v1344_v2 = vld [vmem:[%s1476_s0 + $0xf0] sm:$0xff] }
  0x2e   :  { %v147_v21 = vadd.f32 %v139_v8, %v110_v18  ;;  %v199_v25 = vunpack.c.h.bf16 %v1305_v59  ;;  %v364_v32 = vadd.f32 %v356_v55, %v327_v19  ;;  %v366_v34 = vadd.f32 %v358_v9, %v329_v23  ;;  %v1357_v18 = vld [vmem:[%s1476_s0 + $0x110] sm:$0xff]  ;;  %v1365_v23 = vld [vmem:[%s1476_s0 + $0x118] sm:$0xff] }
  0x2f   :  { %v149_v38 = vadd.f32 %v141_v12, %v112_v14  ;;  %v213_v43 = vmul.f32 %v1050_v5, %v197_v60  ;;  %v234_v49 = vunpack.c.h.bf16 %v1314_v20  ;;  %v236_v62 = vunpack.c.h.bf16 %v1319_v4 }
  0x30   :  { %v184_v35 = vadd.f32 %v176_v31, %v147_v21  ;;  %v215_v22 = vmul.f32 %v1050_v5, %v199_v25  ;;  %v384_v57 = vmul.f32 %v1140_v37, %v364_v32  ;;  %v386_v55 = vmul.f32 %v1140_v37, %v366_v34  ;;  %v1349_v5 = vld [vmem:[%s1476_s0 + $0xf8] sm:$0xff] }
  0x31   :  { %v186_v9 = vadd.f32 %v178_v28, %v149_v38  ;;  %v271_v51 = vunpack.c.h.bf16 %v1327_v27  ;;  %v250_v46 = vmul.f32 %v1064_v39, %v234_v49  ;;  %v252_v44 = vmul.f32 %v1064_v39, %v236_v62 }
  0x32   :  { %v221_v45 = vadd.f32 %v213_v43, %v184_v35  ;;  %v273_v8 = vunpack.c.h.bf16 %v1333_v40  ;;  %v404_v12 = vadd.f32 %v1146_v0, %v384_v57  ;;  %v406_v47 = vadd.f32 %v1146_v0, %v386_v55 }
  0x33   :  { %v223_v13 = vadd.f32 %v215_v22, %v186_v9  ;;  %v287_v19 = vmul.f32 %v1091_v61, %v271_v51  ;;  %v308_v60 = vunpack.c.h.bf16 %v1344_v2  ;;  %v310_v21 = vunpack.c.h.bf16 %v1349_v5 }
  0x34   :  { %v258_v39 = vadd.f32 %v250_v46, %v221_v45  ;;  %v289_v14 = vmul.f32 %v1091_v61, %v273_v8  ;;  %v412_v31 = vmax.f32 %v404_v12, 0.0  ;;  %v414_v28 = vmax.f32 %v406_v47, 0.0 }
  0x35   :  { %v260_v25 = vadd.f32 %v252_v44, %v223_v13  ;;  %v345_v32 = vunpack.c.h.bf16 %v1357_v18  ;;  %v324_v38 = vmul.f32 %v1105_v33, %v308_v60  ;;  %v326_v43 = vmul.f32 %v1105_v33, %v310_v21 }
  0x36   :  { %v295_v34 = vadd.f32 %v287_v19, %v258_v39  ;;  %v347_v35 = vunpack.c.h.bf16 %v1365_v23  ;;  %v420_v22 = vmin.f32 %v412_v31, 6.0  ;;  %v422_v49 = vmin.f32 %v414_v28, 6.0 }
  0x37   :  { %v297_v62 = vadd.f32 %v289_v14, %v260_v25  ;;  %v361_v61 = vmul.f32 %v1115_v41, %v345_v32  ;;  %v48_v9 = vunpack.c.l.bf16 %v1236_v56  ;;  %v50_v51 = vunpack.c.l.bf16 %v1241_v58 }
  0x38   :  { %v332_v57 = vadd.f32 %v324_v38, %v295_v34  ;;  %v363_v55 = vmul.f32 %v1115_v41, %v347_v35  ;;  %v428_v45 = vpack.c.bf16 %v422_v49, %v420_v22  ;;  %v85_v44 = vunpack.c.l.bf16 %v1246_v3 }
  0x39   :  { %v334_v46 = vadd.f32 %v326_v43, %v297_v62  ;;  %v87_v33 = vunpack.c.l.bf16 %v1257_v16  ;;  %v64_v12 = vmul.f32 %v1156_v36, %v48_v9  ;;  %v66_v47 = vmul.f32 %v1156_v36, %v50_v51 }
  0x3a   :  { %v369_v8 = vadd.f32 %v361_v61, %v332_v57  ;;  %v122_v13 = vunpack.c.l.bf16 %v1262_v17  ;;  %544 = vmatmul.mubr.bf16.vlgmr.msra.gmra.mrb[0].mxu0 %v428_v45  ;;  %v101_v41 = vmul.f32 %v1159_v42, %v85_v44  ;;  %v124_v58 = vunpack.c.l.bf16 %v1273_v30 }
  0x3b   :  { %v371_v19 = vadd.f32 %v363_v55, %v334_v46  ;;  %v103_v56 = vmul.f32 %v1159_v42, %v87_v33  ;;  %v159_v16 = vunpack.c.l.bf16 %v1283_v48  ;;  %v161_v14 = vunpack.c.l.bf16 %v1288_v50 }
  0x3c   :  { %v389_v39 = vmul.f32 %v1143_v10, %v369_v8  ;;  %v138_v3 = vmul.f32 %v1163_v11, %v122_v13  ;;  %v109_v60 = vadd.f32 %v101_v41, %v64_v12  ;;  %v140_v21 = vmul.f32 %v1163_v11, %v124_v58 }
  0x3d   :  { %v391_v36 = vmul.f32 %v1143_v10, %v371_v19  ;;  %v111_v17 = vadd.f32 %v103_v56, %v66_v47  ;;  %v175_v42 = vmul.f32 %v1167_v26, %v159_v16  ;;  %v177_v30 = vmul.f32 %v1167_v26, %v161_v14  ;;  %v832_v16 = vld [vmem:[%s1479_s7] ss:$8 sps:$4 sm:$0xff]  }
  0x3e   :  { %v409_v31 = vadd.f32 %v1150_v54, %v389_v39  ;;  %v196_v28 = vunpack.c.l.bf16 %v1298_v24  ;;  %v146_v32 = vadd.f32 %v138_v3, %v109_v60  ;;  %v198_v50 = vunpack.c.l.bf16 %v1305_v59  ;;  %v804_v14 = vld [vmem:[%s1480_s5] ss:$0 sm:$0xff] }
  0x3f   :  { %v411_v25 = vadd.f32 %v1150_v54, %v391_v36  ;;  %v148_v48 = vadd.f32 %v140_v21, %v111_v17  ;;  %v233_v38 = vunpack.c.l.bf16 %v1314_v20  ;;  %v235_v11 = vunpack.c.l.bf16 %v1319_v4  ;;  %v805_v21 = vld [vmem:[%s1481_s6] ss:$0 sm:$0xff] }
  0x40   :  { %v417_v34 = vmax.f32 %v409_v31, 0.0  ;;  %v212_v10 = vmul.f32 %v1172_v52, %v196_v28  ;;  %v183_v35 = vadd.f32 %v175_v42, %v146_v32  ;;  %v214_v26 = vmul.f32 %v1172_v52, %v198_v50 }
  0x41   :  { %v419_v43 = vmax.f32 %v411_v25, 0.0  ;;  %v185_v22 = vadd.f32 %v177_v30, %v148_v48  ;;  %v249_v24 = vmul.f32 %v1176_v53, %v233_v38  ;;  %v251_v54 = vmul.f32 %v1176_v53, %v235_v11 }
  0x42   :  { %v425_v49 = vmin.f32 %v417_v34, 6.0  ;;  %v270_v62 = vunpack.c.l.bf16 %v1327_v27  ;;  %v220_v61 = vadd.f32 %v212_v10, %v183_v35  ;;  %v272_v55 = vunpack.c.l.bf16 %v1333_v40 }
  0x43   :  { %v427_v59 = vmin.f32 %v419_v43, 6.0  ;;  %v222_v57 = vadd.f32 %v214_v26, %v185_v22  ;;  %v307_v4 = vunpack.c.l.bf16 %v1344_v2  ;;  %v309_v9 = vunpack.c.l.bf16 %v1349_v5  ;;  %v668_v26 = vld [vmem:[%s1482_s8] sm:$0x3] }
  0x44   :  { %v286_v20 = vmul.f32 %v1225_v63, %v270_v62  ;;  %v344_v52 = vunpack.c.l.bf16 %v1357_v18  ;;  %v257_v45 = vadd.f32 %v249_v24, %v220_v61  ;;  %v288_v53 = vmul.f32 %v1225_v63, %v272_v55 }
  0x45   :  { %v431_v51 = vpack.c.bf16 %v427_v59, %v425_v49  ;;  %v259_v46 = vadd.f32 %v251_v54, %v222_v57  ;;  %v323_v27 = vmul.f32 %v1229_v15, %v307_v4  ;;  %v325_v44 = vmul.f32 %v1229_v15, %v309_v9  ;;  %v688_v49 = vld [vmem:[%s1483_s9] sm:$0x3] }
  0x46   :  { %v346_v33 = vunpack.c.l.bf16 %v1365_v23  ;;  %v294_v40 = vadd.f32 %v286_v20, %v257_v45  ;;  %v360_v2 = vmul.f32 %v1209_v29, %v344_v52  ;;  %v677_v24 = vrot.slane %v668_v26, %v910_v7 }
  0x47   :  { %803 = vmatprep.mubr.msk.bf16.mxu0 %vm504_vm0, %v431_v51  ;;  %v296_v8 = vadd.f32 %v288_v53, %v259_v46  ;;  %v693_v54 = vrot.slane %v688_v49, %v907_v6  ;;  %v697_v59 = vrot.slane %v688_v49, %v910_v7 }
  0x48   :  { %v362_v5 = vmul.f32 %v1209_v29, %v346_v33  ;;  %v331_v18 = vadd.f32 %v323_v27, %v294_v40  ;;  %v830_v29 = vld [vmem:[%s1479_s7 + $0x4] ss:$8 sps:$4 sm:$0xff]  }
  0x49   :  { %v333_v12 = vadd.f32 %v325_v44, %v296_v8  ;;  %615 = vmatprep.subr.bf16.mxu1 %v830_v29 }
  0x4a   :  { %v368_v47 = vadd.f32 %v360_v2, %v331_v18  ;;  %616 = vmatpush1.bf16.msra.mxu1 %v832_v16 }
  0x4b   :  { %v370_v13 = vadd.f32 %v362_v5, %v333_v12 }
  0x4c   :  { %v388_v63 = vmul.f32 %v1140_v37, %v368_v47 }
  0x4d   :  { %v390_v19 = vmul.f32 %v1140_v37, %v370_v13  ;;  %v833_v37 = vld [vmem:[%s1479_s7 + $0x14] ss:$8 sps:$4 sm:$0xff]  }
  0x4e   :  { %v408_v15 = vadd.f32 %v1146_v0, %v388_v63  ;;  %617 = vmatprep.subr.bf16.mxu1 %v833_v37 }
  0x4f   :  { %v410_v23 = vadd.f32 %v1146_v0, %v390_v19  ;;  %v835_v0 = vld [vmem:[%s1479_s7 + $0x10] ss:$8 sps:$4 sm:$0xff]  }
  0x50   :  { %v416_v41 = vmax.f32 %v408_v15, 0.0  ;;  %618 = vmatpush1.bf16.msra.mxu1 %v835_v0 }
  0x51   :  { %v418_v56 = vmax.f32 %v410_v23, 0.0 }
  0x52   :  { %v424_v58 = vmin.f32 %v416_v41, 6.0 }
  0x53   :  { %v426_v39 = vmin.f32 %v418_v56, 6.0 }
  0x55   :  { %v430_v3 = vpack.c.bf16 %v426_v39, %v424_v58 }
  0x57   :  { %552 = vmatmul.mubr.bf16.gmra.mrb[4].mxu0 %v430_v3 }
 0x10d   :  { %v545_v36 = vpop.f32.mrb[0].mxu0 }
 0x10e   :  { %v567_v60 = vmul.f32 %v804_v14, %v545_v36  ;;  %v547_v17 = vpop.f32.mrb[1].mxu0 }
 0x10f   :  { %v548_v31 = vpop.f32.mrb[2].mxu0 }
 0x110   :  { %v568_v42 = vmul.f32 %v804_v14, %v548_v31  ;;  %v550_v30 = vpop.f32.mrb[3].mxu0  ;;  %v578_v28 = vadd.f32 %v805_v21, %v567_v60 }
 0x112   :  { %v579_v25 = vadd.f32 %v805_v21, %v568_v42 }
 0x114   :  { %v582_v32 = vpack.c.bf16 %v579_v25, %v578_v28 }
 0x116   :  { %810 = vmatmul.mubr.msk.bf16.vlgmr.msra.gmra.mrb[0].mxu1 %vm608_vm1, %v582_v32 }
 0x117   :  { %657 = vmatprep.mubr.bf16.mxu1 %v836_v1  ;;  %v673_v1 = vrot.slane %v668_v26, %v907_v6 }
 0x12a   :  { %v553_v48 = vpop.f32.mrb[4].mxu0 }
 0x12b   :  { %v569_v50 = vmul.f32 %v804_v14, %v553_v48  ;;  %v555_v34 = vpop.f32.mrb[5].mxu0 }
 0x12c   :  { %v556_v10 = vpop.f32.mrb[6].mxu0 }
 0x12d   :  { %v570_v38 = vmul.f32 %v804_v14, %v556_v10  ;;  %v558_v11 = vpop.f32.mrb[7].mxu0  ;;  %v580_v43 = vadd.f32 %v805_v21, %v569_v50 }
 0x12f   :  { %v581_v35 = vadd.f32 %v805_v21, %v570_v38 }
 0x131   :  { %v583_v22 = vpack.c.bf16 %v581_v35, %v580_v43 }
 0x133   :  { %811 = vmatmul.mubr.msk.bf16.gmra.mrb[4].mxu1 %vm608_vm1, %v583_v22 }
 0x1e9   :  { %v649_v62 = vpop.f32.mrb[0].mxu1 }
 0x1ea   :  { %v680_v61 = vmul.f32 %v673_v1, %v649_v62  ;;  %v651_v57 = vpop.f32.mrb[1].mxu1 }
 0x1eb   :  { %v681_v55 = vmul.f32 %v677_v24, %v651_v57  ;;  %v653_v20 = vpop.f32.mrb[2].mxu1 }
 0x1ec   :  { %v700_v4 = vadd.f32 %v693_v54, %v680_v61  ;;  %v682_v9 = vmul.f32 %v673_v1, %v653_v20  ;;  %v655_v52 = vpop.f32.mrb[3].mxu1 }
 0x1ed   :  { %v701_v51 = vadd.f32 %v697_v59, %v681_v55  ;;  %v683_v45 = vmul.f32 %v677_v24, %v655_v52 }
 0x1ee   :  { %v708_v46 = vmax.f32 %v700_v4, 0.0  ;;  %v702_v53 = vadd.f32 %v693_v54, %v682_v9 }
 0x1ef   :  { %v709_v27 = vmax.f32 %v701_v51, 0.0  ;;  %v703_v44 = vadd.f32 %v697_v59, %v683_v45 }
 0x1f0   :  { %v716_v33 = vmin.f32 %v708_v46, 6.0  ;;  %v710_v6 = vmax.f32 %v702_v53, 0.0 }
 0x1f1   :  { %v717_v40 = vmin.f32 %v709_v27, 6.0  ;;  %v711_v8 = vmax.f32 %v703_v44, 0.0 }
 0x1f2   :  { %v718_v2 = vmin.f32 %v710_v6, 6.0 }
 0x1f3   :  { %v816_v5 = vpack.c.bf16 %v717_v40, %v716_v33  ;;  %v719_v18 = vmin.f32 %v711_v8, 6.0 }
 0x1f5   :  { %751 = vst.msk [vmem:[%s1484_s10] sm:$0xff] %vm1450_vm4, %v816_v5  ;;  %v817_v12 = vpack.c.bf16 %v719_v18, %v718_v2 }
 0x1f7   :  { %752 = vst.msk [vmem:[%s1484_s10 + $0x8] sm:$0xff] %vm1450_vm4, %v817_v12 }
 0x206   :  { %v659_v47 = vpop.f32.mrb[4].mxu1 }
 0x207   :  { %v684_v13 = vmul.f32 %v673_v1, %v659_v47  ;;  %v661_v63 = vpop.f32.mrb[5].mxu1 }
 0x208   :  { %v685_v19 = vmul.f32 %v677_v24, %v661_v63  ;;  %v663_v15 = vpop.f32.mrb[6].mxu1 }
 0x209   :  { %v704_v23 = vadd.f32 %v693_v54, %v684_v13  ;;  %v686_v41 = vmul.f32 %v673_v1, %v663_v15  ;;  %v665_v56 = vpop.f32.mrb[7].mxu1 }
 0x20a   :  { %v705_v58 = vadd.f32 %v697_v59, %v685_v19  ;;  %v687_v39 = vmul.f32 %v677_v24, %v665_v56 }
 0x20b   :  { %v712_v3 = vmax.f32 %v704_v23, 0.0  ;;  %v706_v29 = vadd.f32 %v693_v54, %v686_v41 }
 0x20c   :  { %v713_v16 = vmax.f32 %v705_v58, 0.0  ;;  %v707_v37 = vadd.f32 %v697_v59, %v687_v39 }
 0x20d   :  { %v720_v0 = vmin.f32 %v712_v3, 6.0  ;;  %v714_v14 = vmax.f32 %v706_v29, 0.0 }
 0x20e   :  { %v721_v36 = vmin.f32 %v713_v16, 6.0  ;;  %v715_v60 = vmax.f32 %v707_v37, 0.0 }
 0x20f   :  { %v722_v17 = vmin.f32 %v714_v14, 6.0 }
 0x210   :  { %v818_v21 = vpack.c.bf16 %v721_v36, %v720_v0  ;;  %v723_v31 = vmin.f32 %v715_v60, 6.0 }
 0x212   :  { %753 = vst.msk [vmem:[%s1484_s10 + $0x10] sm:$0xff] %vm1450_vm4, %v818_v21  ;;  %v819_v42 = vpack.c.bf16 %v723_v31, %v722_v17 }
 0x214   :  { %754 = vst.msk [vmem:[%s1484_s10 + $0x18] sm:$0xff] %vm1450_vm4, %v819_v42 }

// kernel: forward.12
= control target key start
LH: loop header
LB: loop body
LE: loop exit
PB: predicated region body
PF: predicated region fallthrough
CT: control target
= control target key end

     0   :  { %v34_v5 = vlaneseq  ;;  %vm352_vm0 = vcmask 523264   ;;  %s759_s4 = inlined_call_operand.vmem [shape: bf16[192,256], index: 4, kind: input, shape index: {}]   ;;  %s760_s1 = inlined_call_operand.vmem [shape: f32[9,192], index: 1, kind: input, shape index: {}]   ;;  %s761_s0 = inlined_call_operand.vmem [shape: bf16[9,8,192], index: 0, kind: input, shape index: {}]   ;;  %s762_s2 = inlined_call_operand.vmem [shape: f32[1,192], index: 2, kind: input, shape index: {}]   ;;  %s763_s3 = inlined_call_operand.vmem [shape: f32[1,192], index: 3, kind: input, shape index: {}]   ;;  %s764_s5 = inlined_call_operand.vmem [shape: f32[1,256], index: 5, kind: input, shape index: {}]   ;;  %s765_s6 = inlined_call_operand.vmem [shape: f32[1,256], index: 6, kind: input, shape index: {}]   ;;  %s766_s7 = inlined_call_operand.vmem [shape: bf16[8,256], index: 7, kind: output, shape index: {}]  }
   0x1   :  { %v475_v0 = vld [vmem:[%s759_s4 + $0x4] ss:$8 sps:$4 sm:$0xff]   ;;  %v477_v1 = vld [vmem:[%s759_s4] ss:$8 sps:$4 sm:$0xff]   ;;  %v478_v2 = vld [vmem:[%s759_s4 + $0x14] ss:$8 sps:$4 sm:$0xff]  }
   0x2   :  { %356 = vmatprep.subr.bf16.mxu0 %v475_v0  ;;  %v480_v3 = vld [vmem:[%s759_s4 + $0x10] ss:$8 sps:$4 sm:$0xff]   ;;  %v481_v4 = vld [vmem:[%s759_s4 + $0x24] ss:$8 sps:$4 sm:$0xff]   ;;  %v483_v6 = vld [vmem:[%s759_s4 + $0x20] ss:$8 sps:$4 sm:$0xff]  }
   0x3   :  { %357 = vmatpush1.bf16.msra.mxu0 %v477_v1  ;;  %v484_v7 = vld [vmem:[%s759_s4 + $0x34] ss:$8 sps:$4 sm:$0xff]   ;;  %v572_v8 = vshrl.u32 %v34_v5, 7  ;;  %v486_v9 = vld [vmem:[%s759_s4 + $0x30] ss:$8 sps:$4 sm:$0xff]   ;;  %v28_v17 = vld [vmem:[%s760_s1 + $0x8] sm:$0xff] }
   0x4   :  { %358 = vmatprep.subr.bf16.mxu0 %v478_v2  ;;  %v487_v10 = vld [vmem:[%s759_s4 + $0x44] ss:$8 sps:$4 sm:$0xff]   ;;  %v489_v15 = vld [vmem:[%s759_s4 + $0x40] ss:$8 sps:$4 sm:$0xff]   ;;  %v490_v16 = vld [vmem:[%s759_s4 + $0x54] ss:$8 sps:$4 sm:$0xff]  }
   0x5   :  { %v581_v11 = vsub.s32 0, %v572_v8  ;;  %v584_v12 = vsub.s32 1, %v572_v8  ;;  %v68_v13 = vsub.s32 2, %v572_v8  ;;  %v84_v14 = vsub.s32 3, %v572_v8  ;;  %v600_v18 = vld [vmem:[%s761_s0] sm:$0xff]  ;;  %v606_v20 = vld [vmem:[%s761_s0 + $0x8] sm:$0xff] }
   0x6   :  { %v612_v22 = vld [vmem:[%s761_s0 + $0x10] sm:$0xff]  ;;  %v100_v24 = vsub.s32 4, %v572_v8  ;;  %v33_v25 = vunpack.c.h.bf16 %v600_v18  ;;  %v49_v26 = vunpack.c.h.bf16 %v606_v20  ;;  %v622_v27 = vld [vmem:[%s761_s0 + $0x18] sm:$0xff]  ;;  %v629_v29 = vld [vmem:[%s761_s0 + $0x20] sm:$0xff]  ;;  %v116_v30 = vsub.s32 5, %v572_v8 }
   0x7   :  { %359 = vmatpush1.bf16.msra.mxu0 %v480_v3  ;;  %v41_v19 = vrot.slane %v28_v17, %v581_v11  ;;  %v57_v21 = vrot.slane %v28_v17, %v584_v12  ;;  %v73_v23 = vrot.slane %v28_v17, %v68_v13  ;;  %v89_v28 = vrot.slane %v28_v17, %v84_v14  ;;  %v492_v31 = vld [vmem:[%s759_s4 + $0x50] ss:$8 sps:$4 sm:$0xff]   ;;  %v640_v34 = vld [vmem:[%s761_s0 + $0x28] sm:$0xff]  ;;  %v496_v52 = vld [vmem:[%s759_s4 + $0x74] ss:$8 sps:$4 sm:$0xff]  }
   0x8   :  { %360 = vmatprep.subr.bf16.mxu0 %v481_v4  ;;  %v65_v32 = vunpack.c.h.bf16 %v612_v22  ;;  %v81_v33 = vunpack.c.h.bf16 %v622_v27  ;;  %v132_v35 = vsub.s32 6, %v572_v8  ;;  %v493_v36 = vld [vmem:[%s759_s4 + $0x64] ss:$8 sps:$4 sm:$0xff]   ;;  %v97_v39 = vunpack.c.h.bf16 %v629_v29  ;;  %v650_v40 = vld [vmem:[%s761_s0 + $0x30] sm:$0xff]  ;;  %v495_v48 = vld [vmem:[%s759_s4 + $0x60] ss:$8 sps:$4 sm:$0xff]  }
   0x9   :  { %v43_v37 = vmul.f32 %v41_v19, %v33_v25  ;;  %v59_v38 = vmul.f32 %v57_v21, %v49_v26  ;;  %v105_v42 = vrot.slane %v28_v17, %v100_v24  ;;  %v148_v43 = vsub.s32 7, %v572_v8  ;;  %v665_v51 = vld [vmem:[%s761_s0 + $0x38] sm:$0xff]  ;;  %v27_v53 = vld [vmem:[%s760_s1] sm:$0xff] }
   0xa   :  { %v75_v41 = vmul.f32 %v73_v23, %v65_v32  ;;  %v91_v45 = vmul.f32 %v89_v28, %v81_v33  ;;  %v113_v46 = vunpack.c.h.bf16 %v640_v34  ;;  %v121_v47 = vrot.slane %v28_v17, %v116_v30  ;;  %v679_v59 = vld [vmem:[%s761_s0 + $0x40] sm:$0xff]  ;;  %v498_v0 = vld [vmem:[%s759_s4 + $0x70] ss:$8 sps:$4 sm:$0xff]  }
   0xb   :  { %361 = vmatpush1.bf16.msra.mxu0 %v483_v6  ;;  %v61_v44 = vadd.f32 %v59_v38, %v43_v37  ;;  %v129_v49 = vunpack.c.h.bf16 %v650_v40  ;;  %v137_v50 = vrot.slane %v28_v17, %v132_v35  ;;  %v107_v55 = vmul.f32 %v105_v42, %v97_v39  ;;  %v499_v5 = vld [vmem:[%s759_s4 + $0x84] ss:$8 sps:$4 sm:$0xff]   ;;  %v188_v32 = vld [vmem:[%s763_s3] sm:$0x3]  ;;  %v504_v38 = vld [vmem:[%s759_s4 + $0x90] ss:$8 sps:$4 sm:$0xff]  }
   0xc   :  { %362 = vmatprep.subr.bf16.mxu0 %v484_v7  ;;  %v32_v56 = vunpack.c.l.bf16 %v600_v18  ;;  %v48_v57 = vunpack.c.l.bf16 %v606_v20  ;;  %v64_v58 = vunpack.c.l.bf16 %v612_v22  ;;  %v123_v61 = vmul.f32 %v121_v47, %v113_v46  ;;  %v507_v8 = vld [vmem:[%s759_s4 + $0xa0] ss:$8 sps:$4 sm:$0xff]  }
   0xd   :  { %v77_v54 = vadd.f32 %v75_v41, %v61_v44  ;;  %v145_v62 = vunpack.c.h.bf16 %v665_v51  ;;  %v153_v63 = vrot.slane %v28_v17, %v148_v43  ;;  %v80_v1 = vunpack.c.l.bf16 %v622_v27 }
   0xe   :  { %v139_v2 = vmul.f32 %v137_v50, %v129_v49  ;;  %v37_v3 = vrot.slane %v27_v53, %v581_v11  ;;  %v53_v4 = vrot.slane %v27_v53, %v584_v12  ;;  %v161_v7 = vunpack.c.h.bf16 %v679_v59  ;;  %v446_v50 = vld [vmem:[%s760_s1 + $0x10] ss:$0 sm:$0xff] }
   0xf   :  { %363 = vmatpush1.bf16.msra.mxu0 %v486_v9  ;;  %v93_v60 = vadd.f32 %v91_v45, %v77_v54  ;;  %v69_v9 = vrot.slane %v27_v53, %v68_v13  ;;  %v101_v19 = vrot.slane %v27_v53, %v100_v24  ;;  %v155_v21 = vmul.f32 %v153_v63, %v145_v62  ;;  %v501_v13 = vld [vmem:[%s759_s4 + $0x80] ss:$8 sps:$4 sm:$0xff]   ;;  %v502_v24 = vld [vmem:[%s759_s4 + $0x94] ss:$8 sps:$4 sm:$0xff]  }
  0x10   :  { %364 = vmatprep.subr.bf16.mxu0 %v487_v10  ;;  %v85_v10 = vrot.slane %v27_v53, %v84_v14  ;;  %v42_v17 = vmul.f32 %v37_v3, %v32_v56  ;;  %v58_v18 = vmul.f32 %v53_v4, %v48_v57  ;;  %v112_v23 = vunpack.c.l.bf16 %v640_v34  ;;  %v174_v14 = vld [vmem:[%s762_s2] sm:$0x3]  ;;  %v510_v57 = vld [vmem:[%s759_s4 + $0xb0] ss:$8 sps:$4 sm:$0xff]  }
  0x11   :  { %v109_v6 = vadd.f32 %v107_v55, %v93_v60  ;;  %v74_v22 = vmul.f32 %v69_v9, %v64_v58  ;;  %v117_v27 = vrot.slane %v27_v53, %v116_v30  ;;  %v183_v30 = vrot.slane %v174_v14, %v584_v12 }
  0x12   :  { %v60_v25 = vadd.f32 %v58_v18, %v42_v17  ;;  %v90_v26 = vmul.f32 %v85_v10, %v80_v1  ;;  %v144_v39 = vunpack.c.l.bf16 %v665_v51  ;;  %v149_v42 = vrot.slane %v27_v53, %v148_v43 }
  0x13   :  { %365 = vmatpush1.bf16.msra.mxu0 %v489_v15  ;;  %v447_v15 = vld [vmem:[%s760_s1 + $0x18] ss:$0 sm:$0xff]  ;;  %v125_v20 = vadd.f32 %v123_v61, %v109_v6  ;;  %v122_v41 = vmul.f32 %v117_v27, %v112_v23  ;;  %v197_v45 = vrot.slane %v188_v32, %v584_v12  ;;  %v160_v46 = vunpack.c.l.bf16 %v679_v59  ;;  %v411_v6 = vld [vmem:[%s765_s6] sm:$0x3] }
  0x14   :  { %366 = vmatprep.subr.bf16.mxu0 %v490_v16  ;;  %v96_v16 = vunpack.c.l.bf16 %v629_v29  ;;  %v171_v29 = vmul.f32 %v447_v15, %v161_v7  ;;  %v76_v33 = vadd.f32 %v74_v22, %v60_v25  ;;  %v154_v51 = vmul.f32 %v149_v42, %v144_v39 }
  0x15   :  { %v141_v28 = vadd.f32 %v139_v2, %v125_v20  ;;  %v170_v55 = vmul.f32 %v446_v50, %v160_v46  ;;  %v179_v58 = vrot.slane %v174_v14, %v581_v11  ;;  %v193_v61 = vrot.slane %v188_v32, %v581_v11 }
  0x16   :  { %v106_v34 = vmul.f32 %v101_v19, %v96_v16  ;;  %v416_v10 = vrot.slane %v411_v6, %v581_v11  ;;  %v420_v16 = vrot.slane %v411_v6, %v584_v12 }
  0x17   :  { %367 = vmatpush1.bf16.msra.mxu0 %v492_v31  ;;  %v128_v31 = vunpack.c.l.bf16 %v650_v40  ;;  %v157_v37 = vadd.f32 %v155_v21, %v141_v28  ;;  %v92_v40 = vadd.f32 %v90_v26, %v76_v33 }
  0x18   :  { %368 = vmatprep.subr.bf16.mxu0 %v493_v36  ;;  %v133_v36 = vrot.slane %v27_v53, %v132_v35  ;;  %v505_v35 = vld [vmem:[%s759_s4 + $0xa4] ss:$8 sps:$4 sm:$0xff]  }
  0x19   :  { %v173_v44 = vadd.f32 %v171_v29, %v157_v37  ;;  %v108_v47 = vadd.f32 %v106_v34, %v92_v40 }
  0x1b   :  { %369 = vmatpush1.bf16.msra.mxu0 %v495_v48  ;;  %v138_v48 = vmul.f32 %v133_v36, %v128_v31  ;;  %v187_v49 = vmul.f32 %v183_v30, %v173_v44  ;;  %v124_v43 = vadd.f32 %v122_v41, %v108_v47 }
  0x1c   :  { %370 = vmatprep.subr.bf16.mxu0 %v496_v52  ;;  %v508_v52 = vld [vmem:[%s759_s4 + $0xb4] ss:$8 sps:$4 sm:$0xff]  }
  0x1d   :  { %v201_v53 = vadd.f32 %v197_v45, %v187_v49  ;;  %v140_v54 = vadd.f32 %v138_v48, %v124_v43 }
  0x1f   :  { %371 = vmatpush1.bf16.msra.mxu0 %v498_v0  ;;  %v203_v56 = vmax.f32 %v201_v53, 0.0  ;;  %v156_v59 = vadd.f32 %v154_v51, %v140_v54 }
  0x20   :  { %372 = vmatprep.subr.bf16.mxu0 %v499_v5  ;;  %v397_v5 = vld [vmem:[%s764_s5] sm:$0x3] }
  0x21   :  { %v205_v60 = vmin.f32 %v203_v56, 6.0  ;;  %v172_v62 = vadd.f32 %v170_v55, %v156_v59  ;;  %v402_v7 = vrot.slane %v397_v5, %v581_v11  ;;  %v406_v9 = vrot.slane %v397_v5, %v584_v12 }
  0x23   :  { %373 = vmatpush1.bf16.msra.mxu0 %v501_v13  ;;  %v207_v63 = vpack.c.bf16 %v205_v60, %v205_v60  ;;  %v186_v0 = vmul.f32 %v179_v58, %v172_v62 }
  0x24   :  { %374 = vmatprep.subr.bf16.mxu0 %v502_v24 }
  0x25   :  { %472 = vmatprep.mubr.msk.bf16.mxu0 %vm352_vm0, %v207_v63  ;;  %v200_v1 = vadd.f32 %v193_v61, %v186_v0 }
  0x27   :  { %375 = vmatpush1.bf16.msra.mxu0 %v504_v38  ;;  %v202_v2 = vmax.f32 %v200_v1, 0.0 }
  0x28   :  { %376 = vmatprep.subr.bf16.mxu0 %v505_v35 }
  0x29   :  { %v204_v3 = vmin.f32 %v202_v2, 6.0 }
  0x2b   :  { %377 = vmatpush1.bf16.msra.mxu0 %v507_v8  ;;  %v206_v4 = vpack.c.bf16 %v204_v3, %v204_v3 }
  0x2c   :  { %378 = vmatprep.subr.bf16.mxu0 %v508_v52 }
  0x2f   :  { %379 = vmatpush1.bf16.msra.mxu0 %v510_v57 }
  0x32   :  { %389 = vmatmul.mubr.bf16.vlgmr.msra.gmra.mrb[0].mxu0 %v206_v4 }
 0x105   :  { %v390_v15 = vpop.f32.mrb[0].mxu0 }
 0x106   :  { %v409_v17 = vmul.f32 %v402_v7, %v390_v15  ;;  %v392_v18 = vpop.f32.mrb[1].mxu0 }
 0x107   :  { %v410_v19 = vmul.f32 %v406_v9, %v392_v18  ;;  %v394_v20 = vpop.f32.mrb[2].mxu0 }
 0x108   :  { %v423_v21 = vadd.f32 %v416_v10, %v409_v17  ;;  %v395_v22 = vpop.f32.mrb[3].mxu0 }
 0x109   :  { %v424_v13 = vadd.f32 %v420_v16, %v410_v19 }
 0x10b   :  { %v474_v23 = vpack.c.bf16 %v424_v13, %v423_v21 }
 0x10d   :  { %433 = vst [vmem:[%s766_s7] sm:$0xff] %v474_v23 }

// kernel: forward.13
= control target key start
LH: loop header
LB: loop body
LE: loop exit
PB: predicated region body
PF: predicated region fallthrough
CT: control target
= control target key end

     0   :  { %s1047_s24 = smov 0   ;;  %s1049_s25 = smov 0   ;;  %s1221_s0 = inlined_call_operand.vmem [shape: bf16[16,8,256], index: 0, kind: input, shape index: {}]   ;;  %s1222_s1 = inlined_call_operand.vmem [shape: f32[4,4,256], index: 1, kind: input, shape index: {}]   ;;  %s1223_s2 = inlined_call_operand.vmem [shape: f32[1,256], index: 2, kind: input, shape index: {}]   ;;  %s1224_s3 = inlined_call_operand.vmem [shape: f32[1,256], index: 3, kind: input, shape index: {}]   ;;  %s1225_s4 = inlined_call_operand.vmem [shape: bf16[256,256], index: 4, kind: input, shape index: {}]   ;;  %s1226_s5 = inlined_call_operand.vmem [shape: f32[1,256], index: 5, kind: input, shape index: {}]   ;;  %s1227_s6 = inlined_call_operand.vmem [shape: f32[1,256], index: 6, kind: input, shape index: {}]   ;;  %s1228_s7 = inlined_call_operand.vmem [shape: bf16[4,8,256], index: 7, kind: output, shape index: {}]  }
   0x1   :  { %s1051_s26 = smov 0  }
   0x2 LB: > { %s29_s27 = sadd.s32 1, %s1001_s25  ;;  %p861_p0 = scmp.ge.s32.totalorder %s1005_s26, 1  ;;  %s1005_s26 = sphi %s1051_s26, %s17_s26   ;;  %s1001_s25 = sphi %s1049_s25, %s1230_s25   ;;  %s997_s24 = sphi %s1047_s24, %s1229_s24  }
   0x3   : > { %p31_p1 = scmp.ge.s32.totalorder %s29_s27, 4  ;;  %p269_p2 = scmp.lt.s32.totalorder %s1005_s26, 5 }
   0x5   : > { %s1232_s27 = smov (%p31_p1, %s29_s27), 0  ;;  %p270_p3 = pnand %p861_p0, %p269_p2 }
   0x6   : > { %v935_v0 = vld [vmem:[%s1225_s4 + $0x4] ss:$8 sps:$4 sm:$0xff] (!%p270_p3)   ;;  %v937_v1 = vld [vmem:[%s1225_s4] ss:$8 sps:$4 sm:$0xff] (!%p270_p3)   ;;  %v938_v2 = vld [vmem:[%s1225_s4 + $0x14] ss:$8 sps:$4 sm:$0xff] (!%p270_p3)   ;;  %v345_v7 = vlaneseq (!%p270_p3) }
   0x7   : > { %273 = sbr.rel (%p270_p3) target bundleno = 295 (0x127), region = 48  ;;  %671 = vmatprep.subr.bf16.mxu0 (!%p270_p3), %v935_v0  ;;  %v940_v3 = vld [vmem:[%s1225_s4 + $0x10] ss:$8 sps:$4 sm:$0xff] (!%p270_p3)   ;;  %v941_v4 = vld [vmem:[%s1225_s4 + $0x24] ss:$8 sps:$4 sm:$0xff] (!%p270_p3)   ;;  %s862_s15 = sshll.u32 (!%p270_p3), %s997_s24, 2 }
   0x8   : > { %672 = vmatpush1.bf16.msra.mxu0 (!%p270_p3), %v937_v1  ;;  %p326_p4 = scmp.lt.s32.totalorder (!%p270_p3), %s997_s24, 3  ;;  %v943_v5 = vld [vmem:[%s1225_s4 + $0x20] ss:$8 sps:$4 sm:$0xff] (!%p270_p3)   ;;  %p316_p5 = scmp.lt.s32.totalorder (!%p270_p3), %s862_s15, 15  ;;  %v944_v6 = vld [vmem:[%s1225_s4 + $0x34] ss:$8 sps:$4 sm:$0xff] (!%p270_p3)  }
   0x9   : > { %673 = vmatprep.subr.bf16.mxu0 (!%p270_p3), %v938_v2  ;;  %v946_v8 = vld [vmem:[%s1225_s4 + $0x30] ss:$8 sps:$4 sm:$0xff] (!%p270_p3)   ;;  %v947_v9 = vld [vmem:[%s1225_s4 + $0x44] ss:$8 sps:$4 sm:$0xff] (!%p270_p3)   ;;  %v346_v10 = vshrl.u32 (!%p270_p3), %v345_v7, 7 }
   0xa   : > { %v949_v11 = vld [vmem:[%s1225_s4 + $0x40] ss:$8 sps:$4 sm:$0xff] (!%p270_p3)   ;;  %v950_v12 = vld [vmem:[%s1225_s4 + $0x54] ss:$8 sps:$4 sm:$0xff] (!%p270_p3)   ;;  %v952_v15 = vld [vmem:[%s1225_s4 + $0x50] ss:$8 sps:$4 sm:$0xff] (!%p270_p3)  }
   0xb   : > { %v351_v13 = vsub.s32 (!%p270_p3), 4, %v346_v10  ;;  %v377_v14 = vsub.s32 (!%p270_p3), 5, %v346_v10  ;;  %v1117_v16 = vsub.s32 (!%p270_p3), 0, %v346_v10  ;;  %v953_v17 = vld [vmem:[%s1225_s4 + $0x64] ss:$8 sps:$4 sm:$0xff] (!%p270_p3)   ;;  %v1122_v18 = vsub.s32 (!%p270_p3), 1, %v346_v10 }
   0xc   : > { %674 = vmatpush1.bf16.msra.mxu0 (!%p270_p3), %v940_v3  ;;  %v403_v19 = vsub.s32 (!%p270_p3), 6, %v346_v10  ;;  %v429_v22 = vsub.s32 (!%p270_p3), 7, %v346_v10  ;;  %v399_v28 = vsub.s32 (!%p270_p3), 2, %v346_v10  ;;  %v955_v30 = vld [vmem:[%s1225_s4 + $0x60] ss:$8 sps:$4 sm:$0xff] (!%p270_p3)   ;;  %v425_v32 = vsub.s32 (!%p270_p3), 3, %v346_v10 }
   0xd   : > { %675 = vmatprep.subr.bf16.mxu0 (!%p270_p3), %v941_v4  ;;  %v956_v33 = vld [vmem:[%s1225_s4 + $0x74] ss:$8 sps:$4 sm:$0xff] (!%p270_p3)   ;;  %v958_v44 = vld [vmem:[%s1225_s4 + $0x70] ss:$8 sps:$4 sm:$0xff] (!%p270_p3)   ;;  %v445_v47 = vld [vmem:[%s1223_s2] sm:$0x3] (!%p270_p3) }
   0xe   : > { %s1234_s24 = smov (!%p326_p4, %s997_s24), 3  ;;  %s1236_s15 = smov (!%p316_p5, %s862_s15), 15  ;;  %v959_v50 = vld [vmem:[%s1225_s4 + $0x84] ss:$8 sps:$4 sm:$0xff]   ;;  %v459_v56 = vld [vmem:[%s1224_s3] sm:$0x3]  ;;  %v454_v60 = vrot.slane %v445_v47, %v1122_v18 }
   0xf   : > { %s907_s30 = sshll.u32 %s1236_s15, 3  ;;  %s908_s8 = sshll.u32 %s1234_s24, 3  ;;  %v961_v63 = vld [vmem:[%s1225_s4 + $0x80] ss:$8 sps:$4 sm:$0xff]   ;;  %v962_v2 = vld [vmem:[%s1225_s4 + $0x94] ss:$8 sps:$4 sm:$0xff]   ;;  %v468_v4 = vrot.slane %v459_v56, %v1122_v18 }
  0x10   : > { %676 = vmatpush1.bf16.msra.mxu0 %v943_v5  ;;  %s324_s13 = scalar_lea.vmem %s1221_s0, %s907_s30  ;;  %s330_s17 = scalar_lea.vmem %s1222_s1, %s908_s8  ;;  %v964_v10 = vld [vmem:[%s1225_s4 + $0x90] ss:$8 sps:$4 sm:$0xff]  }
  0x11   : > { %677 = vmatprep.subr.bf16.mxu0 %v944_v6  ;;  %v340_v20 = vld [vmem:[%s330_s17] sm:$0xff]  ;;  %v869_v25 = vld [vmem:[%s324_s13 + $0x8] sm:$0xff]  ;;  %v870_v27 = vld [vmem:[%s324_s13 + $0x10] sm:$0xff]  ;;  %s339_s16 = scalar_lea.vmem %s1228_s7, %s908_s8 }
  0x12   : > { %v341_v21 = vld [vmem:[%s324_s13] sm:$0xff]  ;;  %v352_v24 = vrot.slane %v340_v20, %v351_v13  ;;  %v378_v26 = vrot.slane %v340_v20, %v377_v14  ;;  %v871_v29 = vld [vmem:[%s324_s13 + $0x18] sm:$0xff]  ;;  %v370_v31 = vunpack.c.h.bf16 %v869_v25  ;;  %v396_v36 = vunpack.c.h.bf16 %v870_v27 }
  0x13   : > { %v343_v23 = vunpack.c.h.bf16 %v341_v21  ;;  %v404_v37 = vrot.slane %v340_v20, %v403_v19  ;;  %v422_v38 = vunpack.c.h.bf16 %v871_v29  ;;  %v430_v39 = vrot.slane %v340_v20, %v429_v22  ;;  %v968_v19 = vld [vmem:[%s1225_s4 + $0xb4] ss:$8 sps:$4 sm:$0xff]  }
  0x14   : > { %678 = vmatpush1.bf16.msra.mxu0 %v946_v8  ;;  %v362_v34 = vrot.slane %v352_v24, %v1117_v16  ;;  %v388_v35 = vrot.slane %v378_v26, %v1122_v18  ;;  %v342_v40 = vunpack.c.l.bf16 %v341_v21  ;;  %v369_v45 = vunpack.c.l.bf16 %v869_v25  ;;  %v970_v24 = vld [vmem:[%s1225_s4 + $0xb0] ss:$8 sps:$4 sm:$0xff]   ;;  %v971_v25 = vld [vmem:[%s1225_s4 + $0xc4] ss:$8 sps:$4 sm:$0xff]  }
  0x15   : > { %679 = vmatprep.subr.bf16.mxu0 %v947_v9  ;;  %v414_v43 = vrot.slane %v404_v37, %v399_v28  ;;  %v440_v46 = vrot.slane %v430_v39, %v425_v32  ;;  %v348_v48 = vrot.slane %v340_v20, %v1117_v16  ;;  %v374_v49 = vrot.slane %v340_v20, %v1122_v18  ;;  %v982_v37 = vld [vmem:[%s1225_s4 + $0xf0] ss:$8 sps:$4 sm:$0xff]   ;;  %v712_v39 = vld [vmem:[%s1226_s5] sm:$0x3] }
  0x16   : > { %v364_v41 = vmul.f32 %v362_v34, %v343_v23  ;;  %v390_v42 = vmul.f32 %v388_v35, %v370_v31  ;;  %v400_v53 = vrot.slane %v340_v20, %v399_v28  ;;  %v395_v54 = vunpack.c.l.bf16 %v870_v27  ;;  %v976_v31 = vld [vmem:[%s1225_s4 + $0xd0] ss:$8 sps:$4 sm:$0xff]   ;;  %v979_v34 = vld [vmem:[%s1225_s4 + $0xe0] ss:$8 sps:$4 sm:$0xff]   ;;  %v980_v35 = vld [vmem:[%s1225_s4 + $0xf4] ss:$8 sps:$4 sm:$0xff]  }
  0x17   : > { %v416_v52 = vmul.f32 %v414_v43, %v396_v36  ;;  %v442_v55 = vmul.f32 %v440_v46, %v422_v38  ;;  %v358_v57 = vrot.slane %v348_v48, %v1117_v16  ;;  %v384_v58 = vrot.slane %v374_v49, %v1122_v18 }
  0x18   : > { %680 = vmatpush1.bf16.msra.mxu0 %v949_v11  ;;  %v392_v51 = vadd.f32 %v390_v42, %v364_v41  ;;  %v410_v61 = vrot.slane %v400_v53, %v399_v28  ;;  %v426_v62 = vrot.slane %v340_v20, %v425_v32  ;;  %v421_v5 = vunpack.c.l.bf16 %v871_v29  ;;  %v965_v11 = vld [vmem:[%s1225_s4 + $0xa4] ss:$8 sps:$4 sm:$0xff]   ;;  %v973_v28 = vld [vmem:[%s1225_s4 + $0xc0] ss:$8 sps:$4 sm:$0xff]   ;;  %v974_v29 = vld [vmem:[%s1225_s4 + $0xd4] ss:$8 sps:$4 sm:$0xff]  }
  0x19   : > { %681 = vmatprep.subr.bf16.mxu0 %v950_v12  ;;  %v363_v0 = vmul.f32 %v358_v57, %v342_v40  ;;  %v389_v1 = vmul.f32 %v384_v58, %v369_v45  ;;  %v450_v21 = vrot.slane %v445_v47, %v1117_v16  ;;  %v464_v26 = vrot.slane %v459_v56, %v1117_v16  ;;  %v726_v40 = vld [vmem:[%s1227_s6] sm:$0x3] }
  0x1a   : > { %v418_v59 = vadd.f32 %v416_v52, %v392_v51  ;;  %v415_v8 = vmul.f32 %v410_v61, %v395_v54  ;;  %v436_v9 = vrot.slane %v426_v62, %v425_v32  ;;  %v977_v32 = vld [vmem:[%s1225_s4 + $0xe4] ss:$8 sps:$4 sm:$0xff]   ;;  %v717_v41 = vrot.slane %v712_v39, %v1117_v16 }
  0x1b   : > { %v391_v7 = vadd.f32 %v389_v1, %v363_v0  ;;  %v721_v42 = vrot.slane %v712_v39, %v1122_v18  ;;  %v731_v43 = vrot.slane %v726_v40, %v1117_v16  ;;  %v735_v45 = vrot.slane %v726_v40, %v1122_v18 }
  0x1c   : > { %682 = vmatpush1.bf16.msra.mxu0 %v952_v15  ;;  %v444_v3 = vadd.f32 %v442_v55, %v418_v59  ;;  %v441_v15 = vmul.f32 %v436_v9, %v421_v5 }
  0x1d   : > { %683 = vmatprep.subr.bf16.mxu0 %v953_v17  ;;  %v417_v14 = vadd.f32 %v415_v8, %v391_v7  ;;  %v967_v17 = vld [vmem:[%s1225_s4 + $0xa0] ss:$8 sps:$4 sm:$0xff]  }
  0x1e   : > { %v458_v6 = vmul.f32 %v454_v60, %v444_v3 }
  0x1f   : > { %v443_v23 = vadd.f32 %v441_v15, %v417_v14 }
  0x20   : > { %684 = vmatpush1.bf16.msra.mxu0 %v955_v30  ;;  %v472_v12 = vadd.f32 %v468_v4, %v458_v6 }
  0x21   : > { %685 = vmatprep.subr.bf16.mxu0 %v956_v33  ;;  %v457_v27 = vmul.f32 %v450_v21, %v443_v23 }
  0x22   : > { %v474_v13 = vmax.f32 %v472_v12, 0.0 }
  0x23   : > { %v471_v30 = vadd.f32 %v464_v26, %v457_v27 }
  0x24   : > { %686 = vmatpush1.bf16.msra.mxu0 %v958_v44  ;;  %v476_v20 = vmin.f32 %v474_v13, 6.0 }
  0x25   : > { %687 = vmatprep.subr.bf16.mxu0 %v959_v50  ;;  %v473_v33 = vmax.f32 %v471_v30, 0.0 }
  0x26   : > { %v478_v22 = vpack.c.bf16 %v476_v20, %v476_v20 }
  0x27   : > { %v475_v36 = vmin.f32 %v473_v33, 6.0 }
  0x28   : > { %688 = vmatpush1.bf16.msra.mxu0 %v961_v63  ;;  %703 = vmatprep.mubr.bf16.mxu0 %v478_v22 }
  0x29   : > { %689 = vmatprep.subr.bf16.mxu0 %v962_v2  ;;  %v477_v38 = vpack.c.bf16 %v475_v36, %v475_v36 }
  0x2c   : > { %690 = vmatpush1.bf16.msra.mxu0 %v964_v10 }
  0x2d   : > { %691 = vmatprep.subr.bf16.mxu0 %v965_v11 }
  0x30   : > { %692 = vmatpush1.bf16.msra.mxu0 %v967_v17 }
  0x31   : > { %693 = vmatprep.subr.bf16.mxu0 %v968_v19 }
  0x34   : > { %694 = vmatpush1.bf16.msra.mxu0 %v970_v24 }
  0x35   : > { %695 = vmatprep.subr.bf16.mxu0 %v971_v25 }
  0x38   : > { %696 = vmatpush1.bf16.msra.mxu0 %v973_v28 }
  0x39   : > { %697 = vmatprep.subr.bf16.mxu0 %v974_v29 }
  0x3c   : > { %698 = vmatpush1.bf16.msra.mxu0 %v976_v31 }
  0x3d   : > { %699 = vmatprep.subr.bf16.mxu0 %v977_v32 }
  0x40   : > { %700 = vmatpush1.bf16.msra.mxu0 %v979_v34 }
  0x41   : > { %701 = vmatprep.subr.bf16.mxu0 %v980_v35 }
  0x44   : > { %702 = vmatpush1.bf16.msra.mxu0 %v982_v37 }
  0x47   : > { %704 = vmatmul.mubr.bf16.vlgmr.msra.gmra.mrb[0].mxu0 %v477_v38 }
 0x11a   : > { %v705_v44 = vpop.f32.mrb[0].mxu0 }
 0x11b   : > { %v724_v46 = vmul.f32 %v717_v41, %v705_v44  ;;  %v707_v47 = vpop.f32.mrb[1].mxu0 }
 0x11c   : > { %v725_v48 = vmul.f32 %v721_v42, %v707_v47  ;;  %v709_v49 = vpop.f32.mrb[2].mxu0 }
 0x11d   : > { %v738_v50 = vadd.f32 %v731_v43, %v724_v46  ;;  %v710_v51 = vpop.f32.mrb[3].mxu0 }
 0x11e   : > { %v739_v52 = vadd.f32 %v735_v45, %v725_v48 }
 0x11f   : > { %v740_v53 = vmax.f32 %v738_v50, 0.0 }
 0x120   : > { %v741_v54 = vmax.f32 %v739_v52, 0.0 }
 0x121   : > { %v742_v55 = vmin.f32 %v740_v53, 6.0 }
 0x122   : > { %v743_v56 = vmin.f32 %v741_v54, 6.0 }
 0x124   : > { %v910_v16 = vpack.c.bf16 %v743_v56, %v742_v55 }
 0x126   : > { %752 = vst [vmem:[%s339_s16] sm:$0xff] %v910_v16 }
 0x127 PF: > { %s17_s26 = sadd.s32 1, %s1005_s26   ;;  %s1229_s24 = smov %s1001_s25 }
 0x128   : > { %p14_p6 = scmp.ge.s32.totalorder %s17_s26, 6   ;;  %s1230_s25 = smov %s1232_s27 }
 0x12a   :  { %16 = sbr.rel (!%p14_p6) target bundleno = 2 (0x2), region = 84 }

// kernel: forward.14
= control target key start
LH: loop header
LB: loop body
LE: loop exit
PB: predicated region body
PF: predicated region fallthrough
CT: control target
= control target key end

     0   :  { %s1271_s24 = smov 0   ;;  %s1273_s25 = smov 0   ;;  %s1624_s0 = inlined_call_operand.vmem [shape: bf16[16,32,256], index: 0, kind: input, shape index: {}]   ;;  %s1625_s1 = inlined_call_operand.vmem [shape: f32[4,4,256], index: 1, kind: input, shape index: {}]   ;;  %s1626_s2 = inlined_call_operand.vmem [shape: f32[1,256], index: 2, kind: input, shape index: {}]   ;;  %s1627_s3 = inlined_call_operand.vmem [shape: f32[1,256], index: 3, kind: input, shape index: {}]   ;;  %s1628_s4 = inlined_call_operand.vmem [shape: bf16[256,256], index: 4, kind: input, shape index: {}]   ;;  %s1629_s5 = inlined_call_operand.vmem [shape: f32[1,256], index: 5, kind: input, shape index: {}]   ;;  %s1630_s6 = inlined_call_operand.vmem [shape: f32[1,256], index: 6, kind: input, shape index: {}]   ;;  %s1631_s7 = inlined_call_operand.vmem [shape: bf16[4,32,256], index: 7, kind: output, shape index: {}]  }
   0x1   :  { %s1275_s26 = smov 0  }
   0x2 LB: > { %s29_s27 = sadd.s32 1, %s1225_s25  ;;  %p1038_p0 = scmp.ge.s32.totalorder %s1229_s26, 1  ;;  %s1229_s26 = sphi %s1275_s26, %s17_s26   ;;  %s1225_s25 = sphi %s1273_s25, %s1633_s25   ;;  %s1221_s24 = sphi %s1271_s24, %s1632_s24  }
   0x3   : > { %p31_p1 = scmp.ge.s32.totalorder %s29_s27, 4  ;;  %p271_p2 = scmp.lt.s32.totalorder %s1229_s26, 5 }
   0x5   : > { %s1635_s27 = smov (%p31_p1, %s29_s27), 0  ;;  %p272_p3 = pnand %p1038_p0, %p271_p2 }
   0x6   : > { %v1159_v0 = vld [vmem:[%s1628_s4 + $0x4] ss:$8 sps:$4 sm:$0xff] (!%p272_p3)   ;;  %v1161_v1 = vld [vmem:[%s1628_s4] ss:$8 sps:$4 sm:$0xff] (!%p272_p3)   ;;  %v1162_v2 = vld [vmem:[%s1628_s4 + $0x14] ss:$8 sps:$4 sm:$0xff] (!%p272_p3)   ;;  %v362_v7 = vlaneseq (!%p272_p3) }
   0x7   : > { %275 = sbr.rel (%p272_p3) target bundleno = 297 (0x129), region = 48  ;;  %789 = vmatprep.subr.bf16.mxu0 (!%p272_p3), %v1159_v0  ;;  %1103 = vmatprep.subr.bf16.mxu1 (!%p272_p3), %v1159_v0  ;;  %v1164_v3 = vld [vmem:[%s1628_s4 + $0x10] ss:$8 sps:$4 sm:$0xff] (!%p272_p3)   ;;  %v1165_v4 = vld [vmem:[%s1628_s4 + $0x24] ss:$8 sps:$4 sm:$0xff] (!%p272_p3)   ;;  %s1039_s15 = sshll.u32 (!%p272_p3), %s1221_s24, 2 }
   0x8   : > { %790 = vmatpush1.bf16.msra.mxu0 (!%p272_p3), %v1161_v1  ;;  %1119 = vmatpush1.bf16.msra.mxu1 (!%p272_p3), %v1161_v1  ;;  %p332_p4 = scmp.lt.s32.totalorder (!%p272_p3), %s1221_s24, 3  ;;  %v1167_v5 = vld [vmem:[%s1628_s4 + $0x20] ss:$8 sps:$4 sm:$0xff] (!%p272_p3)   ;;  %p321_p5 = scmp.lt.s32.totalorder (!%p272_p3), %s1039_s15, 15  ;;  %v1168_v6 = vld [vmem:[%s1628_s4 + $0x34] ss:$8 sps:$4 sm:$0xff] (!%p272_p3)  }
   0x9   : > { %791 = vmatprep.subr.bf16.mxu0 (!%p272_p3), %v1162_v2  ;;  %1104 = vmatprep.subr.bf16.mxu1 (!%p272_p3), %v1162_v2  ;;  %v1170_v8 = vld [vmem:[%s1628_s4 + $0x30] ss:$8 sps:$4 sm:$0xff] (!%p272_p3)   ;;  %v1171_v9 = vld [vmem:[%s1628_s4 + $0x44] ss:$8 sps:$4 sm:$0xff] (!%p272_p3)   ;;  %v1323_v10 = vshrl.u32 (!%p272_p3), %v362_v7, 7 }
   0xa   : > { %v1173_v11 = vld [vmem:[%s1628_s4 + $0x40] ss:$8 sps:$4 sm:$0xff] (!%p272_p3)   ;;  %v1174_v12 = vld [vmem:[%s1628_s4 + $0x54] ss:$8 sps:$4 sm:$0xff] (!%p272_p3)   ;;  %v1176_v15 = vld [vmem:[%s1628_s4 + $0x50] ss:$8 sps:$4 sm:$0xff] (!%p272_p3)  }
   0xb   : > { %v368_v13 = vsub.s32 (!%p272_p3), 4, %v1323_v10  ;;  %v415_v14 = vsub.s32 (!%p272_p3), 5, %v1323_v10  ;;  %v1177_v16 = vld [vmem:[%s1628_s4 + $0x64] ss:$8 sps:$4 sm:$0xff] (!%p272_p3)   ;;  %v1349_v17 = vsub.s32 (!%p272_p3), 0, %v1323_v10  ;;  %v1352_v18 = vsub.s32 (!%p272_p3), 1, %v1323_v10 }
   0xc   : > { %792 = vmatpush1.bf16.msra.mxu0 (!%p272_p3), %v1164_v3  ;;  %1120 = vmatpush1.bf16.msra.mxu1 (!%p272_p3), %v1164_v3  ;;  %v1372_v27 = vsub.s32 (!%p272_p3), 2, %v1323_v10  ;;  %v1179_v28 = vld [vmem:[%s1628_s4 + $0x60] ss:$8 sps:$4 sm:$0xff] (!%p272_p3)   ;;  %v462_v31 = vsub.s32 (!%p272_p3), 6, %v1323_v10  ;;  %v1381_v32 = vsub.s32 (!%p272_p3), 3, %v1323_v10  ;;  %v509_v39 = vsub.s32 (!%p272_p3), 7, %v1323_v10 }
   0xd   : > { %793 = vmatprep.subr.bf16.mxu0 (!%p272_p3), %v1165_v4  ;;  %1105 = vmatprep.subr.bf16.mxu1 (!%p272_p3), %v1165_v4  ;;  %v1180_v33 = vld [vmem:[%s1628_s4 + $0x74] ss:$8 sps:$4 sm:$0xff] (!%p272_p3)   ;;  %v1182_v50 = vld [vmem:[%s1628_s4 + $0x70] ss:$8 sps:$4 sm:$0xff] (!%p272_p3)   ;;  %v537_v55 = vld [vmem:[%s1626_s2] sm:$0x3] (!%p272_p3) }
   0xe   : > { %s1637_s24 = smov (!%p332_p4, %s1221_s24), 3  ;;  %s1639_s15 = smov (!%p321_p5, %s1039_s15), 15  ;;  %v1183_v57 = vld [vmem:[%s1628_s4 + $0x84] ss:$8 sps:$4 sm:$0xff]   ;;  %v557_v62 = vld [vmem:[%s1627_s3] sm:$0x3] }
   0xf   : > { %s1096_s30 = sshll.u32 %s1639_s15, 5  ;;  %s1097_s8 = sshll.u32 %s1637_s24, 3 }
  0x10   : > { %794 = vmatpush1.bf16.msra.mxu0 %v1167_v5  ;;  %1121 = vmatpush1.bf16.msra.mxu1 %v1167_v5  ;;  %s1335_s13 = scalar_lea.vmem %s1624_s0, %s1096_s30  ;;  %s336_s17 = scalar_lea.vmem %s1625_s1, %s1097_s8  ;;  %v1446_v5 = vrot.slane %v537_v55, %v1349_v17 }
  0x11   : > { %795 = vmatprep.subr.bf16.mxu0 %v1168_v6  ;;  %1106 = vmatprep.subr.bf16.mxu1 %v1168_v6  ;;  %v1354_v19 = vld [vmem:[%s336_s17] sm:$0xff]  ;;  %v1360_v21 = vld [vmem:[%s1335_s13 + $0x8] sm:$0xff]  ;;  %v1425_v56 = vld [vmem:[%s1335_s13 + $0x10] sm:$0xff]  ;;  %v1449_v6 = vrot.slane %v537_v55, %v1352_v18  ;;  %s1098_s10 = sshll.u32 %s1637_s24, 5 }
  0x12   : > { %v1357_v20 = vld [vmem:[%s1335_s13] sm:$0xff]  ;;  %v369_v23 = vrot.slane %v1354_v19, %v368_v13  ;;  %v1368_v25 = vld [vmem:[%s1335_s13 + $0x28] sm:$0xff]  ;;  %v416_v26 = vrot.slane %v1354_v19, %v415_v14  ;;  %v356_v29 = vunpack.c.h.bf16 %v1360_v21  ;;  %v355_v41 = vunpack.c.l.bf16 %v1360_v21  ;;  %v1438_v63 = vld [vmem:[%s1335_s13 + $0x18] sm:$0xff]  ;;  %s346_s14 = scalar_lea.vmem %s1631_s7, %s1098_s10 }
  0x13   : > { %v354_v22 = vunpack.c.h.bf16 %v1357_v20  ;;  %v1365_v24 = vld [vmem:[%s1335_s13 + $0x20] sm:$0xff]  ;;  %v404_v35 = vunpack.c.h.bf16 %v1368_v25  ;;  %v1397_v38 = vld [vmem:[%s1335_s13 + $0x48] sm:$0xff]  ;;  %v353_v40 = vunpack.c.l.bf16 %v1357_v20  ;;  %v403_v43 = vunpack.c.l.bf16 %v1368_v25  ;;  %v1463_v14 = vld [vmem:[%s1335_s13 + $0x38] sm:$0xff] }
  0x14   : > { %796 = vmatpush1.bf16.msra.mxu0 %v1170_v8  ;;  %1122 = vmatpush1.bf16.msra.mxu1 %v1170_v8  ;;  %v402_v30 = vunpack.c.h.bf16 %v1365_v24  ;;  %v1387_v34 = vrot.slane %v369_v23, %v1349_v17  ;;  %v1391_v36 = vrot.slane %v416_v26, %v1352_v18  ;;  %v1394_v37 = vld [vmem:[%s1335_s13 + $0x40] sm:$0xff]  ;;  %v401_v42 = vunpack.c.l.bf16 %v1365_v24  ;;  %v1408_v45 = vld [vmem:[%s1335_s13 + $0x68] sm:$0xff]  ;;  %v1453_v8 = vld [vmem:[%s1335_s13 + $0x30] sm:$0xff] }
  0x15   : > { %797 = vmatprep.subr.bf16.mxu0 %v1171_v9  ;;  %1107 = vmatprep.subr.bf16.mxu1 %v1171_v9  ;;  %v1405_v44 = vld [vmem:[%s1335_s13 + $0x60] sm:$0xff]  ;;  %v448_v51 = vunpack.c.l.bf16 %v1394_v37  ;;  %v449_v52 = vunpack.c.h.bf16 %v1394_v37  ;;  %v451_v53 = vunpack.c.h.bf16 %v1397_v38  ;;  %v463_v54 = vrot.slane %v1354_v19, %v462_v31  ;;  %v1198_v25 = vld [vmem:[%s1628_s4 + $0xd4] ss:$8 sps:$4 sm:$0xff]  }
  0x16   : > { %v381_v46 = vmul.f32 %v1387_v34, %v354_v22  ;;  %v383_v47 = vmul.f32 %v1387_v34, %v356_v29  ;;  %v428_v48 = vmul.f32 %v1391_v36, %v402_v30  ;;  %v430_v49 = vmul.f32 %v1391_v36, %v404_v35  ;;  %v1185_v9 = vld [vmem:[%s1628_s4 + $0x80] ss:$8 sps:$4 sm:$0xff]   ;;  %v1480_v35 = vld [vmem:[%s1335_s13 + $0x58] sm:$0xff] }
  0x17   : > { %v450_v58 = vunpack.c.l.bf16 %v1397_v38  ;;  %v496_v59 = vunpack.c.h.bf16 %v1405_v44  ;;  %v498_v60 = vunpack.c.h.bf16 %v1408_v45  ;;  %v510_v61 = vrot.slane %v1354_v19, %v509_v39  ;;  %v1197_v20 = vld [vmem:[%s1628_s4 + $0xc0] ss:$8 sps:$4 sm:$0xff]  }
  0x18   : > { %798 = vmatpush1.bf16.msra.mxu0 %v1173_v11  ;;  %1123 = vmatpush1.bf16.msra.mxu1 %v1173_v11  ;;  %v436_v0 = vadd.f32 %v428_v48, %v381_v46  ;;  %v438_v1 = vadd.f32 %v430_v49, %v383_v47  ;;  %v473_v2 = vrot.slane %v463_v54, %v1372_v27  ;;  %v495_v3 = vunpack.c.l.bf16 %v1405_v44  ;;  %v1487_v49 = vld [vmem:[%s1335_s13 + $0x70] sm:$0xff] }
  0x19   : > { %799 = vmatprep.subr.bf16.mxu0 %v1174_v12  ;;  %1108 = vmatprep.subr.bf16.mxu1 %v1174_v12  ;;  %v1443_v4 = vrot.slane %v510_v61, %v1381_v32  ;;  %v358_v7 = vunpack.c.h.bf16 %v1425_v56  ;;  %v1459_v12 = vrot.slane %v557_v62, %v1349_v17  ;;  %v360_v13 = vunpack.c.h.bf16 %v1438_v63 }
  0x1a   : > { %v475_v10 = vmul.f32 %v473_v2, %v449_v52  ;;  %v477_v11 = vmul.f32 %v473_v2, %v451_v53  ;;  %v497_v22 = vunpack.c.l.bf16 %v1408_v45  ;;  %v357_v39 = vunpack.c.l.bf16 %v1425_v56  ;;  %v1200_v56 = vld [vmem:[%s1628_s4 + $0xd0] ss:$8 sps:$4 sm:$0xff]  }
  0x1b   : > { %v522_v23 = vmul.f32 %v1443_v4, %v496_v59  ;;  %v524_v26 = vmul.f32 %v1443_v4, %v498_v60  ;;  %v385_v31 = vmul.f32 %v1387_v34, %v358_v7  ;;  %v387_v46 = vmul.f32 %v1387_v34, %v360_v13  ;;  %v1189_v34 = vld [vmem:[%s1628_s4 + $0xa4] ss:$8 sps:$4 sm:$0xff]  }
  0x1c   : > { %800 = vmatpush1.bf16.msra.mxu0 %v1176_v15  ;;  %1124 = vmatpush1.bf16.msra.mxu1 %v1176_v15  ;;  %v1466_v15 = vld [vmem:[%s1335_s13 + $0x50] sm:$0xff]  ;;  %v483_v29 = vadd.f32 %v475_v10, %v436_v0  ;;  %v485_v30 = vadd.f32 %v477_v11, %v438_v1  ;;  %v408_v47 = vunpack.c.h.bf16 %v1463_v14  ;;  %v359_v54 = vunpack.c.l.bf16 %v1438_v63 }
  0x1d   : > { %801 = vmatprep.subr.bf16.mxu0 %v1177_v16  ;;  %1109 = vmatprep.subr.bf16.mxu1 %v1177_v16  ;;  %v1186_v16 = vld [vmem:[%s1628_s4 + $0x94] ss:$8 sps:$4 sm:$0xff]   ;;  %v453_v48 = vunpack.c.h.bf16 %v1466_v15  ;;  %v405_v59 = vunpack.c.l.bf16 %v1453_v8  ;;  %v455_v61 = vunpack.c.h.bf16 %v1480_v35  ;;  %v407_v10 = vunpack.c.l.bf16 %v1463_v14 }
  0x1e   : > { %v530_v52 = vadd.f32 %v522_v23, %v483_v29  ;;  %v532_v53 = vadd.f32 %v524_v26, %v485_v30  ;;  %v434_v60 = vmul.f32 %v1391_v36, %v408_v47  ;;  %v452_v29 = vunpack.c.l.bf16 %v1466_v15 }
  0x1f   : > { %v481_v13 = vmul.f32 %v473_v2, %v455_v61  ;;  %v506_v61 = vrot.slane %v1354_v19, %v1381_v32 }
  0x20   : > { %802 = vmatpush1.bf16.msra.mxu0 %v1179_v28  ;;  %1125 = vmatpush1.bf16.msra.mxu1 %v1179_v28  ;;  %v1475_v28 = vrot.slane %v557_v62, %v1352_v18  ;;  %v479_v62 = vmul.f32 %v473_v2, %v453_v48  ;;  %v550_v0 = vmul.f32 %v1449_v6, %v530_v52  ;;  %v1192_v2 = vld [vmem:[%s1628_s4 + $0xb4] ss:$8 sps:$4 sm:$0xff]  }
  0x21   : > { %803 = vmatprep.subr.bf16.mxu0 %v1180_v33  ;;  %1110 = vmatprep.subr.bf16.mxu1 %v1180_v33  ;;  %v406_v33 = vunpack.c.h.bf16 %v1453_v8  ;;  %v552_v1 = vmul.f32 %v1449_v6, %v532_v53  ;;  %v442_v11 = vadd.f32 %v434_v60, %v387_v46  ;;  %v365_v52 = vrot.slane %v1354_v19, %v1349_v17 }
  0x22   : > { %v570_v23 = vadd.f32 %v1475_v28, %v550_v0  ;;  %v412_v53 = vrot.slane %v1354_v19, %v1352_v18  ;;  %v459_v60 = vrot.slane %v1354_v19, %v1372_v27  ;;  %v499_v19 = vunpack.c.l.bf16 %v1487_v49 }
  0x23   : > { %v432_v55 = vmul.f32 %v1391_v36, %v406_v33  ;;  %v1191_v36 = vld [vmem:[%s1628_s4 + $0xa0] ss:$8 sps:$4 sm:$0xff]   ;;  %v572_v26 = vadd.f32 %v1475_v28, %v552_v1  ;;  %v489_v33 = vadd.f32 %v481_v13, %v442_v11  ;;  %v375_v1 = vrot.slane %v365_v52, %v1349_v17 }
  0x24   : > { %804 = vmatpush1.bf16.msra.mxu0 %v1182_v50  ;;  %1126 = vmatpush1.bf16.msra.mxu1 %v1182_v50  ;;  %v1188_v50 = vld [vmem:[%s1628_s4 + $0x90] ss:$8 sps:$4 sm:$0xff]   ;;  %v578_v48 = vmax.f32 %v570_v23, 0.0 }
  0x25   : > { %805 = vmatprep.subr.bf16.mxu0 %v1183_v57  ;;  %1111 = vmatprep.subr.bf16.mxu1 %v1183_v57  ;;  %v1495_v57 = vld [vmem:[%s1335_s13 + $0x78] sm:$0xff]  ;;  %v440_v7 = vadd.f32 %v432_v55, %v385_v31  ;;  %v454_v31 = vunpack.c.l.bf16 %v1480_v35  ;;  %v380_v23 = vmul.f32 %v375_v1, %v353_v40 }
  0x26   : > { %v501_v21 = vunpack.c.l.bf16 %v1495_v57  ;;  %v1204_v35 = vld [vmem:[%s1628_s4 + $0xf4] ss:$8 sps:$4 sm:$0xff]  }
  0x27   : > { %v487_v30 = vadd.f32 %v479_v62, %v440_v7  ;;  %v586_v62 = vmin.f32 %v578_v48, 6.0  ;;  %v422_v7 = vrot.slane %v412_v53, %v1352_v18 }
  0x28   : > { %806 = vmatpush1.bf16.msra.mxu0 %v1185_v9  ;;  %1127 = vmatpush1.bf16.msra.mxu1 %v1185_v9  ;;  %v500_v9 = vunpack.c.h.bf16 %v1487_v49 }
  0x29   : > { %807 = vmatprep.subr.bf16.mxu0 %v1186_v16  ;;  %1112 = vmatprep.subr.bf16.mxu1 %v1186_v16  ;;  %v502_v16 = vunpack.c.h.bf16 %v1495_v57  ;;  %v433_v45 = vmul.f32 %v422_v7, %v407_v10 }
  0x2a   : > { %v526_v46 = vmul.f32 %v1443_v4, %v500_v9  ;;  %v1195_v9 = vld [vmem:[%s1628_s4 + $0xc4] ss:$8 sps:$4 sm:$0xff]  }
  0x2b   : > { %v528_v47 = vmul.f32 %v1443_v4, %v502_v16  ;;  %v1194_v4 = vld [vmem:[%s1628_s4 + $0xb0] ss:$8 sps:$4 sm:$0xff]   ;;  %v469_v16 = vrot.slane %v459_v60, %v1372_v27 }
  0x2c   : > { %808 = vmatpush1.bf16.msra.mxu0 %v1188_v50  ;;  %1128 = vmatpush1.bf16.msra.mxu1 %v1188_v50  ;;  %v580_v50 = vmax.f32 %v572_v26, 0.0  ;;  %v534_v55 = vadd.f32 %v526_v46, %v487_v30  ;;  %v382_v26 = vmul.f32 %v375_v1, %v355_v41  ;;  %v427_v30 = vmul.f32 %v422_v7, %v401_v42 }
  0x2d   : > { %809 = vmatprep.subr.bf16.mxu0 %v1189_v34  ;;  %1113 = vmatprep.subr.bf16.mxu1 %v1189_v34  ;;  %v536_v34 = vadd.f32 %v528_v47, %v489_v33  ;;  %v429_v33 = vmul.f32 %v422_v7, %v403_v43  ;;  %v474_v27 = vmul.f32 %v469_v16, %v448_v51 }
  0x2e   : > { %v588_v0 = vmin.f32 %v580_v50, 6.0  ;;  %v554_v11 = vmul.f32 %v1449_v6, %v534_v55  ;;  %v435_v24 = vadd.f32 %v427_v30, %v380_v23  ;;  %v476_v40 = vmul.f32 %v469_v16, %v450_v58  ;;  %v1203_v50 = vld [vmem:[%s1628_s4 + $0xe0] ss:$8 sps:$4 sm:$0xff]  }
  0x2f   : > { %v556_v13 = vmul.f32 %v1449_v6, %v536_v34  ;;  %v516_v41 = vrot.slane %v506_v61, %v1381_v32  ;;  %v437_v43 = vadd.f32 %v429_v33, %v382_v26  ;;  %v384_v51 = vmul.f32 %v375_v1, %v357_v39  ;;  %v862_v30 = vld [vmem:[%s1630_s6] sm:$0x3] }
  0x30   : > { %810 = vmatpush1.bf16.msra.mxu0 %v1191_v36  ;;  %1129 = vmatpush1.bf16.msra.mxu1 %v1191_v36  ;;  %v594_v36 = vpack.c.bf16 %v588_v0, %v586_v62  ;;  %v482_v6 = vadd.f32 %v474_v27, %v435_v24  ;;  %v386_v58 = vmul.f32 %v375_v1, %v359_v54  ;;  %v1206_v62 = vld [vmem:[%s1628_s4 + $0xf0] ss:$8 sps:$4 sm:$0xff]  }
  0x31   : > { %811 = vmatprep.subr.bf16.mxu0 %v1192_v2  ;;  %1114 = vmatprep.subr.bf16.mxu1 %v1192_v2  ;;  %v574_v2 = vadd.f32 %v1475_v28, %v554_v11  ;;  %v576_v49 = vadd.f32 %v1475_v28, %v556_v13  ;;  %v521_v38 = vmul.f32 %v516_v41, %v495_v3  ;;  %v1201_v3 = vld [vmem:[%s1628_s4 + $0xe4] ss:$8 sps:$4 sm:$0xff]  }
  0x32   : > { %821 = vmatprep.mubr.bf16.mxu0 %v594_v36  ;;  %v523_v32 = vmul.f32 %v516_v41, %v497_v22  ;;  %v484_v46 = vadd.f32 %v476_v40, %v437_v43  ;;  %v431_v47 = vmul.f32 %v422_v7, %v405_v59  ;;  %v478_v63 = vmul.f32 %v469_v16, %v452_v29 }
  0x33   : > { %v582_v37 = vmax.f32 %v574_v2, 0.0  ;;  %v584_v42 = vmax.f32 %v576_v49, 0.0  ;;  %v529_v44 = vadd.f32 %v521_v38, %v482_v6  ;;  %v441_v59 = vadd.f32 %v433_v45, %v386_v58 }
  0x34   : > { %812 = vmatpush1.bf16.msra.mxu0 %v1194_v4  ;;  %1130 = vmatpush1.bf16.msra.mxu1 %v1194_v4  ;;  %v531_v22 = vadd.f32 %v523_v32, %v484_v46  ;;  %v439_v39 = vadd.f32 %v431_v47, %v384_v51  ;;  %v480_v48 = vmul.f32 %v469_v16, %v454_v31 }
  0x35   : > { %813 = vmatprep.subr.bf16.mxu0 %v1195_v9  ;;  %1115 = vmatprep.subr.bf16.mxu1 %v1195_v9  ;;  %v590_v28 = vmin.f32 %v582_v37, 6.0  ;;  %v592_v57 = vmin.f32 %v584_v42, 6.0  ;;  %v549_v54 = vmul.f32 %v1446_v5, %v529_v44  ;;  %v525_v14 = vmul.f32 %v516_v41, %v499_v19 }
  0x36   : > { %v551_v15 = vmul.f32 %v1446_v5, %v531_v22  ;;  %v486_v10 = vadd.f32 %v478_v63, %v439_v39  ;;  %v527_v29 = vmul.f32 %v516_v41, %v501_v21  ;;  %v488_v53 = vadd.f32 %v480_v48, %v441_v59 }
  0x37   : > { %v596_v8 = vpack.c.bf16 %v592_v57, %v590_v28  ;;  %v569_v52 = vadd.f32 %v1459_v12, %v549_v54  ;;  %v867_v49 = vrot.slane %v862_v30, %v1349_v17  ;;  %v871_v27 = vrot.slane %v862_v30, %v1352_v18 }
  0x38   : > { %814 = vmatpush1.bf16.msra.mxu0 %v1197_v20  ;;  %1131 = vmatpush1.bf16.msra.mxu1 %v1197_v20  ;;  %v571_v31 = vadd.f32 %v1459_v12, %v551_v15  ;;  %v533_v55 = vadd.f32 %v525_v14, %v486_v10  ;;  %v535_v60 = vadd.f32 %v527_v29, %v488_v53 }
  0x39   : > { %815 = vmatprep.subr.bf16.mxu0 %v1198_v25  ;;  %1116 = vmatprep.subr.bf16.mxu1 %v1198_v25  ;;  %v577_v34 = vmax.f32 %v569_v52, 0.0 }
  0x3a   : > { %831 = vmatprep.mubr.bf16.mxu1 %v596_v8  ;;  %v579_v61 = vmax.f32 %v571_v31, 0.0  ;;  %v553_v4 = vmul.f32 %v1446_v5, %v533_v55  ;;  %v555_v1 = vmul.f32 %v1446_v5, %v535_v60  ;;  %v842_v5 = vld [vmem:[%s1629_s5] sm:$0x3] }
  0x3b   : > { %v585_v0 = vmin.f32 %v577_v34, 6.0  ;;  %v851_v2 = vrot.slane %v842_v5, %v1352_v18 }
  0x3c   : > { %816 = vmatpush1.bf16.msra.mxu0 %v1200_v56  ;;  %1132 = vmatpush1.bf16.msra.mxu1 %v1200_v56  ;;  %v587_v7 = vmin.f32 %v579_v61, 6.0  ;;  %v573_v9 = vadd.f32 %v1459_v12, %v553_v4  ;;  %v575_v19 = vadd.f32 %v1459_v12, %v555_v1  ;;  %v847_v12 = vrot.slane %v842_v5, %v1349_v17 }
  0x3d   : > { %817 = vmatprep.subr.bf16.mxu0 %v1201_v3  ;;  %1117 = vmatprep.subr.bf16.mxu1 %v1201_v3 }
  0x3e   : > { %v593_v11 = vpack.c.bf16 %v587_v7, %v585_v0  ;;  %v581_v13 = vmax.f32 %v573_v9, 0.0  ;;  %v583_v16 = vmax.f32 %v575_v19, 0.0 }
  0x40   : > { %818 = vmatpush1.bf16.msra.mxu0 %v1203_v50  ;;  %1133 = vmatpush1.bf16.msra.mxu1 %v1203_v50  ;;  %v589_v36 = vmin.f32 %v581_v13, 6.0  ;;  %v591_v23 = vmin.f32 %v583_v16, 6.0 }
  0x41   : > { %819 = vmatprep.subr.bf16.mxu0 %v1204_v35  ;;  %1118 = vmatprep.subr.bf16.mxu1 %v1204_v35 }
  0x42   : > { %v595_v26 = vpack.c.bf16 %v591_v23, %v589_v36 }
  0x44   : > { %820 = vmatpush1.bf16.msra.mxu0 %v1206_v62  ;;  %1134 = vmatpush1.bf16.msra.mxu1 %v1206_v62 }
  0x47   : > { %822 = vmatmul.mubr.bf16.vlgmr.msra.gmra.mrb[0].mxu0 %v593_v11  ;;  %832 = vmatmul.mubr.bf16.vlgmr.msra.gmra.mrb[0].mxu1 %v595_v26 }
 0x11a   : > { %v823_v33 = vpop.f32.mrb[0].mxu0  ;;  %v833_v25 = vpop.f32.mrb[0].mxu1 }
 0x11b   : > { %v854_v20 = vmul.f32 %v847_v12, %v823_v33  ;;  %v825_v21 = vpop.f32.mrb[1].mxu0  ;;  %v858_v43 = vmul.f32 %v847_v12, %v833_v25  ;;  %v835_v6 = vpop.f32.mrb[1].mxu1 }
 0x11c   : > { %v855_v24 = vmul.f32 %v851_v2, %v825_v21  ;;  %v827_v40 = vpop.f32.mrb[2].mxu0  ;;  %v859_v58 = vmul.f32 %v851_v2, %v835_v6  ;;  %v837_v17 = vpop.f32.mrb[2].mxu1 }
 0x11d   : > { %v874_v41 = vadd.f32 %v867_v49, %v854_v20  ;;  %v856_v37 = vmul.f32 %v847_v12, %v827_v40  ;;  %v829_v42 = vpop.f32.mrb[3].mxu0  ;;  %v878_v57 = vadd.f32 %v867_v49, %v858_v43  ;;  %v860_v46 = vmul.f32 %v847_v12, %v837_v17  ;;  %v839_v56 = vpop.f32.mrb[3].mxu1 }
 0x11e   : > { %v875_v51 = vadd.f32 %v871_v27, %v855_v24  ;;  %v857_v38 = vmul.f32 %v851_v2, %v829_v42  ;;  %v879_v45 = vadd.f32 %v871_v27, %v859_v58  ;;  %v861_v3 = vmul.f32 %v851_v2, %v839_v56 }
 0x11f   : > { %v882_v32 = vmax.f32 %v874_v41, 0.0  ;;  %v876_v28 = vadd.f32 %v867_v49, %v856_v37  ;;  %v886_v8 = vmax.f32 %v878_v57, 0.0  ;;  %v880_v39 = vadd.f32 %v867_v49, %v860_v46 }
 0x120   : > { %v883_v18 = vmax.f32 %v875_v51, 0.0  ;;  %v877_v47 = vadd.f32 %v871_v27, %v857_v38  ;;  %v887_v59 = vmax.f32 %v879_v45, 0.0  ;;  %v881_v14 = vadd.f32 %v871_v27, %v861_v3 }
 0x121   : > { %v890_v44 = vmin.f32 %v882_v32, 6.0  ;;  %v884_v63 = vmax.f32 %v876_v28, 0.0  ;;  %v894_v15 = vmin.f32 %v886_v8, 6.0  ;;  %v888_v29 = vmax.f32 %v880_v39, 0.0 }
 0x122   : > { %v891_v22 = vmin.f32 %v883_v18, 6.0  ;;  %v885_v54 = vmax.f32 %v877_v47, 0.0  ;;  %v895_v52 = vmin.f32 %v887_v59, 6.0  ;;  %v889_v53 = vmax.f32 %v881_v14, 0.0 }
 0x123   : > { %v892_v48 = vmin.f32 %v884_v63, 6.0  ;;  %v896_v35 = vmin.f32 %v888_v29, 6.0 }
 0x124   : > { %v1099_v10 = vpack.c.bf16 %v891_v22, %v890_v44  ;;  %v893_v50 = vmin.f32 %v885_v54, 6.0  ;;  %v1101_v55 = vpack.c.bf16 %v895_v52, %v894_v15  ;;  %v897_v34 = vmin.f32 %v889_v53, 6.0 }
 0x126   : > { %922 = vst [vmem:[%s346_s14] sm:$0xff] %v1099_v10  ;;  %v1100_v31 = vpack.c.bf16 %v893_v50, %v892_v48  ;;  %924 = vst [vmem:[%s346_s14 + $0x10] sm:$0xff] %v1101_v55  ;;  %v1102_v60 = vpack.c.bf16 %v897_v34, %v896_v35 }
 0x128   : > { %923 = vst [vmem:[%s346_s14 + $0x8] sm:$0xff] %v1100_v31  ;;  %925 = vst [vmem:[%s346_s14 + $0x18] sm:$0xff] %v1102_v60 }
 0x129 PF: > { %s17_s26 = sadd.s32 1, %s1229_s26   ;;  %s1632_s24 = smov %s1225_s25 }
 0x12a   : > { %p14_p6 = scmp.ge.s32.totalorder %s17_s26, 6   ;;  %s1633_s25 = smov %s1635_s27 }
 0x12c   :  { %16 = sbr.rel (!%p14_p6) target bundleno = 2 (0x2), region = 84 }

// kernel: forward.15
= control target key start
LH: loop header
LB: loop body
LE: loop exit
PB: predicated region body
PF: predicated region fallthrough
CT: control target
= control target key end

     0   :  { %s1976_s30 = smov 0   ;;  %s1978_s10 = smov 0   ;;  %s2659_s0 = inlined_call_operand.vmem [shape: bf16[16,128,256], index: 0, kind: input, shape index: {}]   ;;  %s2660_s1 = inlined_call_operand.vmem [shape: f32[4,4,256], index: 1, kind: input, shape index: {}]   ;;  %s2661_s2 = inlined_call_operand.vmem [shape: f32[1,256], index: 2, kind: input, shape index: {}]   ;;  %s2662_s3 = inlined_call_operand.vmem [shape: f32[1,256], index: 3, kind: input, shape index: {}]   ;;  %s2663_s4 = inlined_call_operand.vmem [shape: bf16[256,256], index: 4, kind: input, shape index: {}]   ;;  %s2664_s5 = inlined_call_operand.vmem [shape: f32[1,256], index: 5, kind: input, shape index: {}]   ;;  %s2665_s6 = inlined_call_operand.vmem [shape: f32[1,256], index: 6, kind: input, shape index: {}]   ;;  %s2666_s7 = inlined_call_operand.vmem [shape: bf16[256,128], index: 7, kind: input, shape index: {}]   ;;  %s2667_s8 = inlined_call_operand.vmem [shape: f32[1,128], index: 8, kind: input, shape index: {}]   ;;  %s2668_s9 = inlined_call_operand.vmem [shape: f32[4,128,128], index: 9, kind: output, shape index: {}]  }
   0x1   :  { %s1980_s11 = smov 0   ;;  %s1982_s12 = smov 0  }
   0x2   :  { %s1984_s13 = smov 0   ;;  %s1986_s14 = smov 0  }
   0x3   :  { %s1988_s15 = smov 0  }
   0x4 LB: > { %s28_s16 = sadd.s32 1, %s1916_s13  ;;  %s31_s17 = sadd.s32 1, %s1920_s14  ;;  %s1924_s15 = sphi %s1988_s15, %s19_s15   ;;  %s1920_s14 = sphi %s1986_s14, %s2677_s14   ;;  %s1916_s13 = sphi %s1984_s13, %s2676_s13   ;;  %s1912_s12 = sphi %s1982_s12, %s2675_s12   ;;  %s1908_s11 = sphi %s1980_s11, %s2674_s11   ;;  %s1904_s10 = sphi %s1978_s10, %s2673_s10   ;;  %s1900_s30 = sphi %s1976_s30, %s2672_s30  }
   0x5   : > { %p29_p0 = scmp.ge.s32.totalorder %s28_s16, 2  ;;  %p47_p1 = scmp.ne.s32.totalorder %s1904_s10, %s1900_s30 }
   0x6   : > { %p48_p2 = scmp.eq.s32.totalorder %s1924_s15, 0  ;;  %s40_s21 = sadd.s32 1, %s1904_s10 }
   0x7   : > { %s2679_s16 = smov (%p29_p0, %s28_s16), 0  ;;  %s2681_s17 = smov (!%p29_p0, %s31_s17), %s1920_s14 }
   0x8   : > { %p49_p3 = por %p48_p2, %p47_p1  ;;  %p33_p4 = scmp.ge.s32.totalorder %s2681_s17, 4 }
   0x9   : > { %s36_s18 = ssub.s32 %s1916_s13, %s2679_s16  ;;  %p1618_p6 = scmp.ge.s32.totalorder %s1924_s15, 8 }
   0xa   : > { %s2683_s17 = smov (%p33_p4, %s2681_s17), 0 }
   0xb   : > { %2670 = sst [smem:[#allocation3_spill]] %s2683_s17  ;;  %s35_s19 = ssub.s32 %s1920_s14, %s2683_s17 }
   0xc   : > { %s37_s20 = sor.u32 %s36_s18, %s35_s19  ;;  %295 = sbr.rel (%p1618_p6) target bundleno = 42 (0x2a), region = 44 }
   0xd   : > { %p38_p5 = scmp.eq.s32.totalorder %s37_s20, 0 }
   0xf   : > { %s2027_s22 = scalar_select %p38_p5, %s1904_s10, %s40_s21  }
  0x13   : > { %298 = sbr.rel (!%p49_p3) target bundleno = 42 (0x2a), region = 48  ;;  %s300_s23 = sand.u32 (%p49_p3), 1, %s1904_s10  }
  0x14   : > { %s1707_s24 = sshll.u32 (%p49_p3), %s1916_s13, 4  ;;  %s1619_s25 = sshll.u32 (%p49_p3), %s300_s23, 8 }
  0x15   : > { %s1708_s26 = sshll.u32 (%p49_p3), %s1920_s14, 7  ;;  %s2041_s19 = scalar_lea.vmem (%p49_p3), [#allocation2], %s1619_s25 }
  0x16   : > { %s307_s27 = sadd.s32 (%p49_p3), %s1708_s26, %s1707_s24 }
  0x17   : > { %s1624_s28 = sshll.u32 (%p49_p3), %s307_s27, 2 }
  0x18   : > { %s2036_s18 = scalar_lea.vmem (%p49_p3), %s2659_s0, %s1624_s28 }
  0x19   : > { %v399_v0 = vld [vmem:[%s2036_s18] sm:$0xff] (%p49_p3)  ;;  %v401_v1 = vld [vmem:[%s2036_s18 + $0x8] sm:$0xff] (%p49_p3)  ;;  %v403_v2 = vld [vmem:[%s2036_s18 + $0x10] sm:$0xff] (%p49_p3) }
  0x1a   : > { %400 = vst [vmem:[%s2041_s19] sm:$0xff] %v399_v0  ;;  %402 = vst [vmem:[%s2041_s19 + $0x8] sm:$0xff] %v401_v1  ;;  %v405_v3 = vld [vmem:[%s2036_s18 + $0x18] sm:$0xff]  ;;  %v407_v4 = vld [vmem:[%s2036_s18 + $0x20] sm:$0xff] }
  0x1b   : > { %404 = vst [vmem:[%s2041_s19 + $0x10] sm:$0xff] %v403_v2  ;;  %v409_v5 = vld [vmem:[%s2036_s18 + $0x28] sm:$0xff]  ;;  %406 = vst [vmem:[%s2041_s19 + $0x18] sm:$0xff] %v405_v3  ;;  %v411_v6 = vld [vmem:[%s2036_s18 + $0x30] sm:$0xff] }
  0x1c   : > { %408 = vst [vmem:[%s2041_s19 + $0x20] sm:$0xff] %v407_v4  ;;  %410 = vst [vmem:[%s2041_s19 + $0x28] sm:$0xff] %v409_v5  ;;  %v413_v7 = vld [vmem:[%s2036_s18 + $0x38] sm:$0xff]  ;;  %v415_v8 = vld [vmem:[%s2036_s18 + $0x80] sm:$0xff] }
  0x1d   : > { %412 = vst [vmem:[%s2041_s19 + $0x30] sm:$0xff] %v411_v6  ;;  %414 = vst [vmem:[%s2041_s19 + $0x38] sm:$0xff] %v413_v7  ;;  %v417_v9 = vld [vmem:[%s2036_s18 + $0x88] sm:$0xff]  ;;  %v419_v10 = vld [vmem:[%s2036_s18 + $0x90] sm:$0xff] }
  0x1e   : > { %416 = vst [vmem:[%s2041_s19 + $0x40] sm:$0xff] %v415_v8  ;;  %v421_v11 = vld [vmem:[%s2036_s18 + $0x98] sm:$0xff]  ;;  %418 = vst [vmem:[%s2041_s19 + $0x48] sm:$0xff] %v417_v9  ;;  %v423_v12 = vld [vmem:[%s2036_s18 + $0xa0] sm:$0xff] }
  0x1f   : > { %420 = vst [vmem:[%s2041_s19 + $0x50] sm:$0xff] %v419_v10  ;;  %422 = vst [vmem:[%s2041_s19 + $0x58] sm:$0xff] %v421_v11  ;;  %v425_v13 = vld [vmem:[%s2036_s18 + $0xa8] sm:$0xff]  ;;  %v427_v14 = vld [vmem:[%s2036_s18 + $0xb0] sm:$0xff] }
  0x20   : > { %424 = vst [vmem:[%s2041_s19 + $0x60] sm:$0xff] %v423_v12  ;;  %426 = vst [vmem:[%s2041_s19 + $0x68] sm:$0xff] %v425_v13  ;;  %v429_v15 = vld [vmem:[%s2036_s18 + $0xb8] sm:$0xff]  ;;  %v431_v16 = vld [vmem:[%s2036_s18 + $0x100] sm:$0xff] }
  0x21   : > { %428 = vst [vmem:[%s2041_s19 + $0x70] sm:$0xff] %v427_v14  ;;  %v433_v17 = vld [vmem:[%s2036_s18 + $0x108] sm:$0xff]  ;;  %430 = vst [vmem:[%s2041_s19 + $0x78] sm:$0xff] %v429_v15  ;;  %v435_v18 = vld [vmem:[%s2036_s18 + $0x110] sm:$0xff] }
  0x22   : > { %432 = vst [vmem:[%s2041_s19 + $0x80] sm:$0xff] %v431_v16  ;;  %434 = vst [vmem:[%s2041_s19 + $0x88] sm:$0xff] %v433_v17  ;;  %v437_v19 = vld [vmem:[%s2036_s18 + $0x118] sm:$0xff]  ;;  %v439_v20 = vld [vmem:[%s2036_s18 + $0x120] sm:$0xff] }
  0x23   : > { %436 = vst [vmem:[%s2041_s19 + $0x90] sm:$0xff] %v435_v18  ;;  %438 = vst [vmem:[%s2041_s19 + $0x98] sm:$0xff] %v437_v19  ;;  %v441_v21 = vld [vmem:[%s2036_s18 + $0x128] sm:$0xff]  ;;  %v443_v22 = vld [vmem:[%s2036_s18 + $0x130] sm:$0xff] }
  0x24   : > { %440 = vst [vmem:[%s2041_s19 + $0xa0] sm:$0xff] %v439_v20  ;;  %v445_v23 = vld [vmem:[%s2036_s18 + $0x138] sm:$0xff]  ;;  %442 = vst [vmem:[%s2041_s19 + $0xa8] sm:$0xff] %v441_v21  ;;  %v447_v24 = vld [vmem:[%s2036_s18 + $0x180] sm:$0xff] }
  0x25   : > { %444 = vst [vmem:[%s2041_s19 + $0xb0] sm:$0xff] %v443_v22  ;;  %446 = vst [vmem:[%s2041_s19 + $0xb8] sm:$0xff] %v445_v23  ;;  %v449_v25 = vld [vmem:[%s2036_s18 + $0x188] sm:$0xff]  ;;  %v451_v26 = vld [vmem:[%s2036_s18 + $0x190] sm:$0xff] }
  0x26   : > { %448 = vst [vmem:[%s2041_s19 + $0xc0] sm:$0xff] %v447_v24  ;;  %450 = vst [vmem:[%s2041_s19 + $0xc8] sm:$0xff] %v449_v25  ;;  %v453_v27 = vld [vmem:[%s2036_s18 + $0x198] sm:$0xff]  ;;  %v455_v28 = vld [vmem:[%s2036_s18 + $0x1a0] sm:$0xff] }
  0x27   : > { %452 = vst [vmem:[%s2041_s19 + $0xd0] sm:$0xff] %v451_v26  ;;  %v457_v29 = vld [vmem:[%s2036_s18 + $0x1a8] sm:$0xff]  ;;  %454 = vst [vmem:[%s2041_s19 + $0xd8] sm:$0xff] %v453_v27  ;;  %v459_v30 = vld [vmem:[%s2036_s18 + $0x1b0] sm:$0xff] }
  0x28   : > { %456 = vst [vmem:[%s2041_s19 + $0xe0] sm:$0xff] %v455_v28  ;;  %458 = vst [vmem:[%s2041_s19 + $0xe8] sm:$0xff] %v457_v29  ;;  %v461_v31 = vld [vmem:[%s2036_s18 + $0x1b8] sm:$0xff] }
  0x29   : > { %460 = vst [vmem:[%s2041_s19 + $0xf0] sm:$0xff] %v459_v30  ;;  %462 = vst [vmem:[%s2041_s19 + $0xf8] sm:$0xff] %v461_v31 }
  0x2a PF: > { %p1625_p7 = scmp.ge.s32.totalorder %s1924_s15, 1  ;;  %p475_p8 = scmp.lt.s32.totalorder %s1924_s15, 9 }
  0x2c   : > { %p476_p9 = pnand %p1625_p7, %p475_p8 }
  0x2d   : > { %v1806_v32 = vld [vmem:[%s2663_s4 + $0x4] ss:$8 sps:$4 sm:$0xff] (!%p476_p9)   ;;  %v1808_v33 = vld [vmem:[%s2663_s4] ss:$8 sps:$4 sm:$0xff] (!%p476_p9)   ;;  %v1809_v34 = vld [vmem:[%s2663_s4 + $0x14] ss:$8 sps:$4 sm:$0xff] (!%p476_p9)   ;;  %v570_v39 = vlaneseq (!%p476_p9) }
  0x2e   : > { %479 = sbr.rel (%p476_p9) target bundleno = 580 (0x244), region = 90  ;;  %1133 = vmatprep.subr.bf16.mxu0 (!%p476_p9), %v1806_v32  ;;  %v1811_v35 = vld [vmem:[%s2663_s4 + $0x10] ss:$8 sps:$4 sm:$0xff] (!%p476_p9)   ;;  %v1812_v36 = vld [vmem:[%s2663_s4 + $0x24] ss:$8 sps:$4 sm:$0xff] (!%p476_p9)   ;;  %p528_p10 = scmp.lt.s32.totalorder (!%p476_p9), %s1912_s12, 3 }
  0x2f   : > { %1134 = vmatpush1.bf16.msra.mxu0 (!%p476_p9), %v1808_v33  ;;  %v1814_v37 = vld [vmem:[%s2663_s4 + $0x20] ss:$8 sps:$4 sm:$0xff] (!%p476_p9)   ;;  %v1815_v38 = vld [vmem:[%s2663_s4 + $0x34] ss:$8 sps:$4 sm:$0xff] (!%p476_p9)   ;;  %v1817_v40 = vld [vmem:[%s2663_s4 + $0x30] ss:$8 sps:$4 sm:$0xff] (!%p476_p9)  }
  0x30   : > { %1135 = vmatprep.subr.bf16.mxu0 (!%p476_p9), %v1809_v34  ;;  %v1818_v41 = vld [vmem:[%s2663_s4 + $0x44] ss:$8 sps:$4 sm:$0xff] (!%p476_p9)   ;;  %s482_s26 = sand.u32 (!%p476_p9), 1, %s1900_s30   ;;  %v2138_v42 = vshrl.u32 (!%p476_p9), %v570_v39, 7  ;;  %v1820_v43 = vld [vmem:[%s2663_s4 + $0x40] ss:$8 sps:$4 sm:$0xff] (!%p476_p9)  }
  0x31   : > { %s1626_s29 = sshll.u32 (!%p476_p9), %s482_s26, 8  ;;  %v1821_v44 = vld [vmem:[%s2663_s4 + $0x54] ss:$8 sps:$4 sm:$0xff] (!%p476_p9)   ;;  %v1823_v47 = vld [vmem:[%s2663_s4 + $0x50] ss:$8 sps:$4 sm:$0xff] (!%p476_p9)   ;;  %s1629_s17 = sshll.u32 (!%p476_p9), %s1908_s11, 3 }
  0x32   : > { %v576_v45 = vsub.s32 (!%p476_p9), 4, %v2138_v42  ;;  %v651_v46 = vsub.s32 (!%p476_p9), 5, %v2138_v42  ;;  %v1824_v48 = vld [vmem:[%s2663_s4 + $0x64] ss:$8 sps:$4 sm:$0xff] (!%p476_p9)   ;;  %v2159_v49 = vsub.s32 (!%p476_p9), 0, %v2138_v42  ;;  %v2162_v50 = vsub.s32 (!%p476_p9), 1, %v2138_v42 }
  0x33   : > { %1136 = vmatpush1.bf16.msra.mxu0 (!%p476_p9), %v1811_v35  ;;  %s2166_s27 = scalar_lea.vmem (!%p476_p9), [#allocation2], %s1626_s29  ;;  %v2172_v53 = vsub.s32 (!%p476_p9), 2, %v2138_v42  ;;  %v726_v54 = vsub.s32 (!%p476_p9), 6, %v2138_v42  ;;  %v2176_v55 = vsub.s32 (!%p476_p9), 3, %v2138_v42  ;;  %v801_v56 = vsub.s32 (!%p476_p9), 7, %v2138_v42  ;;  %p536_p11 = scmp.lt.s32.totalorder (!%p476_p9), %s1629_s17, 15 }
  0x34   : > { %1137 = vmatprep.subr.bf16.mxu0 (!%p476_p9), %v1812_v36  ;;  %v2169_v52 = vld [vmem:[%s2166_s27] sm:$0xff] (!%p476_p9)  ;;  %v2180_v57 = vld [vmem:[%s2166_s27 + $0x8] sm:$0xff] (!%p476_p9)  ;;  %v1827_v7 = vld [vmem:[%s2663_s4 + $0x74] ss:$8 sps:$4 sm:$0xff] (!%p476_p9)  }
  0x35   : > { %s2685_s12 = smov (!%p528_p10, %s1912_s12), 3  ;;  %v553_v58 = vunpack.c.l.bf16 %v2169_v52  ;;  %v554_v59 = vunpack.c.h.bf16 %v2169_v52  ;;  %v2186_v61 = vld [vmem:[%s2166_s27 + $0x40] sm:$0xff]  ;;  %v2189_v62 = vld [vmem:[%s2166_s27 + $0x48] sm:$0xff]  ;;  %v555_v1 = vunpack.c.l.bf16 %v2180_v57  ;;  %v556_v2 = vunpack.c.h.bf16 %v2180_v57  ;;  %v1829_v24 = vld [vmem:[%s2663_s4 + $0x70] ss:$8 sps:$4 sm:$0xff]   ;;  %s2687_s17 = smov (!%p536_p11, %s1629_s17), 15 }
  0x36   : > { %s1709_s18 = sshll.u32 %s2685_s12, 3  ;;  %v1826_v0 = vld [vmem:[%s2663_s4 + $0x60] ss:$8 sps:$4 sm:$0xff]   ;;  %v629_v3 = vunpack.c.l.bf16 %v2186_v61  ;;  %v630_v4 = vunpack.c.h.bf16 %v2186_v61  ;;  %v631_v9 = vunpack.c.l.bf16 %v2189_v62  ;;  %v632_v10 = vunpack.c.h.bf16 %v2189_v62  ;;  %v1830_v29 = vld [vmem:[%s2663_s4 + $0x84] ss:$8 sps:$4 sm:$0xff]   ;;  %v2294_v62 = vld [vmem:[%s2166_s27 + $0x18] sm:$0xff] }
  0x37   : > { %1138 = vmatpush1.bf16.msra.mxu0 %v1814_v37  ;;  %s532_s23 = scalar_lea.vmem %s2660_s1, %s1709_s18  ;;  %v2200_v5 = vld [vmem:[%s2166_s27 + $0x80] sm:$0xff]  ;;  %v2203_v6 = vld [vmem:[%s2166_s27 + $0x88] sm:$0xff]  ;;  %s1630_s20 = sshll.u32 %s2685_s12, 4 }
  0x38   : > { %1139 = vmatprep.subr.bf16.mxu0 %v1815_v38  ;;  %v2164_v51 = vld [vmem:[%s532_s23] sm:$0xff]  ;;  %v2220_v13 = vld [vmem:[%s2166_s27 + $0xc8] sm:$0xff]  ;;  %v704_v14 = vunpack.c.l.bf16 %v2200_v5  ;;  %v705_v15 = vunpack.c.h.bf16 %v2200_v5  ;;  %v706_v16 = vunpack.c.l.bf16 %v2203_v6  ;;  %v707_v17 = vunpack.c.h.bf16 %v2203_v6  ;;  %v2306_v5 = vld [vmem:[%s2166_s27 + $0x50] sm:$0xff]  ;;  %s539_s21 = sadd.s32 %s1630_s20, %s2687_s17 }
  0x39   : > { %v577_v60 = vrot.slane %v2164_v51, %v576_v45  ;;  %v652_v63 = vrot.slane %v2164_v51, %v651_v46  ;;  %v2217_v12 = vld [vmem:[%s2166_s27 + $0xc0] sm:$0xff]  ;;  %v727_v25 = vrot.slane %v2164_v51, %v726_v54  ;;  %v781_v28 = vunpack.c.l.bf16 %v2220_v13  ;;  %s1631_s23 = sshll.u32 %s539_s21, 3 }
  0x3a   : > { %v845_v22 = vld [vmem:[%s2661_s2] sm:$0x3]  ;;  %v779_v26 = vunpack.c.l.bf16 %v2217_v12  ;;  %v780_v27 = vunpack.c.h.bf16 %v2217_v12  ;;  %v782_v32 = vunpack.c.h.bf16 %v2220_v13  ;;  %v802_v33 = vrot.slane %v2164_v51, %v801_v56 }
  0x3b   : > { %1140 = vmatpush1.bf16.msra.mxu0 %v1817_v40  ;;  %v2209_v8 = vrot.slane %v577_v60, %v2159_v49  ;;  %v2214_v11 = vrot.slane %v652_v63, %v2162_v50  ;;  %v873_v23 = vld [vmem:[%s2662_s3] sm:$0x3]  ;;  %v2249_v34 = vrot.slane %v727_v25, %v2172_v53  ;;  %v2252_v35 = vrot.slane %v845_v22, %v2159_v49  ;;  %v2291_v60 = vld [vmem:[%s2166_s27 + $0x10] sm:$0xff] }
  0x3c   : > { %1141 = vmatprep.subr.bf16.mxu0 %v1818_v41  ;;  %v2255_v36 = vrot.slane %v845_v22, %v2162_v50  ;;  %v2258_v37 = vrot.slane %v873_v23, %v2159_v49  ;;  %v2261_v38 = vrot.slane %v802_v33, %v2176_v55  ;;  %v2264_v39 = vrot.slane %v873_v23, %v2162_v50  ;;  %v1832_v42 = vld [vmem:[%s2663_s4 + $0x80] ss:$8 sps:$4 sm:$0xff]  }
  0x3d   : > { %v589_v18 = vmul.f32 %v2209_v8, %v554_v59  ;;  %v591_v19 = vmul.f32 %v2209_v8, %v556_v2  ;;  %v664_v20 = vmul.f32 %v2214_v11, %v630_v4  ;;  %v666_v21 = vmul.f32 %v2214_v11, %v632_v10  ;;  %v1854_v6 = vld [vmem:[%s2666_s7 + $0x40] sm:$0xff]   ;;  %v1856_v23 = vld [vmem:[%s2666_s7 + $0x48] sm:$0xff]  }
  0x3e   : > { %v573_v40 = vrot.slane %v2164_v51, %v2159_v49  ;;  %v648_v41 = vrot.slane %v2164_v51, %v2162_v50  ;;  %v723_v45 = vrot.slane %v2164_v51, %v2172_v53  ;;  %v798_v46 = vrot.slane %v2164_v51, %v2176_v55  ;;  %v1835_v51 = vld [vmem:[%s2663_s4 + $0x90] ss:$8 sps:$4 sm:$0xff]   ;;  %v1855_v13 = vld [vmem:[%s2666_s7] sm:$0xff]   ;;  %1710 = vmatprep.subr.bf16.mxu1 %v1854_v6 }
  0x3f   : > { %1142 = vmatpush1.bf16.msra.mxu0 %v1820_v43  ;;  %v680_v30 = vadd.f32 %v664_v20, %v589_v18  ;;  %v682_v31 = vadd.f32 %v666_v21, %v591_v19  ;;  %v739_v43 = vmul.f32 %v2249_v34, %v705_v15  ;;  %v816_v54 = vmul.f32 %v2261_v38, %v782_v32  ;;  %v2335_v18 = vld [vmem:[%s2166_s27 + $0x90] sm:$0xff]  ;;  %v2338_v19 = vld [vmem:[%s2166_s27 + $0x98] sm:$0xff]  ;;  %v1838_v20 = vld [vmem:[%s2663_s4 + $0xa0] ss:$8 sps:$4 sm:$0xff]  }
  0x40   : > { %1143 = vmatprep.subr.bf16.mxu0 %v1821_v44  ;;  %v741_v44 = vmul.f32 %v2249_v34, %v707_v17  ;;  %v2285_v56 = vrot.slane %v573_v40, %v2159_v49  ;;  %v2288_v59 = vrot.slane %v648_v41, %v2162_v50  ;;  %v2300_v2 = vrot.slane %v723_v45, %v2172_v53  ;;  %v2330_v17 = vld [vmem:[%s2166_s27 + $0x58] sm:$0xff]  ;;  %v2363_v40 = vld [vmem:[%s2166_s27 + $0xd0] sm:$0xff]  ;;  %v1842_v6 = vld [vmem:[%s2663_s4 + $0xc4] ss:$8 sps:$4 sm:$0xff]  }
  0x41   : > { %v755_v63 = vadd.f32 %v739_v43, %v680_v30  ;;  %v2303_v4 = vrot.slane %v798_v46, %v2176_v55  ;;  %v558_v21 = vunpack.c.h.bf16 %v2291_v60  ;;  %v560_v22 = vunpack.c.h.bf16 %v2294_v62  ;;  %1711 = vmatpush3.bf16.msra.mxu1 %v1855_v13  ;;  %v2366_v41 = vld [vmem:[%s2166_s27 + $0xd8] sm:$0xff] }
  0x42   : > { %v588_v10 = vmul.f32 %v2285_v56, %v553_v58  ;;  %v590_v53 = vmul.f32 %v2285_v56, %v555_v1  ;;  %v663_v55 = vmul.f32 %v2288_v59, %v629_v3  ;;  %v665_v12 = vmul.f32 %v2288_v59, %v631_v9  ;;  %1712 = vmatprep.subr.bf16.mxu1 %v1856_v23 }
  0x43   : > { %1144 = vmatpush1.bf16.msra.mxu0 %v1823_v47  ;;  %v1833_v47 = vld [vmem:[%s2663_s4 + $0x94] ss:$8 sps:$4 sm:$0xff]   ;;  %v738_v58 = vmul.f32 %v2300_v2, %v704_v14  ;;  %v740_v57 = vmul.f32 %v2300_v2, %v706_v16  ;;  %v813_v3 = vmul.f32 %v2303_v4, %v779_v26  ;;  %v815_v9 = vmul.f32 %v2303_v4, %v781_v28 }
  0x44   : > { %1145 = vmatprep.subr.bf16.mxu0 %v1824_v48  ;;  %v814_v48 = vmul.f32 %v2261_v38, %v780_v27  ;;  %v679_v61 = vadd.f32 %v663_v55, %v588_v10  ;;  %v681_v1 = vadd.f32 %v665_v12, %v590_v53  ;;  %v634_v27 = vunpack.c.h.bf16 %v2306_v5  ;;  %v1860_v12 = vld [vmem:[%s2666_s7 + $0x58] sm:$0xff]  }
  0x45   : > { %v636_v28 = vunpack.c.h.bf16 %v2330_v17  ;;  %v593_v32 = vmul.f32 %v2209_v8, %v558_v21  ;;  %v595_v33 = vmul.f32 %v2209_v8, %v560_v22  ;;  %v557_v22 = vunpack.c.l.bf16 %v2291_v60  ;;  %v1862_v60 = vld [vmem:[%s2666_s7 + $0x60] sm:$0xff]  }
  0x46   : > { %v830_v52 = vadd.f32 %v814_v48, %v755_v63  ;;  %v754_v25 = vadd.f32 %v738_v58, %v679_v61  ;;  %v756_v26 = vadd.f32 %v740_v57, %v681_v1  ;;  %v668_v45 = vmul.f32 %v2214_v11, %v634_v27  ;;  %v1841_v48 = vld [vmem:[%s2663_s4 + $0xb0] ss:$8 sps:$4 sm:$0xff]  }
  0x47   : > { %1146 = vmatpush1.bf16.msra.mxu0 %v1826_v0  ;;  %v757_v0 = vadd.f32 %v741_v44, %v682_v31  ;;  %v670_v46 = vmul.f32 %v2214_v11, %v636_v28  ;;  %v709_v63 = vunpack.c.h.bf16 %v2335_v18  ;;  %v784_v1 = vunpack.c.h.bf16 %v2363_v40 }
  0x48   : > { %1147 = vmatprep.subr.bf16.mxu0 %v1827_v7  ;;  %v1836_v7 = vld [vmem:[%s2663_s4 + $0xa4] ss:$8 sps:$4 sm:$0xff]   ;;  %v858_v14 = vmul.f32 %v2255_v36, %v830_v52  ;;  %v829_v43 = vadd.f32 %v813_v3, %v754_v25  ;;  %v831_v44 = vadd.f32 %v815_v9, %v756_v26  ;;  %v684_v53 = vadd.f32 %v668_v45, %v593_v32  ;;  %v1861_v9 = vld [vmem:[%s2666_s7 + $0x18] sm:$0xff]  }
  0x49   : > { %v832_v15 = vadd.f32 %v816_v54, %v757_v0  ;;  %v711_v0 = vunpack.c.h.bf16 %v2338_v19  ;;  %v686_v55 = vadd.f32 %v670_v46, %v595_v33  ;;  %v786_v3 = vunpack.c.h.bf16 %v2366_v41 }
  0x4a   : > { %v886_v30 = vadd.f32 %v2264_v39, %v858_v14  ;;  %v859_v10 = vmul.f32 %v2252_v35, %v831_v44  ;;  %v818_v25 = vmul.f32 %v2261_v38, %v784_v1  ;;  %v559_v27 = vunpack.c.l.bf16 %v2294_v62 }
  0x4b   : > { %1148 = vmatpush1.bf16.msra.mxu0 %v1829_v24  ;;  %v860_v16 = vmul.f32 %v2255_v36, %v832_v15  ;;  %v1839_v24 = vld [vmem:[%s2663_s4 + $0xb4] ss:$8 sps:$4 sm:$0xff]   ;;  %v743_v15 = vmul.f32 %v2249_v34, %v709_v63  ;;  %v745_v58 = vmul.f32 %v2249_v34, %v711_v0  ;;  %v820_v26 = vmul.f32 %v2261_v38, %v786_v3 }
  0x4c   : > { %1149 = vmatprep.subr.bf16.mxu0 %v1830_v29  ;;  %v1857_v29 = vld [vmem:[%s2666_s7 + $0x8] sm:$0xff]   ;;  %v902_v54 = vmax.f32 %v886_v30, 0.0  ;;  %v887_v61 = vadd.f32 %v2258_v37, %v859_v10  ;;  %v592_v28 = vmul.f32 %v2285_v56, %v557_v22  ;;  %v635_v30 = vunpack.c.l.bf16 %v2330_v17 }
  0x4d   : > { %v888_v31 = vadd.f32 %v2264_v39, %v860_v16  ;;  %1713 = vmatpush3.bf16.msra.mxu1 %v1857_v29  ;;  %v759_v16 = vadd.f32 %v743_v15, %v684_v53  ;;  %v761_v21 = vadd.f32 %v745_v58, %v686_v55  ;;  %v633_v29 = vunpack.c.l.bf16 %v2306_v5 }
  0x4e   : > { %v918_v13 = vmin.f32 %v902_v54, 6.0  ;;  %v594_v5 = vmul.f32 %v2285_v56, %v559_v27  ;;  %v708_v44 = vunpack.c.l.bf16 %v2335_v18  ;;  %v2428_v54 = vld [vmem:[%s2166_s27 + $0x20] sm:$0xff]  ;;  %v1847_v18 = vld [vmem:[%s2663_s4 + $0xd0] ss:$8 sps:$4 sm:$0xff]  }
  0x4f   : > { %1150 = vmatpush1.bf16.msra.mxu0 %v1832_v42  ;;  %v1858_v42 = vld [vmem:[%s2666_s7 + $0x50] sm:$0xff]   ;;  %v834_v33 = vadd.f32 %v818_v25, %v759_v16  ;;  %v667_v17 = vmul.f32 %v2288_v59, %v633_v29  ;;  %v562_v15 = vunpack.c.h.bf16 %v2428_v54 }
  0x50   : > { %1151 = vmatprep.subr.bf16.mxu0 %v1833_v47  ;;  %v1859_v47 = vld [vmem:[%s2666_s7 + $0x10] sm:$0xff]   ;;  %1714 = vmatprep.subr.bf16.mxu1 %v1858_v42  ;;  %v836_v42 = vadd.f32 %v820_v26, %v761_v21 }
  0x51   : > { %1715 = vmatpush3.bf16.msra.mxu1 %v1859_v47  ;;  %v862_v46 = vmul.f32 %v2255_v36, %v834_v33  ;;  %v683_v63 = vadd.f32 %v667_v17, %v592_v28  ;;  %v597_v21 = vmul.f32 %v2209_v8, %v562_v15  ;;  %v1851_v25 = vld [vmem:[%s2663_s4 + $0xf4] ss:$8 sps:$4 sm:$0xff]  }
  0x52   : > { %1716 = vmatprep.subr.bf16.mxu1 %v1860_v12  ;;  %v864_v47 = vmul.f32 %v2255_v36, %v836_v42  ;;  %v785_v12 = vunpack.c.l.bf16 %v2366_v41  ;;  %v1850_v41 = vld [vmem:[%s2663_s4 + $0xe0] ss:$8 sps:$4 sm:$0xff]  }
  0x53   : > { %1152 = vmatpush1.bf16.msra.mxu0 %v1835_v51  ;;  %v904_v51 = vmax.f32 %v888_v31, 0.0  ;;  %v1845_v31 = vld [vmem:[%s2663_s4 + $0xd4] ss:$8 sps:$4 sm:$0xff]   ;;  %v890_v10 = vadd.f32 %v2264_v39, %v862_v46  ;;  %v1653_v42 = vld [vmem:[%s2166_s27 + $0xe8] sm:$0xff]  ;;  %v1853_v46 = vld [vmem:[%s2663_s4 + $0xf0] ss:$8 sps:$4 sm:$0xff]  }
  0x54   : > { %1153 = vmatprep.subr.bf16.mxu0 %v1836_v7  ;;  %v857_v7 = vmul.f32 %v2252_v35, %v829_v43  ;;  %v669_v43 = vmul.f32 %v2288_v59, %v635_v30  ;;  %v892_v53 = vadd.f32 %v2264_v39, %v864_v47 }
  0x55   : > { %v920_v52 = vmin.f32 %v904_v51, 6.0  ;;  %v2431_v51 = vld [vmem:[%s2166_s27 + $0x28] sm:$0xff]  ;;  %1717 = vmatpush3.bf16.msra.mxu1 %v1861_v9  ;;  %v819_v9 = vmul.f32 %v2303_v4, %v785_v12 }
  0x56   : > { %v885_v57 = vadd.f32 %v2258_v37, %v857_v7  ;;  %v685_v0 = vadd.f32 %v669_v43, %v594_v5  ;;  %v783_v7 = vunpack.c.l.bf16 %v2363_v40  ;;  %1718 = vmatprep.subr.bf16.mxu1 %v1862_v60  ;;  %v564_v58 = vunpack.c.h.bf16 %v2431_v51 }
  0x57   : > { %1154 = vmatpush1.bf16.msra.mxu0 %v1838_v20  ;;  %v1844_v20 = vld [vmem:[%s2663_s4 + $0xc0] ss:$8 sps:$4 sm:$0xff]   ;;  %v934_v14 = vpack.c.bf16 %v920_v52, %v918_v13  ;;  %v908_v1 = vmax.f32 %v892_v53, 0.0  ;;  %v563_v12 = vunpack.c.l.bf16 %v2431_v51 }
  0x58   : > { %1155 = vmatprep.subr.bf16.mxu0 %v1839_v24  ;;  %v901_v23 = vmax.f32 %v885_v57, 0.0  ;;  %v903_v24 = vmax.f32 %v887_v61, 0.0  ;;  %v1636_v13 = vld [vmem:[%s2166_s27 + $0x60] sm:$0xff]  ;;  %v817_v40 = vmul.f32 %v2303_v4, %v783_v7  ;;  %v2450_v57 = vld [vmem:[%s2166_s27 + $0x68] sm:$0xff]  ;;  %v906_v61 = vmax.f32 %v890_v10, 0.0 }
  0x59   : > { %1165 = vmatprep.mubr.bf16.mxu0 %v934_v14  ;;  %v2457_v14 = vld [vmem:[%s2166_s27 + $0xa8] sm:$0xff]  ;;  %v599_v22 = vmul.f32 %v2209_v8, %v564_v58  ;;  %v924_v27 = vmin.f32 %v908_v1, 6.0  ;;  %v640_v29 = vunpack.c.h.bf16 %v2450_v57  ;;  %v790_v7 = vunpack.c.h.bf16 %v1653_v42 }
  0x5a   : > { %v2414_v32 = vmin.f32 %v901_v23, 6.0  ;;  %v2416_v62 = vmin.f32 %v903_v24, 6.0  ;;  %v638_v23 = vunpack.c.h.bf16 %v1636_v13  ;;  %v2465_v24 = vld [vmem:[%s2166_s27 + $0xe0] sm:$0xff]  ;;  %v922_v26 = vmin.f32 %v906_v61, 6.0 }
  0x5b   : > { %1156 = vmatpush1.bf16.msra.mxu0 %v1841_v48  ;;  %v710_v48 = vunpack.c.l.bf16 %v2338_v19  ;;  %v1848_v19 = vld [vmem:[%s2663_s4 + $0xe4] ss:$8 sps:$4 sm:$0xff]   ;;  %v715_v33 = vunpack.c.h.bf16 %v2457_v14  ;;  %v674_v43 = vmul.f32 %v2214_v11, %v640_v29  ;;  %v824_v15 = vmul.f32 %v2261_v38, %v790_v7  ;;  %v552_v29 = vld [vmem:[%s2166_s27 + $0x38] sm:$0xff] }
  0x5c   : > { %1157 = vmatprep.subr.bf16.mxu0 %v1842_v6  ;;  %v933_v45 = vpack.c.bf16 %v2416_v62, %v2414_v32  ;;  %v742_v6 = vmul.f32 %v2300_v2, %v708_v44  ;;  %v672_v60 = vmul.f32 %v2214_v11, %v638_v23  ;;  %v936_v5 = vpack.c.bf16 %v924_v27, %v922_v26  ;;  %v1638_v32 = vld [vmem:[%s2166_s27 + $0x70] sm:$0xff] }
  0x5d   : > { %v744_v55 = vmul.f32 %v2300_v2, %v710_v48  ;;  %v788_v44 = vunpack.c.h.bf16 %v2465_v24  ;;  %v637_v58 = vunpack.c.l.bf16 %v1636_v13  ;;  %v714_v13 = vunpack.c.l.bf16 %v2457_v14 }
  0x5e   : > { %v758_v52 = vadd.f32 %v742_v6, %v683_v63  ;;  %v688_v48 = vadd.f32 %v672_v60, %v597_v21  ;;  %v749_v63 = vmul.f32 %v2249_v34, %v715_v33  ;;  %v690_v6 = vadd.f32 %v674_v43, %v599_v22  ;;  %v1639_v33 = vld [vmem:[%s2166_s27 + $0x78] sm:$0xff] }
  0x5f   : > { %1158 = vmatpush1.bf16.msra.mxu0 %v1844_v20  ;;  %v760_v3 = vadd.f32 %v744_v55, %v685_v0  ;;  %v2454_v20 = vld [vmem:[%s2166_s27 + $0xa0] sm:$0xff]  ;;  %v561_v55 = vunpack.c.l.bf16 %v2428_v54  ;;  %v639_v54 = vunpack.c.l.bf16 %v2450_v57  ;;  %v671_v51 = vmul.f32 %v2288_v59, %v637_v58 }
  0x60   : > { %1159 = vmatprep.subr.bf16.mxu0 %v1845_v31  ;;  %v833_v16 = vadd.f32 %v817_v40, %v758_v52  ;;  %v713_v31 = vunpack.c.h.bf16 %v2454_v20  ;;  %v765_v40 = vadd.f32 %v749_v63, %v690_v6  ;;  %v712_v22 = vunpack.c.l.bf16 %v2454_v20  ;;  %v1647_v63 = vld [vmem:[%s2166_s27 + $0xb8] sm:$0xff] }
  0x61   : > { %v835_v28 = vadd.f32 %v819_v9, %v760_v3  ;;  %v596_v3 = vmul.f32 %v2285_v56, %v561_v55  ;;  %v598_v9 = vmul.f32 %v2285_v56, %v563_v12  ;;  %v787_v23 = vunpack.c.l.bf16 %v2465_v24 }
  0x62   : > { %v861_v30 = vmul.f32 %v2252_v35, %v833_v16  ;;  %v840_v16 = vadd.f32 %v824_v15, %v765_v40  ;;  %v673_v27 = vmul.f32 %v2288_v59, %v639_v54  ;;  %v746_v14 = vmul.f32 %v2300_v2, %v712_v22  ;;  %v1655_v40 = vld [vmem:[%s2166_s27 + $0xf8] sm:$0xff] }
  0x63   : > { %1160 = vmatpush1.bf16.msra.mxu0 %v1847_v18  ;;  %v863_v17 = vmul.f32 %v2252_v35, %v835_v28  ;;  %v747_v18 = vmul.f32 %v2249_v34, %v713_v31  ;;  %v687_v28 = vadd.f32 %v671_v51, %v596_v3  ;;  %v748_v24 = vmul.f32 %v2300_v2, %v714_v13 }
  0x64   : > { %1161 = vmatprep.subr.bf16.mxu0 %v1848_v19  ;;  %v889_v47 = vadd.f32 %v2258_v37, %v861_v30  ;;  %v822_v19 = vmul.f32 %v2261_v38, %v788_v44  ;;  %v868_v57 = vmul.f32 %v2255_v36, %v840_v16  ;;  %v789_v30 = vunpack.c.l.bf16 %v1653_v42 }
  0x65   : > { %v891_v0 = vadd.f32 %v2258_v37, %v863_v17  ;;  %v763_v53 = vadd.f32 %v747_v18, %v688_v48  ;;  %v821_v60 = vmul.f32 %v2303_v4, %v787_v23  ;;  %v568_v44 = vunpack.c.h.bf16 %v552_v29 }
  0x66   : > { %v905_v10 = vmax.f32 %v889_v47, 0.0  ;;  %v896_v62 = vadd.f32 %v2264_v39, %v868_v57  ;;  %v823_v43 = vmul.f32 %v2303_v4, %v789_v30  ;;  %v642_v18 = vunpack.c.h.bf16 %v1638_v32 }
  0x67   : > { %1162 = vmatpush1.bf16.msra.mxu0 %v1850_v41  ;;  %v907_v52 = vmax.f32 %v891_v0, 0.0  ;;  %v838_v1 = vadd.f32 %v822_v19, %v763_v53  ;;  %v1654_v0 = vld [vmem:[%s2166_s27 + $0xf0] sm:$0xff]  ;;  %v603_v19 = vmul.f32 %v2209_v8, %v568_v44  ;;  %v641_v30 = vunpack.c.l.bf16 %v1638_v32 }
  0x68   : > { %1163 = vmatprep.subr.bf16.mxu0 %v1851_v25  ;;  %v921_v61 = vmin.f32 %v905_v10, 6.0  ;;  %v2499_v25 = vld [vmem:[%s2166_s27 + $0x30] sm:$0xff]  ;;  %v912_v47 = vmax.f32 %v896_v62, 0.0  ;;  %v644_v10 = vunpack.c.h.bf16 %v1639_v33  ;;  %v676_v12 = vmul.f32 %v2214_v11, %v642_v18 }
  0x69   : > { %v923_v41 = vmin.f32 %v907_v52, 6.0  ;;  %v866_v21 = vmul.f32 %v2255_v36, %v838_v1  ;;  %v566_v31 = vunpack.c.h.bf16 %v2499_v25  ;;  %v792_v1 = vunpack.c.h.bf16 %v1654_v0 }
  0x6a   : > { %v928_v53 = vmin.f32 %v912_v47, 6.0  ;;  %v678_v58 = vmul.f32 %v2214_v11, %v644_v10  ;;  %v565_v23 = vunpack.c.l.bf16 %v2499_v25  ;;  %v675_v25 = vmul.f32 %v2288_v59, %v641_v30 }
  0x6b   : > { %1164 = vmatpush1.bf16.msra.mxu0 %v1853_v46  ;;  %v935_v26 = vpack.c.bf16 %v923_v41, %v921_v61  ;;  %v894_v20 = vadd.f32 %v2264_v39, %v866_v21  ;;  %v1646_v46 = vld [vmem:[%s2166_s27 + $0xb0] sm:$0xff]  ;;  %v601_v48 = vmul.f32 %v2209_v8, %v566_v31  ;;  %v719_v61 = vunpack.c.h.bf16 %v1647_v63  ;;  %s2628_s27 = scalar_lea.vmem %s2668_s9, %s1631_s23 }
  0x6c   : > { %v717_v52 = vunpack.c.h.bf16 %v1646_v46  ;;  %v694_v54 = vadd.f32 %v678_v58, %v603_v19  ;;  %v794_v21 = vunpack.c.h.bf16 %v1655_v40  ;;  %v826_v11 = vmul.f32 %v2261_v38, %v792_v1 }
  0x6d   : > { %v910_v17 = vmax.f32 %v894_v20, 0.0  ;;  %v692_v41 = vadd.f32 %v676_v12, %v601_v48  ;;  %v753_v51 = vmul.f32 %v2249_v34, %v719_v61  ;;  %v791_v44 = vunpack.c.l.bf16 %v1654_v0 }
  0x6e   : > { %1166 = vmatmul.mubr.bf16.vlgmr.msra.gmra.mrb[0].mxu0 %v933_v45  ;;  %v689_v45 = vadd.f32 %v673_v27, %v598_v9  ;;  %v751_v8 = vmul.f32 %v2249_v34, %v717_v52  ;;  %v828_v27 = vmul.f32 %v2261_v38, %v794_v21 }
  0x6f   : > { %1175 = vmatprep.mubr.bf16.mxu0 %v936_v5  ;;  %v762_v5 = vadd.f32 %v746_v14, %v687_v28  ;;  %v926_v6 = vmin.f32 %v910_v17, 6.0  ;;  %v769_v57 = vadd.f32 %v753_v51, %v694_v54  ;;  %v567_v28 = vunpack.c.l.bf16 %v552_v29  ;;  %v1206_v54 = vld [vmem:[%s2664_s5] sm:$0x3] }
  0x70   : > { %v764_v42 = vadd.f32 %v748_v24, %v689_v45  ;;  %v767_v13 = vadd.f32 %v751_v8, %v692_v41  ;;  %v600_v24 = vmul.f32 %v2285_v56, %v565_v23  ;;  %v718_v29 = vunpack.c.l.bf16 %v1647_v63  ;;  %v1867_v41 = vld [vmem:[%s2666_s7 + $0x30] sm:$0xff]   ;;  %v1868_v8 = vld [vmem:[%s2666_s7 + $0x78] sm:$0xff]   ;;  %v1234_v51 = vld [vmem:[%s2665_s6] sm:$0x3] }
  0x71   : > { %v837_v7 = vadd.f32 %v821_v60, %v762_v5  ;;  %v938_v3 = vpack.c.bf16 %v928_v53, %v926_v6  ;;  %v844_v62 = vadd.f32 %v828_v27, %v769_v57  ;;  %v602_v45 = vmul.f32 %v2285_v56, %v567_v28 }
  0x72   : > { %v839_v55 = vadd.f32 %v823_v43, %v764_v42  ;;  %v842_v14 = vadd.f32 %v826_v11, %v767_v13  ;;  %v643_v60 = vunpack.c.l.bf16 %v1639_v33  ;;  %v716_v5 = vunpack.c.l.bf16 %v1646_v46 }
  0x73   : > { %v865_v15 = vmul.f32 %v2252_v35, %v837_v7  ;;  %v872_v43 = vmul.f32 %v2255_v36, %v844_v62  ;;  %v691_v42 = vadd.f32 %v675_v25, %v600_v24  ;;  %v752_v18 = vmul.f32 %v2300_v2, %v718_v29 }
  0x74   : > { %v867_v9 = vmul.f32 %v2252_v35, %v839_v55  ;;  %v870_v17 = vmul.f32 %v2255_v36, %v842_v14  ;;  %v677_v38 = vmul.f32 %v2288_v59, %v643_v60  ;;  %v750_v48 = vmul.f32 %v2300_v2, %v716_v5 }
  0x75   : > { %v893_v16 = vadd.f32 %v2258_v37, %v865_v15  ;;  %v900_v56 = vadd.f32 %v2264_v39, %v872_v43  ;;  %v793_v6 = vunpack.c.l.bf16 %v1655_v40  ;;  %v825_v36 = vmul.f32 %v2303_v4, %v791_v44 }
  0x76   : > { %1176 = vmatmul.mubr.bf16.gmra.mrb[4].mxu0 %v935_v26  ;;  %v895_v22 = vadd.f32 %v2258_v37, %v867_v9  ;;  %v898_v32 = vadd.f32 %v2264_v39, %v870_v17  ;;  %v693_v33 = vadd.f32 %v677_v38, %v602_v45  ;;  %v766_v7 = vadd.f32 %v750_v48, %v691_v42  ;;  %v1865_v9 = vld [vmem:[%s2666_s7 + $0x28] sm:$0xff]  }
  0x77   : > { %1185 = vmatprep.mubr.bf16.mxu0 %v938_v3  ;;  %v909_v26 = vmax.f32 %v893_v16, 0.0  ;;  %v916_v59 = vmax.f32 %v900_v56, 0.0  ;;  %v827_v0 = vmul.f32 %v2303_v4, %v793_v6  ;;  %v1863_v4 = vld [vmem:[%s2666_s7 + $0x20] sm:$0xff]   ;;  %v1869_v16 = vld [vmem:[%s2666_s7 + $0x38] sm:$0xff]   ;;  %v2577_v21 = vrot.slane %v1206_v54, %v2159_v49 }
  0x78   : > { %v911_v20 = vmax.f32 %v895_v22, 0.0  ;;  %v914_v46 = vmax.f32 %v898_v32, 0.0  ;;  %v768_v63 = vadd.f32 %v752_v18, %v693_v33  ;;  %v841_v10 = vadd.f32 %v825_v36, %v766_v7  ;;  %1719 = vmatpush3.bf16.msra.mxu1 %v1863_v4 }
  0x79   : > { %v925_v34 = vmin.f32 %v909_v26, 6.0  ;;  %v932_v53 = vmin.f32 %v916_v59, 6.0  ;;  %v2580_v22 = vrot.slane %v1206_v54, %v2162_v50  ;;  %v2583_v13 = vrot.slane %v1234_v51, %v2159_v49 }
  0x7a   : > { %v927_v31 = vmin.f32 %v911_v20, 6.0  ;;  %v930_v19 = vmin.f32 %v914_v46, 6.0  ;;  %v843_v55 = vadd.f32 %v827_v0, %v768_v63  ;;  %v869_v12 = vmul.f32 %v2252_v35, %v841_v10 }
  0x7b   : > { %v2586_v23 = vrot.slane %v1234_v51, %v2162_v50 }
  0x7c   : > { %v937_v47 = vpack.c.bf16 %v927_v31, %v925_v34  ;;  %v940_v39 = vpack.c.bf16 %v932_v53, %v930_v19  ;;  %v871_v52 = vmul.f32 %v2252_v35, %v843_v55  ;;  %v897_v2 = vadd.f32 %v2258_v37, %v869_v12  ;;  %v1864_v35 = vld [vmem:[%s2666_s7 + $0x68] sm:$0xff]  }
  0x7d   : > { %1720 = vmatprep.subr.bf16.mxu1 %v1864_v35 }
  0x7e   : > { %1186 = vmatmul.mubr.bf16.gmra.mrb[8].mxu0 %v937_v47  ;;  %v899_v40 = vadd.f32 %v2258_v37, %v871_v52  ;;  %v913_v15 = vmax.f32 %v897_v2, 0.0  ;;  %v1866_v37 = vld [vmem:[%s2666_s7 + $0x70] sm:$0xff]   ;;  %1721 = vmatpush3.bf16.msra.mxu1 %v1865_v9 }
  0x7f   : > { %1195 = vmatprep.mubr.bf16.mxu0 %v940_v39  ;;  %1722 = vmatprep.subr.bf16.mxu1 %v1866_v37 }
  0x80   : > { %v915_v58 = vmax.f32 %v899_v40, 0.0  ;;  %v929_v61 = vmin.f32 %v913_v15, 6.0 }
  0x82   : > { %v931_v1 = vmin.f32 %v915_v58, 6.0  ;;  %1723 = vmatpush3.bf16.msra.mxu1 %v1867_v41 }
  0x83   : > { %1724 = vmatprep.subr.bf16.mxu1 %v1868_v8 }
  0x84   : > { %v939_v3 = vpack.c.bf16 %v931_v1, %v929_v61 }
  0x86   : > { %1196 = vmatmul.mubr.bf16.gmra.mrb[12].mxu0 %v939_v3  ;;  %1725 = vmatpush3.bf16.msra.mxu1 %v1869_v16 }
 0x141   : > { %v1167_v11 = vpop.f32.mrb[0].mxu0 }
 0x142   : > { %v1218_v26 = vmul.f32 %v2577_v21, %v1167_v11  ;;  %v1169_v57 = vpop.f32.mrb[1].mxu0 }
 0x143   : > { %v1219_v27 = vmul.f32 %v2580_v22, %v1169_v57  ;;  %v1171_v28 = vpop.f32.mrb[2].mxu0 }
 0x144   : > { %v1246_v20 = vadd.f32 %v2583_v13, %v1218_v26  ;;  %v1220_v14 = vmul.f32 %v2577_v21, %v1171_v28  ;;  %v1173_v24 = vpop.f32.mrb[3].mxu0 }
 0x145   : > { %v1247_v30 = vadd.f32 %v2586_v23, %v1219_v27  ;;  %v1221_v49 = vmul.f32 %v2580_v22, %v1173_v24 }
 0x146   : > { %v1262_v34 = vmax.f32 %v1246_v20, 0.0  ;;  %v1248_v62 = vadd.f32 %v2583_v13, %v1220_v14 }
 0x147   : > { %v1249_v50 = vadd.f32 %v2586_v23, %v1221_v49  ;;  %v1263_v45 = vmax.f32 %v1247_v30, 0.0 }
 0x148   : > { %v1264_v60 = vmax.f32 %v1248_v62, 0.0  ;;  %v1278_v25 = vmin.f32 %v1262_v34, 6.0 }
 0x149   : > { %v1177_v31 = vpop.f32.mrb[4].mxu0  ;;  %v1265_v17 = vmax.f32 %v1249_v50, 0.0  ;;  %v1279_v47 = vmin.f32 %v1263_v45, 6.0 }
 0x14a   : > { %v1280_v5 = vmin.f32 %v1264_v60, 6.0  ;;  %v1222_v43 = vmul.f32 %v2577_v21, %v1177_v31  ;;  %v1179_v38 = vpop.f32.mrb[5].mxu0 }
 0x14b   : > { %v1223_v29 = vmul.f32 %v2580_v22, %v1179_v38  ;;  %v1181_v44 = vpop.f32.mrb[6].mxu0  ;;  %v1281_v32 = vmin.f32 %v1265_v17, 6.0 }
 0x14c   : > { %v1250_v42 = vadd.f32 %v2583_v13, %v1222_v43  ;;  %v1224_v48 = vmul.f32 %v2577_v21, %v1181_v44  ;;  %v1183_v56 = vpop.f32.mrb[7].mxu0  ;;  %v1294_v33 = vpack.c.bf16 %v1280_v5, %v1278_v25 }
 0x14d   : > { %v1251_v18 = vadd.f32 %v2586_v23, %v1223_v29  ;;  %v1225_v6 = vmul.f32 %v2580_v22, %v1183_v56  ;;  %v1295_v46 = vpack.c.bf16 %v1281_v32, %v1279_v47 }
 0x14e   : > { %v1266_v7 = vmax.f32 %v1250_v42, 0.0  ;;  %v1252_v36 = vadd.f32 %v2583_v13, %v1224_v48 }
 0x14f   : > { %v1267_v59 = vmax.f32 %v1251_v18, 0.0  ;;  %v1253_v63 = vadd.f32 %v2586_v23, %v1225_v6  ;;  %1469 = vmatprep.mubr.bf16.mxu1 %v1295_v46 }
 0x150   : > { %v1268_v0 = vmax.f32 %v1252_v36, 0.0  ;;  %1470 = vmatmul.mubr.bf16.vlgmr.msra.gmra.mrb[0].mxu1 %v1294_v33  ;;  %v1282_v10 = vmin.f32 %v1266_v7, 6.0 }
 0x151   : > { %v1269_v19 = vmax.f32 %v1253_v63, 0.0  ;;  %v1283_v55 = vmin.f32 %v1267_v59, 6.0  ;;  %v1187_v39 = vpop.f32.mrb[8].mxu0 }
 0x152   : > { %v1284_v53 = vmin.f32 %v1268_v0, 6.0  ;;  %v1226_v52 = vmul.f32 %v2577_v21, %v1187_v39  ;;  %v1189_v2 = vpop.f32.mrb[9].mxu0 }
 0x153   : > { %v1285_v12 = vmin.f32 %v1269_v19, 6.0  ;;  %v1227_v15 = vmul.f32 %v2580_v22, %v1189_v2  ;;  %v1191_v58 = vpop.f32.mrb[10].mxu0 }
 0x154   : > { %v1296_v40 = vpack.c.bf16 %v1284_v53, %v1282_v10  ;;  %v1254_v1 = vadd.f32 %v2583_v13, %v1226_v52  ;;  %v1228_v3 = vmul.f32 %v2577_v21, %v1191_v58  ;;  %v1193_v4 = vpop.f32.mrb[11].mxu0 }
 0x155   : > { %v1297_v61 = vpack.c.bf16 %v1285_v12, %v1283_v55  ;;  %v1255_v35 = vadd.f32 %v2586_v23, %v1227_v15  ;;  %v1229_v9 = vmul.f32 %v2580_v22, %v1193_v4 }
 0x156   : > { %v1270_v37 = vmax.f32 %v1254_v1, 0.0  ;;  %v1256_v41 = vadd.f32 %v2583_v13, %v1228_v3 }
 0x157   : > { %1477 = vmatprep.mubr.bf16.mxu1 %v1297_v61  ;;  %v1271_v8 = vmax.f32 %v1255_v35, 0.0  ;;  %v1257_v16 = vadd.f32 %v2586_v23, %v1229_v9 }
 0x158   : > { %1478 = vmatmul.mubr.bf16.gmra.mrb[4].mxu1 %v1296_v40  ;;  %v1272_v54 = vmax.f32 %v1256_v41, 0.0  ;;  %v1286_v11 = vmin.f32 %v1270_v37, 6.0 }
 0x159   : > { %v1273_v51 = vmax.f32 %v1257_v16, 0.0  ;;  %v1287_v57 = vmin.f32 %v1271_v8, 6.0  ;;  %v1197_v14 = vpop.f32.mrb[12].mxu0 }
 0x15a   : > { %v1288_v26 = vmin.f32 %v1272_v54, 6.0  ;;  %v1230_v24 = vmul.f32 %v2577_v21, %v1197_v14  ;;  %v1199_v30 = vpop.f32.mrb[13].mxu0 }
 0x15b   : > { %v1289_v27 = vmin.f32 %v1273_v51, 6.0  ;;  %v1231_v49 = vmul.f32 %v2580_v22, %v1199_v30  ;;  %v1201_v34 = vpop.f32.mrb[14].mxu0 }
 0x15c   : > { %v1298_v28 = vpack.c.bf16 %v1288_v26, %v1286_v11  ;;  %v1258_v62 = vadd.f32 %v2583_v13, %v1230_v24  ;;  %v1232_v50 = vmul.f32 %v2577_v21, %v1201_v34  ;;  %v1203_v45 = vpop.f32.mrb[15].mxu0 }
 0x15d   : > { %v1299_v20 = vpack.c.bf16 %v1289_v27, %v1287_v57  ;;  %v1259_v60 = vadd.f32 %v2586_v23, %v1231_v49  ;;  %v1233_v31 = vmul.f32 %v2580_v22, %v1203_v45 }
 0x15e   : > { %v1274_v17 = vmax.f32 %v1258_v62, 0.0  ;;  %v1260_v25 = vadd.f32 %v2583_v13, %v1232_v50  ;;  %v1688_v13 = vld [vmem:[%s2667_s8] ss:$0 sm:$0xff] }
 0x15f   : > { %1485 = vmatprep.mubr.bf16.mxu1 %v1299_v20  ;;  %v1275_v5 = vmax.f32 %v1259_v60, 0.0  ;;  %v1261_v43 = vadd.f32 %v2586_v23, %v1233_v31 }
 0x160   : > { %1486 = vmatmul.mubr.bf16.gmra.mrb[8].mxu1 %v1298_v28  ;;  %v1276_v38 = vmax.f32 %v1260_v25, 0.0  ;;  %v1290_v44 = vmin.f32 %v1274_v17, 6.0 }
 0x161   : > { %v1277_v29 = vmax.f32 %v1261_v43, 0.0  ;;  %v1291_v32 = vmin.f32 %v1275_v5, 6.0 }
 0x162   : > { %v1292_v47 = vmin.f32 %v1276_v38, 6.0 }
 0x163   : > { %v1293_v42 = vmin.f32 %v1277_v29, 6.0 }
 0x164   : > { %v1300_v21 = vpack.c.bf16 %v1292_v47, %v1290_v44 }
 0x165   : > { %v1301_v48 = vpack.c.bf16 %v1293_v42, %v1291_v32 }
 0x167   : > { %1493 = vmatprep.mubr.bf16.mxu1 %v1301_v48 }
 0x168   : > { %1494 = vmatmul.mubr.bf16.gmra.mrb[12].mxu1 %v1300_v21 }
 0x223   : > { %v1726_v22 = vpop.f32.mrb[0].mxu1 }
 0x224   : > { %v1727_v23 = vpop.f32.mrb[1].mxu1 }
 0x225   : > { %v1728_v56 = vadd.f32 %v1727_v23, %v1726_v22  ;;  %v1729_v33 = vpop.f32.mrb[2].mxu1 }
 0x226   : > { %v1730_v18 = vpop.f32.mrb[3].mxu1 }
 0x227   : > { %v1472_v6 = vadd.f32 %v1728_v56, %v1688_v13  ;;  %v1731_v46 = vadd.f32 %v1730_v18, %v1729_v33 }
 0x229   : > { %1502 = vst [vmem:[%s2628_s27] sm:$0xff] %v1472_v6  ;;  %v1475_v7 = vadd.f32 %v1731_v46, %v1688_v13 }
 0x22b   : > { %1503 = vst [vmem:[%s2628_s27 + $0x8] sm:$0xff] %v1475_v7  ;;  %v1732_v36 = vpop.f32.mrb[4].mxu1 }
 0x22c   : > { %v1733_v59 = vpop.f32.mrb[5].mxu1 }
 0x22d   : > { %v1734_v63 = vadd.f32 %v1733_v59, %v1732_v36  ;;  %v1735_v0 = vpop.f32.mrb[6].mxu1 }
 0x22e   : > { %v1736_v19 = vpop.f32.mrb[7].mxu1 }
 0x22f   : > { %v1480_v10 = vadd.f32 %v1734_v63, %v1688_v13  ;;  %v1737_v53 = vadd.f32 %v1736_v19, %v1735_v0 }
 0x231   : > { %1504 = vst [vmem:[%s2628_s27 + $0x10] sm:$0xff] %v1480_v10  ;;  %v1483_v55 = vadd.f32 %v1737_v53, %v1688_v13 }
 0x233   : > { %1505 = vst [vmem:[%s2628_s27 + $0x18] sm:$0xff] %v1483_v55  ;;  %v1738_v12 = vpop.f32.mrb[8].mxu1 }
 0x234   : > { %v1739_v39 = vpop.f32.mrb[9].mxu1 }
 0x235   : > { %v1740_v52 = vadd.f32 %v1739_v39, %v1738_v12  ;;  %v1741_v2 = vpop.f32.mrb[10].mxu1 }
 0x236   : > { %v1742_v40 = vpop.f32.mrb[11].mxu1 }
 0x237   : > { %v1488_v15 = vadd.f32 %v1740_v52, %v1688_v13  ;;  %v1743_v58 = vadd.f32 %v1742_v40, %v1741_v2 }
 0x239   : > { %1506 = vst [vmem:[%s2628_s27 + $0x20] sm:$0xff] %v1488_v15  ;;  %v1491_v61 = vadd.f32 %v1743_v58, %v1688_v13 }
 0x23b   : > { %1507 = vst [vmem:[%s2628_s27 + $0x28] sm:$0xff] %v1491_v61  ;;  %v1744_v1 = vpop.f32.mrb[12].mxu1 }
 0x23c   : > { %v1745_v3 = vpop.f32.mrb[13].mxu1 }
 0x23d   : > { %v1746_v4 = vadd.f32 %v1745_v3, %v1744_v1  ;;  %v1747_v35 = vpop.f32.mrb[14].mxu1 }
 0x23e   : > { %v1748_v9 = vpop.f32.mrb[15].mxu1 }
 0x23f   : > { %v1496_v37 = vadd.f32 %v1746_v4, %v1688_v13  ;;  %v1749_v41 = vadd.f32 %v1748_v9, %v1747_v35 }
 0x241   : > { %1508 = vst [vmem:[%s2628_s27 + $0x30] sm:$0xff] %v1496_v37  ;;  %v1499_v8 = vadd.f32 %v1749_v41, %v1688_v13 }
 0x243   : > { %1509 = vst [vmem:[%s2628_s27 + $0x38] sm:$0xff] %v1499_v8 }
 0x244 PF: > { %s19_s15 = sadd.s32 1, %s1924_s15   ;;  %s2671_s28 = sld [smem:[#allocation3_spill]] }
 0x245   : > { %p16_p12 = scmp.ge.s32.totalorder %s19_s15, 10   ;;  %s2672_s30 = smov %s1904_s10 }
 0x246   : > { %s2673_s10 = smov %s2027_s22  ;;  %s2674_s11 = smov %s1916_s13 }
 0x247   : > { %s2675_s12 = smov %s1920_s14  ;;  %s2676_s13 = smov %s2679_s16 }
 0x248   :  { %18 = sbr.rel (!%p16_p12) target bundleno = 4 (0x4), region = 135 }
 0x24a   : > { %s2677_s14 = smov %s2671_s28 }

</bundles_post_ra>
